<compile_context>
chip_gen: v7x
topology: tpu7x:2x2x1
jax: 0.10.0
libtpu: 0.0.40
codegen_flags: <defaults>
</compile_context>

<pallas_src>
import functools

import jax
import jax.numpy as jnp
from jax.experimental import pallas as pl
from jax.experimental.pallas import tpu as pltpu

_BN_EPS = 1e-5
_LANE = 128


def _round_up(x, m):
    return (x + m - 1) // m * m


def _batchnorm(x, gamma, beta):
    """BatchNorm1d, training mode: per-column batch stats, biased variance."""
    mean = jnp.mean(x, axis=0, keepdims=True)
    var = jnp.mean(jnp.square(x - mean), axis=0, keepdims=True)
    return gamma * (x - mean) * jax.lax.rsqrt(var + _BN_EPS) + beta


def _prelu(x, alpha):
    return jnp.where(x > 0.0, x, alpha * x)


# ------------------------------ fused kernel --------------------------------

def _bgrl_kernel(hp,  # static: padded hidden width (multiple of 128)
                 x_ref, a_ref, wall_ref, encv_ref,
                 wp_ref, projv_ref, wq_ref, predv_ref,
                 out_ref, acc_ref):
    """Fused BGRL forward.

    Grid axis 0 tiles the contraction (node) axis of A_hat @ (x @ W).  Each step
    does ONE wide encoder matmul x_tile @ [We | We⊙mask | Wt | Wt⊙mask] and
    accumulates A_hat_tile @ z into an f32 VMEM accumulator [N, 4*hp] holding
        [online(x1) | online(x2) | target(x1) | target(x2)].
    On the last step the downstream chain (bias+relu, BatchNorm, projector,
    predictor) runs once out of VMEM and writes one lane-dense [N, 6*hp] slab.
    """
    k = pl.program_id(0)
    nk = pl.num_programs(0)

    @pl.when(k == 0)
    def _init():
        acc_ref[...] = jnp.zeros_like(acc_ref)

    # ---- encoder matmuls for this contraction tile (bf16 MXU, f32 accumulate) --
    z = jnp.dot(x_ref[...], wall_ref[...],
                preferred_element_type=jnp.float32)            # [tk, 4*hp]
    acc_ref[...] += jnp.dot(a_ref[...], z.astype(jnp.bfloat16),
                            preferred_element_type=jnp.float32)

    # ---- finalize: bias + relu + BN + projector + predictor, exactly once -----
    @pl.when(k == nk - 1)
    def _finalize():
        wp = wp_ref[...]               # projection-head weight (shared by branches)
        wq = wq_ref[...]               # predictor weight       (shared by branches)
        for b in range(4):             # static unroll over branches
            col = slice(b * hp, (b + 1) * hp)
            bias = encv_ref[0:1, :] if b < 2 else encv_ref[1:2, :]
            h = jnp.maximum(acc_ref[:, col] + bias, 0.0)
            # TODO(synk): jnp.mean(axis=0) uses the XLU; if the column reductions
            # ever bind, switch to a ones-row MXU matmul for the sums.
            h = _batchnorm(h, encv_ref[2:3, :], encv_ref[3:4, :])

            # projection head: Linear -> BatchNorm1d -> PReLU -> Dropout(identity)
            g = jnp.dot(h.astype(jnp.bfloat16), wp,
                        preferred_element_type=jnp.float32) + projv_ref[0:1, :]
            g = _batchnorm(g, projv_ref[1:2, :], projv_ref[2:3, :])
            g = _prelu(g, projv_ref[3:4, :])

            if b < 2:
                # online branch -> predictor: Linear -> BN -> PReLU -> Dropout(id)
                q = jnp.dot(g.astype(jnp.bfloat16), wq,
                            preferred_element_type=jnp.float32) + predv_ref[0:1, :]
                q = _batchnorm(q, predv_ref[1:2, :], predv_ref[2:3, :])
                q = _prelu(q, predv_ref[3:4, :])
                out_ref[:, (4 + b) * hp:(5 + b) * hp] = q              # h{1,2}_pred
            else:
                out_ref[:, (b - 2) * hp:(b - 1) * hp] = h              # h1, h2 (target BN)
                out_ref[:, b * hp:(b + 1) * hp] = g                    # h{1,2}_target


# ------------------------------ thin wrapper ---------------------------------

def bgrl_forward(x, a_hat, aug_mask, params, *, tk=None):
    n, f = x.shape
    h = params["enc"]["w"].shape[1]
    hp = _round_up(h, _LANE)

    def pad_mat(w):                    # [F, H] -> [F, hp]
        return jnp.pad(w, ((0, 0), (0, hp - w.shape[1])))

    def pad_sq(w):                     # [H, H] -> [hp, hp]
        return jnp.pad(w, ((0, hp - w.shape[0]), (0, hp - w.shape[1])))

    def pad_vec(v):                    # [1, H] -> [1, hp]
        v = v.reshape(1, -1)
        return jnp.pad(v, ((0, 0), (0, hp - v.shape[-1])))

    enc, tgt = params["enc"], params["tgt"]
    bn, proj, pred = params["bn"], params["proj"], params["pred"]

    # Fold augmentation #2 (0/1 feature mask) into the weights:
    #   (x * mask) @ W == x @ (mask^T * W)      -- exact for 0/1 masks.
    mask_col = aug_mask.reshape(-1, 1)                       # [F, 1]
    w_all = jnp.concatenate(
        [pad_mat(enc["w"]), pad_mat(mask_col * enc["w"]),
         pad_mat(tgt["w"]), pad_mat(mask_col * tgt["w"])],
        axis=1).astype(jnp.bfloat16)                         # [F, 4*hp]
    wp = pad_sq(proj["w"]).astype(jnp.bfloat16)
    wq = pad_sq(pred["w"]).astype(jnp.bfloat16)

    # Per-stage small vectors, packed into one lane-dense [4, hp] array each
    # (hoisted out of the kernel's k loop: broadcast only happens at finalize).
    encv = jnp.concatenate([pad_vec(enc["b"]), pad_vec(tgt["b"]),
                            pad_vec(bn["gamma"]), pad_vec(bn["beta"])], axis=0)
    projv = jnp.concatenate([pad_vec(proj["b"]), pad_vec(proj["gamma"]),
                             pad_vec(proj["beta"]), pad_vec(proj["alpha"])], axis=0)
    predv = jnp.concatenate([pad_vec(pred["b"]), pad_vec(pred["gamma"]),
                             pad_vec(pred["beta"]), pad_vec(pred["alpha"])], axis=0)

    x_bf16 = x.astype(jnp.bfloat16)                          # streamed once
    a_bf16 = a_hat.astype(jnp.bfloat16)

    # Contraction-tile size for A_hat @ Z (must keep lane alignment).
    if tk is None:
        tk = n
        for cand in (512, 256, 128):
            if n % cand == 0 and n > cand:
                tk = cand
                break
    nk = n // tk

    kernel = functools.partial(_bgrl_kernel, hp)

    out = pl.pallas_call(
        kernel,
        out_shape=jax.ShapeDtypeStruct((n, 6 * hp), jnp.float32),
        grid_spec=pltpu.PrefetchScalarGridSpec(
            num_scalar_prefetch=0,
            grid=(nk,),
            in_specs=[
                pl.BlockSpec((tk, f), lambda k: (k, 0)),      # x: stream node rows
                pl.BlockSpec((n, tk), lambda k: (0, k)),      # A_hat: stream k tiles
                pl.BlockSpec((f, 4 * hp), lambda k: (0, 0)),  # wide encoder weights
                pl.BlockSpec((4, hp), lambda k: (0, 0)),      # enc/tgt bias, BN gamma/beta
                pl.BlockSpec((hp, hp), lambda k: (0, 0)),     # projector weight
                pl.BlockSpec((4, hp), lambda k: (0, 0)),      # projector vectors
                pl.BlockSpec((hp, hp), lambda k: (0, 0)),     # predictor weight
                pl.BlockSpec((4, hp), lambda k: (0, 0)),      # predictor vectors
            ],
            out_specs=pl.BlockSpec((n, 6 * hp), lambda k: (0, 0)),
            scratch_shapes=[pltpu.VMEM((n, 4 * hp), jnp.float32)],
        ),
        compiler_params=pltpu.CompilerParams(
            dimension_semantics=("arbitrary",),        # single axis = contraction
            vmem_limit_bytes=48 * 1024 * 1024,
        ),
    )(x_bf16, a_bf16, w_all, encv, wp, projv, wq, predv)

    # Slice the logical (unpadded) H columns back out of the lane-dense slab.
    h1 = out[:, 0:h]
    h2 = out[:, hp:hp + h]
    h1_target = out[:, 2 * hp:2 * hp + h]
    h2_target = out[:, 3 * hp:3 * hp + h]
    h1_pred = out[:, 4 * hp:4 * hp + h]
    h2_pred = out[:, 5 * hp:5 * hp + h]

    # target branch runs under torch.no_grad()
    h1 = jax.lax.stop_gradient(h1)
    h2 = jax.lax.stop_gradient(h2)
    h1_target = jax.lax.stop_gradient(h1_target)
    h2_target = jax.lax.stop_gradient(h2_target)
    return h1, h2, h1_pred, h2_pred, h1_target, h2_target


# ------------------------------ setup / main ---------------------------------

def _make_params(key, feat_dim, hidden_dim):
    ks = jax.random.split(key, 6)
    enc_w = 0.1 * jax.random.normal(ks[0], (feat_dim, hidden_dim), jnp.float32)
    enc_b = 0.1 * jax.random.normal(ks[1], (1, hidden_dim), jnp.float32)
    proj_w = 0.1 * jax.random.normal(ks[2], (hidden_dim, hidden_dim), jnp.float32)
    proj_b = 0.1 * jax.random.normal(ks[3], (1, hidden_dim), jnp.float32)
    pred_w = 0.1 * jax.random.normal(ks[4], (hidden_dim, hidden_dim), jnp.float32)
    pred_b = 0.1 * jax.random.normal(ks[5], (1, hidden_dim), jnp.float32)
    ones = jnp.ones((1, hidden_dim), jnp.float32)
    zeros = jnp.zeros((1, hidden_dim), jnp.float32)
    alpha = jnp.full((1, hidden_dim), 0.25, jnp.float32)  # PReLU default init
    return {
        "enc": {"w": enc_w, "b": enc_b},
        # target encoder == deepcopy of online encoder at first forward
        "tgt": {"w": enc_w, "b": enc_b},
        "bn": {"gamma": ones, "beta": zeros},
        "proj": {"w": proj_w, "b": proj_b, "gamma": ones, "beta": zeros, "alpha": alpha},
        "pred": {"w": pred_w, "b": pred_b, "gamma": ones, "beta": zeros, "alpha": alpha},
    }


def _normalized_adjacency(edge_index, num_nodes):
    a = jnp.zeros((num_nodes, num_nodes), jnp.float32)
    a = a.at[edge_index[0], edge_index[1]].set(1.0)
    a = jnp.maximum(a, a.T)                              # undirected
    a = a + jnp.eye(num_nodes, dtype=jnp.float32)        # self loops
    d_inv_sqrt = 1.0 / jnp.sqrt(a.sum(axis=1))
    return d_inv_sqrt[:, None] * a * d_inv_sqrt[None, :]


if __name__ == "__main__":
    N, F, HIDDEN = 256, 128, 32
    key = jax.random.PRNGKey(0)
    k_x, k_mask, k_params = jax.random.split(key, 3)

    x = jax.random.normal(k_x, (N, F), jnp.float32)
    # ring graph edge_index [2, E]
    src = jnp.arange(N, dtype=jnp.int32)
    dst = (src + 1) % N
    edge_index = jnp.stack([src, dst], axis=0)
    a_hat = _normalized_adjacency(edge_index, N)

    # deterministic feature mask for augmentor #2 (keep prob 0.8, not rescaled)
    aug_mask = (jax.random.uniform(k_mask, (1, F)) > 0.2).astype(jnp.float32)

    params = _make_params(k_params, F, HIDDEN)

    outs = bgrl_forward(x, a_hat, aug_mask, params)
    outs = jax.block_until_ready(outs)
    assert len(outs) == 6 and all(o.shape == (N, HIDDEN) for o in outs)
    assert all(bool(jnp.isfinite(o).all()) for o in outs)
    print("KERNEL_OK")
</pallas_src>

<mosaic_0001>
module attributes {stable_mosaic.version = 11 : i64} {
  func.func @_bgrl_kernel(%arg0: i32, %arg1: memref<128x128xbf16, #tpu.memory_space<vmem>>, %arg2: memref<256x128xbf16, #tpu.memory_space<vmem>>, %arg3: memref<128x512xbf16, #tpu.memory_space<vmem>>, %arg4: memref<4x128xf32, #tpu.memory_space<vmem>>, %arg5: memref<128x128xbf16, #tpu.memory_space<vmem>>, %arg6: memref<4x128xf32, #tpu.memory_space<vmem>>, %arg7: memref<128x128xbf16, #tpu.memory_space<vmem>>, %arg8: memref<4x128xf32, #tpu.memory_space<vmem>>, %arg9: memref<256x768xf32, #tpu.memory_space<vmem>>, %arg10: memref<256x512xf32, #tpu.memory_space<vmem>>) attributes {dimension_semantics = [#tpu.dimension_semantics<arbitrary>], iteration_bounds = array<i64: 2>, scalar_prefetch = 0 : i64, scratch_operands = 1 : i64, tpu.core_type = #tpu.core_type<tc>, window_params = [{transform_indices = @transform_0, window_bounds = array<i64: 128, 128>}, {transform_indices = @transform_1, window_bounds = array<i64: 256, 128>}, {pipeline_mode = #tpu.pipeline_mode<synchronous>, transform_indices = @transform_2, window_bounds = array<i64: 128, 512>}, {pipeline_mode = #tpu.pipeline_mode<synchronous>, transform_indices = @transform_3, window_bounds = array<i64: 4, 128>}, {pipeline_mode = #tpu.pipeline_mode<synchronous>, transform_indices = @transform_4, window_bounds = array<i64: 128, 128>}, {pipeline_mode = #tpu.pipeline_mode<synchronous>, transform_indices = @transform_5, window_bounds = array<i64: 4, 128>}, {pipeline_mode = #tpu.pipeline_mode<synchronous>, transform_indices = @transform_6, window_bounds = array<i64: 128, 128>}, {pipeline_mode = #tpu.pipeline_mode<synchronous>, transform_indices = @transform_7, window_bounds = array<i64: 4, 128>}, {pipeline_mode = #tpu.pipeline_mode<synchronous>, transform_indices = @transform_8, window_bounds = array<i64: 256, 768>}]} {
    %c0_i32 = arith.constant 0 : i32
    %0 = arith.cmpi eq, %arg0, %c0_i32 : i32
    %1 = arith.extui %0 : i1 to i32
    %c0_i32_0 = arith.constant 0 : i32
    %2 = arith.cmpi ne, %1, %c0_i32_0 : i32
    scf.if %2 {
      %cst_12 = arith.constant 0.000000e+00 : f32
      %15 = vector.broadcast %cst_12 : f32 to vector<256x512xf32>
      %c0_13 = arith.constant 0 : index
      %c0_14 = arith.constant 0 : index
      %16 = vector.load %arg10[%c0_13, %c0_14] : memref<256x512xf32, #tpu.memory_space<vmem>>, vector<256x512xf32>
      tpu.vector_store %arg10[%c0_13, %c0_14], %15 {strides = array<i32>} : memref<256x512xf32, #tpu.memory_space<vmem>>, vector<256x512xf32>,
    } else {
    }
    %c0 = arith.constant 0 : index
    %c0_1 = arith.constant 0 : index
    %3 = vector.load %arg1[%c0, %c0_1] : memref<128x128xbf16, #tpu.memory_space<vmem>>, vector<128x128xbf16>
    %c0_2 = arith.constant 0 : index
    %c0_3 = arith.constant 0 : index
    %4 = vector.load %arg3[%c0_2, %c0_3] : memref<128x512xbf16, #tpu.memory_space<vmem>>, vector<128x512xbf16>
    %cst = arith.constant dense<0.000000e+00> : vector<128x512xf32>
    %5 = tpu.matmul %3, %4, %cst {dimension_numbers = #tpu.dot_dimension_numbers<[1], [0], [0], [1], [0, 0, 1, 1], [], []>} : vector<128x128xbf16>, vector<128x512xbf16>, vector<128x512xf32> -> vector<128x512xf32>
    %c0_4 = arith.constant 0 : index
    %c0_5 = arith.constant 0 : index
    %6 = vector.load %arg10[%c0_4, %c0_5] : memref<256x512xf32, #tpu.memory_space<vmem>>, vector<256x512xf32>
    %c0_6 = arith.constant 0 : index
    %c0_7 = arith.constant 0 : index
    %7 = vector.load %arg2[%c0_6, %c0_7] : memref<256x128xbf16, #tpu.memory_space<vmem>>, vector<256x128xbf16>
    %8 = arith.truncf %5 : vector<128x512xf32> to vector<128x512xbf16>
    %cst_8 = arith.constant dense<0.000000e+00> : vector<256x512xf32>
    %9 = tpu.matmul %7, %8, %cst_8 {dimension_numbers = #tpu.dot_dimension_numbers<[1], [0], [0], [1], [0, 0, 1, 1], [], []>} : vector<256x128xbf16>, vector<128x512xbf16>, vector<256x512xf32> -> vector<256x512xf32>
    %10 = arith.addf %6, %9 : vector<256x512xf32>
    %c0_9 = arith.constant 0 : index
    %c0_10 = arith.constant 0 : index
    %11 = vector.load %arg10[%c0_9, %c0_10] : memref<256x512xf32, #tpu.memory_space<vmem>>, vector<256x512xf32>
    tpu.vector_store %arg10[%c0_9, %c0_10], %10 {strides = array<i32>} : memref<256x512xf32, #tpu.memory_space<vmem>>, vector<256x512xf32>,
    %c1_i32 = arith.constant 1 : i32
    %12 = arith.cmpi eq, %arg0, %c1_i32 : i32
    %13 = arith.extui %12 : i1 to i32
    %c0_i32_11 = arith.constant 0 : i32
    %14 = arith.cmpi ne, %13, %c0_i32_11 : i32
    scf.if %14 {
      %c0_12 = arith.constant 0 : index
      %c0_13 = arith.constant 0 : index
      %15 = vector.load %arg5[%c0_12, %c0_13] : memref<128x128xbf16, #tpu.memory_space<vmem>>, vector<128x128xbf16>
      %c0_14 = arith.constant 0 : index
      %c0_15 = arith.constant 0 : index
      %16 = vector.load %arg7[%c0_14, %c0_15] : memref<128x128xbf16, #tpu.memory_space<vmem>>, vector<128x128xbf16>
      %c0_16 = arith.constant 0 : index
      %c0_17 = arith.constant 0 : index
      %17 = vector.load %arg4[%c0_16, %c0_17] : memref<4x128xf32, #tpu.memory_space<vmem>>, vector<1x128xf32>
      %c0_18 = arith.constant 0 : index
      %c0_19 = arith.constant 0 : index
      %18 = vector.load %arg10[%c0_18, %c0_19] : memref<256x512xf32, #tpu.memory_space<vmem>>, vector<256x128xf32>
      %19 = vector.broadcast %17 : vector<1x128xf32> to vector<256x128xf32>
      %20 = arith.addf %18, %19 : vector<256x128xf32>
      %cst_20 = arith.constant 0.000000e+00 : f32
      %21 = vector.broadcast %cst_20 : f32 to vector<256x128xf32>
      %22 = arith.maximumf %20, %21 : vector<256x128xf32>
      %c2 = arith.constant 2 : index
      %c0_21 = arith.constant 0 : index
      %23 = vector.load %arg4[%c2, %c0_21] : memref<4x128xf32, #tpu.memory_space<vmem>>, vector<1x128xf32>
      %c3 = arith.constant 3 : index
      %c0_22 = arith.constant 0 : index
      %24 = vector.load %arg4[%c3, %c0_22] : memref<4x128xf32, #tpu.memory_space<vmem>>, vector<1x128xf32>
      %cst_23 = arith.constant dense<0.000000e+00> : vector<128xf32>
      %25 = vector.multi_reduction <add>, %22, %cst_23 [0] : vector<256x128xf32> to vector<128xf32>
      %26 = vector.shape_cast %25 : vector<128xf32> to vector<1x128xf32>
      %cst_24 = arith.constant 2.560000e+02 : f32
      %27 = vector.broadcast %cst_24 : f32 to vector<1x128xf32>
      %28 = arith.divf %26, %27 : vector<1x128xf32>
      %29 = vector.broadcast %28 : vector<1x128xf32> to vector<256x128xf32>
      %30 = arith.subf %22, %29 : vector<256x128xf32>
      %31 = arith.mulf %30, %30 : vector<256x128xf32>
      %cst_25 = arith.constant dense<0.000000e+00> : vector<128xf32>
      %32 = vector.multi_reduction <add>, %31, %cst_25 [0] : vector<256x128xf32> to vector<128xf32>
      %33 = vector.shape_cast %32 : vector<128xf32> to vector<1x128xf32>
      %cst_26 = arith.constant 2.560000e+02 : f32
      %34 = vector.broadcast %cst_26 : f32 to vector<1x128xf32>
      %35 = arith.divf %33, %34 : vector<1x128xf32>
      %36 = vector.broadcast %28 : vector<1x128xf32> to vector<256x128xf32>
      %37 = arith.subf %22, %36 : vector<256x128xf32>
      %38 = vector.broadcast %23 : vector<1x128xf32> to vector<256x128xf32>
      %39 = arith.mulf %38, %37 : vector<256x128xf32>
      %cst_27 = arith.constant 9.99999974E-6 : f32
      %40 = vector.broadcast %cst_27 : f32 to vector<1x128xf32>
      %41 = arith.addf %35, %40 : vector<1x128xf32>
      %42 = math.rsqrt %41 : vector<1x128xf32>
      %43 = vector.broadcast %42 : vector<1x128xf32> to vector<256x128xf32>
      %44 = arith.mulf %39, %43 : vector<256x128xf32>
      %45 = vector.broadcast %24 : vector<1x128xf32> to vector<256x128xf32>
      %46 = arith.addf %44, %45 : vector<256x128xf32>
      %47 = arith.truncf %46 : vector<256x128xf32> to vector<256x128xbf16>
      %cst_28 = arith.constant dense<0.000000e+00> : vector<256x128xf32>
      %48 = tpu.matmul %47, %15, %cst_28 {dimension_numbers = #tpu.dot_dimension_numbers<[1], [0], [0], [1], [0, 0, 1, 1], [], []>} : vector<256x128xbf16>, vector<128x128xbf16>, vector<256x128xf32> -> vector<256x128xf32>
      %c0_29 = arith.constant 0 : index
      %c0_30 = arith.constant 0 : index
      %49 = vector.load %arg6[%c0_29, %c0_30] : memref<4x128xf32, #tpu.memory_space<vmem>>, vector<1x128xf32>
      %50 = vector.broadcast %49 : vector<1x128xf32> to vector<256x128xf32>
      %51 = arith.addf %48, %50 : vector<256x128xf32>
      %c1 = arith.constant 1 : index
      %c0_31 = arith.constant 0 : index
      %52 = vector.load %arg6[%c1, %c0_31] : memref<4x128xf32, #tpu.memory_space<vmem>>, vector<1x128xf32>
      %c2_32 = arith.constant 2 : index
      %c0_33 = arith.constant 0 : index
      %53 = vector.load %arg6[%c2_32, %c0_33] : memref<4x128xf32, #tpu.memory_space<vmem>>, vector<1x128xf32>
      %cst_34 = arith.constant dense<0.000000e+00> : vector<128xf32>
      %54 = vector.multi_reduction <add>, %51, %cst_34 [0] : vector<256x128xf32> to vector<128xf32>
      %55 = vector.shape_cast %54 : vector<128xf32> to vector<1x128xf32>
      %cst_35 = arith.constant 2.560000e+02 : f32
      %56 = vector.broadcast %cst_35 : f32 to vector<1x128xf32>
      %57 = arith.divf %55, %56 : vector<1x128xf32>
      %58 = vector.broadcast %57 : vector<1x128xf32> to vector<256x128xf32>
      %59 = arith.subf %51, %58 : vector<256x128xf32>
      %60 = arith.mulf %59, %59 : vector<256x128xf32>
      %cst_36 = arith.constant dense<0.000000e+00> : vector<128xf32>
      %61 = vector.multi_reduction <add>, %60, %cst_36 [0] : vector<256x128xf32> to vector<128xf32>
      %62 = vector.shape_cast %61 : vector<128xf32> to vector<1x128xf32>
      %cst_37 = arith.constant 2.560000e+02 : f32
      %63 = vector.broadcast %cst_37 : f32 to vector<1x128xf32>
      %64 = arith.divf %62, %63 : vector<1x128xf32>
      %65 = vector.broadcast %57 : vector<1x128xf32> to vector<256x128xf32>
      %66 = arith.subf %51, %65 : vector<256x128xf32>
      %67 = vector.broadcast %52 : vector<1x128xf32> to vector<256x128xf32>
      %68 = arith.mulf %67, %66 : vector<256x128xf32>
      %cst_38 = arith.constant 9.99999974E-6 : f32
      %69 = vector.broadcast %cst_38 : f32 to vector<1x128xf32>
      %70 = arith.addf %64, %69 : vector<1x128xf32>
      %71 = math.rsqrt %70 : vector<1x128xf32>
      %72 = vector.broadcast %71 : vector<1x128xf32> to vector<256x128xf32>
      %73 = arith.mulf %68, %72 : vector<256x128xf32>
      %74 = vector.broadcast %53 : vector<1x128xf32> to vector<256x128xf32>
      %75 = arith.addf %73, %74 : vector<256x128xf32>
      %c3_39 = arith.constant 3 : index
      %c0_40 = arith.constant 0 : index
      %76 = vector.load %arg6[%c3_39, %c0_40] : memref<4x128xf32, #tpu.memory_space<vmem>>, vector<1x128xf32>
      %cst_41 = arith.constant 0.000000e+00 : f32
      %77 = vector.broadcast %cst_41 : f32 to vector<256x128xf32>
      %78 = arith.cmpf ogt, %75, %77 : vector<256x128xf32>
      %79 = vector.broadcast %76 : vector<1x128xf32> to vector<256x128xf32>
      %80 = arith.mulf %79, %75 : vector<256x128xf32>
      %81 = arith.select %78, %75, %80 : vector<256x128xi1>, vector<256x128xf32>
      %82 = arith.truncf %81 : vector<256x128xf32> to vector<256x128xbf16>
      %cst_42 = arith.constant dense<0.000000e+00> : vector<256x128xf32>
      %83 = tpu.matmul %82, %16, %cst_42 {dimension_numbers = #tpu.dot_dimension_numbers<[1], [0], [0], [1], [0, 0, 1, 1], [], []>} : vector<256x128xbf16>, vector<128x128xbf16>, vector<256x128xf32> -> vector<256x128xf32>
      %c0_43 = arith.constant 0 : index
      %c0_44 = arith.constant 0 : index
      %84 = vector.load %arg8[%c0_43, %c0_44] : memref<4x128xf32, #tpu.memory_space<vmem>>, vector<1x128xf32>
      %85 = vector.broadcast %84 : vector<1x128xf32> to vector<256x128xf32>
      %86 = arith.addf %83, %85 : vector<256x128xf32>
      %c1_45 = arith.constant 1 : index
      %c0_46 = arith.constant 0 : index
      %87 = vector.load %arg8[%c1_45, %c0_46] : memref<4x128xf32, #tpu.memory_space<vmem>>, vector<1x128xf32>
      %c2_47 = arith.constant 2 : index
      %c0_48 = arith.constant 0 : index
      %88 = vector.load %arg8[%c2_47, %c0_48] : memref<4x128xf32, #tpu.memory_space<vmem>>, vector<1x128xf32>
      %cst_49 = arith.constant dense<0.000000e+00> : vector<128xf32>
      %89 = vector.multi_reduction <add>, %86, %cst_49 [0] : vector<256x128xf32> to vector<128xf32>
      %90 = vector.shape_cast %89 : vector<128xf32> to vector<1x128xf32>
      %cst_50 = arith.constant 2.560000e+02 : f32
      %91 = vector.broadcast %cst_50 : f32 to vector<1x128xf32>
      %92 = arith.divf %90, %91 : vector<1x128xf32>
      %93 = vector.broadcast %92 : vector<1x128xf32> to vector<256x128xf32>
      %94 = arith.subf %86, %93 : vector<256x128xf32>
      %95 = arith.mulf %94, %94 : vector<256x128xf32>
      %cst_51 = arith.constant dense<0.000000e+00> : vector<128xf32>
      %96 = vector.multi_reduction <add>, %95, %cst_51 [0] : vector<256x128xf32> to vector<128xf32>
      %97 = vector.shape_cast %96 : vector<128xf32> to vector<1x128xf32>
      %cst_52 = arith.constant 2.560000e+02 : f32
      %98 = vector.broadcast %cst_52 : f32 to vector<1x128xf32>
      %99 = arith.divf %97, %98 : vector<1x128xf32>
      %100 = vector.broadcast %92 : vector<1x128xf32> to vector<256x128xf32>
      %101 = arith.subf %86, %100 : vector<256x128xf32>
      %102 = vector.broadcast %87 : vector<1x128xf32> to vector<256x128xf32>
      %103 = arith.mulf %102, %101 : vector<256x128xf32>
      %cst_53 = arith.constant 9.99999974E-6 : f32
      %104 = vector.broadcast %cst_53 : f32 to vector<1x128xf32>
      %105 = arith.addf %99, %104 : vector<1x128xf32>
      %106 = math.rsqrt %105 : vector<1x128xf32>
      %107 = vector.broadcast %106 : vector<1x128xf32> to vector<256x128xf32>
      %108 = arith.mulf %103, %107 : vector<256x128xf32>
      %109 = vector.broadcast %88 : vector<1x128xf32> to vector<256x128xf32>
      %110 = arith.addf %108, %109 : vector<256x128xf32>
      %c3_54 = arith.constant 3 : index
      %c0_55 = arith.constant 0 : index
      %111 = vector.load %arg8[%c3_54, %c0_55] : memref<4x128xf32, #tpu.memory_space<vmem>>, vector<1x128xf32>
      %cst_56 = arith.constant 0.000000e+00 : f32
      %112 = vector.broadcast %cst_56 : f32 to vector<256x128xf32>
      %113 = arith.cmpf ogt, %110, %112 : vector<256x128xf32>
      %114 = vector.broadcast %111 : vector<1x128xf32> to vector<256x128xf32>
      %115 = arith.mulf %114, %110 : vector<256x128xf32>
      %116 = arith.select %113, %110, %115 : vector<256x128xi1>, vector<256x128xf32>
      %c0_57 = arith.constant 0 : index
      %c512 = arith.constant 512 : index
      %117 = vector.load %arg9[%c0_57, %c512] : memref<256x768xf32, #tpu.memory_space<vmem>>, vector<256x128xf32>
      tpu.vector_store %arg9[%c0_57, %c512], %116 {strides = array<i32>} : memref<256x768xf32, #tpu.memory_space<vmem>>, vector<256x128xf32>,
      %c0_58 = arith.constant 0 : index
      %c0_59 = arith.constant 0 : index
      %118 = vector.load %arg4[%c0_58, %c0_59] : memref<4x128xf32, #tpu.memory_space<vmem>>, vector<1x128xf32>
      %c0_60 = arith.constant 0 : index
      %c128 = arith.constant 128 : index
      %119 = vector.load %arg10[%c0_60, %c128] : memref<256x512xf32, #tpu.memory_space<vmem>>, vector<256x128xf32>
      %120 = vector.broadcast %118 : vector<1x128xf32> to vector<256x128xf32>
      %121 = arith.addf %119, %120 : vector<256x128xf32>
      %cst_61 = arith.constant 0.000000e+00 : f32
      %122 = vector.broadcast %cst_61 : f32 to vector<256x128xf32>
      %123 = arith.maximumf %121, %122 : vector<256x128xf32>
      %c2_62 = arith.constant 2 : index
      %c0_63 = arith.constant 0 : index
      %124 = vector.load %arg4[%c2_62, %c0_63] : memref<4x128xf32, #tpu.memory_space<vmem>>, vector<1x128xf32>
      %c3_64 = arith.constant 3 : index
      %c0_65 = arith.constant 0 : index
      %125 = vector.load %arg4[%c3_64, %c0_65] : memref<4x128xf32, #tpu.memory_space<vmem>>, vector<1x128xf32>
      %cst_66 = arith.constant dense<0.000000e+00> : vector<128xf32>
      %126 = vector.multi_reduction <add>, %123, %cst_66 [0] : vector<256x128xf32> to vector<128xf32>
      %127 = vector.shape_cast %126 : vector<128xf32> to vector<1x128xf32>
      %cst_67 = arith.constant 2.560000e+02 : f32
      %128 = vector.broadcast %cst_67 : f32 to vector<1x128xf32>
      %129 = arith.divf %127, %128 : vector<1x128xf32>
      %130 = vector.broadcast %129 : vector<1x128xf32> to vector<256x128xf32>
      %131 = arith.subf %123, %130 : vector<256x128xf32>
      %132 = arith.mulf %131, %131 : vector<256x128xf32>
      %cst_68 = arith.constant dense<0.000000e+00> : vector<128xf32>
      %133 = vector.multi_reduction <add>, %132, %cst_68 [0] : vector<256x128xf32> to vector<128xf32>
      %134 = vector.shape_cast %133 : vector<128xf32> to vector<1x128xf32>
      %cst_69 = arith.constant 2.560000e+02 : f32
      %135 = vector.broadcast %cst_69 : f32 to vector<1x128xf32>
      %136 = arith.divf %134, %135 : vector<1x128xf32>
      %137 = vector.broadcast %129 : vector<1x128xf32> to vector<256x128xf32>
      %138 = arith.subf %123, %137 : vector<256x128xf32>
      %139 = vector.broadcast %124 : vector<1x128xf32> to vector<256x128xf32>
      %140 = arith.mulf %139, %138 : vector<256x128xf32>
      %cst_70 = arith.constant 9.99999974E-6 : f32
      %141 = vector.broadcast %cst_70 : f32 to vector<1x128xf32>
      %142 = arith.addf %136, %141 : vector<1x128xf32>
      %143 = math.rsqrt %142 : vector<1x128xf32>
      %144 = vector.broadcast %143 : vector<1x128xf32> to vector<256x128xf32>
      %145 = arith.mulf %140, %144 : vector<256x128xf32>
      %146 = vector.broadcast %125 : vector<1x128xf32> to vector<256x128xf32>
      %147 = arith.addf %145, %146 : vector<256x128xf32>
      %148 = arith.truncf %147 : vector<256x128xf32> to vector<256x128xbf16>
      %cst_71 = arith.constant dense<0.000000e+00> : vector<256x128xf32>
      %149 = tpu.matmul %148, %15, %cst_71 {dimension_numbers = #tpu.dot_dimension_numbers<[1], [0], [0], [1], [0, 0, 1, 1], [], []>} : vector<256x128xbf16>, vector<128x128xbf16>, vector<256x128xf32> -> vector<256x128xf32>
      %c0_72 = arith.constant 0 : index
      %c0_73 = arith.constant 0 : index
      %150 = vector.load %arg6[%c0_72, %c0_73] : memref<4x128xf32, #tpu.memory_space<vmem>>, vector<1x128xf32>
      %151 = vector.broadcast %150 : vector<1x128xf32> to vector<256x128xf32>
      %152 = arith.addf %149, %151 : vector<256x128xf32>
      %c1_74 = arith.constant 1 : index
      %c0_75 = arith.constant 0 : index
      %153 = vector.load %arg6[%c1_74, %c0_75] : memref<4x128xf32, #tpu.memory_space<vmem>>, vector<1x128xf32>
      %c2_76 = arith.constant 2 : index
      %c0_77 = arith.constant 0 : index
      %154 = vector.load %arg6[%c2_76, %c0_77] : memref<4x128xf32, #tpu.memory_space<vmem>>, vector<1x128xf32>
      %cst_78 = arith.constant dense<0.000000e+00> : vector<128xf32>
      %155 = vector.multi_reduction <add>, %152, %cst_78 [0] : vector<256x128xf32> to vector<128xf32>
      %156 = vector.shape_cast %155 : vector<128xf32> to vector<1x128xf32>
      %cst_79 = arith.constant 2.560000e+02 : f32
      %157 = vector.broadcast %cst_79 : f32 to vector<1x128xf32>
      %158 = arith.divf %156, %157 : vector<1x128xf32>
      %159 = vector.broadcast %158 : vector<1x128xf32> to vector<256x128xf32>
      %160 = arith.subf %152, %159 : vector<256x128xf32>
      %161 = arith.mulf %160, %160 : vector<256x128xf32>
      %cst_80 = arith.constant dense<0.000000e+00> : vector<128xf32>
      %162 = vector.multi_reduction <add>, %161, %cst_80 [0] : vector<256x128xf32> to vector<128xf32>
      %163 = vector.shape_cast %162 : vector<128xf32> to vector<1x128xf32>
      %cst_81 = arith.constant 2.560000e+02 : f32
      %164 = vector.broadcast %cst_81 : f32 to vector<1x128xf32>
      %165 = arith.divf %163, %164 : vector<1x128xf32>
      %166 = vector.broadcast %158 : vector<1x128xf32> to vector<256x128xf32>
      %167 = arith.subf %152, %166 : vector<256x128xf32>
      %168 = vector.broadcast %153 : vector<1x128xf32> to vector<256x128xf32>
      %169 = arith.mulf %168, %167 : vector<256x128xf32>
      %cst_82 = arith.constant 9.99999974E-6 : f32
      %170 = vector.broadcast %cst_82 : f32 to vector<1x128xf32>
      %171 = arith.addf %165, %170 : vector<1x128xf32>
      %172 = math.rsqrt %171 : vector<1x128xf32>
      %173 = vector.broadcast %172 : vector<1x128xf32> to vector<256x128xf32>
      %174 = arith.mulf %169, %173 : vector<256x128xf32>
      %175 = vector.broadcast %154 : vector<1x128xf32> to vector<256x128xf32>
      %176 = arith.addf %174, %175 : vector<256x128xf32>
      %c3_83 = arith.constant 3 : index
      %c0_84 = arith.constant 0 : index
      %177 = vector.load %arg6[%c3_83, %c0_84] : memref<4x128xf32, #tpu.memory_space<vmem>>, vector<1x128xf32>
      %cst_85 = arith.constant 0.000000e+00 : f32
      %178 = vector.broadcast %cst_85 : f32 to vector<256x128xf32>
      %179 = arith.cmpf ogt, %176, %178 : vector<256x128xf32>
      %180 = vector.broadcast %177 : vector<1x128xf32> to vector<256x128xf32>
      %181 = arith.mulf %180, %176 : vector<256x128xf32>
      %182 = arith.select %179, %176, %181 : vector<256x128xi1>, vector<256x128xf32>
      %183 = arith.truncf %182 : vector<256x128xf32> to vector<256x128xbf16>
      %cst_86 = arith.constant dense<0.000000e+00> : vector<256x128xf32>
      %184 = tpu.matmul %183, %16, %cst_86 {dimension_numbers = #tpu.dot_dimension_numbers<[1], [0], [0], [1], [0, 0, 1, 1], [], []>} : vector<256x128xbf16>, vector<128x128xbf16>, vector<256x128xf32> -> vector<256x128xf32>
      %c0_87 = arith.constant 0 : index
      %c0_88 = arith.constant 0 : index
      %185 = vector.load %arg8[%c0_87, %c0_88] : memref<4x128xf32, #tpu.memory_space<vmem>>, vector<1x128xf32>
      %186 = vector.broadcast %185 : vector<1x128xf32> to vector<256x128xf32>
      %187 = arith.addf %184, %186 : vector<256x128xf32>
      %c1_89 = arith.constant 1 : index
      %c0_90 = arith.constant 0 : index
      %188 = vector.load %arg8[%c1_89, %c0_90] : memref<4x128xf32, #tpu.memory_space<vmem>>, vector<1x128xf32>
      %c2_91 = arith.constant 2 : index
      %c0_92 = arith.constant 0 : index
      %189 = vector.load %arg8[%c2_91, %c0_92] : memref<4x128xf32, #tpu.memory_space<vmem>>, vector<1x128xf32>
      %cst_93 = arith.constant dense<0.000000e+00> : vector<128xf32>
      %190 = vector.multi_reduction <add>, %187, %cst_93 [0] : vector<256x128xf32> to vector<128xf32>
      %191 = vector.shape_cast %190 : vector<128xf32> to vector<1x128xf32>
      %cst_94 = arith.constant 2.560000e+02 : f32
      %192 = vector.broadcast %cst_94 : f32 to vector<1x128xf32>
      %193 = arith.divf %191, %192 : vector<1x128xf32>
      %194 = vector.broadcast %193 : vector<1x128xf32> to vector<256x128xf32>
      %195 = arith.subf %187, %194 : vector<256x128xf32>
      %196 = arith.mulf %195, %195 : vector<256x128xf32>
      %cst_95 = arith.constant dense<0.000000e+00> : vector<128xf32>
      %197 = vector.multi_reduction <add>, %196, %cst_95 [0] : vector<256x128xf32> to vector<128xf32>
      %198 = vector.shape_cast %197 : vector<128xf32> to vector<1x128xf32>
      %cst_96 = arith.constant 2.560000e+02 : f32
      %199 = vector.broadcast %cst_96 : f32 to vector<1x128xf32>
      %200 = arith.divf %198, %199 : vector<1x128xf32>
      %201 = vector.broadcast %193 : vector<1x128xf32> to vector<256x128xf32>
      %202 = arith.subf %187, %201 : vector<256x128xf32>
      %203 = vector.broadcast %188 : vector<1x128xf32> to vector<256x128xf32>
      %204 = arith.mulf %203, %202 : vector<256x128xf32>
      %cst_97 = arith.constant 9.99999974E-6 : f32
      %205 = vector.broadcast %cst_97 : f32 to vector<1x128xf32>
      %206 = arith.addf %200, %205 : vector<1x128xf32>
      %207 = math.rsqrt %206 : vector<1x128xf32>
      %208 = vector.broadcast %207 : vector<1x128xf32> to vector<256x128xf32>
      %209 = arith.mulf %204, %208 : vector<256x128xf32>
      %210 = vector.broadcast %189 : vector<1x128xf32> to vector<256x128xf32>
      %211 = arith.addf %209, %210 : vector<256x128xf32>
      %c3_98 = arith.constant 3 : index
      %c0_99 = arith.constant 0 : index
      %212 = vector.load %arg8[%c3_98, %c0_99] : memref<4x128xf32, #tpu.memory_space<vmem>>, vector<1x128xf32>
      %cst_100 = arith.constant 0.000000e+00 : f32
      %213 = vector.broadcast %cst_100 : f32 to vector<256x128xf32>
      %214 = arith.cmpf ogt, %211, %213 : vector<256x128xf32>
      %215 = vector.broadcast %212 : vector<1x128xf32> to vector<256x128xf32>
      %216 = arith.mulf %215, %211 : vector<256x128xf32>
      %217 = arith.select %214, %211, %216 : vector<256x128xi1>, vector<256x128xf32>
      %c0_101 = arith.constant 0 : index
      %c640 = arith.constant 640 : index
      %218 = vector.load %arg9[%c0_101, %c640] : memref<256x768xf32, #tpu.memory_space<vmem>>, vector<256x128xf32>
      tpu.vector_store %arg9[%c0_101, %c640], %217 {strides = array<i32>} : memref<256x768xf32, #tpu.memory_space<vmem>>, vector<256x128xf32>,
      %c1_102 = arith.constant 1 : index
      %c0_103 = arith.constant 0 : index
      %219 = vector.load %arg4[%c1_102, %c0_103] : memref<4x128xf32, #tpu.memory_space<vmem>>, vector<1x128xf32>
      %c0_104 = arith.constant 0 : index
      %c256 = arith.constant 256 : index
      %220 = vector.load %arg10[%c0_104, %c256] : memref<256x512xf32, #tpu.memory_space<vmem>>, vector<256x128xf32>
      %221 = vector.broadcast %219 : vector<1x128xf32> to vector<256x128xf32>
      %222 = arith.addf %220, %221 : vector<256x128xf32>
      %cst_105 = arith.constant 0.000000e+00 : f32
      %223 = vector.broadcast %cst_105 : f32 to vector<256x128xf32>
      %224 = arith.maximumf %222, %223 : vector<256x128xf32>
      %c2_106 = arith.constant 2 : index
      %c0_107 = arith.constant 0 : index
      %225 = vector.load %arg4[%c2_106, %c0_107] : memref<4x128xf32, #tpu.memory_space<vmem>>, vector<1x128xf32>
      %c3_108 = arith.constant 3 : index
      %c0_109 = arith.constant 0 : index
      %226 = vector.load %arg4[%c3_108, %c0_109] : memref<4x128xf32, #tpu.memory_space<vmem>>, vector<1x128xf32>
      %cst_110 = arith.constant dense<0.000000e+00> : vector<128xf32>
      %227 = vector.multi_reduction <add>, %224, %cst_110 [0] : vector<256x128xf32> to vector<128xf32>
      %228 = vector.shape_cast %227 : vector<128xf32> to vector<1x128xf32>
      %cst_111 = arith.constant 2.560000e+02 : f32
      %229 = vector.broadcast %cst_111 : f32 to vector<1x128xf32>
      %230 = arith.divf %228, %229 : vector<1x128xf32>
      %231 = vector.broadcast %230 : vector<1x128xf32> to vector<256x128xf32>
      %232 = arith.subf %224, %231 : vector<256x128xf32>
      %233 = arith.mulf %232, %232 : vector<256x128xf32>
      %cst_112 = arith.constant dense<0.000000e+00> : vector<128xf32>
      %234 = vector.multi_reduction <add>, %233, %cst_112 [0] : vector<256x128xf32> to vector<128xf32>
      %235 = vector.shape_cast %234 : vector<128xf32> to vector<1x128xf32>
      %cst_113 = arith.constant 2.560000e+02 : f32
      %236 = vector.broadcast %cst_113 : f32 to vector<1x128xf32>
      %237 = arith.divf %235, %236 : vector<1x128xf32>
      %238 = vector.broadcast %230 : vector<1x128xf32> to vector<256x128xf32>
      %239 = arith.subf %224, %238 : vector<256x128xf32>
      %240 = vector.broadcast %225 : vector<1x128xf32> to vector<256x128xf32>
      %241 = arith.mulf %240, %239 : vector<256x128xf32>
      %cst_114 = arith.constant 9.99999974E-6 : f32
      %242 = vector.broadcast %cst_114 : f32 to vector<1x128xf32>
      %243 = arith.addf %237, %242 : vector<1x128xf32>
      %244 = math.rsqrt %243 : vector<1x128xf32>
      %245 = vector.broadcast %244 : vector<1x128xf32> to vector<256x128xf32>
      %246 = arith.mulf %241, %245 : vector<256x128xf32>
      %247 = vector.broadcast %226 : vector<1x128xf32> to vector<256x128xf32>
      %248 = arith.addf %246, %247 : vector<256x128xf32>
      %249 = arith.truncf %248 : vector<256x128xf32> to vector<256x128xbf16>
      %cst_115 = arith.constant dense<0.000000e+00> : vector<256x128xf32>
      %250 = tpu.matmul %249, %15, %cst_115 {dimension_numbers = #tpu.dot_dimension_numbers<[1], [0], [0], [1], [0, 0, 1, 1], [], []>} : vector<256x128xbf16>, vector<128x128xbf16>, vector<256x128xf32> -> vector<256x128xf32>
      %c0_116 = arith.constant 0 : index
      %c0_117 = arith.constant 0 : index
      %251 = vector.load %arg6[%c0_116, %c0_117] : memref<4x128xf32, #tpu.memory_space<vmem>>, vector<1x128xf32>
      %252 = vector.broadcast %251 : vector<1x128xf32> to vector<256x128xf32>
      %253 = arith.addf %250, %252 : vector<256x128xf32>
      %c1_118 = arith.constant 1 : index
      %c0_119 = arith.constant 0 : index
      %254 = vector.load %arg6[%c1_118, %c0_119] : memref<4x128xf32, #tpu.memory_space<vmem>>, vector<1x128xf32>
      %c2_120 = arith.constant 2 : index
      %c0_121 = arith.constant 0 : index
      %255 = vector.load %arg6[%c2_120, %c0_121] : memref<4x128xf32, #tpu.memory_space<vmem>>, vector<1x128xf32>
      %cst_122 = arith.constant dense<0.000000e+00> : vector<128xf32>
      %256 = vector.multi_reduction <add>, %253, %cst_122 [0] : vector<256x128xf32> to vector<128xf32>
      %257 = vector.shape_cast %256 : vector<128xf32> to vector<1x128xf32>
      %cst_123 = arith.constant 2.560000e+02 : f32
      %258 = vector.broadcast %cst_123 : f32 to vector<1x128xf32>
      %259 = arith.divf %257, %258 : vector<1x128xf32>
      %260 = vector.broadcast %259 : vector<1x128xf32> to vector<256x128xf32>
      %261 = arith.subf %253, %260 : vector<256x128xf32>
      %262 = arith.mulf %261, %261 : vector<256x128xf32>
      %cst_124 = arith.constant dense<0.000000e+00> : vector<128xf32>
      %263 = vector.multi_reduction <add>, %262, %cst_124 [0] : vector<256x128xf32> to vector<128xf32>
      %264 = vector.shape_cast %263 : vector<128xf32> to vector<1x128xf32>
      %cst_125 = arith.constant 2.560000e+02 : f32
      %265 = vector.broadcast %cst_125 : f32 to vector<1x128xf32>
      %266 = arith.divf %264, %265 : vector<1x128xf32>
      %267 = vector.broadcast %259 : vector<1x128xf32> to vector<256x128xf32>
      %268 = arith.subf %253, %267 : vector<256x128xf32>
      %269 = vector.broadcast %254 : vector<1x128xf32> to vector<256x128xf32>
      %270 = arith.mulf %269, %268 : vector<256x128xf32>
      %cst_126 = arith.constant 9.99999974E-6 : f32
      %271 = vector.broadcast %cst_126 : f32 to vector<1x128xf32>
      %272 = arith.addf %266, %271 : vector<1x128xf32>
      %273 = math.rsqrt %272 : vector<1x128xf32>
      %274 = vector.broadcast %273 : vector<1x128xf32> to vector<256x128xf32>
      %275 = arith.mulf %270, %274 : vector<256x128xf32>
      %276 = vector.broadcast %255 : vector<1x128xf32> to vector<256x128xf32>
      %277 = arith.addf %275, %276 : vector<256x128xf32>
      %c3_127 = arith.constant 3 : index
      %c0_128 = arith.constant 0 : index
      %278 = vector.load %arg6[%c3_127, %c0_128] : memref<4x128xf32, #tpu.memory_space<vmem>>, vector<1x128xf32>
      %cst_129 = arith.constant 0.000000e+00 : f32
      %279 = vector.broadcast %cst_129 : f32 to vector<256x128xf32>
      %280 = arith.cmpf ogt, %277, %279 : vector<256x128xf32>
      %281 = vector.broadcast %278 : vector<1x128xf32> to vector<256x128xf32>
      %282 = arith.mulf %281, %277 : vector<256x128xf32>
      %283 = arith.select %280, %277, %282 : vector<256x128xi1>, vector<256x128xf32>
      %c0_130 = arith.constant 0 : index
      %c0_131 = arith.constant 0 : index
      %284 = vector.load %arg9[%c0_130, %c0_131] : memref<256x768xf32, #tpu.memory_space<vmem>>, vector<256x128xf32>
      tpu.vector_store %arg9[%c0_130, %c0_131], %248 {strides = array<i32>} : memref<256x768xf32, #tpu.memory_space<vmem>>, vector<256x128xf32>,
      %c0_132 = arith.constant 0 : index
      %c256_133 = arith.constant 256 : index
      %285 = vector.load %arg9[%c0_132, %c256_133] : memref<256x768xf32, #tpu.memory_space<vmem>>, vector<256x128xf32>
      tpu.vector_store %arg9[%c0_132, %c256_133], %283 {strides = array<i32>} : memref<256x768xf32, #tpu.memory_space<vmem>>, vector<256x128xf32>,
      %c1_134 = arith.constant 1 : index
      %c0_135 = arith.constant 0 : index
      %286 = vector.load %arg4[%c1_134, %c0_135] : memref<4x128xf32, #tpu.memory_space<vmem>>, vector<1x128xf32>
      %c0_136 = arith.constant 0 : index
      %c384 = arith.constant 384 : index
      %287 = vector.load %arg10[%c0_136, %c384] : memref<256x512xf32, #tpu.memory_space<vmem>>, vector<256x128xf32>
      %288 = vector.broadcast %286 : vector<1x128xf32> to vector<256x128xf32>
      %289 = arith.addf %287, %288 : vector<256x128xf32>
      %cst_137 = arith.constant 0.000000e+00 : f32
      %290 = vector.broadcast %cst_137 : f32 to vector<256x128xf32>
      %291 = arith.maximumf %289, %290 : vector<256x128xf32>
      %c2_138 = arith.constant 2 : index
      %c0_139 = arith.constant 0 : index
      %292 = vector.load %arg4[%c2_138, %c0_139] : memref<4x128xf32, #tpu.memory_space<vmem>>, vector<1x128xf32>
      %c3_140 = arith.constant 3 : index
      %c0_141 = arith.constant 0 : index
      %293 = vector.load %arg4[%c3_140, %c0_141] : memref<4x128xf32, #tpu.memory_space<vmem>>, vector<1x128xf32>
      %cst_142 = arith.constant dense<0.000000e+00> : vector<128xf32>
      %294 = vector.multi_reduction <add>, %291, %cst_142 [0] : vector<256x128xf32> to vector<128xf32>
      %295 = vector.shape_cast %294 : vector<128xf32> to vector<1x128xf32>
      %cst_143 = arith.constant 2.560000e+02 : f32
      %296 = vector.broadcast %cst_143 : f32 to vector<1x128xf32>
      %297 = arith.divf %295, %296 : vector<1x128xf32>
      %298 = vector.broadcast %297 : vector<1x128xf32> to vector<256x128xf32>
      %299 = arith.subf %291, %298 : vector<256x128xf32>
      %300 = arith.mulf %299, %299 : vector<256x128xf32>
      %cst_144 = arith.constant dense<0.000000e+00> : vector<128xf32>
      %301 = vector.multi_reduction <add>, %300, %cst_144 [0] : vector<256x128xf32> to vector<128xf32>
      %302 = vector.shape_cast %301 : vector<128xf32> to vector<1x128xf32>
      %cst_145 = arith.constant 2.560000e+02 : f32
      %303 = vector.broadcast %cst_145 : f32 to vector<1x128xf32>
      %304 = arith.divf %302, %303 : vector<1x128xf32>
      %305 = vector.broadcast %297 : vector<1x128xf32> to vector<256x128xf32>
      %306 = arith.subf %291, %305 : vector<256x128xf32>
      %307 = vector.broadcast %292 : vector<1x128xf32> to vector<256x128xf32>
      %308 = arith.mulf %307, %306 : vector<256x128xf32>
      %cst_146 = arith.constant 9.99999974E-6 : f32
      %309 = vector.broadcast %cst_146 : f32 to vector<1x128xf32>
      %310 = arith.addf %304, %309 : vector<1x128xf32>
      %311 = math.rsqrt %310 : vector<1x128xf32>
      %312 = vector.broadcast %311 : vector<1x128xf32> to vector<256x128xf32>
      %313 = arith.mulf %308, %312 : vector<256x128xf32>
      %314 = vector.broadcast %293 : vector<1x128xf32> to vector<256x128xf32>
      %315 = arith.addf %313, %314 : vector<256x128xf32>
      %316 = arith.truncf %315 : vector<256x128xf32> to vector<256x128xbf16>
      %cst_147 = arith.constant dense<0.000000e+00> : vector<256x128xf32>
      %317 = tpu.matmul %316, %15, %cst_147 {dimension_numbers = #tpu.dot_dimension_numbers<[1], [0], [0], [1], [0, 0, 1, 1], [], []>} : vector<256x128xbf16>, vector<128x128xbf16>, vector<256x128xf32> -> vector<256x128xf32>
      %c0_148 = arith.constant 0 : index
      %c0_149 = arith.constant 0 : index
      %318 = vector.load %arg6[%c0_148, %c0_149] : memref<4x128xf32, #tpu.memory_space<vmem>>, vector<1x128xf32>
      %319 = vector.broadcast %318 : vector<1x128xf32> to vector<256x128xf32>
      %320 = arith.addf %317, %319 : vector<256x128xf32>
      %c1_150 = arith.constant 1 : index
      %c0_151 = arith.constant 0 : index
      %321 = vector.load %arg6[%c1_150, %c0_151] : memref<4x128xf32, #tpu.memory_space<vmem>>, vector<1x128xf32>
      %c2_152 = arith.constant 2 : index
      %c0_153 = arith.constant 0 : index
      %322 = vector.load %arg6[%c2_152, %c0_153] : memref<4x128xf32, #tpu.memory_space<vmem>>, vector<1x128xf32>
      %cst_154 = arith.constant dense<0.000000e+00> : vector<128xf32>
      %323 = vector.multi_reduction <add>, %320, %cst_154 [0] : vector<256x128xf32> to vector<128xf32>
      %324 = vector.shape_cast %323 : vector<128xf32> to vector<1x128xf32>
      %cst_155 = arith.constant 2.560000e+02 : f32
      %325 = vector.broadcast %cst_155 : f32 to vector<1x128xf32>
      %326 = arith.divf %324, %325 : vector<1x128xf32>
      %327 = vector.broadcast %326 : vector<1x128xf32> to vector<256x128xf32>
      %328 = arith.subf %320, %327 : vector<256x128xf32>
      %329 = arith.mulf %328, %328 : vector<256x128xf32>
      %cst_156 = arith.constant dense<0.000000e+00> : vector<128xf32>
      %330 = vector.multi_reduction <add>, %329, %cst_156 [0] : vector<256x128xf32> to vector<128xf32>
      %331 = vector.shape_cast %330 : vector<128xf32> to vector<1x128xf32>
      %cst_157 = arith.constant 2.560000e+02 : f32
      %332 = vector.broadcast %cst_157 : f32 to vector<1x128xf32>
      %333 = arith.divf %331, %332 : vector<1x128xf32>
      %334 = vector.broadcast %326 : vector<1x128xf32> to vector<256x128xf32>
      %335 = arith.subf %320, %334 : vector<256x128xf32>
      %336 = vector.broadcast %321 : vector<1x128xf32> to vector<256x128xf32>
      %337 = arith.mulf %336, %335 : vector<256x128xf32>
      %cst_158 = arith.constant 9.99999974E-6 : f32
      %338 = vector.broadcast %cst_158 : f32 to vector<1x128xf32>
      %339 = arith.addf %333, %338 : vector<1x128xf32>
      %340 = math.rsqrt %339 : vector<1x128xf32>
      %341 = vector.broadcast %340 : vector<1x128xf32> to vector<256x128xf32>
      %342 = arith.mulf %337, %341 : vector<256x128xf32>
      %343 = vector.broadcast %322 : vector<1x128xf32> to vector<256x128xf32>
      %344 = arith.addf %342, %343 : vector<256x128xf32>
      %c3_159 = arith.constant 3 : index
      %c0_160 = arith.constant 0 : index
      %345 = vector.load %arg6[%c3_159, %c0_160] : memref<4x128xf32, #tpu.memory_space<vmem>>, vector<1x128xf32>
      %cst_161 = arith.constant 0.000000e+00 : f32
      %346 = vector.broadcast %cst_161 : f32 to vector<256x128xf32>
      %347 = arith.cmpf ogt, %344, %346 : vector<256x128xf32>
      %348 = vector.broadcast %345 : vector<1x128xf32> to vector<256x128xf32>
      %349 = arith.mulf %348, %344 : vector<256x128xf32>
      %350 = arith.select %347, %344, %349 : vector<256x128xi1>, vector<256x128xf32>
      %c0_162 = arith.constant 0 : index
      %c128_163 = arith.constant 128 : index
      %351 = vector.load %arg9[%c0_162, %c128_163] : memref<256x768xf32, #tpu.memory_space<vmem>>, vector<256x128xf32>
      tpu.vector_store %arg9[%c0_162, %c128_163], %315 {strides = array<i32>} : memref<256x768xf32, #tpu.memory_space<vmem>>, vector<256x128xf32>,
      %c0_164 = arith.constant 0 : index
      %c384_165 = arith.constant 384 : index
      %352 = vector.load %arg9[%c0_164, %c384_165] : memref<256x768xf32, #tpu.memory_space<vmem>>, vector<256x128xf32>
      tpu.vector_store %arg9[%c0_164, %c384_165], %350 {strides = array<i32>} : memref<256x768xf32, #tpu.memory_space<vmem>>, vector<256x128xf32>,
    } else {
    }
    return
  }
  func.func @transform_0(%arg0: i32) -> (i32, i32) {
    %c0_i32 = arith.constant 0 : i32
    %c0_i32_0 = arith.constant 0 : i32
    return %arg0, %c0_i32 : i32, i32
  }
  func.func @transform_1(%arg0: i32) -> (i32, i32) {
    %c0_i32 = arith.constant 0 : i32
    %c0_i32_0 = arith.constant 0 : i32
    return %c0_i32, %arg0 : i32, i32
  }
  func.func @transform_2(%arg0: i32) -> (i32, i32) {
    %c0_i32 = arith.constant 0 : i32
    %c0_i32_0 = arith.constant 0 : i32
    %c0_i32_1 = arith.constant 0 : i32
    return %c0_i32, %c0_i32_0 : i32, i32
  }
  func.func @transform_3(%arg0: i32) -> (i32, i32) {
    %c0_i32 = arith.constant 0 : i32
    %c0_i32_0 = arith.constant 0 : i32
    %c0_i32_1 = arith.constant 0 : i32
    return %c0_i32, %c0_i32_0 : i32, i32
  }
  func.func @transform_4(%arg0: i32) -> (i32, i32) {
    %c0_i32 = arith.constant 0 : i32
    %c0_i32_0 = arith.constant 0 : i32
    %c0_i32_1 = arith.constant 0 : i32
    return %c0_i32, %c0_i32_0 : i32, i32
  }
  func.func @transform_5(%arg0: i32) -> (i32, i32) {
    %c0_i32 = arith.constant 0 : i32
    %c0_i32_0 = arith.constant 0 : i32
    %c0_i32_1 = arith.constant 0 : i32
    return %c0_i32, %c0_i32_0 : i32, i32
  }
  func.func @transform_6(%arg0: i32) -> (i32, i32) {
    %c0_i32 = arith.constant 0 : i32
    %c0_i32_0 = arith.constant 0 : i32
    %c0_i32_1 = arith.constant 0 : i32
    return %c0_i32, %c0_i32_0 : i32, i32
  }
  func.func @transform_7(%arg0: i32) -> (i32, i32) {
    %c0_i32 = arith.constant 0 : i32
    %c0_i32_0 = arith.constant 0 : i32
    %c0_i32_1 = arith.constant 0 : i32
    return %c0_i32, %c0_i32_0 : i32, i32
  }
  func.func @transform_8(%arg0: i32) -> (i32, i32) {
    %c0_i32 = arith.constant 0 : i32
    %c0_i32_0 = arith.constant 0 : i32
    %c0_i32_1 = arith.constant 0 : i32
    return %c0_i32, %c0_i32_0 : i32, i32
  }
}

</mosaic_0001>

<bundles_post_ra>
// kernel: tpu_custom_call.1
= control target key start
LH: loop header
LB: loop body
LE: loop exit
PB: predicated region body
PF: predicated region fallthrough
CT: control target
= control target key end

     0   :  { %s15579_s0 = inlined_call_operand.hbm [shape: bf16[256,128], index: 0, kind: input, shape index: {}]   ;;  %s15580_s1 = inlined_call_operand.hbm [shape: bf16[256,256], index: 1, kind: input, shape index: {}]   ;;  %s15581_s2 = inlined_call_operand.hbm [shape: bf16[128,512], index: 2, kind: input, shape index: {}]   ;;  %s15582_s3 = inlined_call_operand.vmem [shape: f32[4,128], index: 3, kind: input, shape index: {}]   ;;  %s15583_s4 = inlined_call_operand.hbm [shape: bf16[128,128], index: 4, kind: input, shape index: {}]   ;;  %s15584_s5 = inlined_call_operand.vmem [shape: f32[4,128], index: 5, kind: input, shape index: {}]   ;;  %s15585_s6 = inlined_call_operand.hbm [shape: bf16[128,128], index: 6, kind: input, shape index: {}]   ;;  %s15586_s7 = inlined_call_operand.vmem [shape: f32[4,128], index: 7, kind: input, shape index: {}]   ;;  %s15587_s8 = inlined_call_operand.hbm [shape: f32[256,768], index: 8, kind: output, shape index: {}]  }
   0x1   :  { %16053 = sst [smem:[#allocation92_spill]] %s15579_s0 }
   0x2   :  { %16054 = sst [smem:[#allocation93_spill]] %s15581_s2 }
   0x3   :  { %16055 = sst [smem:[#allocation94_spill]] %s15583_s4 }
   0x4   :  { %13 = vsyncpa [#allocation4], 0 }
   0x5   :  { %15 = vsyncpa [#allocation4 + $0x1], 0 }
   0x6   :  { %16 = vsyncpa [#allocation7], 0 }
   0x7   :  { %18 = vsyncpa [#allocation7 + $0x1], 0 }
   0x8   :  { %19 = vsyncpa [#allocation10], 0 }
   0x9   :  { %20 = vsyncpa [#allocation5], 0  ;;  %s8027_s27 = smov 0   ;;  %s8029_s28 = smov 0  }
   0xa   :  { %s8031_s29 = smov 0   ;;  %s8033_s30 = smov 0  }
   0xb LB: > { %s8046_s9 = sadd.s32 4294967295, %s7965_s30   ;;  %p46_p0 = scmp.ne.s32.totalorder %s7957_s28, %s7953_s27  ;;  %s7965_s30 = sphi %s8033_s30, %s17070_s30   ;;  %s7961_s29 = sphi %s8031_s29, %s17069_s29   ;;  %s7957_s28 = sphi %s8029_s28, %s17068_s28   ;;  %s7953_s27 = sphi %s8027_s27, %s17067_s27  }
   0xc   : > { %p15588_p1 = scmp.eq.s32.totalorder %s8046_s9, 0  ;;  %p6958_p2 = scmp.ge.s32.totalorder %s7965_s30, 1 }
   0xd   : > { %p230_p3 = scmp.lt.s32.totalorder %s7965_s30, 3  ;;  %s7967_s12 = smov [#allocation8]  }
   0xe   : > { %p8055_p5 = por %p15588_p1, %p46_p0  ;;  %s242_s13 = sshll.u32 %s7967_s12, 4  ;;  %s243_s13 = int_to_ptr.vmem [resolvable:$true] %s242_s13 }
   0xf   : > { %p8059_p6 = pnand %p6958_p2, %p230_p3  ;;  %s7968_s15 = smov [#allocation9]  }
  0x10   : > { %s16056_s10 = scalar_select %p8055_p5, 1, 0 }
  0x11   : > { %s16057_s11 = scalar_select %p8059_p6, 1, 0 }
  0x12   : > { %p7541_p7 = pneg %p8059_p6  ;;  %s258_s16 = sshll.u32 %s7968_s15, 4  ;;  %s8071_s16 = int_to_ptr.vmem [resolvable:$true] %s258_s16 }
  0x13   : > { %s16059_s2 = sld [smem:[#allocation93_spill]] }
  0x14   : > { %p8067_p8 = pnand %p7541_p7, %p15588_p1 }
  0x16   : > { %p8081_p10 = pneg %p8067_p8 }
  0x19   : > { %s7745_s19 = scalar_lea.hbm %s16059_s2, 4096 }
  0x1a   : > { %p7746_p9 = scmp.ne.s32.totalorder %s16059_s2, %s7745_s19  ;;  %p7752_p13 = scmp.lt.u32.totalorder %s7745_s19, %s16059_s2 }
  0x1c   : > { %p7748_p11 = pnand %p8081_p10, %p7746_p9 }
  0x1e   : > { %p7749_p12 = pneg %p7748_p11 }
  0x20   : > { %p7754_p0 = pnand %p7752_p13, %p7749_p12 }
  0x22   : > { %7757 = shalt.err (!%p7754_p0)
}
  0x23   : > { %s7758_s25 = scalar_lea.vmem %s243_s13, 4096  ;;  %p7766_p4 = scmp.lt.s32.totalorder %s243_s13, %s243_s13 }
  0x24   : > { %p7759_p2 = scmp.ne.s32.totalorder %s243_s13, %s7758_s25  ;;  %p7767_p1 = scmp.lt.s32.totalorder %s7758_s25, %s7758_s25 }
  0x26   : > { %p7761_p3 = pnand %p7759_p2, %p8081_p10  ;;  %p7768_p5 = por %p7767_p1, %p7766_p4 }
  0x28   : > { %p7762_p7 = pneg %p7761_p3 }
  0x2a   : > { %p7769_p6 = pnand %p7768_p5, %p7762_p7 }
  0x2c   : > { %7772 = shalt.err (!%p7769_p6)
}
  0x2d   : > { %s7969_s26 = smov 256   ;;  %s7970_s27 = smov 16  }
  0x2e   : > { %7544 = dma.hbm_to_vmem [thread:$0]  (!%p8067_p8), %s16059_s2, 4096, %s243_s13, [#allocation7], %s7969_s26, %s7969_s26, %s7970_s27  }
  0x2f   : > { %s16061_s4 = sld [smem:[#allocation94_spill]] }
  0x35   : > { %s7773_s19 = scalar_lea.hbm %s16061_s4, 1024 }
  0x36   : > { %p7774_p9 = scmp.ne.s32.totalorder %s16061_s4, %s7773_s19  ;;  %p7780_p5 = scmp.lt.u32.totalorder %s7773_s19, %s16061_s4 }
  0x38   : > { %p7776_p1 = pnand %p7774_p9, %p8081_p10 }
  0x3a   : > { %p7777_p4 = pneg %p7776_p1 }
  0x3c   : > { %p7782_p6 = pnand %p7780_p5, %p7777_p4 }
  0x3e   : > { %7785 = shalt.err (!%p7782_p6)
}
  0x3f   : > { %s7786_s13 = scalar_lea.vmem %s8071_s16, 1024  ;;  %p7794_p0 = scmp.lt.s32.totalorder %s8071_s16, %s8071_s16 }
  0x40   : > { %p7787_p11 = scmp.ne.s32.totalorder %s8071_s16, %s7786_s13  ;;  %p7795_p2 = scmp.lt.s32.totalorder %s7786_s13, %s7786_s13 }
  0x42   : > { %p7789_p12 = pnand %p7787_p11, %p8081_p10  ;;  %p7796_p3 = por %p7795_p2, %p7794_p0 }
  0x44   : > { %p7790_p13 = pneg %p7789_p12 }
  0x46   : > { %p7797_p7 = pnand %p7796_p3, %p7790_p13 }
  0x48   : > { %7800 = shalt.err (!%p7797_p7)
}
  0x49   : > { %s7971_s25 = smov 64   ;;  %s7972_s26 = smov 4  }
  0x4a   : > { %7547 = dma.hbm_to_vmem [thread:$0]  (!%p8067_p8), %s16061_s4, 1024, %s8071_s16, [#allocation10], %s7971_s25, %s7971_s25, %s7972_s26  }
  0x4b   : > { %s7973_s15 = smov [#allocation11]   ;;  %s8124_s18 = sadd.s32 1, %s7965_s30  }
  0x4c   : > { %s274_s17 = sshll.u32 %s7973_s15, 4  ;;  %s7801_s21 = scalar_lea.hbm %s15585_s6, 1024  ;;  %s275_s17 = int_to_ptr.vmem [resolvable:$true] %s274_s17 }
  0x4d   : > { %p7802_p9 = scmp.ne.s32.totalorder %s15585_s6, %s7801_s21  ;;  %p7808_p5 = scmp.lt.u32.totalorder %s7801_s21, %s15585_s6 }
  0x4f   : > { %p7804_p1 = pnand %p7802_p9, %p8081_p10 }
  0x51   : > { %p7805_p4 = pneg %p7804_p1 }
  0x53   : > { %p7810_p6 = pnand %p7808_p5, %p7805_p4 }
  0x55   : > { %7813 = shalt.err (!%p7810_p6)
}
  0x56   : > { %s7814_s16 = scalar_lea.vmem %s275_s17, 1024  ;;  %p7822_p0 = scmp.lt.s32.totalorder %s275_s17, %s275_s17 }
  0x57   : > { %p7815_p11 = scmp.ne.s32.totalorder %s275_s17, %s7814_s16  ;;  %p7823_p2 = scmp.lt.s32.totalorder %s7814_s16, %s7814_s16 }
  0x59   : > { %p7817_p12 = pnand %p7815_p11, %p8081_p10  ;;  %p7824_p3 = por %p7823_p2, %p7822_p0 }
  0x5b   : > { %p7818_p13 = pneg %p7817_p12 }
  0x5d   : > { %p7825_p7 = pnand %p7824_p3, %p7818_p13 }
  0x5f   : > { %7828 = shalt.err (!%p7825_p7)
}
  0x60   : > { %7550 = dma.hbm_to_vmem [thread:$0]  (!%p8067_p8), %s15585_s6, 1024, %s275_s17, [#allocation10], %s7971_s25, %s7971_s25, %s7972_s26  }
  0x61   : > { %s30_s22 = ssub.s32 %s7965_s30, %s8124_s18  ;;  %s33_s12 = sadd.s32 1, %s7961_s29 }
  0x62   : > { %p31_p10 = scmp.eq.s32.totalorder %s30_s22, 0  ;;  %p40_p9 = scmp.ne.s32.totalorder %s7961_s29, %s7957_s28 }
  0x63   : > { %p41_p1 = scmp.eq.s32.totalorder %s7965_s30, 0  ;;  %p7561_p4 = scmp.lt.s32.totalorder %s7965_s30, 2 }
  0x64   : > { %s8155_s14 = scalar_select %p31_p10, %s7961_s29, %s33_s12  }
  0x65   : > { %p42_p5 = por %p41_p1, %p40_p9  ;;  %s8158_s15 = sand.u32 1, %s7961_s29  }
  0x66   : > { %s6963_s19 = sshll.u32 %s8158_s15, 6  ;;  %s7088_s20 = sshll.u32 %s7965_s30, 10 }
  0x67   : > { %s16062_s0 = sld [smem:[#allocation92_spill]]  ;;  %s295_s24 = scalar_lea.vmem [#allocation3], %s6963_s19 }
  0x68   : > { %s302_s13 = sshll.u32 %s295_s24, 4  ;;  %p8169_p8 = pnand %p7561_p4, %p42_p5  ;;  %s8167_s13 = int_to_ptr.vmem [resolvable:$true] %s302_s13 }
  0x69   : > { %s6966_s2 = sshll.u32 %s8158_s15, 7  ;;  %s292_s22 = scalar_lea.sflag [#allocation4], %s8158_s15 }
  0x6a   : > { %p7831_p11 = pneg %p8169_p8 }
  0x6d   : > { %s8165_s17 = scalar_lea.hbm %s16062_s0, %s7088_s20  ;;  %s7834_s21 = scalar_lea.hbm %s16062_s0, 2048 }
  0x6e   : > { %s7829_s12 = scalar_lea.hbm %s8165_s17, 1024  ;;  %p7835_p0 = scmp.lt.u32.totalorder %s8165_s17, %s16062_s0 }
  0x6f   : > { %p7830_p6 = scmp.ne.s32.totalorder %s8165_s17, %s7829_s12  ;;  %p7836_p2 = scmp.lt.u32.totalorder %s7834_s21, %s7829_s12 }
  0x70   : > { %p7838_p7 = scmp.lt.u32.totalorder %s7829_s12, %s8165_s17 }
  0x71   : > { %p7832_p12 = pnand %p7831_p11, %p7830_p6  ;;  %p7837_p3 = por %p7836_p2, %p7835_p0 }
  0x73   : > { %p7833_p13 = pneg %p7832_p12  ;;  %p7839_p10 = por %p7838_p7, %p7837_p3 }
  0x75   : > { %p7840_p9 = pnand %p7839_p10, %p7833_p13 }
  0x77   : > { %7843 = shalt.err (!%p7840_p9)
}
  0x78   : > { %s7844_s27 = scalar_lea.vmem %s8167_s13, 1024  ;;  %s7974_s19 = smov [#allocation3]  }
  0x79   : > { %p7845_p1 = scmp.ne.s32.totalorder %s8167_s13, %s7844_s27  ;;  %s7849_s20 = sshll.u32 %s7974_s19, 4  ;;  %s7850_s20 = int_to_ptr.vmem [resolvable:$false] %s7849_s20 }
  0x7a   : > { %s7851_s23 = scalar_lea.vmem %s7850_s20, 2048  ;;  %p7852_p6 = scmp.lt.s32.totalorder %s8167_s13, %s7850_s20 }
  0x7b   : > { %p7847_p4 = pnand %p7845_p1, %p7831_p11  ;;  %p7853_p12 = scmp.lt.s32.totalorder %s7851_s23, %s7844_s27 }
  0x7d   : > { %p7848_p5 = pneg %p7847_p4  ;;  %p7854_p0 = por %p7853_p12, %p7852_p6 }
  0x7f   : > { %p7855_p2 = pnand %p7854_p0, %p7848_p5 }
  0x81   : > { %7858 = shalt.err (!%p7855_p2)
}
  0x82   : > { %7554 = dma.hbm_to_vmem [thread:$0]  (!%p8169_p8), %s8165_s17, 1024, %s8167_s13, %s292_s22, %s7971_s25, %s7971_s25, %s7972_s26  }
  0x83   : > { %s316_s12 = scalar_lea.vmem [#allocation6], %s6966_s2  ;;  %s6967_s21 = sshll.u32 %s7965_s30, 6 }
  0x84   : > { %s322_s27 = sshll.u32 %s316_s12, 4  ;;  %s8214_s20 = scalar_lea.hbm %s15580_s1, %s6967_s21  ;;  %s8208_s27 = int_to_ptr.vmem [resolvable:$true] %s322_s27 }
  0x85   : > { %s16064_s23 = sand.u32 1, %s7965_s30   ;;  %s7859_s4 = scalar_lea.hbm %s8214_s20, 2048 }
  0x86   : > { %s8218_s0 = scalar_lea.sflag [#allocation7], %s16064_s23  ;;  %p7860_p13 = scmp.ne.s32.totalorder %s8214_s20, %s7859_s4 }
  0x87   : > { %s7864_s13 = scalar_lea.hbm %s15580_s1, 4096  ;;  %p7865_p10 = scmp.lt.u32.totalorder %s8214_s20, %s15580_s1 }
  0x88   : > { %p7862_p3 = pnand %p7860_p13, %p7831_p11  ;;  %p7866_p9 = scmp.lt.u32.totalorder %s7864_s13, %s7859_s4 }
  0x89   : > { %p7868_p4 = scmp.lt.u32.totalorder %s7859_s4, %s8214_s20 }
  0x8a   : > { %p7863_p7 = pneg %p7862_p3  ;;  %p7867_p1 = por %p7866_p9, %p7865_p10 }
  0x8c   : > { %p7869_p5 = por %p7868_p4, %p7867_p1 }
  0x8e   : > { %p7870_p6 = pnand %p7869_p5, %p7863_p7 }
  0x90   : > { %7873 = shalt.err (!%p7870_p6)
}
  0x91   : > { %s7874_s30 = scalar_lea.vmem %s8208_s27, 2048  ;;  %s7975_s12 = smov [#allocation6]  }
  0x92   : > { %p7875_p12 = scmp.ne.s32.totalorder %s8208_s27, %s7874_s30  ;;  %s7879_s21 = sshll.u32 %s7975_s12, 4  ;;  %s7880_s21 = int_to_ptr.vmem [resolvable:$false] %s7879_s21 }
  0x93   : > { %s7881_s24 = scalar_lea.vmem %s7880_s21, 4096  ;;  %p7882_p13 = scmp.lt.s32.totalorder %s8208_s27, %s7880_s21 }
  0x94   : > { %p7877_p0 = pnand %p7875_p12, %p7831_p11  ;;  %p7883_p3 = scmp.lt.s32.totalorder %s7881_s24, %s7874_s30 }
  0x96   : > { %p7878_p2 = pneg %p7877_p0  ;;  %p7884_p10 = por %p7883_p3, %p7882_p13 }
  0x98   : > { %p7885_p9 = pnand %p7884_p10, %p7878_p2 }
  0x9a   : > { %7888 = shalt.err (!%p7885_p9)
}
  0x9b   : > { %s7976_s4 = smov 128   ;;  %p16065_p11 = scmp.ne.s32.totalorder %s16057_s11, 0 }
  0x9c   : > { %7557 = dma.hbm_to_vmem [thread:$0]  (!%p8169_p8), %s8214_s20, 2048, %s8208_s27, %s8218_s0, %s7976_s4, %s7971_s25, %s7972_s26  }
  0x9d   : > { %334 = sbr.rel (%p16065_p11) target bundleno = 2320 (0x910), region = 52  ;;  %s336_s19 = sand.u32 (!%p16065_p11), 1, %s7957_s28  }
  0x9e   : > { %s6969_s23 = sshll.u32 (!%p16065_p11), %s336_s19, 6  ;;  %s337_s15 = scalar_lea.sflag (!%p16065_p11), [#allocation4], %s336_s19 }
  0x9f   : > { %s8249_s17 = scalar_lea.vmem (!%p16065_p11), [#allocation3], %s6969_s23  ;;  %p16066_p7 = scmp.ne.s32.totalorder (!%p16065_p11), %s16056_s10, 0 }
  0xa4   : > { %7932 = dma.done.wait (%p16066_p7), %s337_s15, 1024  }
  0xa5   : > { %7934 = vsyncadd (%p16066_p7), %s337_s15, 4294966272  ;;  %s345_s16 = sand.u32 1, %s8046_s9   ;;  %s6970_s13 = sshll.u32 %s336_s19, 7 }
  0xa6   : > { %s346_s0 = scalar_lea.sflag [#allocation7], %s345_s16  ;;  %s8256_s25 = scalar_lea.vmem [#allocation6], %s6970_s13 }
  0xa7   : > { %7936 = dma.done.wait (%p16066_p7), %s346_s0, 2048  }
  0xa8   : > { %7938 = vsyncadd (%p16066_p7), %s346_s0, 4294965248  ;;  %p16067_p8 = scmp.eq.s32.totalorder %s8046_s9, 0 }
  0xaa   : > { %7940 = dma.done.wait (%p16067_p8), [#allocation7], 4096   ;;  %p16068_p1 = pmov %p16067_p8 }
  0xac   : > { %7942 = vsyncadd (%p16068_p1), [#allocation7], 4294963200  ;;  %p16069_p4 = pmov %p16068_p1 }
  0xad   : > { %p16070_p5 = pmov %p16068_p1 }
  0xae   : > { %7944 = dma.done.wait (%p16069_p4), [#allocation10], 2048  }
  0xaf   : > { %7946 = vsyncadd (%p16070_p5), [#allocation10], 4294965248  ;;  %p16071_p6 = scmp.ne.s32.totalorder %s8046_s9, 0 }
  0xb0   : > { %v7977_v0 = vmov (!%p16071_p6), 0.0  }
  0xb1   : > { %399 = sbr.rel (%p16071_p6) target bundleno = 241 (0xf1), region = 76  ;;  %400 = vst [vmem:[#allocation2] sm:$0xff] (!%p16071_p6), %v7977_v0  ;;  %401 = vst [vmem:[#allocation2 + $0x8] sm:$0xff] (!%p16071_p6), %v7977_v0 }
  0xb2   : > { %402 = vst [vmem:[#allocation2 + $0x10] sm:$0xff] (!%p16071_p6), %v7977_v0  ;;  %403 = vst [vmem:[#allocation2 + $0x18] sm:$0xff] (!%p16071_p6), %v7977_v0 }
  0xb3   : > { %404 = vst [vmem:[#allocation2 + $0x20] sm:$0xff] (!%p16071_p6), %v7977_v0  ;;  %405 = vst [vmem:[#allocation2 + $0x28] sm:$0xff] (!%p16071_p6), %v7977_v0 }
  0xb4   : > { %406 = vst [vmem:[#allocation2 + $0x30] sm:$0xff] (!%p16071_p6), %v7977_v0  ;;  %407 = vst [vmem:[#allocation2 + $0x38] sm:$0xff] (!%p16071_p6), %v7977_v0 }
  0xb5   : > { %408 = vst [vmem:[#allocation2 + $0x40] sm:$0xff] (!%p16071_p6), %v7977_v0  ;;  %409 = vst [vmem:[#allocation2 + $0x48] sm:$0xff] (!%p16071_p6), %v7977_v0 }
  0xb6   : > { %410 = vst [vmem:[#allocation2 + $0x50] sm:$0xff] (!%p16071_p6), %v7977_v0  ;;  %411 = vst [vmem:[#allocation2 + $0x58] sm:$0xff] (!%p16071_p6), %v7977_v0 }
  0xb7   : > { %412 = vst [vmem:[#allocation2 + $0x60] sm:$0xff] (!%p16071_p6), %v7977_v0  ;;  %413 = vst [vmem:[#allocation2 + $0x68] sm:$0xff] (!%p16071_p6), %v7977_v0 }
  0xb8   : > { %414 = vst [vmem:[#allocation2 + $0x70] sm:$0xff] %v7977_v0  ;;  %415 = vst [vmem:[#allocation2 + $0x78] sm:$0xff] %v7977_v0 }
  0xb9   : > { %416 = vst [vmem:[#allocation2 + $0x80] sm:$0xff] %v7977_v0  ;;  %417 = vst [vmem:[#allocation2 + $0x88] sm:$0xff] %v7977_v0 }
  0xba   : > { %418 = vst [vmem:[#allocation2 + $0x90] sm:$0xff] %v7977_v0  ;;  %419 = vst [vmem:[#allocation2 + $0x98] sm:$0xff] %v7977_v0 }
  0xbb   : > { %420 = vst [vmem:[#allocation2 + $0xa0] sm:$0xff] %v7977_v0  ;;  %421 = vst [vmem:[#allocation2 + $0xa8] sm:$0xff] %v7977_v0 }
  0xbc   : > { %422 = vst [vmem:[#allocation2 + $0xb0] sm:$0xff] %v7977_v0  ;;  %423 = vst [vmem:[#allocation2 + $0xb8] sm:$0xff] %v7977_v0 }
  0xbd   : > { %424 = vst [vmem:[#allocation2 + $0xc0] sm:$0xff] %v7977_v0  ;;  %425 = vst [vmem:[#allocation2 + $0xc8] sm:$0xff] %v7977_v0 }
  0xbe   : > { %426 = vst [vmem:[#allocation2 + $0xd0] sm:$0xff] %v7977_v0  ;;  %427 = vst [vmem:[#allocation2 + $0xd8] sm:$0xff] %v7977_v0 }
  0xbf   : > { %428 = vst [vmem:[#allocation2 + $0xe0] sm:$0xff] %v7977_v0  ;;  %429 = vst [vmem:[#allocation2 + $0xe8] sm:$0xff] %v7977_v0 }
  0xc0   : > { %430 = vst [vmem:[#allocation2 + $0xf0] sm:$0xff] %v7977_v0  ;;  %431 = vst [vmem:[#allocation2 + $0xf8] sm:$0xff] %v7977_v0 }
  0xc1   : > { %432 = vst [vmem:[#allocation2 + $0x100] sm:$0xff] %v7977_v0  ;;  %433 = vst [vmem:[#allocation2 + $0x108] sm:$0xff] %v7977_v0 }
  0xc2   : > { %434 = vst [vmem:[#allocation2 + $0x110] sm:$0xff] %v7977_v0  ;;  %435 = vst [vmem:[#allocation2 + $0x118] sm:$0xff] %v7977_v0 }
  0xc3   : > { %436 = vst [vmem:[#allocation2 + $0x120] sm:$0xff] %v7977_v0  ;;  %437 = vst [vmem:[#allocation2 + $0x128] sm:$0xff] %v7977_v0 }
  0xc4   : > { %438 = vst [vmem:[#allocation2 + $0x130] sm:$0xff] %v7977_v0  ;;  %439 = vst [vmem:[#allocation2 + $0x138] sm:$0xff] %v7977_v0 }
  0xc5   : > { %440 = vst [vmem:[#allocation2 + $0x140] sm:$0xff] %v7977_v0  ;;  %441 = vst [vmem:[#allocation2 + $0x148] sm:$0xff] %v7977_v0 }
  0xc6   : > { %442 = vst [vmem:[#allocation2 + $0x150] sm:$0xff] %v7977_v0  ;;  %443 = vst [vmem:[#allocation2 + $0x158] sm:$0xff] %v7977_v0 }
  0xc7   : > { %444 = vst [vmem:[#allocation2 + $0x160] sm:$0xff] %v7977_v0  ;;  %445 = vst [vmem:[#allocation2 + $0x168] sm:$0xff] %v7977_v0 }
  0xc8   : > { %446 = vst [vmem:[#allocation2 + $0x170] sm:$0xff] %v7977_v0  ;;  %447 = vst [vmem:[#allocation2 + $0x178] sm:$0xff] %v7977_v0 }
  0xc9   : > { %448 = vst [vmem:[#allocation2 + $0x180] sm:$0xff] %v7977_v0  ;;  %449 = vst [vmem:[#allocation2 + $0x188] sm:$0xff] %v7977_v0 }
  0xca   : > { %450 = vst [vmem:[#allocation2 + $0x190] sm:$0xff] %v7977_v0  ;;  %451 = vst [vmem:[#allocation2 + $0x198] sm:$0xff] %v7977_v0 }
  0xcb   : > { %452 = vst [vmem:[#allocation2 + $0x1a0] sm:$0xff] %v7977_v0  ;;  %453 = vst [vmem:[#allocation2 + $0x1a8] sm:$0xff] %v7977_v0 }
  0xcc   : > { %454 = vst [vmem:[#allocation2 + $0x1b0] sm:$0xff] %v7977_v0  ;;  %455 = vst [vmem:[#allocation2 + $0x1b8] sm:$0xff] %v7977_v0 }
  0xcd   : > { %456 = vst [vmem:[#allocation2 + $0x1c0] sm:$0xff] %v7977_v0  ;;  %457 = vst [vmem:[#allocation2 + $0x1c8] sm:$0xff] %v7977_v0 }
  0xce   : > { %458 = vst [vmem:[#allocation2 + $0x1d0] sm:$0xff] %v7977_v0  ;;  %459 = vst [vmem:[#allocation2 + $0x1d8] sm:$0xff] %v7977_v0 }
  0xcf   : > { %460 = vst [vmem:[#allocation2 + $0x1e0] sm:$0xff] %v7977_v0  ;;  %461 = vst [vmem:[#allocation2 + $0x1e8] sm:$0xff] %v7977_v0 }
  0xd0   : > { %462 = vst [vmem:[#allocation2 + $0x1f0] sm:$0xff] %v7977_v0  ;;  %463 = vst [vmem:[#allocation2 + $0x1f8] sm:$0xff] %v7977_v0 }
  0xd1   : > { %464 = vst [vmem:[#allocation2 + $0x200] sm:$0xff] %v7977_v0  ;;  %465 = vst [vmem:[#allocation2 + $0x208] sm:$0xff] %v7977_v0 }
  0xd2   : > { %466 = vst [vmem:[#allocation2 + $0x210] sm:$0xff] %v7977_v0  ;;  %467 = vst [vmem:[#allocation2 + $0x218] sm:$0xff] %v7977_v0 }
  0xd3   : > { %468 = vst [vmem:[#allocation2 + $0x220] sm:$0xff] %v7977_v0  ;;  %469 = vst [vmem:[#allocation2 + $0x228] sm:$0xff] %v7977_v0 }
  0xd4   : > { %470 = vst [vmem:[#allocation2 + $0x230] sm:$0xff] %v7977_v0  ;;  %471 = vst [vmem:[#allocation2 + $0x238] sm:$0xff] %v7977_v0 }
  0xd5   : > { %472 = vst [vmem:[#allocation2 + $0x240] sm:$0xff] %v7977_v0  ;;  %473 = vst [vmem:[#allocation2 + $0x248] sm:$0xff] %v7977_v0 }
  0xd6   : > { %474 = vst [vmem:[#allocation2 + $0x250] sm:$0xff] %v7977_v0  ;;  %475 = vst [vmem:[#allocation2 + $0x258] sm:$0xff] %v7977_v0 }
  0xd7   : > { %476 = vst [vmem:[#allocation2 + $0x260] sm:$0xff] %v7977_v0  ;;  %477 = vst [vmem:[#allocation2 + $0x268] sm:$0xff] %v7977_v0 }
  0xd8   : > { %478 = vst [vmem:[#allocation2 + $0x270] sm:$0xff] %v7977_v0  ;;  %479 = vst [vmem:[#allocation2 + $0x278] sm:$0xff] %v7977_v0 }
  0xd9   : > { %480 = vst [vmem:[#allocation2 + $0x280] sm:$0xff] %v7977_v0  ;;  %481 = vst [vmem:[#allocation2 + $0x288] sm:$0xff] %v7977_v0 }
  0xda   : > { %482 = vst [vmem:[#allocation2 + $0x290] sm:$0xff] %v7977_v0  ;;  %483 = vst [vmem:[#allocation2 + $0x298] sm:$0xff] %v7977_v0 }
  0xdb   : > { %484 = vst [vmem:[#allocation2 + $0x2a0] sm:$0xff] %v7977_v0  ;;  %485 = vst [vmem:[#allocation2 + $0x2a8] sm:$0xff] %v7977_v0 }
  0xdc   : > { %486 = vst [vmem:[#allocation2 + $0x2b0] sm:$0xff] %v7977_v0  ;;  %487 = vst [vmem:[#allocation2 + $0x2b8] sm:$0xff] %v7977_v0 }
  0xdd   : > { %488 = vst [vmem:[#allocation2 + $0x2c0] sm:$0xff] %v7977_v0  ;;  %489 = vst [vmem:[#allocation2 + $0x2c8] sm:$0xff] %v7977_v0 }
  0xde   : > { %490 = vst [vmem:[#allocation2 + $0x2d0] sm:$0xff] %v7977_v0  ;;  %491 = vst [vmem:[#allocation2 + $0x2d8] sm:$0xff] %v7977_v0 }
  0xdf   : > { %492 = vst [vmem:[#allocation2 + $0x2e0] sm:$0xff] %v7977_v0  ;;  %493 = vst [vmem:[#allocation2 + $0x2e8] sm:$0xff] %v7977_v0 }
  0xe0   : > { %494 = vst [vmem:[#allocation2 + $0x2f0] sm:$0xff] %v7977_v0  ;;  %495 = vst [vmem:[#allocation2 + $0x2f8] sm:$0xff] %v7977_v0 }
  0xe1   : > { %496 = vst [vmem:[#allocation2 + $0x300] sm:$0xff] %v7977_v0  ;;  %497 = vst [vmem:[#allocation2 + $0x308] sm:$0xff] %v7977_v0 }
  0xe2   : > { %498 = vst [vmem:[#allocation2 + $0x310] sm:$0xff] %v7977_v0  ;;  %499 = vst [vmem:[#allocation2 + $0x318] sm:$0xff] %v7977_v0 }
  0xe3   : > { %500 = vst [vmem:[#allocation2 + $0x320] sm:$0xff] %v7977_v0  ;;  %501 = vst [vmem:[#allocation2 + $0x328] sm:$0xff] %v7977_v0 }
  0xe4   : > { %502 = vst [vmem:[#allocation2 + $0x330] sm:$0xff] %v7977_v0  ;;  %503 = vst [vmem:[#allocation2 + $0x338] sm:$0xff] %v7977_v0 }
  0xe5   : > { %504 = vst [vmem:[#allocation2 + $0x340] sm:$0xff] %v7977_v0  ;;  %505 = vst [vmem:[#allocation2 + $0x348] sm:$0xff] %v7977_v0 }
  0xe6   : > { %506 = vst [vmem:[#allocation2 + $0x350] sm:$0xff] %v7977_v0  ;;  %507 = vst [vmem:[#allocation2 + $0x358] sm:$0xff] %v7977_v0 }
  0xe7   : > { %508 = vst [vmem:[#allocation2 + $0x360] sm:$0xff] %v7977_v0  ;;  %509 = vst [vmem:[#allocation2 + $0x368] sm:$0xff] %v7977_v0 }
  0xe8   : > { %510 = vst [vmem:[#allocation2 + $0x370] sm:$0xff] %v7977_v0  ;;  %511 = vst [vmem:[#allocation2 + $0x378] sm:$0xff] %v7977_v0 }
  0xe9   : > { %512 = vst [vmem:[#allocation2 + $0x380] sm:$0xff] %v7977_v0  ;;  %513 = vst [vmem:[#allocation2 + $0x388] sm:$0xff] %v7977_v0 }
  0xea   : > { %514 = vst [vmem:[#allocation2 + $0x390] sm:$0xff] %v7977_v0  ;;  %515 = vst [vmem:[#allocation2 + $0x398] sm:$0xff] %v7977_v0 }
  0xeb   : > { %516 = vst [vmem:[#allocation2 + $0x3a0] sm:$0xff] %v7977_v0  ;;  %517 = vst [vmem:[#allocation2 + $0x3a8] sm:$0xff] %v7977_v0 }
  0xec   : > { %518 = vst [vmem:[#allocation2 + $0x3b0] sm:$0xff] %v7977_v0  ;;  %519 = vst [vmem:[#allocation2 + $0x3b8] sm:$0xff] %v7977_v0 }
  0xed   : > { %520 = vst [vmem:[#allocation2 + $0x3c0] sm:$0xff] %v7977_v0  ;;  %521 = vst [vmem:[#allocation2 + $0x3c8] sm:$0xff] %v7977_v0 }
  0xee   : > { %522 = vst [vmem:[#allocation2 + $0x3d0] sm:$0xff] %v7977_v0  ;;  %523 = vst [vmem:[#allocation2 + $0x3d8] sm:$0xff] %v7977_v0 }
  0xef   : > { %524 = vst [vmem:[#allocation2 + $0x3e0] sm:$0xff] %v7977_v0  ;;  %525 = vst [vmem:[#allocation2 + $0x3e8] sm:$0xff] %v7977_v0 }
  0xf0   : > { %526 = vst [vmem:[#allocation2 + $0x3f0] sm:$0xff] %v7977_v0  ;;  %527 = vst [vmem:[#allocation2 + $0x3f8] sm:$0xff] %v7977_v0 }
  0xf1 PF: > { %v7612_v1 = vld [vmem:[#allocation8 + $0x4] ss:$16 sps:$4 sm:$0xff]   ;;  %v7614_v2 = vld [vmem:[#allocation8 + $0xc] ss:$16 sps:$4 sm:$0xff]   ;;  %v7978_v3 = vmov 0   ;;  %p7031_p12 = scmp.ne.s32.totalorder %s8046_s9, 1 }
  0xf2   : > { %816 = vmatprep.mubr.bf16.mxu0 %v7978_v3  ;;  %929 = vmatprep.mubr.bf16.mxu1 %v7978_v3  ;;  %v7616_v4 = vld [vmem:[#allocation8] ss:$16 sps:$4 sm:$0xff]   ;;  %v7617_v5 = vld [vmem:[#allocation8 + $0x8] ss:$16 sps:$4 sm:$0xff]   ;;  %v7618_v6 = vld [vmem:[#allocation8 + $0x24] ss:$16 sps:$4 sm:$0xff]  }
  0xf3   : > { %784 = vmatprep.subr.bf16.mxu0 %v7612_v1  ;;  %897 = vmatprep.subr.bf16.mxu1 %v7614_v2  ;;  %v7620_v7 = vld [vmem:[#allocation8 + $0x2c] ss:$16 sps:$4 sm:$0xff]   ;;  %v7622_v8 = vld [vmem:[#allocation8 + $0x20] ss:$16 sps:$4 sm:$0xff]   ;;  %v7623_v9 = vld [vmem:[#allocation8 + $0x28] ss:$16 sps:$4 sm:$0xff]  }
  0xf4   : > { %785 = vmatpush1.bf16.msra.mxu0 %v7616_v4  ;;  %898 = vmatpush1.bf16.msra.mxu1 %v7617_v5  ;;  %v7624_v10 = vld [vmem:[#allocation8 + $0x44] ss:$16 sps:$4 sm:$0xff]   ;;  %v7626_v11 = vld [vmem:[#allocation8 + $0x4c] ss:$16 sps:$4 sm:$0xff]   ;;  %v7628_v12 = vld [vmem:[#allocation8 + $0x40] ss:$16 sps:$4 sm:$0xff]  }
  0xf5   : > { %786 = vmatprep.subr.bf16.mxu0 %v7618_v6  ;;  %899 = vmatprep.subr.bf16.mxu1 %v7620_v7  ;;  %v7629_v13 = vld [vmem:[#allocation8 + $0x48] ss:$16 sps:$4 sm:$0xff]   ;;  %v7630_v14 = vld [vmem:[#allocation8 + $0x64] ss:$16 sps:$4 sm:$0xff]   ;;  %v7632_v15 = vld [vmem:[#allocation8 + $0x6c] ss:$16 sps:$4 sm:$0xff]  }
  0xf6   : > { %v7634_v16 = vld [vmem:[#allocation8 + $0x60] ss:$16 sps:$4 sm:$0xff]   ;;  %v7635_v17 = vld [vmem:[#allocation8 + $0x68] ss:$16 sps:$4 sm:$0xff]   ;;  %v7636_v18 = vld [vmem:[#allocation8 + $0x84] ss:$16 sps:$4 sm:$0xff]  }
  0xf7   : > { %v7638_v19 = vld [vmem:[#allocation8 + $0x8c] ss:$16 sps:$4 sm:$0xff]   ;;  %v7640_v20 = vld [vmem:[#allocation8 + $0x80] ss:$16 sps:$4 sm:$0xff]   ;;  %v7641_v21 = vld [vmem:[#allocation8 + $0x88] ss:$16 sps:$4 sm:$0xff]  }
  0xf8   : > { %787 = vmatpush1.bf16.msra.mxu0 %v7622_v8  ;;  %900 = vmatpush1.bf16.msra.mxu1 %v7623_v9  ;;  %v7642_v22 = vld [vmem:[#allocation8 + $0xa4] ss:$16 sps:$4 sm:$0xff]   ;;  %v7644_v23 = vld [vmem:[#allocation8 + $0xac] ss:$16 sps:$4 sm:$0xff]   ;;  %v7646_v24 = vld [vmem:[#allocation8 + $0xa0] ss:$16 sps:$4 sm:$0xff]  }
  0xf9   : > { %788 = vmatprep.subr.bf16.mxu0 %v7624_v10  ;;  %901 = vmatprep.subr.bf16.mxu1 %v7626_v11  ;;  %v7647_v25 = vld [vmem:[#allocation8 + $0xa8] ss:$16 sps:$4 sm:$0xff]   ;;  %v7648_v26 = vld [vmem:[#allocation8 + $0xc4] ss:$16 sps:$4 sm:$0xff]   ;;  %v7650_v27 = vld [vmem:[#allocation8 + $0xcc] ss:$16 sps:$4 sm:$0xff]  }
  0xfa   : > { %v7652_v28 = vld [vmem:[#allocation8 + $0xc0] ss:$16 sps:$4 sm:$0xff]   ;;  %v7653_v29 = vld [vmem:[#allocation8 + $0xc8] ss:$16 sps:$4 sm:$0xff]   ;;  %v7654_v30 = vld [vmem:[#allocation8 + $0xe4] ss:$16 sps:$4 sm:$0xff]  }
  0xfb   : > { %v7656_v31 = vld [vmem:[#allocation8 + $0xec] ss:$16 sps:$4 sm:$0xff]   ;;  %v7658_v32 = vld [vmem:[#allocation8 + $0xe0] ss:$16 sps:$4 sm:$0xff]   ;;  %v7659_v33 = vld [vmem:[#allocation8 + $0xe8] ss:$16 sps:$4 sm:$0xff]  }
  0xfc   : > { %789 = vmatpush1.bf16.msra.mxu0 %v7628_v12  ;;  %902 = vmatpush1.bf16.msra.mxu1 %v7629_v13  ;;  %v7660_v34 = vld [vmem:[%s8249_s17] sm:$0xff]   ;;  %v7661_v35 = vld [vmem:[%s8249_s17 + $0x8] sm:$0xff]   ;;  %v7662_v36 = vld [vmem:[%s8249_s17 + $0x10] sm:$0xff]  }
  0xfd   : > { %790 = vmatprep.subr.bf16.mxu0 %v7630_v14  ;;  %903 = vmatprep.subr.bf16.mxu1 %v7632_v15  ;;  %v7663_v37 = vld [vmem:[%s8249_s17 + $0x18] sm:$0xff]   ;;  %v7664_v38 = vld [vmem:[%s8249_s17 + $0x20] sm:$0xff]   ;;  %v7665_v39 = vld [vmem:[%s8249_s17 + $0x28] sm:$0xff]  }
  0xfe   : > { %v7666_v40 = vld [vmem:[%s8249_s17 + $0x30] sm:$0xff]   ;;  %v7667_v41 = vld [vmem:[%s8249_s17 + $0x38] sm:$0xff]  }
 0x100   : > { %791 = vmatpush1.bf16.msra.mxu0 %v7634_v16  ;;  %904 = vmatpush1.bf16.msra.mxu1 %v7635_v17 }
 0x101   : > { %792 = vmatprep.subr.bf16.mxu0 %v7636_v18  ;;  %905 = vmatprep.subr.bf16.mxu1 %v7638_v19 }
 0x104   : > { %793 = vmatpush1.bf16.msra.mxu0 %v7640_v20  ;;  %906 = vmatpush1.bf16.msra.mxu1 %v7641_v21 }
 0x105   : > { %794 = vmatprep.subr.bf16.mxu0 %v7642_v22  ;;  %907 = vmatprep.subr.bf16.mxu1 %v7644_v23 }
 0x108   : > { %795 = vmatpush1.bf16.msra.mxu0 %v7646_v24  ;;  %908 = vmatpush1.bf16.msra.mxu1 %v7647_v25 }
 0x109   : > { %796 = vmatprep.subr.bf16.mxu0 %v7648_v26  ;;  %909 = vmatprep.subr.bf16.mxu1 %v7650_v27 }
 0x10c   : > { %797 = vmatpush1.bf16.msra.mxu0 %v7652_v28  ;;  %910 = vmatpush1.bf16.msra.mxu1 %v7653_v29 }
 0x10d   : > { %798 = vmatprep.subr.bf16.mxu0 %v7654_v30  ;;  %911 = vmatprep.subr.bf16.mxu1 %v7656_v31 }
 0x110   : > { %799 = vmatpush1.bf16.msra.mxu0 %v7658_v32  ;;  %912 = vmatpush1.bf16.msra.mxu1 %v7659_v33 }
 0x113   : > { %817 = vmatmul.mubr.bf16.vlgmr.msra.gmra.mrb[0].mxu0 %v7660_v34  ;;  %930 = vmatmul.mubr.bf16.vlgmr.msra.gmra.mrb[0].mxu1 %v7660_v34 }
 0x114   : > { %826 = vmatprep.mubr.bf16.mxu0 %v7978_v3  ;;  %939 = vmatprep.mubr.bf16.mxu1 %v7978_v3 }
 0x11b   : > { %827 = vmatmul.mubr.bf16.gmra.mrb[4].mxu0 %v7661_v35  ;;  %940 = vmatmul.mubr.bf16.gmra.mrb[4].mxu1 %v7661_v35 }
 0x11c   : > { %836 = vmatprep.mubr.bf16.mxu0 %v7978_v3  ;;  %949 = vmatprep.mubr.bf16.mxu1 %v7978_v3 }
 0x123   : > { %837 = vmatmul.mubr.bf16.gmra.mrb[8].mxu0 %v7662_v36  ;;  %950 = vmatmul.mubr.bf16.gmra.mrb[8].mxu1 %v7662_v36 }
 0x124   : > { %846 = vmatprep.mubr.bf16.mxu0 %v7978_v3  ;;  %959 = vmatprep.mubr.bf16.mxu1 %v7978_v3 }
 0x12b   : > { %847 = vmatmul.mubr.bf16.gmra.mrb[12].mxu0 %v7663_v37  ;;  %960 = vmatmul.mubr.bf16.gmra.mrb[12].mxu1 %v7663_v37 }
 0x12c   : > { %856 = vmatprep.mubr.bf16.mxu0 %v7978_v3  ;;  %969 = vmatprep.mubr.bf16.mxu1 %v7978_v3 }
 0x133   : > { %857 = vmatmul.mubr.bf16.gmra.mrb[16].mxu0 %v7664_v38  ;;  %970 = vmatmul.mubr.bf16.gmra.mrb[16].mxu1 %v7664_v38 }
 0x134   : > { %866 = vmatprep.mubr.bf16.mxu0 %v7978_v3  ;;  %979 = vmatprep.mubr.bf16.mxu1 %v7978_v3 }
 0x13b   : > { %867 = vmatmul.mubr.bf16.gmra.mrb[20].mxu0 %v7665_v39  ;;  %980 = vmatmul.mubr.bf16.gmra.mrb[20].mxu1 %v7665_v39 }
 0x13c   : > { %876 = vmatprep.mubr.bf16.mxu0 %v7978_v3  ;;  %989 = vmatprep.mubr.bf16.mxu1 %v7978_v3 }
 0x143   : > { %877 = vmatmul.mubr.bf16.gmra.mrb[24].mxu0 %v7666_v40  ;;  %990 = vmatmul.mubr.bf16.gmra.mrb[24].mxu1 %v7666_v40 }
 0x144   : > { %886 = vmatprep.mubr.bf16.mxu0 %v7978_v3  ;;  %999 = vmatprep.mubr.bf16.mxu1 %v7978_v3 }
 0x14b   : > { %887 = vmatmul.mubr.bf16.gmra.mrb[28].mxu0 %v7667_v41  ;;  %1000 = vmatmul.mubr.bf16.gmra.mrb[28].mxu1 %v7667_v41 }
 0x14c   : > { %1330 = vmatprep.mubr.bf16.mxu0 %v7978_v3  ;;  %1523 = vmatprep.mubr.bf16.mxu1 %v7978_v3 }
 0x1e6   : > { %v818_v42 = vpop.f32.mrb[0].mxu0  ;;  %v931_v43 = vpop.f32.mrb[0].mxu1 }
 0x1e7   : > { %v820_v44 = vpop.f32.mrb[1].mxu0  ;;  %v933_v45 = vpop.f32.mrb[1].mxu1 }
 0x1e8   : > { %v822_v46 = vpop.f32.mrb[2].mxu0  ;;  %v935_v47 = vpop.f32.mrb[2].mxu1 }
 0x1e9   : > { %v1170_v48 = vpack.c.bf16 %v822_v46, %v818_v42  ;;  %v1172_v49 = vpack.c.bf16 %v935_v47, %v931_v43  ;;  %v824_v50 = vpop.f32.mrb[3].mxu0  ;;  %v937_v51 = vpop.f32.mrb[3].mxu1 }
 0x1ea   : > { %v1171_v52 = vpack.c.bf16 %v824_v50, %v820_v44  ;;  %v1173_v53 = vpack.c.bf16 %v937_v51, %v933_v45 }
 0x1ec   : > { %1298 = vmatprep.subr.bf16.mxu0 %v1171_v52  ;;  %1491 = vmatprep.subr.bf16.mxu1 %v1173_v53 }
 0x1ed   : > { %1299 = vmatpush1.bf16.msra.mxu0 %v1170_v48  ;;  %1492 = vmatpush1.bf16.msra.mxu1 %v1172_v49 }
 0x1ee   : > { %v828_v54 = vpop.f32.mrb[4].mxu0  ;;  %v941_v55 = vpop.f32.mrb[4].mxu1 }
 0x1ef   : > { %v830_v56 = vpop.f32.mrb[5].mxu0  ;;  %v943_v57 = vpop.f32.mrb[5].mxu1 }
 0x1f0   : > { %v832_v58 = vpop.f32.mrb[6].mxu0  ;;  %v945_v59 = vpop.f32.mrb[6].mxu1 }
 0x1f1   : > { %v1174_v60 = vpack.c.bf16 %v832_v58, %v828_v54  ;;  %v1176_v61 = vpack.c.bf16 %v945_v59, %v941_v55  ;;  %v834_v62 = vpop.f32.mrb[7].mxu0  ;;  %v947_v63 = vpop.f32.mrb[7].mxu1 }
 0x1f2   : > { %v1175_v0 = vpack.c.bf16 %v834_v62, %v830_v56  ;;  %v1177_v1 = vpack.c.bf16 %v947_v63, %v943_v57 }
 0x1f4   : > { %1300 = vmatprep.subr.bf16.mxu0 %v1175_v0  ;;  %1493 = vmatprep.subr.bf16.mxu1 %v1177_v1 }
 0x1f5   : > { %1301 = vmatpush1.bf16.msra.mxu0 %v1174_v60  ;;  %1494 = vmatpush1.bf16.msra.mxu1 %v1176_v61 }
 0x1f6   : > { %v838_v2 = vpop.f32.mrb[8].mxu0  ;;  %v951_v4 = vpop.f32.mrb[8].mxu1 }
 0x1f7   : > { %v840_v5 = vpop.f32.mrb[9].mxu0  ;;  %v953_v6 = vpop.f32.mrb[9].mxu1 }
 0x1f8   : > { %v842_v7 = vpop.f32.mrb[10].mxu0  ;;  %v955_v8 = vpop.f32.mrb[10].mxu1 }
 0x1f9   : > { %v1178_v9 = vpack.c.bf16 %v842_v7, %v838_v2  ;;  %v1180_v10 = vpack.c.bf16 %v955_v8, %v951_v4  ;;  %v844_v11 = vpop.f32.mrb[11].mxu0  ;;  %v957_v12 = vpop.f32.mrb[11].mxu1 }
 0x1fa   : > { %v1179_v13 = vpack.c.bf16 %v844_v11, %v840_v5  ;;  %v1181_v14 = vpack.c.bf16 %v957_v12, %v953_v6  ;;  %v7668_v12 = vld [vmem:[%s8256_s25] sm:$0xff]  }
 0x1fc   : > { %1302 = vmatprep.subr.bf16.mxu0 %v1179_v13  ;;  %1495 = vmatprep.subr.bf16.mxu1 %v1181_v14  ;;  %v7669_v13 = vld [vmem:[%s8256_s25 + $0x8] sm:$0xff]   ;;  %v7670_v14 = vld [vmem:[%s8256_s25 + $0x10] sm:$0xff]  }
 0x1fd   : > { %1303 = vmatpush1.bf16.msra.mxu0 %v1178_v9  ;;  %1496 = vmatpush1.bf16.msra.mxu1 %v1180_v10 }
 0x1fe   : > { %v848_v15 = vpop.f32.mrb[12].mxu0  ;;  %v961_v16 = vpop.f32.mrb[12].mxu1 }
 0x1ff   : > { %v850_v17 = vpop.f32.mrb[13].mxu0  ;;  %v963_v18 = vpop.f32.mrb[13].mxu1 }
 0x200   : > { %v852_v19 = vpop.f32.mrb[14].mxu0  ;;  %v965_v20 = vpop.f32.mrb[14].mxu1 }
 0x201   : > { %v1182_v21 = vpack.c.bf16 %v852_v19, %v848_v15  ;;  %v1184_v22 = vpack.c.bf16 %v965_v20, %v961_v16  ;;  %v854_v23 = vpop.f32.mrb[15].mxu0  ;;  %v967_v24 = vpop.f32.mrb[15].mxu1  ;;  %v7671_v15 = vld [vmem:[%s8256_s25 + $0x18] sm:$0xff]   ;;  %v7672_v16 = vld [vmem:[%s8256_s25 + $0x20] sm:$0xff]  }
 0x202   : > { %v1183_v25 = vpack.c.bf16 %v854_v23, %v850_v17  ;;  %v1185_v26 = vpack.c.bf16 %v967_v24, %v963_v18  ;;  %v7673_v17 = vld [vmem:[%s8256_s25 + $0x28] sm:$0xff]   ;;  %v7674_v18 = vld [vmem:[%s8256_s25 + $0x30] sm:$0xff]   ;;  %v7675_v19 = vld [vmem:[%s8256_s25 + $0x38] sm:$0xff]  }
 0x203   : > { %v7676_v20 = vld [vmem:[%s8256_s25 + $0x40] sm:$0xff]   ;;  %v7679_v23 = vld [vmem:[%s8256_s25 + $0x58] sm:$0xff]  }
 0x204   : > { %1304 = vmatprep.subr.bf16.mxu0 %v1183_v25  ;;  %1497 = vmatprep.subr.bf16.mxu1 %v1185_v26  ;;  %v7680_v24 = vld [vmem:[%s8256_s25 + $0x60] sm:$0xff]   ;;  %v7681_v25 = vld [vmem:[%s8256_s25 + $0x68] sm:$0xff]   ;;  %v7682_v26 = vld [vmem:[%s8256_s25 + $0x70] sm:$0xff]  }
 0x205   : > { %1305 = vmatpush1.bf16.msra.mxu0 %v1182_v21  ;;  %1498 = vmatpush1.bf16.msra.mxu1 %v1184_v22  ;;  %v7677_v21 = vld [vmem:[%s8256_s25 + $0x48] sm:$0xff]   ;;  %v7678_v22 = vld [vmem:[%s8256_s25 + $0x50] sm:$0xff]  }
 0x206   : > { %v858_v27 = vpop.f32.mrb[16].mxu0  ;;  %v971_v28 = vpop.f32.mrb[16].mxu1 }
 0x207   : > { %v860_v29 = vpop.f32.mrb[17].mxu0  ;;  %v973_v30 = vpop.f32.mrb[17].mxu1 }
 0x208   : > { %v862_v31 = vpop.f32.mrb[18].mxu0  ;;  %v975_v32 = vpop.f32.mrb[18].mxu1 }
 0x209   : > { %v1186_v33 = vpack.c.bf16 %v862_v31, %v858_v27  ;;  %v1188_v34 = vpack.c.bf16 %v975_v32, %v971_v28  ;;  %v864_v35 = vpop.f32.mrb[19].mxu0  ;;  %v977_v36 = vpop.f32.mrb[19].mxu1  ;;  %v7683_v27 = vld [vmem:[%s8256_s25 + $0x78] sm:$0xff]   ;;  %v1010_v28 = vld [vmem:[#allocation2] sm:$0xff] }
 0x20a   : > { %v1187_v37 = vpack.c.bf16 %v864_v35, %v860_v29  ;;  %v1189_v38 = vpack.c.bf16 %v977_v36, %v973_v30  ;;  %v1012_v29 = vld [vmem:[#allocation2 + $0x10] sm:$0xff]  ;;  %v1011_v30 = vld [vmem:[#allocation2 + $0x8] sm:$0xff]  ;;  %v1013_v31 = vld [vmem:[#allocation2 + $0x18] sm:$0xff] }
 0x20b   : > { %v1016_v35 = vld [vmem:[#allocation2 + $0x30] sm:$0xff] }
 0x20c   : > { %1306 = vmatprep.subr.bf16.mxu0 %v1187_v37  ;;  %1499 = vmatprep.subr.bf16.mxu1 %v1189_v38 }
 0x20d   : > { %1307 = vmatpush1.bf16.msra.mxu0 %v1186_v33  ;;  %1500 = vmatpush1.bf16.msra.mxu1 %v1188_v34  ;;  %v1014_v34 = vld [vmem:[#allocation2 + $0x20] sm:$0xff] }
 0x20e   : > { %v868_v39 = vpop.f32.mrb[20].mxu0  ;;  %v981_v40 = vpop.f32.mrb[20].mxu1 }
 0x20f   : > { %v870_v41 = vpop.f32.mrb[21].mxu0  ;;  %v983_v42 = vpop.f32.mrb[21].mxu1 }
 0x210   : > { %v872_v43 = vpop.f32.mrb[22].mxu0  ;;  %v985_v44 = vpop.f32.mrb[22].mxu1 }
 0x211   : > { %v1190_v45 = vpack.c.bf16 %v872_v43, %v868_v39  ;;  %v1192_v46 = vpack.c.bf16 %v985_v44, %v981_v40  ;;  %v874_v47 = vpop.f32.mrb[23].mxu0  ;;  %v987_v48 = vpop.f32.mrb[23].mxu1  ;;  %v1015_v40 = vld [vmem:[#allocation2 + $0x28] sm:$0xff] }
 0x212   : > { %v1191_v49 = vpack.c.bf16 %v874_v47, %v870_v41  ;;  %v1193_v50 = vpack.c.bf16 %v987_v48, %v983_v42  ;;  %v1017_v41 = vld [vmem:[#allocation2 + $0x38] sm:$0xff] }
 0x214   : > { %1308 = vmatprep.subr.bf16.mxu0 %v1191_v49  ;;  %1501 = vmatprep.subr.bf16.mxu1 %v1193_v50 }
 0x215   : > { %1309 = vmatpush1.bf16.msra.mxu0 %v1190_v45  ;;  %1502 = vmatpush1.bf16.msra.mxu1 %v1192_v46 }
 0x216   : > { %v878_v51 = vpop.f32.mrb[24].mxu0  ;;  %v991_v52 = vpop.f32.mrb[24].mxu1 }
 0x217   : > { %v880_v53 = vpop.f32.mrb[25].mxu0  ;;  %v993_v54 = vpop.f32.mrb[25].mxu1 }
 0x218   : > { %v882_v55 = vpop.f32.mrb[26].mxu0  ;;  %v995_v56 = vpop.f32.mrb[26].mxu1 }
 0x219   : > { %v1194_v57 = vpack.c.bf16 %v882_v55, %v878_v51  ;;  %v1196_v58 = vpack.c.bf16 %v995_v56, %v991_v52  ;;  %v884_v59 = vpop.f32.mrb[27].mxu0  ;;  %v997_v60 = vpop.f32.mrb[27].mxu1  ;;  %v1018_v51 = vld [vmem:[#allocation2 + $0x40] sm:$0xff]  ;;  %v1020_v52 = vld [vmem:[#allocation2 + $0x50] sm:$0xff] }
 0x21a   : > { %v1195_v61 = vpack.c.bf16 %v884_v59, %v880_v53  ;;  %v1197_v62 = vpack.c.bf16 %v997_v60, %v993_v54  ;;  %v1019_v53 = vld [vmem:[#allocation2 + $0x48] sm:$0xff]  ;;  %v1021_v54 = vld [vmem:[#allocation2 + $0x58] sm:$0xff] }
 0x21c   : > { %1310 = vmatprep.subr.bf16.mxu0 %v1195_v61  ;;  %1503 = vmatprep.subr.bf16.mxu1 %v1197_v62 }
 0x21d   : > { %1311 = vmatpush1.bf16.msra.mxu0 %v1194_v57  ;;  %1504 = vmatpush1.bf16.msra.mxu1 %v1196_v58  ;;  %v1022_v57 = vld [vmem:[#allocation2 + $0x60] sm:$0xff]  ;;  %v1024_v58 = vld [vmem:[#allocation2 + $0x70] sm:$0xff] }
 0x21e   : > { %v888_v63 = vpop.f32.mrb[28].mxu0  ;;  %v1001_v0 = vpop.f32.mrb[28].mxu1 }
 0x21f   : > { %v890_v1 = vpop.f32.mrb[29].mxu0  ;;  %v1003_v2 = vpop.f32.mrb[29].mxu1 }
 0x220   : > { %v892_v4 = vpop.f32.mrb[30].mxu0  ;;  %v1005_v5 = vpop.f32.mrb[30].mxu1 }
 0x221   : > { %v1198_v6 = vpack.c.bf16 %v892_v4, %v888_v63  ;;  %v1200_v7 = vpack.c.bf16 %v1005_v5, %v1001_v0  ;;  %v894_v8 = vpop.f32.mrb[31].mxu0  ;;  %v1007_v9 = vpop.f32.mrb[31].mxu1  ;;  %v1023_v63 = vld [vmem:[#allocation2 + $0x68] sm:$0xff]  ;;  %v1025_v0 = vld [vmem:[#allocation2 + $0x78] sm:$0xff] }
 0x222   : > { %v1199_v10 = vpack.c.bf16 %v894_v8, %v890_v1  ;;  %v1201_v11 = vpack.c.bf16 %v1007_v9, %v1003_v2 }
 0x224   : > { %1312 = vmatprep.subr.bf16.mxu0 %v1199_v10  ;;  %1505 = vmatprep.subr.bf16.mxu1 %v1201_v11 }
 0x225   : > { %1313 = vmatpush1.bf16.msra.mxu0 %v1198_v6  ;;  %1506 = vmatpush1.bf16.msra.mxu1 %v1200_v7 }
 0x228   : > { %1331 = vmatmul.mubr.bf16.vlgmr.msra.gmra.mrb[32].mxu0 %v7668_v12  ;;  %1524 = vmatmul.mubr.bf16.vlgmr.msra.gmra.mrb[32].mxu1 %v7668_v12  ;;  %v1026_v12 = vld [vmem:[#allocation2 + $0x80] sm:$0xff] }
 0x229   : > { %1340 = vmatprep.mubr.bf16.mxu0 %v7978_v3  ;;  %1533 = vmatprep.mubr.bf16.mxu1 %v7978_v3 }
 0x230   : > { %1341 = vmatmul.mubr.bf16.gmra.mrb[36].mxu0 %v7669_v13  ;;  %1534 = vmatmul.mubr.bf16.gmra.mrb[36].mxu1 %v7669_v13  ;;  %v1028_v13 = vld [vmem:[#allocation2 + $0x90] sm:$0xff] }
 0x231   : > { %1350 = vmatprep.mubr.bf16.mxu0 %v7978_v3  ;;  %1543 = vmatprep.mubr.bf16.mxu1 %v7978_v3 }
 0x238   : > { %1351 = vmatmul.mubr.bf16.gmra.mrb[40].mxu0 %v7670_v14  ;;  %1544 = vmatmul.mubr.bf16.gmra.mrb[40].mxu1 %v7670_v14  ;;  %v1027_v14 = vld [vmem:[#allocation2 + $0x88] sm:$0xff] }
 0x239   : > { %1360 = vmatprep.mubr.bf16.mxu0 %v7978_v3  ;;  %1553 = vmatprep.mubr.bf16.mxu1 %v7978_v3 }
 0x240   : > { %1361 = vmatmul.mubr.bf16.gmra.mrb[44].mxu0 %v7671_v15  ;;  %1554 = vmatmul.mubr.bf16.gmra.mrb[44].mxu1 %v7671_v15  ;;  %v1029_v15 = vld [vmem:[#allocation2 + $0x98] sm:$0xff] }
 0x241   : > { %1370 = vmatprep.mubr.bf16.mxu0 %v7978_v3  ;;  %1563 = vmatprep.mubr.bf16.mxu1 %v7978_v3 }
 0x248   : > { %1371 = vmatmul.mubr.bf16.gmra.mrb[48].mxu0 %v7672_v16  ;;  %1564 = vmatmul.mubr.bf16.gmra.mrb[48].mxu1 %v7672_v16 }
 0x249   : > { %1380 = vmatprep.mubr.bf16.mxu0 %v7978_v3  ;;  %1573 = vmatprep.mubr.bf16.mxu1 %v7978_v3 }
 0x250   : > { %1381 = vmatmul.mubr.bf16.gmra.mrb[52].mxu0 %v7673_v17  ;;  %1574 = vmatmul.mubr.bf16.gmra.mrb[52].mxu1 %v7673_v17 }
 0x251   : > { %1390 = vmatprep.mubr.bf16.mxu0 %v7978_v3  ;;  %1583 = vmatprep.mubr.bf16.mxu1 %v7978_v3 }
 0x258   : > { %1391 = vmatmul.mubr.bf16.gmra.mrb[56].mxu0 %v7674_v18  ;;  %1584 = vmatmul.mubr.bf16.gmra.mrb[56].mxu1 %v7674_v18  ;;  %v1030_v18 = vld [vmem:[#allocation2 + $0xa0] sm:$0xff] }
 0x259   : > { %1400 = vmatprep.mubr.bf16.mxu0 %v7978_v3  ;;  %1593 = vmatprep.mubr.bf16.mxu1 %v7978_v3 }
 0x260   : > { %1401 = vmatmul.mubr.bf16.gmra.mrb[60].mxu0 %v7675_v19  ;;  %1594 = vmatmul.mubr.bf16.gmra.mrb[60].mxu1 %v7675_v19  ;;  %v1032_v19 = vld [vmem:[#allocation2 + $0xb0] sm:$0xff] }
 0x261   : > { %1410 = vmatprep.mubr.bf16.mxu0 %v7978_v3  ;;  %1603 = vmatprep.mubr.bf16.mxu1 %v7978_v3 }
 0x268   : > { %1411 = vmatmul.mubr.bf16.gmra.mrb[64].mxu0 %v7676_v20  ;;  %1604 = vmatmul.mubr.bf16.gmra.mrb[64].mxu1 %v7676_v20 }
 0x269   : > { %1420 = vmatprep.mubr.bf16.mxu0 %v7978_v3  ;;  %1613 = vmatprep.mubr.bf16.mxu1 %v7978_v3 }
 0x270   : > { %1421 = vmatmul.mubr.bf16.gmra.mrb[68].mxu0 %v7677_v21  ;;  %1614 = vmatmul.mubr.bf16.gmra.mrb[68].mxu1 %v7677_v21 }
 0x271   : > { %1430 = vmatprep.mubr.bf16.mxu0 %v7978_v3  ;;  %1623 = vmatprep.mubr.bf16.mxu1 %v7978_v3 }
 0x278   : > { %1431 = vmatmul.mubr.bf16.gmra.mrb[72].mxu0 %v7678_v22  ;;  %1624 = vmatmul.mubr.bf16.gmra.mrb[72].mxu1 %v7678_v22 }
 0x279   : > { %1440 = vmatprep.mubr.bf16.mxu0 %v7978_v3  ;;  %1633 = vmatprep.mubr.bf16.mxu1 %v7978_v3 }
 0x280   : > { %1441 = vmatmul.mubr.bf16.gmra.mrb[76].mxu0 %v7679_v23  ;;  %1634 = vmatmul.mubr.bf16.gmra.mrb[76].mxu1 %v7679_v23 }
 0x281   : > { %1450 = vmatprep.mubr.bf16.mxu0 %v7978_v3  ;;  %1643 = vmatprep.mubr.bf16.mxu1 %v7978_v3 }
 0x288   : > { %1451 = vmatmul.mubr.bf16.gmra.mrb[80].mxu0 %v7680_v24  ;;  %1644 = vmatmul.mubr.bf16.gmra.mrb[80].mxu1 %v7680_v24  ;;  %v1031_v24 = vld [vmem:[#allocation2 + $0xa8] sm:$0xff] }
 0x289   : > { %1460 = vmatprep.mubr.bf16.mxu0 %v7978_v3  ;;  %1653 = vmatprep.mubr.bf16.mxu1 %v7978_v3 }
 0x290   : > { %1461 = vmatmul.mubr.bf16.gmra.mrb[84].mxu0 %v7681_v25  ;;  %1654 = vmatmul.mubr.bf16.gmra.mrb[84].mxu1 %v7681_v25  ;;  %v1033_v25 = vld [vmem:[#allocation2 + $0xb8] sm:$0xff] }
 0x291   : > { %1470 = vmatprep.mubr.bf16.mxu0 %v7978_v3  ;;  %1663 = vmatprep.mubr.bf16.mxu1 %v7978_v3 }
 0x298   : > { %1471 = vmatmul.mubr.bf16.gmra.mrb[88].mxu0 %v7682_v26  ;;  %1664 = vmatmul.mubr.bf16.gmra.mrb[88].mxu1 %v7682_v26 }
 0x299   : > { %1480 = vmatprep.mubr.bf16.mxu0 %v7978_v3  ;;  %1673 = vmatprep.mubr.bf16.mxu1 %v7978_v3 }
 0x2a0   : > { %1481 = vmatmul.mubr.bf16.gmra.mrb[92].mxu0 %v7683_v27  ;;  %1674 = vmatmul.mubr.bf16.gmra.mrb[92].mxu1 %v7683_v27 }
 0x2fb   : > { %v1332_v32 = vpop.f32.mrb[32].mxu0  ;;  %v1525_v33 = vpop.f32.mrb[32].mxu1 }
 0x2fc   : > { %v1684_v36 = vadd.f32 %v1332_v32, %v1010_v28  ;;  %v1686_v37 = vadd.f32 %v1525_v33, %v1012_v29  ;;  %v1334_v38 = vpop.f32.mrb[33].mxu0  ;;  %v1527_v39 = vpop.f32.mrb[33].mxu1 }
 0x2fd   : > { %v1685_v42 = vadd.f32 %v1334_v38, %v1011_v30  ;;  %v1687_v43 = vadd.f32 %v1527_v39, %v1013_v31  ;;  %v1336_v3 = vpop.f32.mrb[34].mxu0  ;;  %v1529_v44 = vpop.f32.mrb[34].mxu1  ;;  %v1035_v38 = vld [vmem:[#allocation2 + $0xc8] sm:$0xff]  ;;  %v1037_v39 = vld [vmem:[#allocation2 + $0xd8] sm:$0xff] }
 0x2fe   : > { %1812 = vst [vmem:[#allocation2] sm:$0xff] %v1684_v36  ;;  %1814 = vst [vmem:[#allocation2 + $0x10] sm:$0xff] %v1686_v37  ;;  %v1688_v45 = vadd.f32 %v1336_v3, %v1014_v34  ;;  %v1690_v46 = vadd.f32 %v1529_v44, %v1016_v35  ;;  %v1338_v47 = vpop.f32.mrb[35].mxu0  ;;  %v1531_v48 = vpop.f32.mrb[35].mxu1  ;;  %v1034_v36 = vld [vmem:[#allocation2 + $0xc0] sm:$0xff]  ;;  %v1036_v37 = vld [vmem:[#allocation2 + $0xd0] sm:$0xff] }
 0x2ff   : > { %1813 = vst [vmem:[#allocation2 + $0x8] sm:$0xff] %v1685_v42  ;;  %1815 = vst [vmem:[#allocation2 + $0x18] sm:$0xff] %v1687_v43  ;;  %v1689_v49 = vadd.f32 %v1338_v47, %v1015_v40  ;;  %v1691_v50 = vadd.f32 %v1531_v48, %v1017_v41  ;;  %v1038_v42 = vld [vmem:[#allocation2 + $0xe0] sm:$0xff]  ;;  %v1040_v43 = vld [vmem:[#allocation2 + $0xf0] sm:$0xff] }
 0x300   : > { %1816 = vst [vmem:[#allocation2 + $0x20] sm:$0xff] %v1688_v45  ;;  %1818 = vst [vmem:[#allocation2 + $0x30] sm:$0xff] %v1690_v46  ;;  %v1039_v47 = vld [vmem:[#allocation2 + $0xe8] sm:$0xff]  ;;  %v1041_v48 = vld [vmem:[#allocation2 + $0xf8] sm:$0xff] }
 0x301   : > { %1817 = vst [vmem:[#allocation2 + $0x28] sm:$0xff] %v1689_v49  ;;  %1819 = vst [vmem:[#allocation2 + $0x38] sm:$0xff] %v1691_v50 }
 0x303   : > { %v1342_v55 = vpop.f32.mrb[36].mxu0  ;;  %v1535_v56 = vpop.f32.mrb[36].mxu1 }
 0x304   : > { %v1692_v59 = vadd.f32 %v1342_v55, %v1018_v51  ;;  %v1694_v60 = vadd.f32 %v1535_v56, %v1020_v52  ;;  %v1344_v61 = vpop.f32.mrb[37].mxu0  ;;  %v1537_v62 = vpop.f32.mrb[37].mxu1 }
 0x305   : > { %v1693_v1 = vadd.f32 %v1344_v61, %v1019_v53  ;;  %v1695_v2 = vadd.f32 %v1537_v62, %v1021_v54  ;;  %v1346_v4 = vpop.f32.mrb[38].mxu0  ;;  %v1539_v5 = vpop.f32.mrb[38].mxu1  ;;  %v1043_v61 = vld [vmem:[#allocation2 + $0x108] sm:$0xff]  ;;  %v1045_v62 = vld [vmem:[#allocation2 + $0x118] sm:$0xff] }
 0x306   : > { %1820 = vst [vmem:[#allocation2 + $0x40] sm:$0xff] %v1692_v59  ;;  %1822 = vst [vmem:[#allocation2 + $0x50] sm:$0xff] %v1694_v60  ;;  %v1696_v6 = vadd.f32 %v1346_v4, %v1022_v57  ;;  %v1698_v7 = vadd.f32 %v1539_v5, %v1024_v58  ;;  %v1348_v8 = vpop.f32.mrb[39].mxu0  ;;  %v1541_v9 = vpop.f32.mrb[39].mxu1  ;;  %v1042_v59 = vld [vmem:[#allocation2 + $0x100] sm:$0xff]  ;;  %v1044_v60 = vld [vmem:[#allocation2 + $0x110] sm:$0xff] }
 0x307   : > { %1821 = vst [vmem:[#allocation2 + $0x48] sm:$0xff] %v1693_v1  ;;  %1823 = vst [vmem:[#allocation2 + $0x58] sm:$0xff] %v1695_v2  ;;  %v1697_v10 = vadd.f32 %v1348_v8, %v1023_v63  ;;  %v1699_v11 = vadd.f32 %v1541_v9, %v1025_v0  ;;  %v1046_v1 = vld [vmem:[#allocation2 + $0x120] sm:$0xff]  ;;  %v1048_v2 = vld [vmem:[#allocation2 + $0x130] sm:$0xff] }
 0x308   : > { %1824 = vst [vmem:[#allocation2 + $0x60] sm:$0xff] %v1696_v6  ;;  %1826 = vst [vmem:[#allocation2 + $0x70] sm:$0xff] %v1698_v7  ;;  %v1047_v8 = vld [vmem:[#allocation2 + $0x128] sm:$0xff]  ;;  %v1049_v9 = vld [vmem:[#allocation2 + $0x138] sm:$0xff] }
 0x309   : > { %1825 = vst [vmem:[#allocation2 + $0x68] sm:$0xff] %v1697_v10  ;;  %1827 = vst [vmem:[#allocation2 + $0x78] sm:$0xff] %v1699_v11 }
 0x30b   : > { %v1352_v16 = vpop.f32.mrb[40].mxu0  ;;  %v1545_v17 = vpop.f32.mrb[40].mxu1 }
 0x30c   : > { %v1700_v20 = vadd.f32 %v1352_v16, %v1026_v12  ;;  %v1702_v21 = vadd.f32 %v1545_v17, %v1028_v13  ;;  %v1354_v22 = vpop.f32.mrb[41].mxu0  ;;  %v1547_v23 = vpop.f32.mrb[41].mxu1 }
 0x30d   : > { %v1701_v26 = vadd.f32 %v1354_v22, %v1027_v14  ;;  %v1703_v27 = vadd.f32 %v1547_v23, %v1029_v15  ;;  %v1356_v28 = vpop.f32.mrb[42].mxu0  ;;  %v1549_v29 = vpop.f32.mrb[42].mxu1  ;;  %v1051_v22 = vld [vmem:[#allocation2 + $0x148] sm:$0xff]  ;;  %v1053_v23 = vld [vmem:[#allocation2 + $0x158] sm:$0xff] }
 0x30e   : > { %1828 = vst [vmem:[#allocation2 + $0x80] sm:$0xff] %v1700_v20  ;;  %1830 = vst [vmem:[#allocation2 + $0x90] sm:$0xff] %v1702_v21  ;;  %v1704_v30 = vadd.f32 %v1356_v28, %v1030_v18  ;;  %v1706_v31 = vadd.f32 %v1549_v29, %v1032_v19  ;;  %v1358_v32 = vpop.f32.mrb[43].mxu0  ;;  %v1551_v33 = vpop.f32.mrb[43].mxu1  ;;  %v1050_v20 = vld [vmem:[#allocation2 + $0x140] sm:$0xff]  ;;  %v1052_v21 = vld [vmem:[#allocation2 + $0x150] sm:$0xff] }
 0x30f   : > { %1829 = vst [vmem:[#allocation2 + $0x88] sm:$0xff] %v1701_v26  ;;  %1831 = vst [vmem:[#allocation2 + $0x98] sm:$0xff] %v1703_v27  ;;  %v1705_v34 = vadd.f32 %v1358_v32, %v1031_v24  ;;  %v1707_v35 = vadd.f32 %v1551_v33, %v1033_v25  ;;  %v1054_v26 = vld [vmem:[#allocation2 + $0x160] sm:$0xff]  ;;  %v1056_v27 = vld [vmem:[#allocation2 + $0x170] sm:$0xff] }
 0x310   : > { %1832 = vst [vmem:[#allocation2 + $0xa0] sm:$0xff] %v1704_v30  ;;  %1834 = vst [vmem:[#allocation2 + $0xb0] sm:$0xff] %v1706_v31  ;;  %v1055_v32 = vld [vmem:[#allocation2 + $0x168] sm:$0xff]  ;;  %v1057_v33 = vld [vmem:[#allocation2 + $0x178] sm:$0xff] }
 0x311   : > { %1833 = vst [vmem:[#allocation2 + $0xa8] sm:$0xff] %v1705_v34  ;;  %1835 = vst [vmem:[#allocation2 + $0xb8] sm:$0xff] %v1707_v35 }
 0x313   : > { %v1362_v40 = vpop.f32.mrb[44].mxu0  ;;  %v1555_v41 = vpop.f32.mrb[44].mxu1 }
 0x314   : > { %v1708_v3 = vadd.f32 %v1362_v40, %v1034_v36  ;;  %v1710_v44 = vadd.f32 %v1555_v41, %v1036_v37  ;;  %v1364_v45 = vpop.f32.mrb[45].mxu0  ;;  %v1557_v46 = vpop.f32.mrb[45].mxu1 }
 0x315   : > { %v1709_v49 = vadd.f32 %v1364_v45, %v1035_v38  ;;  %v1711_v50 = vadd.f32 %v1557_v46, %v1037_v39  ;;  %v1366_v51 = vpop.f32.mrb[46].mxu0  ;;  %v1559_v52 = vpop.f32.mrb[46].mxu1  ;;  %v1059_v45 = vld [vmem:[#allocation2 + $0x188] sm:$0xff]  ;;  %v1061_v46 = vld [vmem:[#allocation2 + $0x198] sm:$0xff] }
 0x316   : > { %1836 = vst [vmem:[#allocation2 + $0xc0] sm:$0xff] %v1708_v3  ;;  %1838 = vst [vmem:[#allocation2 + $0xd0] sm:$0xff] %v1710_v44  ;;  %v1712_v53 = vadd.f32 %v1366_v51, %v1038_v42  ;;  %v1714_v54 = vadd.f32 %v1559_v52, %v1040_v43  ;;  %v1368_v55 = vpop.f32.mrb[47].mxu0  ;;  %v1561_v56 = vpop.f32.mrb[47].mxu1  ;;  %v1058_v3 = vld [vmem:[#allocation2 + $0x180] sm:$0xff]  ;;  %v1060_v44 = vld [vmem:[#allocation2 + $0x190] sm:$0xff] }
 0x317   : > { %1837 = vst [vmem:[#allocation2 + $0xc8] sm:$0xff] %v1709_v49  ;;  %1839 = vst [vmem:[#allocation2 + $0xd8] sm:$0xff] %v1711_v50  ;;  %v1713_v57 = vadd.f32 %v1368_v55, %v1039_v47  ;;  %v1715_v58 = vadd.f32 %v1561_v56, %v1041_v48  ;;  %v1062_v49 = vld [vmem:[#allocation2 + $0x1a0] sm:$0xff]  ;;  %v1064_v50 = vld [vmem:[#allocation2 + $0x1b0] sm:$0xff] }
 0x318   : > { %1840 = vst [vmem:[#allocation2 + $0xe0] sm:$0xff] %v1712_v53  ;;  %1842 = vst [vmem:[#allocation2 + $0xf0] sm:$0xff] %v1714_v54  ;;  %v1063_v55 = vld [vmem:[#allocation2 + $0x1a8] sm:$0xff]  ;;  %v1065_v56 = vld [vmem:[#allocation2 + $0x1b8] sm:$0xff] }
 0x319   : > { %1841 = vst [vmem:[#allocation2 + $0xe8] sm:$0xff] %v1713_v57  ;;  %1843 = vst [vmem:[#allocation2 + $0xf8] sm:$0xff] %v1715_v58 }
 0x31b   : > { %v1372_v63 = vpop.f32.mrb[48].mxu0  ;;  %v1565_v0 = vpop.f32.mrb[48].mxu1 }
 0x31c   : > { %v1716_v4 = vadd.f32 %v1372_v63, %v1042_v59  ;;  %v1718_v5 = vadd.f32 %v1565_v0, %v1044_v60  ;;  %v1374_v6 = vpop.f32.mrb[49].mxu0  ;;  %v1567_v7 = vpop.f32.mrb[49].mxu1 }
 0x31d   : > { %v1717_v10 = vadd.f32 %v1374_v6, %v1043_v61  ;;  %v1719_v11 = vadd.f32 %v1567_v7, %v1045_v62  ;;  %v1376_v12 = vpop.f32.mrb[50].mxu0  ;;  %v1569_v13 = vpop.f32.mrb[50].mxu1  ;;  %v1067_v6 = vld [vmem:[#allocation2 + $0x1c8] sm:$0xff]  ;;  %v1069_v7 = vld [vmem:[#allocation2 + $0x1d8] sm:$0xff] }
 0x31e   : > { %1844 = vst [vmem:[#allocation2 + $0x100] sm:$0xff] %v1716_v4  ;;  %1846 = vst [vmem:[#allocation2 + $0x110] sm:$0xff] %v1718_v5  ;;  %v1720_v14 = vadd.f32 %v1376_v12, %v1046_v1  ;;  %v1722_v15 = vadd.f32 %v1569_v13, %v1048_v2  ;;  %v1378_v16 = vpop.f32.mrb[51].mxu0  ;;  %v1571_v17 = vpop.f32.mrb[51].mxu1  ;;  %v1066_v4 = vld [vmem:[#allocation2 + $0x1c0] sm:$0xff]  ;;  %v1068_v5 = vld [vmem:[#allocation2 + $0x1d0] sm:$0xff] }
 0x31f   : > { %1845 = vst [vmem:[#allocation2 + $0x108] sm:$0xff] %v1717_v10  ;;  %1847 = vst [vmem:[#allocation2 + $0x118] sm:$0xff] %v1719_v11  ;;  %v1721_v18 = vadd.f32 %v1378_v16, %v1047_v8  ;;  %v1723_v19 = vadd.f32 %v1571_v17, %v1049_v9  ;;  %v1070_v10 = vld [vmem:[#allocation2 + $0x1e0] sm:$0xff]  ;;  %v1072_v11 = vld [vmem:[#allocation2 + $0x1f0] sm:$0xff] }
 0x320   : > { %1848 = vst [vmem:[#allocation2 + $0x120] sm:$0xff] %v1720_v14  ;;  %1850 = vst [vmem:[#allocation2 + $0x130] sm:$0xff] %v1722_v15  ;;  %v1071_v16 = vld [vmem:[#allocation2 + $0x1e8] sm:$0xff]  ;;  %v1073_v17 = vld [vmem:[#allocation2 + $0x1f8] sm:$0xff] }
 0x321   : > { %1849 = vst [vmem:[#allocation2 + $0x128] sm:$0xff] %v1721_v18  ;;  %1851 = vst [vmem:[#allocation2 + $0x138] sm:$0xff] %v1723_v19 }
 0x323   : > { %v1382_v24 = vpop.f32.mrb[52].mxu0  ;;  %v1575_v25 = vpop.f32.mrb[52].mxu1 }
 0x324   : > { %v1724_v28 = vadd.f32 %v1382_v24, %v1050_v20  ;;  %v1726_v29 = vadd.f32 %v1575_v25, %v1052_v21  ;;  %v1384_v30 = vpop.f32.mrb[53].mxu0  ;;  %v1577_v31 = vpop.f32.mrb[53].mxu1 }
 0x325   : > { %v1725_v34 = vadd.f32 %v1384_v30, %v1051_v22  ;;  %v1727_v35 = vadd.f32 %v1577_v31, %v1053_v23  ;;  %v1386_v36 = vpop.f32.mrb[54].mxu0  ;;  %v1579_v37 = vpop.f32.mrb[54].mxu1  ;;  %v1075_v30 = vld [vmem:[#allocation2 + $0x208] sm:$0xff]  ;;  %v1077_v31 = vld [vmem:[#allocation2 + $0x218] sm:$0xff] }
 0x326   : > { %1852 = vst [vmem:[#allocation2 + $0x140] sm:$0xff] %v1724_v28  ;;  %1854 = vst [vmem:[#allocation2 + $0x150] sm:$0xff] %v1726_v29  ;;  %v1728_v38 = vadd.f32 %v1386_v36, %v1054_v26  ;;  %v1730_v39 = vadd.f32 %v1579_v37, %v1056_v27  ;;  %v1388_v40 = vpop.f32.mrb[55].mxu0  ;;  %v1581_v41 = vpop.f32.mrb[55].mxu1  ;;  %v1074_v28 = vld [vmem:[#allocation2 + $0x200] sm:$0xff]  ;;  %v1076_v29 = vld [vmem:[#allocation2 + $0x210] sm:$0xff] }
 0x327   : > { %1853 = vst [vmem:[#allocation2 + $0x148] sm:$0xff] %v1725_v34  ;;  %1855 = vst [vmem:[#allocation2 + $0x158] sm:$0xff] %v1727_v35  ;;  %v1729_v42 = vadd.f32 %v1388_v40, %v1055_v32  ;;  %v1731_v43 = vadd.f32 %v1581_v41, %v1057_v33  ;;  %v1078_v34 = vld [vmem:[#allocation2 + $0x220] sm:$0xff]  ;;  %v1080_v35 = vld [vmem:[#allocation2 + $0x230] sm:$0xff] }
 0x328   : > { %1856 = vst [vmem:[#allocation2 + $0x160] sm:$0xff] %v1728_v38  ;;  %1858 = vst [vmem:[#allocation2 + $0x170] sm:$0xff] %v1730_v39  ;;  %v1079_v40 = vld [vmem:[#allocation2 + $0x228] sm:$0xff]  ;;  %v1081_v41 = vld [vmem:[#allocation2 + $0x238] sm:$0xff] }
 0x329   : > { %1857 = vst [vmem:[#allocation2 + $0x168] sm:$0xff] %v1729_v42  ;;  %1859 = vst [vmem:[#allocation2 + $0x178] sm:$0xff] %v1731_v43 }
 0x32b   : > { %v1392_v47 = vpop.f32.mrb[56].mxu0  ;;  %v1585_v48 = vpop.f32.mrb[56].mxu1 }
 0x32c   : > { %v1732_v51 = vadd.f32 %v1392_v47, %v1058_v3  ;;  %v1734_v52 = vadd.f32 %v1585_v48, %v1060_v44  ;;  %v1394_v53 = vpop.f32.mrb[57].mxu0  ;;  %v1587_v54 = vpop.f32.mrb[57].mxu1 }
 0x32d   : > { %v1733_v57 = vadd.f32 %v1394_v53, %v1059_v45  ;;  %v1735_v58 = vadd.f32 %v1587_v54, %v1061_v46  ;;  %v1396_v59 = vpop.f32.mrb[58].mxu0  ;;  %v1589_v60 = vpop.f32.mrb[58].mxu1  ;;  %v1083_v53 = vld [vmem:[#allocation2 + $0x248] sm:$0xff]  ;;  %v1085_v54 = vld [vmem:[#allocation2 + $0x258] sm:$0xff] }
 0x32e   : > { %1860 = vst [vmem:[#allocation2 + $0x180] sm:$0xff] %v1732_v51  ;;  %1862 = vst [vmem:[#allocation2 + $0x190] sm:$0xff] %v1734_v52  ;;  %v1736_v61 = vadd.f32 %v1396_v59, %v1062_v49  ;;  %v1738_v62 = vadd.f32 %v1589_v60, %v1064_v50  ;;  %v1398_v63 = vpop.f32.mrb[59].mxu0  ;;  %v1591_v0 = vpop.f32.mrb[59].mxu1  ;;  %v1082_v51 = vld [vmem:[#allocation2 + $0x240] sm:$0xff]  ;;  %v1084_v52 = vld [vmem:[#allocation2 + $0x250] sm:$0xff] }
 0x32f   : > { %1861 = vst [vmem:[#allocation2 + $0x188] sm:$0xff] %v1733_v57  ;;  %1863 = vst [vmem:[#allocation2 + $0x198] sm:$0xff] %v1735_v58  ;;  %v1737_v1 = vadd.f32 %v1398_v63, %v1063_v55  ;;  %v1739_v2 = vadd.f32 %v1591_v0, %v1065_v56  ;;  %v1086_v57 = vld [vmem:[#allocation2 + $0x260] sm:$0xff]  ;;  %v1088_v58 = vld [vmem:[#allocation2 + $0x270] sm:$0xff] }
 0x330   : > { %1864 = vst [vmem:[#allocation2 + $0x1a0] sm:$0xff] %v1736_v61  ;;  %1866 = vst [vmem:[#allocation2 + $0x1b0] sm:$0xff] %v1738_v62  ;;  %v1087_v63 = vld [vmem:[#allocation2 + $0x268] sm:$0xff]  ;;  %v1089_v0 = vld [vmem:[#allocation2 + $0x278] sm:$0xff] }
 0x331   : > { %1865 = vst [vmem:[#allocation2 + $0x1a8] sm:$0xff] %v1737_v1  ;;  %1867 = vst [vmem:[#allocation2 + $0x1b8] sm:$0xff] %v1739_v2 }
 0x333   : > { %v1402_v8 = vpop.f32.mrb[60].mxu0  ;;  %v1595_v9 = vpop.f32.mrb[60].mxu1 }
 0x334   : > { %v1740_v12 = vadd.f32 %v1402_v8, %v1066_v4  ;;  %v1742_v13 = vadd.f32 %v1595_v9, %v1068_v5  ;;  %v1404_v14 = vpop.f32.mrb[61].mxu0  ;;  %v1597_v15 = vpop.f32.mrb[61].mxu1 }
 0x335   : > { %v1741_v18 = vadd.f32 %v1404_v14, %v1067_v6  ;;  %v1743_v19 = vadd.f32 %v1597_v15, %v1069_v7  ;;  %v1406_v20 = vpop.f32.mrb[62].mxu0  ;;  %v1599_v21 = vpop.f32.mrb[62].mxu1  ;;  %v1091_v14 = vld [vmem:[#allocation2 + $0x288] sm:$0xff]  ;;  %v1093_v15 = vld [vmem:[#allocation2 + $0x298] sm:$0xff] }
 0x336   : > { %1868 = vst [vmem:[#allocation2 + $0x1c0] sm:$0xff] %v1740_v12  ;;  %1870 = vst [vmem:[#allocation2 + $0x1d0] sm:$0xff] %v1742_v13  ;;  %v1744_v22 = vadd.f32 %v1406_v20, %v1070_v10  ;;  %v1746_v23 = vadd.f32 %v1599_v21, %v1072_v11  ;;  %v1408_v24 = vpop.f32.mrb[63].mxu0  ;;  %v1601_v25 = vpop.f32.mrb[63].mxu1  ;;  %v1090_v12 = vld [vmem:[#allocation2 + $0x280] sm:$0xff]  ;;  %v1092_v13 = vld [vmem:[#allocation2 + $0x290] sm:$0xff] }
 0x337   : > { %1869 = vst [vmem:[#allocation2 + $0x1c8] sm:$0xff] %v1741_v18  ;;  %1871 = vst [vmem:[#allocation2 + $0x1d8] sm:$0xff] %v1743_v19  ;;  %v1745_v26 = vadd.f32 %v1408_v24, %v1071_v16  ;;  %v1747_v27 = vadd.f32 %v1601_v25, %v1073_v17  ;;  %v1094_v18 = vld [vmem:[#allocation2 + $0x2a0] sm:$0xff]  ;;  %v1096_v19 = vld [vmem:[#allocation2 + $0x2b0] sm:$0xff] }
 0x338   : > { %1872 = vst [vmem:[#allocation2 + $0x1e0] sm:$0xff] %v1744_v22  ;;  %1874 = vst [vmem:[#allocation2 + $0x1f0] sm:$0xff] %v1746_v23  ;;  %v1095_v24 = vld [vmem:[#allocation2 + $0x2a8] sm:$0xff]  ;;  %v1097_v25 = vld [vmem:[#allocation2 + $0x2b8] sm:$0xff] }
 0x339   : > { %1873 = vst [vmem:[#allocation2 + $0x1e8] sm:$0xff] %v1745_v26  ;;  %1875 = vst [vmem:[#allocation2 + $0x1f8] sm:$0xff] %v1747_v27 }
 0x33b   : > { %v1412_v32 = vpop.f32.mrb[64].mxu0  ;;  %v1605_v33 = vpop.f32.mrb[64].mxu1 }
 0x33c   : > { %v1748_v36 = vadd.f32 %v1412_v32, %v1074_v28  ;;  %v1750_v37 = vadd.f32 %v1605_v33, %v1076_v29  ;;  %v1414_v38 = vpop.f32.mrb[65].mxu0  ;;  %v1607_v39 = vpop.f32.mrb[65].mxu1 }
 0x33d   : > { %v1749_v42 = vadd.f32 %v1414_v38, %v1075_v30  ;;  %v1751_v43 = vadd.f32 %v1607_v39, %v1077_v31  ;;  %v1416_v3 = vpop.f32.mrb[66].mxu0  ;;  %v1609_v44 = vpop.f32.mrb[66].mxu1  ;;  %v1099_v38 = vld [vmem:[#allocation2 + $0x2c8] sm:$0xff]  ;;  %v1101_v39 = vld [vmem:[#allocation2 + $0x2d8] sm:$0xff] }
 0x33e   : > { %1876 = vst [vmem:[#allocation2 + $0x200] sm:$0xff] %v1748_v36  ;;  %1878 = vst [vmem:[#allocation2 + $0x210] sm:$0xff] %v1750_v37  ;;  %v1752_v45 = vadd.f32 %v1416_v3, %v1078_v34  ;;  %v1754_v46 = vadd.f32 %v1609_v44, %v1080_v35  ;;  %v1418_v47 = vpop.f32.mrb[67].mxu0  ;;  %v1611_v48 = vpop.f32.mrb[67].mxu1  ;;  %v1098_v36 = vld [vmem:[#allocation2 + $0x2c0] sm:$0xff]  ;;  %v1100_v37 = vld [vmem:[#allocation2 + $0x2d0] sm:$0xff] }
 0x33f   : > { %1877 = vst [vmem:[#allocation2 + $0x208] sm:$0xff] %v1749_v42  ;;  %1879 = vst [vmem:[#allocation2 + $0x218] sm:$0xff] %v1751_v43  ;;  %v1753_v49 = vadd.f32 %v1418_v47, %v1079_v40  ;;  %v1755_v50 = vadd.f32 %v1611_v48, %v1081_v41  ;;  %v1102_v42 = vld [vmem:[#allocation2 + $0x2e0] sm:$0xff]  ;;  %v1104_v43 = vld [vmem:[#allocation2 + $0x2f0] sm:$0xff] }
 0x340   : > { %1880 = vst [vmem:[#allocation2 + $0x220] sm:$0xff] %v1752_v45  ;;  %1882 = vst [vmem:[#allocation2 + $0x230] sm:$0xff] %v1754_v46  ;;  %v1103_v47 = vld [vmem:[#allocation2 + $0x2e8] sm:$0xff]  ;;  %v1105_v48 = vld [vmem:[#allocation2 + $0x2f8] sm:$0xff] }
 0x341   : > { %1881 = vst [vmem:[#allocation2 + $0x228] sm:$0xff] %v1753_v49  ;;  %1883 = vst [vmem:[#allocation2 + $0x238] sm:$0xff] %v1755_v50 }
 0x343   : > { %v1422_v55 = vpop.f32.mrb[68].mxu0  ;;  %v1615_v56 = vpop.f32.mrb[68].mxu1 }
 0x344   : > { %v1756_v59 = vadd.f32 %v1422_v55, %v1082_v51  ;;  %v1758_v60 = vadd.f32 %v1615_v56, %v1084_v52  ;;  %v1424_v61 = vpop.f32.mrb[69].mxu0  ;;  %v1617_v62 = vpop.f32.mrb[69].mxu1 }
 0x345   : > { %v1757_v1 = vadd.f32 %v1424_v61, %v1083_v53  ;;  %v1759_v2 = vadd.f32 %v1617_v62, %v1085_v54  ;;  %v1426_v4 = vpop.f32.mrb[70].mxu0  ;;  %v1619_v5 = vpop.f32.mrb[70].mxu1  ;;  %v1107_v61 = vld [vmem:[#allocation2 + $0x308] sm:$0xff]  ;;  %v1109_v62 = vld [vmem:[#allocation2 + $0x318] sm:$0xff] }
 0x346   : > { %1884 = vst [vmem:[#allocation2 + $0x240] sm:$0xff] %v1756_v59  ;;  %1886 = vst [vmem:[#allocation2 + $0x250] sm:$0xff] %v1758_v60  ;;  %v1760_v6 = vadd.f32 %v1426_v4, %v1086_v57  ;;  %v1762_v7 = vadd.f32 %v1619_v5, %v1088_v58  ;;  %v1428_v8 = vpop.f32.mrb[71].mxu0  ;;  %v1621_v9 = vpop.f32.mrb[71].mxu1  ;;  %v1106_v59 = vld [vmem:[#allocation2 + $0x300] sm:$0xff]  ;;  %v1108_v60 = vld [vmem:[#allocation2 + $0x310] sm:$0xff] }
 0x347   : > { %1885 = vst [vmem:[#allocation2 + $0x248] sm:$0xff] %v1757_v1  ;;  %1887 = vst [vmem:[#allocation2 + $0x258] sm:$0xff] %v1759_v2  ;;  %v1761_v10 = vadd.f32 %v1428_v8, %v1087_v63  ;;  %v1763_v11 = vadd.f32 %v1621_v9, %v1089_v0  ;;  %v1110_v1 = vld [vmem:[#allocation2 + $0x320] sm:$0xff]  ;;  %v1112_v2 = vld [vmem:[#allocation2 + $0x330] sm:$0xff] }
 0x348   : > { %1888 = vst [vmem:[#allocation2 + $0x260] sm:$0xff] %v1760_v6  ;;  %1890 = vst [vmem:[#allocation2 + $0x270] sm:$0xff] %v1762_v7  ;;  %v1111_v8 = vld [vmem:[#allocation2 + $0x328] sm:$0xff]  ;;  %v1113_v9 = vld [vmem:[#allocation2 + $0x338] sm:$0xff] }
 0x349   : > { %1889 = vst [vmem:[#allocation2 + $0x268] sm:$0xff] %v1761_v10  ;;  %1891 = vst [vmem:[#allocation2 + $0x278] sm:$0xff] %v1763_v11 }
 0x34b   : > { %v1432_v16 = vpop.f32.mrb[72].mxu0  ;;  %v1625_v17 = vpop.f32.mrb[72].mxu1 }
 0x34c   : > { %v1764_v20 = vadd.f32 %v1432_v16, %v1090_v12  ;;  %v1766_v21 = vadd.f32 %v1625_v17, %v1092_v13  ;;  %v1434_v22 = vpop.f32.mrb[73].mxu0  ;;  %v1627_v23 = vpop.f32.mrb[73].mxu1 }
 0x34d   : > { %v1765_v26 = vadd.f32 %v1434_v22, %v1091_v14  ;;  %v1767_v27 = vadd.f32 %v1627_v23, %v1093_v15  ;;  %v1436_v28 = vpop.f32.mrb[74].mxu0  ;;  %v1629_v29 = vpop.f32.mrb[74].mxu1  ;;  %v1115_v22 = vld [vmem:[#allocation2 + $0x348] sm:$0xff]  ;;  %v1117_v23 = vld [vmem:[#allocation2 + $0x358] sm:$0xff] }
 0x34e   : > { %1892 = vst [vmem:[#allocation2 + $0x280] sm:$0xff] %v1764_v20  ;;  %1894 = vst [vmem:[#allocation2 + $0x290] sm:$0xff] %v1766_v21  ;;  %v1768_v30 = vadd.f32 %v1436_v28, %v1094_v18  ;;  %v1770_v31 = vadd.f32 %v1629_v29, %v1096_v19  ;;  %v1438_v32 = vpop.f32.mrb[75].mxu0  ;;  %v1631_v33 = vpop.f32.mrb[75].mxu1  ;;  %v1114_v20 = vld [vmem:[#allocation2 + $0x340] sm:$0xff]  ;;  %v1116_v21 = vld [vmem:[#allocation2 + $0x350] sm:$0xff] }
 0x34f   : > { %1893 = vst [vmem:[#allocation2 + $0x288] sm:$0xff] %v1765_v26  ;;  %1895 = vst [vmem:[#allocation2 + $0x298] sm:$0xff] %v1767_v27  ;;  %v1769_v34 = vadd.f32 %v1438_v32, %v1095_v24  ;;  %v1771_v35 = vadd.f32 %v1631_v33, %v1097_v25  ;;  %v1118_v26 = vld [vmem:[#allocation2 + $0x360] sm:$0xff]  ;;  %v1120_v27 = vld [vmem:[#allocation2 + $0x370] sm:$0xff] }
 0x350   : > { %1896 = vst [vmem:[#allocation2 + $0x2a0] sm:$0xff] %v1768_v30  ;;  %1898 = vst [vmem:[#allocation2 + $0x2b0] sm:$0xff] %v1770_v31  ;;  %v1119_v32 = vld [vmem:[#allocation2 + $0x368] sm:$0xff]  ;;  %v1121_v33 = vld [vmem:[#allocation2 + $0x378] sm:$0xff] }
 0x351   : > { %1897 = vst [vmem:[#allocation2 + $0x2a8] sm:$0xff] %v1769_v34  ;;  %1899 = vst [vmem:[#allocation2 + $0x2b8] sm:$0xff] %v1771_v35 }
 0x353   : > { %v1442_v40 = vpop.f32.mrb[76].mxu0  ;;  %v1635_v41 = vpop.f32.mrb[76].mxu1 }
 0x354   : > { %v1772_v3 = vadd.f32 %v1442_v40, %v1098_v36  ;;  %v1774_v44 = vadd.f32 %v1635_v41, %v1100_v37  ;;  %v1444_v45 = vpop.f32.mrb[77].mxu0  ;;  %v1637_v46 = vpop.f32.mrb[77].mxu1 }
 0x355   : > { %v1773_v49 = vadd.f32 %v1444_v45, %v1099_v38  ;;  %v1775_v50 = vadd.f32 %v1637_v46, %v1101_v39  ;;  %v1446_v51 = vpop.f32.mrb[78].mxu0  ;;  %v1639_v52 = vpop.f32.mrb[78].mxu1  ;;  %v1123_v45 = vld [vmem:[#allocation2 + $0x388] sm:$0xff]  ;;  %v1125_v46 = vld [vmem:[#allocation2 + $0x398] sm:$0xff] }
 0x356   : > { %1900 = vst [vmem:[#allocation2 + $0x2c0] sm:$0xff] %v1772_v3  ;;  %1902 = vst [vmem:[#allocation2 + $0x2d0] sm:$0xff] %v1774_v44  ;;  %v1776_v53 = vadd.f32 %v1446_v51, %v1102_v42  ;;  %v1778_v54 = vadd.f32 %v1639_v52, %v1104_v43  ;;  %v1448_v55 = vpop.f32.mrb[79].mxu0  ;;  %v1641_v56 = vpop.f32.mrb[79].mxu1  ;;  %v1122_v3 = vld [vmem:[#allocation2 + $0x380] sm:$0xff]  ;;  %v1124_v44 = vld [vmem:[#allocation2 + $0x390] sm:$0xff] }
 0x357   : > { %1901 = vst [vmem:[#allocation2 + $0x2c8] sm:$0xff] %v1773_v49  ;;  %1903 = vst [vmem:[#allocation2 + $0x2d8] sm:$0xff] %v1775_v50  ;;  %v1777_v57 = vadd.f32 %v1448_v55, %v1103_v47  ;;  %v1779_v58 = vadd.f32 %v1641_v56, %v1105_v48  ;;  %v1126_v49 = vld [vmem:[#allocation2 + $0x3a0] sm:$0xff]  ;;  %v1128_v50 = vld [vmem:[#allocation2 + $0x3b0] sm:$0xff] }
 0x358   : > { %1904 = vst [vmem:[#allocation2 + $0x2e0] sm:$0xff] %v1776_v53  ;;  %1906 = vst [vmem:[#allocation2 + $0x2f0] sm:$0xff] %v1778_v54  ;;  %v1127_v55 = vld [vmem:[#allocation2 + $0x3a8] sm:$0xff]  ;;  %v1129_v56 = vld [vmem:[#allocation2 + $0x3b8] sm:$0xff] }
 0x359   : > { %1905 = vst [vmem:[#allocation2 + $0x2e8] sm:$0xff] %v1777_v57  ;;  %1907 = vst [vmem:[#allocation2 + $0x2f8] sm:$0xff] %v1779_v58 }
 0x35b   : > { %v1452_v63 = vpop.f32.mrb[80].mxu0  ;;  %v1645_v0 = vpop.f32.mrb[80].mxu1 }
 0x35c   : > { %v1780_v4 = vadd.f32 %v1452_v63, %v1106_v59  ;;  %v1782_v5 = vadd.f32 %v1645_v0, %v1108_v60  ;;  %v1454_v6 = vpop.f32.mrb[81].mxu0  ;;  %v1647_v7 = vpop.f32.mrb[81].mxu1 }
 0x35d   : > { %v1781_v10 = vadd.f32 %v1454_v6, %v1107_v61  ;;  %v1783_v11 = vadd.f32 %v1647_v7, %v1109_v62  ;;  %v1456_v12 = vpop.f32.mrb[82].mxu0  ;;  %v1649_v13 = vpop.f32.mrb[82].mxu1  ;;  %v1131_v6 = vld [vmem:[#allocation2 + $0x3c8] sm:$0xff]  ;;  %v1133_v7 = vld [vmem:[#allocation2 + $0x3d8] sm:$0xff] }
 0x35e   : > { %1908 = vst [vmem:[#allocation2 + $0x300] sm:$0xff] %v1780_v4  ;;  %1910 = vst [vmem:[#allocation2 + $0x310] sm:$0xff] %v1782_v5  ;;  %v1784_v14 = vadd.f32 %v1456_v12, %v1110_v1  ;;  %v1786_v15 = vadd.f32 %v1649_v13, %v1112_v2  ;;  %v1458_v16 = vpop.f32.mrb[83].mxu0  ;;  %v1651_v17 = vpop.f32.mrb[83].mxu1  ;;  %v1130_v4 = vld [vmem:[#allocation2 + $0x3c0] sm:$0xff]  ;;  %v1132_v5 = vld [vmem:[#allocation2 + $0x3d0] sm:$0xff] }
 0x35f   : > { %1909 = vst [vmem:[#allocation2 + $0x308] sm:$0xff] %v1781_v10  ;;  %1911 = vst [vmem:[#allocation2 + $0x318] sm:$0xff] %v1783_v11  ;;  %v1785_v18 = vadd.f32 %v1458_v16, %v1111_v8  ;;  %v1787_v19 = vadd.f32 %v1651_v17, %v1113_v9  ;;  %v1134_v10 = vld [vmem:[#allocation2 + $0x3e0] sm:$0xff]  ;;  %v1136_v11 = vld [vmem:[#allocation2 + $0x3f0] sm:$0xff] }
 0x360   : > { %1912 = vst [vmem:[#allocation2 + $0x320] sm:$0xff] %v1784_v14  ;;  %1914 = vst [vmem:[#allocation2 + $0x330] sm:$0xff] %v1786_v15  ;;  %v1135_v16 = vld [vmem:[#allocation2 + $0x3e8] sm:$0xff]  ;;  %v1137_v17 = vld [vmem:[#allocation2 + $0x3f8] sm:$0xff] }
 0x361   : > { %1913 = vst [vmem:[#allocation2 + $0x328] sm:$0xff] %v1785_v18  ;;  %1915 = vst [vmem:[#allocation2 + $0x338] sm:$0xff] %v1787_v19 }
 0x363   : > { %v1462_v24 = vpop.f32.mrb[84].mxu0  ;;  %v1655_v25 = vpop.f32.mrb[84].mxu1 }
 0x364   : > { %v1788_v28 = vadd.f32 %v1462_v24, %v1114_v20  ;;  %v1790_v29 = vadd.f32 %v1655_v25, %v1116_v21  ;;  %v1464_v30 = vpop.f32.mrb[85].mxu0  ;;  %v1657_v31 = vpop.f32.mrb[85].mxu1 }
 0x365   : > { %v1789_v34 = vadd.f32 %v1464_v30, %v1115_v22  ;;  %v1791_v35 = vadd.f32 %v1657_v31, %v1117_v23  ;;  %v1466_v36 = vpop.f32.mrb[86].mxu0  ;;  %v1659_v37 = vpop.f32.mrb[86].mxu1 }
 0x366   : > { %1916 = vst [vmem:[#allocation2 + $0x340] sm:$0xff] %v1788_v28  ;;  %1918 = vst [vmem:[#allocation2 + $0x350] sm:$0xff] %v1790_v29  ;;  %v1792_v38 = vadd.f32 %v1466_v36, %v1118_v26  ;;  %v1794_v39 = vadd.f32 %v1659_v37, %v1120_v27  ;;  %v1468_v40 = vpop.f32.mrb[87].mxu0  ;;  %v1661_v41 = vpop.f32.mrb[87].mxu1 }
 0x367   : > { %1917 = vst [vmem:[#allocation2 + $0x348] sm:$0xff] %v1789_v34  ;;  %1919 = vst [vmem:[#allocation2 + $0x358] sm:$0xff] %v1791_v35  ;;  %v1793_v42 = vadd.f32 %v1468_v40, %v1119_v32  ;;  %v1795_v43 = vadd.f32 %v1661_v41, %v1121_v33 }
 0x368   : > { %1920 = vst [vmem:[#allocation2 + $0x360] sm:$0xff] %v1792_v38  ;;  %1922 = vst [vmem:[#allocation2 + $0x370] sm:$0xff] %v1794_v39 }
 0x369   : > { %1921 = vst [vmem:[#allocation2 + $0x368] sm:$0xff] %v1793_v42  ;;  %1923 = vst [vmem:[#allocation2 + $0x378] sm:$0xff] %v1795_v43 }
 0x36b   : > { %v1472_v47 = vpop.f32.mrb[88].mxu0  ;;  %v1665_v48 = vpop.f32.mrb[88].mxu1 }
 0x36c   : > { %v1796_v51 = vadd.f32 %v1472_v47, %v1122_v3  ;;  %v1798_v52 = vadd.f32 %v1665_v48, %v1124_v44  ;;  %v1474_v53 = vpop.f32.mrb[89].mxu0  ;;  %v1667_v54 = vpop.f32.mrb[89].mxu1 }
 0x36d   : > { %v1797_v57 = vadd.f32 %v1474_v53, %v1123_v45  ;;  %v1799_v58 = vadd.f32 %v1667_v54, %v1125_v46  ;;  %v1476_v59 = vpop.f32.mrb[90].mxu0  ;;  %v1669_v60 = vpop.f32.mrb[90].mxu1 }
 0x36e   : > { %1924 = vst [vmem:[#allocation2 + $0x380] sm:$0xff] %v1796_v51  ;;  %1926 = vst [vmem:[#allocation2 + $0x390] sm:$0xff] %v1798_v52  ;;  %v1800_v61 = vadd.f32 %v1476_v59, %v1126_v49  ;;  %v1802_v62 = vadd.f32 %v1669_v60, %v1128_v50  ;;  %v1478_v63 = vpop.f32.mrb[91].mxu0  ;;  %v1671_v0 = vpop.f32.mrb[91].mxu1 }
 0x36f   : > { %1925 = vst [vmem:[#allocation2 + $0x388] sm:$0xff] %v1797_v57  ;;  %1927 = vst [vmem:[#allocation2 + $0x398] sm:$0xff] %v1799_v58  ;;  %v1801_v1 = vadd.f32 %v1478_v63, %v1127_v55  ;;  %v1803_v2 = vadd.f32 %v1671_v0, %v1129_v56 }
 0x370   : > { %1928 = vst [vmem:[#allocation2 + $0x3a0] sm:$0xff] %v1800_v61  ;;  %1930 = vst [vmem:[#allocation2 + $0x3b0] sm:$0xff] %v1802_v62 }
 0x371   : > { %1929 = vst [vmem:[#allocation2 + $0x3a8] sm:$0xff] %v1801_v1  ;;  %1931 = vst [vmem:[#allocation2 + $0x3b8] sm:$0xff] %v1803_v2 }
 0x373   : > { %v1482_v8 = vpop.f32.mrb[92].mxu0  ;;  %v1675_v9 = vpop.f32.mrb[92].mxu1  ;;  %1943 = sbr.rel (%p7031_p12) target bundleno = 2294 (0x8f6), region = 80 }
 0x374   : > { %v1804_v12 = vadd.f32 %v1482_v8, %v1130_v4  ;;  %v1806_v13 = vadd.f32 %v1675_v9, %v1132_v5  ;;  %v1484_v14 = vpop.f32.mrb[93].mxu0  ;;  %v1677_v15 = vpop.f32.mrb[93].mxu1 }
 0x375   : > { %v1805_v18 = vadd.f32 %v1484_v14, %v1131_v6  ;;  %v1807_v19 = vadd.f32 %v1677_v15, %v1133_v7  ;;  %v1486_v20 = vpop.f32.mrb[94].mxu0  ;;  %v1679_v21 = vpop.f32.mrb[94].mxu1 }
 0x376   : > { %1932 = vst [vmem:[#allocation2 + $0x3c0] sm:$0xff] %v1804_v12  ;;  %1934 = vst [vmem:[#allocation2 + $0x3d0] sm:$0xff] %v1806_v13  ;;  %v1808_v22 = vadd.f32 %v1486_v20, %v1134_v10  ;;  %v1810_v23 = vadd.f32 %v1679_v21, %v1136_v11  ;;  %v1488_v24 = vpop.f32.mrb[95].mxu0  ;;  %v1681_v25 = vpop.f32.mrb[95].mxu1 }
 0x377   : > { %1933 = vst [vmem:[#allocation2 + $0x3c8] sm:$0xff] %v1805_v18  ;;  %1935 = vst [vmem:[#allocation2 + $0x3d8] sm:$0xff] %v1807_v19  ;;  %v1809_v26 = vadd.f32 %v1488_v24, %v1135_v16  ;;  %v1811_v27 = vadd.f32 %v1681_v25, %v1137_v17 }
 0x378   : > { %1936 = vst [vmem:[#allocation2 + $0x3e0] sm:$0xff] %v1808_v22  ;;  %1938 = vst [vmem:[#allocation2 + $0x3f0] sm:$0xff] %v1810_v23 }
 0x379   : > { %1937 = vst [vmem:[#allocation2 + $0x3e8] sm:$0xff] %v1809_v26  ;;  %1939 = vst [vmem:[#allocation2 + $0x3f8] sm:$0xff] %v1811_v27 }
 0x37a   : > { %v7684_v28 = vld [vmem:[#allocation9] sm:$0xff]   ;;  %v7685_v29 = vld [vmem:[#allocation9 + $0x8] sm:$0xff]   ;;  %v7686_v30 = vld [vmem:[#allocation9 + $0x10] sm:$0xff]  }
 0x37b   : > { %7233 = vmatprep.subr.bf16.mxu0 %v7684_v28  ;;  %v7687_v31 = vld [vmem:[#allocation9 + $0x18] sm:$0xff]   ;;  %v7688_v32 = vld [vmem:[#allocation9 + $0x20] sm:$0xff]   ;;  %v7689_v36 = vld [vmem:[#allocation9 + $0x28] sm:$0xff]  }
 0x37c   : > { %7234 = vmatpush3.bf16.msra.mxu0 %v7684_v28  ;;  %v8476_v33 = vld [vmem:[%s15582_s3] ss:$0 sm:$0xff]  ;;  %v7690_v42 = vld [vmem:[#allocation9 + $0x30] sm:$0xff]   ;;  %v7691_v49 = vld [vmem:[#allocation9 + $0x38] sm:$0xff]  }
 0x37d   : > { %7235 = vmatprep.subr.bf16.mxu0 %v7685_v29  ;;  %v1977_v34 = vld [vmem:[#allocation2] sm:$0xff]  ;;  %v3517_v5 = vld [vmem:[#allocation2 + $0x8] sm:$0xff] }
 0x37e   : > { %v1978_v35 = vld [vmem:[#allocation2 + $0x20] sm:$0xff]  ;;  %v8479_v38 = vadd.f32 %v8476_v33, %v1977_v34  ;;  %v3518_v6 = vld [vmem:[#allocation2 + $0x28] sm:$0xff]  ;;  %v8535_v15 = vadd.f32 %v8476_v33, %v3517_v5 }
 0x37f   : > { %v1979_v37 = vld [vmem:[#allocation2 + $0x40] sm:$0xff]  ;;  %v8482_v39 = vadd.f32 %v8476_v33, %v1978_v35  ;;  %v3519_v13 = vld [vmem:[#allocation2 + $0x48] sm:$0xff]  ;;  %v8538_v16 = vadd.f32 %v8476_v33, %v3518_v6 }
 0x380   : > { %7236 = vmatpush3.bf16.msra.mxu0 %v7685_v29  ;;  %v1980_v40 = vld [vmem:[#allocation2 + $0x60] sm:$0xff]  ;;  %v8485_v41 = vadd.f32 %v8476_v33, %v1979_v37  ;;  %v15625_v44 = vmax.f32 %v8479_v38, 0.0  ;;  %v3520_v20 = vld [vmem:[#allocation2 + $0x68] sm:$0xff]  ;;  %v8547_v22 = vadd.f32 %v8476_v33, %v3519_v13  ;;  %v15595_v29 = vmax.f32 %v8535_v15, 0.0 }
 0x381   : > { %7237 = vmatprep.subr.bf16.mxu0 %v7686_v30  ;;  %v1981_v43 = vld [vmem:[#allocation2 + $0x80] sm:$0xff]  ;;  %v8488_v3 = vadd.f32 %v8476_v33, %v1980_v40  ;;  %v15623_v45 = vmax.f32 %v8482_v39, 0.0  ;;  %v3521_v26 = vld [vmem:[#allocation2 + $0x88] sm:$0xff] }
 0x382   : > { %v1982_v46 = vld [vmem:[#allocation2 + $0xa0] sm:$0xff]  ;;  %v8493_v47 = vadd.f32 %v8476_v33, %v1981_v43  ;;  %v15621_v48 = vmax.f32 %v8485_v41, 0.0  ;;  %v3522_v35 = vld [vmem:[#allocation2 + $0xa8] sm:$0xff]  ;;  %v8567_v37 = vadd.f32 %v8476_v33, %v3521_v26  ;;  %v15593_v40 = vmax.f32 %v8547_v22, 0.0 }
 0x383   : > { %v1983_v50 = vld [vmem:[#allocation2 + $0xc0] sm:$0xff]  ;;  %v8497_v52 = vadd.f32 %v8476_v33, %v1982_v46  ;;  %v15619_v53 = vmax.f32 %v8488_v3, 0.0  ;;  %v2079_v54 = vadd.f32 %v15623_v45, %v15625_v44  ;;  %v3536_v44 = vld [vmem:[#allocation2 + $0x268] sm:$0xff] }
 0x384   : > { %7238 = vmatpush3.bf16.msra.mxu0 %v7686_v30  ;;  %v1984_v51 = vld [vmem:[#allocation2 + $0xe0] sm:$0xff]  ;;  %v8505_v55 = vadd.f32 %v8476_v33, %v1983_v50  ;;  %v15617_v57 = vmax.f32 %v8493_v47, 0.0  ;;  %v15594_v30 = vmax.f32 %v8538_v16, 0.0  ;;  %v15592_v6 = vmax.f32 %v8567_v37, 0.0 }
 0x385   : > { %7239 = vmatprep.subr.bf16.mxu0 %v7687_v31  ;;  %v8508_v56 = vadd.f32 %v8476_v33, %v1984_v51  ;;  %v2080_v58 = vadd.f32 %v2079_v54, %v15621_v48  ;;  %v1985_v59 = vld [vmem:[#allocation2 + $0x100] sm:$0xff]  ;;  %v15615_v60 = vmax.f32 %v8497_v52, 0.0  ;;  %v8577_v51 = vadd.f32 %v8476_v33, %v3522_v35  ;;  %v3526_v35 = vld [vmem:[#allocation2 + $0x128] sm:$0xff] }
 0x386   : > { %v1986_v62 = vld [vmem:[#allocation2 + $0x120] sm:$0xff]  ;;  %v8517_v0 = vadd.f32 %v8476_v33, %v1985_v59  ;;  %v15613_v1 = vmax.f32 %v8505_v55, 0.0  ;;  %v3535_v48 = vld [vmem:[#allocation2 + $0x248] sm:$0xff] }
 0x387   : > { %v2081_v61 = vadd.f32 %v2080_v58, %v15619_v53  ;;  %v1987_v63 = vld [vmem:[#allocation2 + $0x140] sm:$0xff]  ;;  %v15611_v2 = vmax.f32 %v8508_v56, 0.0  ;;  %v8524_v8 = vadd.f32 %v8476_v33, %v1986_v62  ;;  %v3619_v58 = vadd.f32 %v15594_v30, %v15595_v29 }
 0x388   : > { %7240 = vmatpush3.bf16.msra.mxu0 %v7687_v31  ;;  %v1988_v7 = vld [vmem:[#allocation2 + $0x160] sm:$0xff]  ;;  %v8529_v10 = vadd.f32 %v8476_v33, %v1987_v63  ;;  %v15609_v11 = vmax.f32 %v8517_v0, 0.0  ;;  %v3524_v63 = vld [vmem:[#allocation2 + $0xe8] sm:$0xff] }
 0x389   : > { %7241 = vmatprep.subr.bf16.mxu0 %v7688_v32  ;;  %v2082_v4 = vadd.f32 %v2081_v61, %v15617_v57  ;;  %v1989_v14 = vld [vmem:[#allocation2 + $0x180] sm:$0xff]  ;;  %v8541_v17 = vadd.f32 %v8476_v33, %v1988_v7  ;;  %v15607_v18 = vmax.f32 %v8524_v8, 0.0  ;;  %v3620_v7 = vadd.f32 %v3619_v58, %v15593_v40  ;;  %v3528_v40 = vld [vmem:[#allocation2 + $0x168] sm:$0xff] }
 0x38a   : > { %v1990_v21 = vld [vmem:[#allocation2 + $0x1a0] sm:$0xff]  ;;  %v8550_v23 = vadd.f32 %v8476_v33, %v1989_v14  ;;  %v15605_v24 = vmax.f32 %v8529_v10, 0.0  ;;  %v3525_v14 = vld [vmem:[#allocation2 + $0x108] sm:$0xff] }
 0x38b   : > { %v2083_v9 = vadd.f32 %v2082_v4, %v15615_v60  ;;  %v1991_v27 = vld [vmem:[#allocation2 + $0x1c0] sm:$0xff]  ;;  %v8561_v31 = vadd.f32 %v8476_v33, %v1990_v21  ;;  %v15596_v21 = vmax.f32 %v8577_v51, 0.0  ;;  %v3534_v57 = vld [vmem:[#allocation2 + $0x228] sm:$0xff] }
 0x38c   : > { %7242 = vmatpush3.bf16.msra.mxu0 %v7688_v32  ;;  %v15603_v32 = vmax.f32 %v8541_v17, 0.0  ;;  %v15601_v43 = vmax.f32 %v8550_v23, 0.0  ;;  %v1993_v50 = vld [vmem:[#allocation2 + $0x200] sm:$0xff] }
 0x38d   : > { %7243 = vmatprep.subr.bf16.mxu0 %v7689_v36  ;;  %v2084_v12 = vadd.f32 %v2083_v9, %v15613_v1  ;;  %v15599_v61 = vmax.f32 %v8561_v31, 0.0  ;;  %v1994_v4 = vld [vmem:[#allocation2 + $0x220] sm:$0xff]  ;;  %v8597_v9 = vadd.f32 %v8476_v33, %v1993_v50  ;;  %v3533_v1 = vld [vmem:[#allocation2 + $0x208] sm:$0xff] }
 0x38e   : > { %v8609_v26 = vadd.f32 %v8476_v33, %v1994_v4  ;;  %v3527_v4 = vld [vmem:[#allocation2 + $0x148] sm:$0xff] }
 0x38f   : > { %v2085_v19 = vadd.f32 %v2084_v12, %v15611_v2  ;;  %v8639_v30 = vadd.f32 %v8476_v33, %v3527_v4 }
 0x390   : > { %7244 = vmatpush3.bf16.msra.mxu0 %v7689_v36  ;;  %v1992_v36 = vld [vmem:[#allocation2 + $0x1e0] sm:$0xff] }
 0x391   : > { %7245 = vmatprep.subr.bf16.mxu0 %v7690_v42  ;;  %v2086_v25 = vadd.f32 %v2085_v19, %v15609_v11  ;;  %v8585_v59 = vadd.f32 %v8476_v33, %v1992_v36  ;;  %v1995_v19 = vld [vmem:[#allocation2 + $0x240] sm:$0xff]  ;;  %16073 = vst [vmem:[#allocation19_spill] sm:$0xff] %v8639_v30  ;;  %v3532_v11 = vld [vmem:[#allocation2 + $0x1e8] sm:$0xff] }
 0x392   : > { %v1996_v36 = vld [vmem:[#allocation2 + $0x260] sm:$0xff]  ;;  %v8621_v58 = vadd.f32 %v8476_v33, %v1995_v19  ;;  %v15606_v19 = vmax.f32 %v8609_v26, 0.0 }
 0x393   : > { %v2087_v34 = vadd.f32 %v2086_v25, %v15607_v18 }
 0x394   : > { %7246 = vmatpush3.bf16.msra.mxu0 %v7690_v42  ;;  %v8571_v42 = vadd.f32 %v8476_v33, %v1991_v27  ;;  %v15598_v27 = vmax.f32 %v8585_v59, 0.0 }
 0x395   : > { %7247 = vmatprep.subr.bf16.mxu0 %v7691_v49  ;;  %v2088_v46 = vadd.f32 %v2087_v34, %v15605_v24  ;;  %v3531_v24 = vld [vmem:[#allocation2 + $0x1c8] sm:$0xff] }
 0x396   : > { %v15597_v12 = vmax.f32 %v8571_v42, 0.0 }
 0x397   : > { %v2089_v62 = vadd.f32 %v2088_v46, %v15603_v32  ;;  %v8615_v46 = vadd.f32 %v8476_v33, %v3525_v14 }
 0x398   : > { %7248 = vmatpush3.bf16.msra.mxu0 %v7691_v49  ;;  %v3523_v49 = vld [vmem:[#allocation2 + $0xc8] sm:$0xff] }
 0x399   : > { %7329 = vmatprep.subr.bf16.mxu0 %v7684_v28  ;;  %v8556_v28 = vadd.f32 %v8476_v33, %v3520_v20  ;;  %v8591_v5 = vadd.f32 %v8476_v33, %v3523_v49  ;;  %v2090_v13 = vadd.f32 %v2089_v62, %v15601_v43  ;;  %v8603_v20 = vadd.f32 %v8476_v33, %v3524_v63  ;;  %v3530_v43 = vld [vmem:[#allocation2 + $0x1a8] sm:$0xff] }
 0x39a   : > { %v15602_v62 = vmax.f32 %v8597_v9, 0.0 }
 0x39b   : > { %v15591_v54 = vmax.f32 %v8556_v28, 0.0  ;;  %v2091_v34 = vadd.f32 %v2090_v13, %v15599_v61  ;;  %v15600_v49 = vmax.f32 %v8591_v5, 0.0  ;;  %v8627_v13 = vadd.f32 %v8476_v33, %v3526_v35 }
 0x39c   : > { %v15604_v14 = vmax.f32 %v8603_v20, 0.0  ;;  %v15608_v35 = vmax.f32 %v8615_v46, 0.0 }
 0x39d   : > { %v3621_v25 = vadd.f32 %v3620_v7, %v15591_v54  ;;  %v2092_v63 = vadd.f32 %v2091_v34, %v15597_v12  ;;  %v1997_v7 = vld [vmem:[#allocation2 + $0x280] sm:$0xff]  ;;  %16072 = vst [vmem:[#allocation18_spill] sm:$0xff] %v8627_v13  ;;  %v3529_v12 = vld [vmem:[#allocation2 + $0x188] sm:$0xff]  ;;  %v15612_v4 = vmax.f32 %v8627_v13, 0.0 }
 0x39e   : > { %v1998_v34 = vld [vmem:[#allocation2 + $0x2a0] sm:$0xff] }
 0x39f   : > { %v3622_v50 = vadd.f32 %v3621_v25, %v15592_v6  ;;  %v8633_v25 = vadd.f32 %v8476_v33, %v1996_v36  ;;  %v2093_v6 = vadd.f32 %v2092_v63, %v15598_v27  ;;  %v15610_v36 = vmax.f32 %v8621_v58, 0.0  ;;  %v1999_v63 = vld [vmem:[#allocation2 + $0x2c0] sm:$0xff] }
 0x3a0   : > { %v8651_v27 = vadd.f32 %v8476_v33, %v3528_v40  ;;  %v15616_v40 = vmax.f32 %v8639_v30, 0.0 }
 0x3a1   : > { %v3623_v54 = vadd.f32 %v3622_v50, %v15596_v21  ;;  %v8645_v50 = vadd.f32 %v8476_v33, %v1997_v7  ;;  %v2094_v21 = vadd.f32 %v2093_v6, %v15602_v62  ;;  %v15614_v7 = vmax.f32 %v8633_v25, 0.0  ;;  %v2000_v6 = vld [vmem:[#allocation2 + $0x2e0] sm:$0xff] }
 0x3a2   : > { %16074 = vst [vmem:[#allocation20_spill] sm:$0xff] %v8651_v27  ;;  %v8663_v62 = vadd.f32 %v8476_v33, %v3529_v12  ;;  %v15620_v12 = vmax.f32 %v8651_v27, 0.0  ;;  %v3545_v27 = vld [vmem:[#allocation2 + $0x388] sm:$0xff] }
 0x3a3   : > { %v3624_v29 = vadd.f32 %v3623_v54, %v15600_v49  ;;  %v8657_v54 = vadd.f32 %v8476_v33, %v1998_v34  ;;  %v2095_v49 = vadd.f32 %v2094_v21, %v15606_v19  ;;  %v15618_v34 = vmax.f32 %v8645_v50, 0.0  ;;  %v2001_v21 = vld [vmem:[#allocation2 + $0x300] sm:$0xff] }
 0x3a4   : > { %16075 = vst [vmem:[#allocation21_spill] sm:$0xff] %v8663_v62  ;;  %v8675_v19 = vadd.f32 %v8476_v33, %v3530_v43  ;;  %v15624_v43 = vmax.f32 %v8663_v62, 0.0 }
 0x3a5   : > { %v3625_v61 = vadd.f32 %v3624_v29, %v15604_v14  ;;  %v8669_v29 = vadd.f32 %v8476_v33, %v1999_v63  ;;  %v2096_v14 = vadd.f32 %v2095_v49, %v15610_v36  ;;  %v15622_v63 = vmax.f32 %v8657_v54, 0.0  ;;  %v2002_v49 = vld [vmem:[#allocation2 + $0x320] sm:$0xff] }
 0x3a6   : > { %16076 = vst [vmem:[#allocation22_spill] sm:$0xff] %v8675_v19  ;;  %v8687_v36 = vadd.f32 %v8476_v33, %v3531_v24  ;;  %v15627_v24 = vmax.f32 %v8675_v19, 0.0  ;;  %v2008_v19 = vld [vmem:[#allocation2 + $0x3e0] sm:$0xff] }
 0x3a7   : > { %v3626_v32 = vadd.f32 %v3625_v61, %v15608_v35  ;;  %v8681_v61 = vadd.f32 %v8476_v33, %v2000_v6  ;;  %v2097_v35 = vadd.f32 %v2096_v14, %v15614_v7  ;;  %v15626_v6 = vmax.f32 %v8669_v29, 0.0  ;;  %v2003_v14 = vld [vmem:[#allocation2 + $0x340] sm:$0xff] }
 0x3a8   : > { %16077 = vst [vmem:[#allocation23_spill] sm:$0xff] %v8687_v36  ;;  %v8699_v7 = vadd.f32 %v8476_v33, %v3532_v11  ;;  %v15630_v11 = vmax.f32 %v8687_v36, 0.0 }
 0x3a9   : > { %v3627_v18 = vadd.f32 %v3626_v32, %v15612_v4  ;;  %v8693_v32 = vadd.f32 %v8476_v33, %v2001_v21  ;;  %v2098_v4 = vadd.f32 %v2097_v35, %v15618_v34  ;;  %v15628_v21 = vmax.f32 %v8681_v61, 0.0  ;;  %v2004_v35 = vld [vmem:[#allocation2 + $0x360] sm:$0xff] }
 0x3aa   : > { %16078 = vst [vmem:[#allocation24_spill] sm:$0xff] %v8699_v7  ;;  %v8711_v34 = vadd.f32 %v8476_v33, %v3533_v1 }
 0x3ab   : > { %v3628_v2 = vadd.f32 %v3627_v18, %v15616_v40  ;;  %v8705_v18 = vadd.f32 %v8476_v33, %v2002_v49  ;;  %v2099_v40 = vadd.f32 %v2098_v4, %v15622_v63  ;;  %v15632_v49 = vmax.f32 %v8693_v32, 0.0  ;;  %v2005_v4 = vld [vmem:[#allocation2 + $0x380] sm:$0xff] }
 0x3ac   : > { %16079 = vst [vmem:[#allocation25_spill] sm:$0xff] %v8711_v34  ;;  %v8723_v63 = vadd.f32 %v8476_v33, %v3534_v57 }
 0x3ad   : > { %v3629_v60 = vadd.f32 %v3628_v2, %v15620_v12  ;;  %v8717_v2 = vadd.f32 %v8476_v33, %v2003_v14  ;;  %v2100_v12 = vadd.f32 %v2099_v40, %v15626_v6  ;;  %v2006_v40 = vld [vmem:[#allocation2 + $0x3a0] sm:$0xff]  ;;  %v8735_v6 = vadd.f32 %v8476_v33, %v3535_v48 }
 0x3ae   : > { %16080 = vst [vmem:[#allocation26_spill] sm:$0xff] %v8723_v63  ;;  %v2007_v14 = vld [vmem:[#allocation2 + $0x3c0] sm:$0xff]  ;;  %v8753_v36 = vadd.f32 %v8476_v33, %v2006_v40 }
 0x3af   : > { %v3630_v53 = vadd.f32 %v3629_v60, %v15624_v43  ;;  %v8729_v60 = vadd.f32 %v8476_v33, %v2004_v35  ;;  %v2101_v43 = vadd.f32 %v2100_v12, %v15628_v21  ;;  %16081 = vst [vmem:[#allocation27_spill] sm:$0xff] %v8735_v6  ;;  %v8747_v12 = vadd.f32 %v8476_v33, %v3536_v44  ;;  %v3537_v35 = vld [vmem:[#allocation2 + $0x288] sm:$0xff] }
 0x3b0   : > { %v16083_v21 = vmax.f32 %v8699_v7, 0.0  ;;  %v16085_v44 = vmax.f32 %v8711_v34, 0.0  ;;  %v8762_v48 = vadd.f32 %v8476_v33, %v2007_v14  ;;  %v16091_v34 = vmax.f32 %v8735_v6, 0.0  ;;  %v3539_v6 = vld [vmem:[#allocation2 + $0x2c8] sm:$0xff] }
 0x3b1   : > { %v3631_v45 = vadd.f32 %v3630_v53, %v15627_v24  ;;  %v8741_v53 = vadd.f32 %v8476_v33, %v2005_v4  ;;  %v2102_v24 = vadd.f32 %v2101_v43, %v15632_v49  ;;  %16082 = vst [vmem:[#allocation28_spill] sm:$0xff] %v8747_v12  ;;  %v16084_v4 = vmax.f32 %v8705_v18, 0.0 }
 0x3b2   : > { %v8774_v43 = vadd.f32 %v8476_v33, %v2008_v19  ;;  %v16090_v14 = vmax.f32 %v8729_v60, 0.0 }
 0x3b3   : > { %v3632_v1 = vadd.f32 %v3631_v45, %v15630_v11  ;;  %v2103_v11 = vadd.f32 %v2102_v24, %v16084_v4  ;;  %v8768_v45 = vadd.f32 %v8476_v33, %v3537_v35  ;;  %v16088_v4 = vmax.f32 %v8723_v63, 0.0 }
 0x3b4   : > { %16089 = vst [vmem:[#allocation30_spill] sm:$0xff] %v8774_v43  ;;  %v15638_v35 = vmax.f32 %v8762_v48, 0.0 }
 0x3b5   : > { %v3633_v57 = vadd.f32 %v3632_v1, %v16083_v21  ;;  %v16086_v1 = vmax.f32 %v8717_v2, 0.0  ;;  %16087 = vst [vmem:[#allocation29_spill] sm:$0xff] %v8768_v45  ;;  %v3538_v21 = vld [vmem:[#allocation2 + $0x2a8] sm:$0xff]  ;;  %v15640_v19 = vmax.f32 %v8768_v45, 0.0 }
 0x3b6   : > { %v8785_v63 = vadd.f32 %v8476_v33, %v3538_v21 }
 0x3b7   : > { %v3634_v49 = vadd.f32 %v3633_v57, %v16085_v44  ;;  %v2104_v40 = vadd.f32 %v2103_v11, %v16086_v1  ;;  %v16092_v1 = vmax.f32 %v8741_v53, 0.0  ;;  %v15641_v57 = vmax.f32 %v8774_v43, 0.0 }
 0x3b8   : > { %v15643_v21 = vmax.f32 %v8785_v63, 0.0 }
 0x3b9   : > { %v3635_v7 = vadd.f32 %v3634_v49, %v16088_v4  ;;  %v2105_v44 = vadd.f32 %v2104_v40, %v16090_v14  ;;  %v16093_v49 = vmax.f32 %v8747_v12, 0.0  ;;  %v16094_v40 = vmax.f32 %v8753_v36, 0.0 }
 0x3bb   : > { %v3636_v11 = vadd.f32 %v3635_v7, %v16091_v34  ;;  %v2106_v24 = vadd.f32 %v2105_v44, %v16092_v1  ;;  %v8796_v34 = vadd.f32 %v8476_v33, %v3539_v6  ;;  %v3540_v1 = vld [vmem:[#allocation2 + $0x2e8] sm:$0xff] }
 0x3bc   : > { %v8804_v12 = vadd.f32 %v8476_v33, %v3540_v1 }
 0x3bd   : > { %v3637_v4 = vadd.f32 %v3636_v11, %v16093_v49  ;;  %v2107_v14 = vadd.f32 %v2106_v24, %v16094_v40  ;;  %v15644_v24 = vmax.f32 %v8796_v34, 0.0 }
 0x3bf   : > { %v2108_v7 = vadd.f32 %v2107_v14, %v15638_v35  ;;  %v3638_v44 = vadd.f32 %v3637_v4, %v15640_v19  ;;  %v3541_v14 = vld [vmem:[#allocation2 + $0x308] sm:$0xff]  ;;  %v15645_v4 = vmax.f32 %v8804_v12, 0.0 }
 0x3c0   : > { %v8810_v62 = vadd.f32 %v8476_v33, %v3541_v14 }
 0x3c1   : > { %v2109_v11 = vadd.f32 %v2108_v7, %v15641_v57  ;;  %v3639_v40 = vadd.f32 %v3638_v44, %v15643_v21  ;;  %v3542_v57 = vld [vmem:[#allocation2 + $0x328] sm:$0xff] }
 0x3c2   : > { %v8816_v1 = vadd.f32 %v8476_v33, %v3542_v57  ;;  %v15649_v45 = vmax.f32 %v8810_v62, 0.0 }
 0x3c3   : > { %v2110_v49 = vrot.slane %v2109_v11, 4  ;;  %v3640_v7 = vadd.f32 %v3639_v40, %v15644_v24 }
 0x3c4   : > { %v15648_v21 = vmax.f32 %v8816_v1, 0.0 }
 0x3c5   : > { %v2111_v6 = vadd.f32 %v2110_v49, %v2109_v11  ;;  %v3641_v44 = vadd.f32 %v3640_v7, %v15645_v4  ;;  %v3543_v49 = vld [vmem:[#allocation2 + $0x348] sm:$0xff] }
 0x3c6   : > { %v8822_v14 = vadd.f32 %v8476_v33, %v3543_v49  ;;  %v8836_v49 = vadd.f32 %v8476_v33, %v3545_v27  ;;  %v16099_v27 = vmax.f32 %v8485_v41, 0.0 }
 0x3c7   : > { %v2112_v35 = vrot.slane %v2111_v6, 2  ;;  %v3642_v40 = vadd.f32 %v3641_v44, %v15649_v45  ;;  %v16095_v44 = vmax.f32 %v8479_v38, 0.0 }
 0x3c8   : > { %v15650_v24 = vmax.f32 %v8822_v14, 0.0 }
 0x3c9   : > { %v2113_v19 = vadd.f32 %v2112_v35, %v2111_v6  ;;  %v3544_v6 = vld [vmem:[#allocation2 + $0x368] sm:$0xff]  ;;  %v3643_v7 = vadd.f32 %v3642_v40, %v15648_v21 }
 0x3ca   : > { %v8828_v57 = vadd.f32 %v8476_v33, %v3544_v6  ;;  %v16097_v6 = vmax.f32 %v8482_v39, 0.0 }
 0x3cb   : > { %v2114_v11 = vrot.slane %v2113_v19, 1 }
 0x3cc   : > { %v15651_v30 = vmax.f32 %v8828_v57, 0.0 }
 0x3cd   : > { %v2115_v35 = vadd.f32 %v2114_v11, %v2113_v19  ;;  %v3644_v19 = vadd.f32 %v3643_v7, %v15650_v24  ;;  %v15657_v7 = vmax.f32 %v8836_v49, 0.0 }
 0x3cf   : > { %v8833_v4 = vmul.f32 0.00390625, %v2115_v35  ;;  %v3546_v35 = vld [vmem:[#allocation2 + $0x3a8] sm:$0xff]  ;;  %v3645_v38 = vadd.f32 %v3644_v19, %v15651_v30 }
 0x3d0   : > { %v8857_v45 = vadd.f32 %v8476_v33, %v3546_v35  ;;  %v16102_v35 = vmax.f32 %v8493_v47, 0.0  ;;  %v3548_v30 = vld [vmem:[#allocation2 + $0x3e8] sm:$0xff] }
 0x3d1   : > { %v8844_v11 = vsub.f32 %v16095_v44, %v8833_v4  ;;  %v8849_v40 = vsub.f32 %v16097_v6, %v8833_v4  ;;  %v8854_v21 = vsub.f32 %v16099_v27, %v8833_v4  ;;  %v16101_v44 = vmax.f32 %v8488_v3, 0.0  ;;  %v3547_v27 = vld [vmem:[#allocation2 + $0x3c8] sm:$0xff] }
 0x3d2   : > { %v8874_v24 = vsub.f32 %v16102_v35, %v8833_v4  ;;  %v8879_v3 = vadd.f32 %v8476_v33, %v3547_v27  ;;  %v16104_v27 = vmax.f32 %v8505_v55, 0.0 }
 0x3d3   : > { %16096 = vst [vmem:[#allocation31_spill] sm:$0xff] %v8844_v11  ;;  %16098 = vst [vmem:[#allocation32_spill] sm:$0xff] %v8849_v40  ;;  %v8865_v39 = vsub.f32 %v16101_v44, %v8833_v4  ;;  %v2150_v6 = vmul.f32 %v8844_v11, %v8844_v11  ;;  %v2151_v41 = vmul.f32 %v8849_v40, %v8849_v40  ;;  %v15658_v44 = vmax.f32 %v8857_v45, 0.0 }
 0x3d4   : > { %16100 = vst [vmem:[#allocation33_spill] sm:$0xff] %v8854_v21  ;;  %v2152_v19 = vmul.f32 %v8854_v21, %v8854_v21  ;;  %v3646_v11 = vadd.f32 %v3645_v38, %v15657_v7  ;;  %v16103_v40 = vmax.f32 %v8497_v52, 0.0  ;;  %v8892_v21 = vadd.f32 %v8476_v33, %v3548_v30 }
 0x3d5   : > { %v2153_v47 = vmul.f32 %v8865_v39, %v8865_v39  ;;  %v2182_v35 = vadd.f32 %v2151_v41, %v2150_v6  ;;  %v8897_v13 = vsub.f32 %v16104_v27, %v8833_v4  ;;  %v2154_v38 = vmul.f32 %v8874_v24, %v8874_v24 }
 0x3d6   : > { %v8887_v43 = vsub.f32 %v16103_v40, %v8833_v4  ;;  %v15659_v52 = vmax.f32 %v8879_v3, 0.0  ;;  %v3647_v40 = vadd.f32 %v3646_v11, %v15658_v44  ;;  %v16105_v6 = vmax.f32 %v8508_v56, 0.0 }
 0x3d7   : > { %v2183_v7 = vadd.f32 %v2182_v35, %v2152_v19  ;;  %v3616_v30 = vmax.f32 %v8892_v21, 0.0  ;;  %v16106_v27 = vmax.f32 %v8517_v0, 0.0  ;;  %v2156_v35 = vmul.f32 %v8897_v13, %v8897_v13 }
 0x3d8   : > { %v8907_v41 = vsub.f32 %v16105_v6, %v8833_v4  ;;  %v2155_v33 = vmul.f32 %v8887_v43, %v8887_v43  ;;  %v3648_v56 = vadd.f32 %v3647_v40, %v15659_v52  ;;  %v16107_v6 = vmax.f32 %v8524_v8, 0.0 }
 0x3d9   : > { %v2184_v55 = vadd.f32 %v2183_v7, %v2153_v47  ;;  %v8915_v19 = vsub.f32 %v16106_v27, %v8833_v4  ;;  %v16109_v0 = vmax.f32 %v8529_v10, 0.0  ;;  %v16110_v8 = vmax.f32 %v8541_v17, 0.0 }
 0x3da   : > { %v8924_v44 = vsub.f32 %v16107_v6, %v8833_v4  ;;  %v2157_v21 = vmul.f32 %v8907_v41, %v8907_v41  ;;  %v3649_v47 = vadd.f32 %v3648_v56, %v3616_v30  ;;  %v16111_v10 = vmax.f32 %v8550_v23, 0.0 }
 0x3db   : > { %v2185_v11 = vadd.f32 %v2184_v55, %v2154_v38  ;;  %v8931_v27 = vsub.f32 %v16109_v0, %v8833_v4  ;;  %v2158_v38 = vmul.f32 %v8915_v19, %v8915_v19  ;;  %v8938_v6 = vsub.f32 %v16110_v8, %v8833_v4 }
 0x3dc   : > { %16108 = vst [vmem:[#allocation34_spill] sm:$0xff] %v8924_v44  ;;  %v3650_v40 = vrot.slane %v3649_v47, 4  ;;  %v2159_v52 = vmul.f32 %v8924_v44, %v8924_v44  ;;  %v8945_v56 = vsub.f32 %v16111_v10, %v8833_v4  ;;  %v16112_v17 = vmax.f32 %v8561_v31, 0.0 }
 0x3dd   : > { %v2186_v7 = vadd.f32 %v2185_v11, %v2155_v33  ;;  %v2160_v0 = vmul.f32 %v8931_v27, %v8931_v27  ;;  %v2161_v44 = vmul.f32 %v8938_v6, %v8938_v6  ;;  %v16113_v23 = vmax.f32 %v8571_v42, 0.0 }
 0x3de   : > { %v3651_v11 = vadd.f32 %v3650_v40, %v3649_v47  ;;  %v8952_v8 = vsub.f32 %v16112_v17, %v8833_v4  ;;  %v2162_v40 = vmul.f32 %v8945_v56, %v8945_v56 }
 0x3df   : > { %v2187_v55 = vadd.f32 %v2186_v7, %v2156_v35 }
 0x3e0   : > { %v3652_v7 = vrot.slane %v3651_v11, 2  ;;  %v2163_v10 = vmul.f32 %v8952_v8, %v8952_v8 }
 0x3e1   : > { %v2188_v33 = vadd.f32 %v2187_v55, %v2157_v21  ;;  %v8959_v55 = vsub.f32 %v16113_v23, %v8833_v4 }
 0x3e2   : > { %v3653_v47 = vadd.f32 %v3652_v7, %v3651_v11  ;;  %v16115_v11 = vmax.f32 %v8597_v9, 0.0 }
 0x3e3   : > { %v2189_v35 = vadd.f32 %v2188_v33, %v2158_v38  ;;  %v16114_v33 = vmax.f32 %v8585_v59, 0.0 }
 0x3e4   : > { %v8973_v42 = vsub.f32 %v16115_v11, %v8833_v4 }
 0x3e5   : > { %v2190_v21 = vadd.f32 %v2189_v35, %v2159_v52  ;;  %v8966_v31 = vsub.f32 %v16114_v33, %v8833_v4  ;;  %v3654_v52 = vrot.slane %v3653_v47, 1  ;;  %v2164_v35 = vmul.f32 %v8959_v55, %v8959_v55 }
 0x3e6   : > { %v16118_v33 = vmax.f32 %v8633_v25, 0.0  ;;  %v16120_v25 = vmax.f32 %v8657_v54, 0.0  ;;  %v16125_v54 = vmax.f32 %v8804_v12, 0.0  ;;  %v16132_v12 = vmax.f32 %v8828_v57, 0.0 }
 0x3e7   : > { %v2191_v38 = vadd.f32 %v2190_v21, %v2160_v0  ;;  %v16116_v0 = vmax.f32 %v8609_v26, 0.0  ;;  %v2165_v21 = vmul.f32 %v8966_v31, %v8966_v31  ;;  %v2166_v26 = vmul.f32 %v8973_v42, %v8973_v42 }
 0x3e8   : > { %v8992_v11 = vsub.f32 %v16118_v33, %v8833_v4  ;;  %v16136_v57 = vmax.f32 %v8669_v29, 0.0 }
 0x3e9   : > { %v2192_v17 = vadd.f32 %v2191_v38, %v2161_v44  ;;  %v8980_v59 = vsub.f32 %v16116_v0, %v8833_v4  ;;  %v3655_v44 = vadd.f32 %v3654_v52, %v3653_v47  ;;  %v16117_v38 = vmax.f32 %v8621_v58, 0.0 }
 0x3ea   : > { %v16119_v47 = vmax.f32 %v8645_v50, 0.0  ;;  %v9008_v52 = vsub.f32 %v16120_v25, %v8833_v4 }
 0x3eb   : > { %v2193_v7 = vadd.f32 %v2192_v17, %v2162_v40  ;;  %v8987_v9 = vsub.f32 %v16117_v38, %v8833_v4  ;;  %v2167_v17 = vmul.f32 %v8980_v59, %v8980_v59  ;;  %v9003_v58 = vmul.f32 0.00390625, %v3655_v44 }
 0x3ec   : > { %v16123_v44 = vmax.f32 %v8796_v34, 0.0  ;;  %v16131_v34 = vmax.f32 %v8822_v14, 0.0  ;;  %v16135_v14 = vmax.f32 %v8879_v3, 0.0  ;;  %v16138_v3 = vmax.f32 %v8538_v16, 0.0 }
 0x3ed   : > { %v2194_v23 = vadd.f32 %v2193_v7, %v2163_v10  ;;  %v9001_v10 = vsub.f32 %v16119_v47, %v8833_v4  ;;  %v2168_v7 = vmul.f32 %v8987_v9, %v8987_v9  ;;  %v9027_v33 = vsub.f32 %v16125_v54, %v9003_v58 }
 0x3ee   : > { %v9022_v38 = vsub.f32 %v16123_v44, %v9003_v58  ;;  %v9042_v25 = vsub.f32 %v16131_v34, %v9003_v58  ;;  %v9065_v54 = vsub.f32 %v3616_v30, %v9003_v58  ;;  %v16139_v30 = vmax.f32 %v8681_v61, 0.0 }
 0x3ef   : > { %v2195_v40 = vadd.f32 %v2194_v23, %v2164_v35  ;;  %v2169_v35 = vmul.f32 %v8992_v11, %v8992_v11  ;;  %16126 = vst [vmem:[#allocation37_spill] sm:$0xff] %v9027_v33 }
 0x3f0   : > { %16124 = vst [vmem:[#allocation36_spill] sm:$0xff] %v9022_v38  ;;  %v9087_v29 = vsub.f32 %v16139_v30, %v8833_v4 }
 0x3f1   : > { %v2196_v0 = vadd.f32 %v2195_v40, %v2165_v21  ;;  %v16121_v21 = vmax.f32 %v8785_v63, 0.0  ;;  %v16127_v40 = vmax.f32 %v8810_v62, 0.0  ;;  %v16129_v63 = vmax.f32 %v8816_v1, 0.0 }
 0x3f2   : > { %v16133_v62 = vmax.f32 %v8836_v49, 0.0  ;;  %v16134_v1 = vmax.f32 %v8857_v45, 0.0  ;;  %v2170_v49 = vmul.f32 %v9001_v10, %v9001_v10  ;;  %v16137_v45 = vmax.f32 %v8535_v15, 0.0 }
 0x3f3   : > { %v2197_v23 = vadd.f32 %v2196_v0, %v2166_v26  ;;  %v9017_v50 = vsub.f32 %v16121_v21, %v9003_v58  ;;  %v9032_v47 = vsub.f32 %v16127_v40, %v9003_v58  ;;  %v9037_v0 = vsub.f32 %v16129_v63, %v9003_v58 }
 0x3f4   : > { %v9047_v21 = vsub.f32 %v16132_v12, %v9003_v58  ;;  %v9052_v44 = vsub.f32 %v16133_v62, %v9003_v58  ;;  %v9070_v40 = vsub.f32 %v16136_v57, %v8833_v4  ;;  %v9077_v34 = vsub.f32 %v16137_v45, %v9003_v58 }
 0x3f5   : > { %16122 = vst [vmem:[#allocation35_spill] sm:$0xff] %v9017_v50  ;;  %16128 = vst [vmem:[#allocation38_spill] sm:$0xff] %v9032_v47  ;;  %v2198_v26 = vadd.f32 %v2197_v23, %v2167_v17  ;;  %v9057_v17 = vsub.f32 %v16134_v1, %v9003_v58  ;;  %v9062_v23 = vsub.f32 %v16135_v14, %v9003_v58  ;;  %v16143_v57 = vmax.f32 %v8556_v28, 0.0 }
 0x3f6   : > { %16130 = vst [vmem:[#allocation39_spill] sm:$0xff] %v9037_v0  ;;  %v9082_v12 = vsub.f32 %v16138_v3, %v9003_v58  ;;  %v2171_v62 = vmul.f32 %v9008_v52, %v9008_v52  ;;  %v2172_v14 = vmul.f32 %v9070_v40, %v9070_v40  ;;  %v2173_v3 = vmul.f32 %v9087_v29, %v9087_v29 }
 0x3f7   : > { %v2199_v63 = vadd.f32 %v2198_v26, %v2168_v7  ;;  %v16140_v7 = vmax.f32 %v8547_v22, 0.0  ;;  %v16142_v26 = vmax.f32 %v8693_v32, 0.0  ;;  %v9106_v45 = vsub.f32 %v16143_v57, %v9003_v58 }
 0x3f8   : > { %v3690_v22 = vmul.f32 %v9082_v12, %v9082_v12  ;;  %v16145_v32 = vmax.f32 %v8705_v18, 0.0  ;;  %v16146_v28 = vmax.f32 %v8567_v37, 0.0 }
 0x3f9   : > { %v2200_v1 = vadd.f32 %v2199_v63, %v2169_v35  ;;  %v9094_v15 = vsub.f32 %v16140_v7, %v9003_v58  ;;  %v9099_v16 = vsub.f32 %v16142_v26, %v8833_v4  ;;  %16144 = vst [vmem:[#allocation41_spill] sm:$0xff] %v9106_v45  ;;  %v3689_v35 = vmul.f32 %v9077_v34, %v9077_v34 }
 0x3fa   : > { %v9115_v63 = vsub.f32 %v16145_v32, %v8833_v4  ;;  %v9122_v30 = vsub.f32 %v16146_v28, %v9003_v58  ;;  %v16148_v7 = vmax.f32 %v8717_v2, 0.0  ;;  %v3692_v37 = vmul.f32 %v9106_v45, %v9106_v45 }
 0x3fb   : > { %16141 = vst [vmem:[#allocation40_spill] sm:$0xff] %v9094_v15  ;;  %v2201_v61 = vadd.f32 %v2200_v1, %v2170_v49  ;;  %v3691_v1 = vmul.f32 %v9094_v15, %v9094_v15  ;;  %v2174_v18 = vmul.f32 %v9099_v16, %v9099_v16  ;;  %v3721_v32 = vadd.f32 %v3690_v22, %v3689_v35 }
 0x3fc   : > { %16147 = vst [vmem:[#allocation42_spill] sm:$0xff] %v9122_v30  ;;  %v9129_v26 = vsub.f32 %v16148_v7, %v8833_v4  ;;  %v16151_v28 = vmax.f32 %v8729_v60, 0.0  ;;  %v2175_v2 = vmul.f32 %v9115_v63, %v9115_v63  ;;  %v16154_v35 = vmax.f32 %v8741_v53, 0.0 }
 0x3fd   : > { %v2202_v49 = vadd.f32 %v2201_v61, %v2171_v62  ;;  %v16149_v62 = vmax.f32 %v8577_v51, 0.0  ;;  %v3693_v51 = vmul.f32 %v9122_v30, %v9122_v30 }
 0x3fe   : > { %v9143_v15 = vsub.f32 %v16151_v28, %v8833_v4  ;;  %v9157_v22 = vsub.f32 %v16154_v35, %v8833_v4  ;;  %v2176_v60 = vmul.f32 %v9129_v26, %v9129_v26 }
 0x3ff   : > { %v2203_v57 = vadd.f32 %v2202_v49, %v2172_v14  ;;  %v9136_v61 = vsub.f32 %v16149_v62, %v9003_v58  ;;  %v16152_v14 = vmax.f32 %v8591_v5, 0.0  ;;  %v3722_v62 = vadd.f32 %v3721_v32, %v3691_v1 }
 0x400   : > { %v16157_v1 = vmax.f32 %v8753_v36, 0.0  ;;  %v2177_v53 = vmul.f32 %v9143_v15, %v9143_v15  ;;  %v2178_v36 = vmul.f32 %v9157_v22, %v9157_v22 }
 0x401   : > { %16150 = vst [vmem:[#allocation43_spill] sm:$0xff] %v9136_v61  ;;  %v2204_v7 = vadd.f32 %v2203_v57, %v2173_v3  ;;  %v9150_v49 = vsub.f32 %v16152_v14, %v9003_v58  ;;  %v16155_v3 = vmax.f32 %v8603_v20, 0.0  ;;  %v3694_v5 = vmul.f32 %v9136_v61, %v9136_v61 }
 0x402   : > { %v3723_v14 = vadd.f32 %v3722_v62, %v3692_v37  ;;  %v9171_v32 = vsub.f32 %v16157_v1, %v8833_v4  ;;  %v16160_v37 = vmax.f32 %v8762_v48, 0.0 }
 0x403   : > { %16153 = vst [vmem:[#allocation44_spill] sm:$0xff] %v9150_v49  ;;  %v2205_v28 = vadd.f32 %v2204_v7, %v2174_v18  ;;  %v9164_v57 = vsub.f32 %v16155_v3, %v9003_v58  ;;  %v16158_v18 = vmax.f32 %v8615_v46, 0.0  ;;  %v3695_v20 = vmul.f32 %v9150_v49, %v9150_v49 }
 0x404   : > { %v3724_v3 = vadd.f32 %v3723_v14, %v3693_v51  ;;  %v9185_v62 = vsub.f32 %v16160_v37, %v8833_v4  ;;  %v16163_v51 = vld [vmem:[#allocation30_spill] sm:$0xff]  ;;  %v2179_v48 = vmul.f32 %v9171_v32, %v9171_v32 }
 0x405   : > { %16156 = vst [vmem:[#allocation45_spill] sm:$0xff] %v9164_v57  ;;  %v2206_v35 = vadd.f32 %v2205_v28, %v2175_v2  ;;  %v9178_v7 = vsub.f32 %v16158_v18, %v9003_v58  ;;  %v16161_v2 = vld [vmem:[#allocation18_spill] sm:$0xff]  ;;  %v3696_v46 = vmul.f32 %v9164_v57, %v9164_v57  ;;  %v16164_v14 = vmax.f32 %v16163_v51, 0.0 }
 0x406   : > { %v16162_v28 = vmax.f32 %v16161_v2, 0.0  ;;  %v3725_v18 = vadd.f32 %v3724_v3, %v3694_v5  ;;  %v2180_v5 = vmul.f32 %v9185_v62, %v9185_v62 }
 0x407   : > { %16159 = vst [vmem:[#allocation46_spill] sm:$0xff] %v9178_v7  ;;  %v2207_v1 = vadd.f32 %v2206_v35, %v2176_v60  ;;  %v9199_v49 = vsub.f32 %v16164_v14, %v8833_v4  ;;  %v16165_v60 = vld [vmem:[#allocation19_spill] sm:$0xff]  ;;  %v3697_v2 = vmul.f32 %v9178_v7, %v9178_v7  ;;  %v16168_v4 = vld [vmem:[#allocation20_spill] sm:$0xff]  ;;  %v16170_v7 = vld [vmem:[#allocation21_spill] sm:$0xff] }
 0x408   : > { %v9192_v61 = vsub.f32 %v16162_v28, %v9003_v58  ;;  %v16166_v35 = vmax.f32 %v16165_v60, 0.0  ;;  %v3726_v28 = vadd.f32 %v3725_v18, %v3695_v20  ;;  %v16169_v51 = vmax.f32 %v16168_v4, 0.0 }
 0x409   : > { %v2208_v37 = vadd.f32 %v2207_v1, %v2177_v53  ;;  %v2181_v60 = vmul.f32 %v9199_v49, %v9199_v49  ;;  %v16171_v20 = vmax.f32 %v16170_v7, 0.0 }
 0x40a   : > { %v9206_v30 = vsub.f32 %v16166_v35, %v9003_v58  ;;  %v9215_v14 = vsub.f32 %v16169_v51, %v9003_v58  ;;  %v3698_v53 = vmul.f32 %v9192_v61, %v9192_v61  ;;  %v3727_v1 = vadd.f32 %v3726_v28, %v3696_v46  ;;  %v16173_v51 = vld [vmem:[#allocation22_spill] sm:$0xff] }
 0x40b   : > { %v2209_v3 = vadd.f32 %v2208_v37, %v2178_v36  ;;  %v9224_v18 = vsub.f32 %v16171_v20, %v9003_v58  ;;  %v16174_v57 = vmax.f32 %v16173_v51, 0.0 }
 0x40c   : > { %16167 = vst [vmem:[#allocation18_spill] sm:$0xff] %v9206_v30  ;;  %v3699_v36 = vmul.f32 %v9206_v30, %v9206_v30  ;;  %v3728_v37 = vadd.f32 %v3727_v1, %v3697_v2  ;;  %v3700_v46 = vmul.f32 %v9215_v14, %v9215_v14  ;;  %v16179_v1 = vld [vmem:[#allocation24_spill] sm:$0xff] }
 0x40d   : > { %v2210_v35 = vadd.f32 %v2209_v3, %v2179_v48  ;;  %16172 = vst [vmem:[#allocation30_spill] sm:$0xff] %v9224_v18  ;;  %v9231_v45 = vsub.f32 %v16174_v57, %v9003_v58  ;;  %v16176_v3 = vld [vmem:[#allocation23_spill] sm:$0xff]  ;;  %v3701_v30 = vmul.f32 %v9224_v18, %v9224_v18  ;;  %v16184_v18 = vld [vmem:[#allocation26_spill] sm:$0xff] }
 0x40e   : > { %v3729_v28 = vadd.f32 %v3728_v37, %v3698_v53  ;;  %v16177_v7 = vmax.f32 %v16176_v3, 0.0  ;;  %v16182_v37 = vld [vmem:[#allocation25_spill] sm:$0xff] }
 0x40f   : > { %v2211_v4 = vadd.f32 %v2210_v35, %v2180_v5  ;;  %16175 = vst [vmem:[#allocation19_spill] sm:$0xff] %v9231_v45  ;;  %v16180_v35 = vmax.f32 %v16179_v1, 0.0  ;;  %v3702_v51 = vmul.f32 %v9231_v45, %v9231_v45  ;;  %v16185_v1 = vmax.f32 %v16184_v18, 0.0 }
 0x410   : > { %v9238_v20 = vsub.f32 %v16177_v7, %v9003_v58  ;;  %v3730_v2 = vadd.f32 %v3729_v28, %v3699_v36 }
 0x411   : > { %v2212_v48 = vadd.f32 %v2211_v4, %v2181_v60  ;;  %v9245_v57 = vsub.f32 %v16180_v35, %v9003_v58  ;;  %v16183_v4 = vmax.f32 %v16182_v37, 0.0  ;;  %v9259_v35 = vsub.f32 %v16185_v1, %v9003_v58 }
 0x412   : > { %16178 = vst [vmem:[#allocation20_spill] sm:$0xff] %v9238_v20  ;;  %v3731_v53 = vadd.f32 %v3730_v2, %v3700_v46  ;;  %v3703_v7 = vmul.f32 %v9238_v20, %v9238_v20  ;;  %v16186_v2 = vld [vmem:[#allocation27_spill] sm:$0xff]  ;;  %v16189_v20 = vld [vmem:[#allocation28_spill] sm:$0xff] }
 0x413   : > { %v2213_v5 = vrot.slane %v2212_v48, 4  ;;  %16181 = vst [vmem:[#allocation21_spill] sm:$0xff] %v9245_v57  ;;  %v9252_v3 = vsub.f32 %v16183_v4, %v9003_v58  ;;  %v3704_v45 = vmul.f32 %v9245_v57, %v9245_v57  ;;  %v16190_v18 = vmax.f32 %v16189_v20, 0.0  ;;  %v9287_v20 = vld [vmem:[%s15582_s3 + $0x2] ss:$0 sm:$0xff] }
 0x414   : > { %v3732_v36 = vadd.f32 %v3731_v53, %v3701_v30  ;;  %v3706_v57 = vmul.f32 %v9259_v35, %v9259_v35 }
 0x415   : > { %v2214_v60 = vadd.f32 %v2213_v5, %v2212_v48  ;;  %v16187_v5 = vmax.f32 %v16186_v2, 0.0  ;;  %v3705_v4 = vmul.f32 %v9252_v3, %v9252_v3  ;;  %v9273_v1 = vsub.f32 %v16190_v18, %v9003_v58 }
 0x416   : > { %v3733_v46 = vadd.f32 %v3732_v36, %v3702_v51  ;;  %v16191_v36 = vld [vmem:[#allocation29_spill] sm:$0xff] }
 0x417   : > { %v2215_v28 = vrot.slane %v2214_v60, 2  ;;  %v9266_v37 = vsub.f32 %v16187_v5, %v9003_v58  ;;  %v3708_v18 = vmul.f32 %v9273_v1, %v9273_v1 }
 0x418   : > { %v3734_v30 = vadd.f32 %v3733_v46, %v3703_v7 }
 0x419   : > { %v2216_v48 = vadd.f32 %v2215_v28, %v2214_v60  ;;  %16188 = vst [vmem:[#allocation22_spill] sm:$0xff] %v9266_v37  ;;  %v16192_v28 = vmax.f32 %v16191_v36, 0.0  ;;  %v3707_v5 = vmul.f32 %v9266_v37, %v9266_v37  ;;  %v2227_v37 = vmul.f32 %v9287_v20, %v8865_v39  ;;  %v16196_v39 = vld [vmem:[#allocation34_spill] sm:$0xff] }
 0x41a   : > { %v3735_v51 = vadd.f32 %v3734_v30, %v3704_v45 }
 0x41b   : > { %v2217_v53 = vrot.slane %v2216_v48, 1  ;;  %v9280_v2 = vsub.f32 %v16192_v28, %v9003_v58  ;;  %v16194_v28 = vld [vmem:[#allocation32_spill] sm:$0xff] }
 0x41c   : > { %v3736_v7 = vadd.f32 %v3735_v51, %v3705_v4  ;;  %v2225_v4 = vmul.f32 %v9287_v20, %v16194_v28  ;;  %v16195_v51 = vld [vmem:[#allocation33_spill] sm:$0xff]  ;;  %v2233_v28 = vmul.f32 %v9287_v20, %v16196_v39  ;;  %v9410_v39 = vmul.f32 %v9037_v0, %v9037_v0 }
 0x41d   : > { %v2218_v60 = vadd.f32 %v2217_v53, %v2216_v48  ;;  %v3709_v30 = vmul.f32 %v9280_v2, %v9280_v2  ;;  %v16193_v53 = vld [vmem:[#allocation31_spill] sm:$0xff] }
 0x41e   : > { %v3737_v45 = vadd.f32 %v3736_v7, %v3706_v57  ;;  %v2224_v36 = vmul.f32 %v9287_v20, %v16193_v53  ;;  %v3710_v57 = vmul.f32 %v9017_v50, %v9017_v50  ;;  %v2232_v53 = vmul.f32 %v9287_v20, %v8915_v19 }
 0x41f   : > { %v2219_v46 = vmul.f32 0.00390625, %v2218_v60  ;;  %v2226_v60 = vmul.f32 %v9287_v20, %v16195_v51  ;;  %v2238_v19 = vmul.f32 %v9287_v20, %v8959_v55  ;;  %v2239_v51 = vmul.f32 %v9287_v20, %v8966_v31 }
 0x420   : > { %v3738_v58 = vadd.f32 %v3737_v45, %v3707_v5  ;;  %v2228_v5 = vmul.f32 %v9287_v20, %v8874_v24  ;;  %v2230_v45 = vmul.f32 %v9287_v20, %v8897_v13  ;;  %v2234_v24 = vmul.f32 %v9287_v20, %v8931_v27 }
 0x421   : > { %v2256_v48 = vadd.f32 1e-05, %v2219_v46  ;;  %v2229_v46 = vmul.f32 %v9287_v20, %v8887_v43  ;;  %v2235_v43 = vmul.f32 %v9287_v20, %v8938_v6  ;;  %v2236_v13 = vmul.f32 %v9287_v20, %v8945_v56 }
 0x422   : > { %v3739_v7 = vadd.f32 %v3738_v58, %v3708_v18  ;;  %v3711_v18 = vmul.f32 %v9022_v38, %v9022_v38  ;;  %v9333_v27 = vmul.f32 %v9287_v20, %v8973_v42  ;;  %v9337_v6 = vmul.f32 %v9287_v20, %v8980_v59 }
 0x423   : > { %7700 = vrsqrt.f32 %v2256_v48  ;;  %v2231_v48 = vmul.f32 %v9287_v20, %v8907_v41  ;;  %v2237_v41 = vmul.f32 %v9287_v20, %v8952_v8  ;;  %v9341_v56 = vmul.f32 %v9287_v20, %v8987_v9 }
 0x424   : > { %v3740_v58 = vadd.f32 %v3739_v7, %v3709_v30  ;;  %v3712_v30 = vmul.f32 %v9027_v33, %v9027_v33  ;;  %v9345_v8 = vmul.f32 %v9287_v20, %v8992_v11  ;;  %v9349_v55 = vmul.f32 %v9287_v20, %v9001_v10 }
 0x425   : > { %v9353_v31 = vmul.f32 %v9287_v20, %v9008_v52  ;;  %v9357_v42 = vmul.f32 %v9287_v20, %v9070_v40  ;;  %v9361_v9 = vmul.f32 %v9287_v20, %v9087_v29  ;;  %v9365_v11 = vmul.f32 %v9287_v20, %v9099_v16 }
 0x426   : > { %v3741_v7 = vadd.f32 %v3740_v58, %v3710_v57  ;;  %v9369_v10 = vmul.f32 %v9287_v20, %v9115_v63  ;;  %v9373_v52 = vmul.f32 %v9287_v20, %v9129_v26  ;;  %v9377_v40 = vmul.f32 %v9287_v20, %v9143_v15  ;;  %v9394_v26 = vld [vmem:[%s15582_s3 + $0x3] ss:$0 sm:$0xff] }
 0x427   : > { %v9381_v29 = vmul.f32 %v9287_v20, %v9157_v22  ;;  %v9385_v16 = vmul.f32 %v9287_v20, %v9171_v32  ;;  %v9398_v15 = vmul.f32 %v9287_v20, %v9185_v62  ;;  %v9402_v22 = vmul.f32 %v9287_v20, %v9199_v49 }
 0x428   : > { %v3742_v59 = vadd.f32 %v3741_v7, %v3711_v18  ;;  %v9406_v32 = vmul.f32 %v9032_v47, %v9032_v47 }
 0x42a   : > { %v9387_v57 = vadd.f32 %v3742_v59, %v3712_v30 }
 0x42d   : > { %v9389_v63 = vpop.eup %7700 }
 0x42e   : > { %v2258_v18 = vmul.f32 %v9389_v63, %v2224_v36  ;;  %v2259_v58 = vmul.f32 %v9389_v63, %v2225_v4  ;;  %v2260_v30 = vmul.f32 %v9389_v63, %v2226_v60  ;;  %v2261_v62 = vmul.f32 %v9389_v63, %v2227_v37 }
 0x42f   : > { %v2262_v7 = vmul.f32 %v9389_v63, %v2228_v5  ;;  %v2263_v49 = vmul.f32 %v9389_v63, %v2229_v46  ;;  %v2264_v59 = vmul.f32 %v9389_v63, %v2230_v45  ;;  %v2265_v47 = vmul.f32 %v9389_v63, %v2231_v48 }
 0x430   : > { %v2294_v33 = vadd.f32 %v9394_v26, %v2258_v18  ;;  %v2295_v0 = vadd.f32 %v9394_v26, %v2259_v58  ;;  %v2296_v36 = vadd.f32 %v9394_v26, %v2260_v30  ;;  %v2297_v4 = vadd.f32 %v9394_v26, %v2261_v62 }
 0x431   : > { %v2298_v60 = vadd.f32 %v9394_v26, %v2262_v7  ;;  %v2299_v37 = vadd.f32 %v9394_v26, %v2263_v49  ;;  %v2300_v5 = vadd.f32 %v9394_v26, %v2264_v59  ;;  %v2301_v46 = vadd.f32 %v9394_v26, %v2265_v47 }
 0x432   : > { %v2326_v38 = vpack.c.bf16 %v2295_v0, %v2294_v33  ;;  %v2327_v45 = vpack.c.bf16 %v2297_v4, %v2296_v36  ;;  %v2266_v48 = vmul.f32 %v9389_v63, %v2232_v53  ;;  %v2267_v18 = vmul.f32 %v9389_v63, %v2233_v28 }
 0x433   : > { %v2328_v50 = vpack.c.bf16 %v2299_v37, %v2298_v60  ;;  %v2329_v58 = vpack.c.bf16 %v2301_v46, %v2300_v5  ;;  %v2268_v30 = vmul.f32 %v9389_v63, %v2234_v24  ;;  %v2269_v62 = vmul.f32 %v9389_v63, %v2235_v43 }
 0x434   : > { %7249 = vmatprep.mubr.bf16.mxu0 %v2326_v38  ;;  %v2302_v7 = vadd.f32 %v9394_v26, %v2266_v48  ;;  %v2303_v49 = vadd.f32 %v9394_v26, %v2267_v18  ;;  %v2270_v59 = vmul.f32 %v9389_v63, %v2236_v13  ;;  %v2271_v33 = vmul.f32 %v9389_v63, %v2237_v41  ;;  %v9444_v38 = vld [vmem:[#allocation9] sm:$0xff]   ;;  %v9453_v41 = vld [vmem:[#allocation9 + $0x8] sm:$0xff]  }
 0x435   : > { %7250 = vmatmul.mubr.bf16.vlgmr.msra.gmra.mrb[0].mxu0 %v2327_v45  ;;  %v9437_v47 = vadd.f32 %v9394_v26, %v2268_v30  ;;  %v9440_v0 = vadd.f32 %v9394_v26, %v2269_v62  ;;  %v2272_v53 = vmul.f32 %v9389_v63, %v2238_v19  ;;  %v2273_v28 = vmul.f32 %v9389_v63, %v2239_v51  ;;  %v9495_v30 = vld [vmem:[#allocation9 + $0x10] sm:$0xff]  }
 0x436   : > { %7330 = vmatpush3.bf16.msra.mxu0 %v9444_v38  ;;  %7253 = vmatprep.mubr.bf16.mxu0 %v2328_v50  ;;  %v2330_v24 = vpack.c.bf16 %v2303_v49, %v2302_v7  ;;  %v9448_v43 = vadd.f32 %v9394_v26, %v2270_v59  ;;  %v9451_v13 = vadd.f32 %v9394_v26, %v2271_v33 }
 0x437   : > { %7331 = vmatprep.subr.bf16.mxu0 %v9453_v41  ;;  %v2331_v19 = vpack.c.bf16 %v9440_v0, %v9437_v47  ;;  %v9459_v51 = vadd.f32 %v9394_v26, %v2272_v53  ;;  %v9462_v36 = vadd.f32 %v9394_v26, %v2273_v28  ;;  %v2274_v50 = vmul.f32 %v9389_v63, %v9333_v27  ;;  %v9533_v28 = vld [vmem:[#allocation9 + $0x18] sm:$0xff]  }
 0x438   : > { %v2332_v4 = vpack.c.bf16 %v9451_v13, %v9448_v43  ;;  %v2275_v60 = vmul.f32 %v9389_v63, %v9337_v6  ;;  %v2276_v37 = vmul.f32 %v9389_v63, %v9341_v56  ;;  %v2277_v5 = vmul.f32 %v9389_v63, %v9345_v8 }
 0x439   : > { %v2333_v46 = vpack.c.bf16 %v9462_v36, %v9459_v51  ;;  %v9477_v45 = vadd.f32 %v9394_v26, %v2274_v50  ;;  %v2278_v27 = vmul.f32 %v9389_v63, %v9349_v55  ;;  %v2279_v48 = vmul.f32 %v9389_v63, %v9353_v31 }
 0x43a   : > { %7332 = vmatpush3.bf16.msra.mxu0 %v9453_v41  ;;  %v9485_v6 = vadd.f32 %v9394_v26, %v2275_v60  ;;  %v9488_v56 = vadd.f32 %v9394_v26, %v2276_v37  ;;  %v9491_v8 = vadd.f32 %v9394_v26, %v2277_v5  ;;  %v2280_v18 = vmul.f32 %v9389_v63, %v9357_v42 }
 0x43b   : > { %7333 = vmatprep.subr.bf16.mxu0 %v9495_v30  ;;  %v9499_v55 = vadd.f32 %v9394_v26, %v2278_v27  ;;  %v9502_v31 = vadd.f32 %v9394_v26, %v2279_v48  ;;  %v2281_v62 = vmul.f32 %v9389_v63, %v9361_v9  ;;  %v2282_v7 = vmul.f32 %v9389_v63, %v9365_v11  ;;  %v9560_v48 = vld [vmem:[#allocation9 + $0x20] sm:$0xff]  }
 0x43c   : > { %v2334_v49 = vpack.c.bf16 %v9485_v6, %v9477_v45  ;;  %v2335_v42 = vpack.c.bf16 %v9491_v8, %v9488_v56  ;;  %v9513_v59 = vadd.f32 %v9394_v26, %v2280_v18  ;;  %v2283_v33 = vmul.f32 %v9389_v63, %v9369_v10  ;;  %v9571_v8 = vld [vmem:[#allocation9 + $0x28] sm:$0xff]  }
 0x43d   : > { %7254 = vmatmul.mubr.bf16.gmra.mrb[4].mxu0 %v2329_v58  ;;  %v2336_v47 = vpack.c.bf16 %v9502_v31, %v9499_v55  ;;  %v9520_v9 = vadd.f32 %v9394_v26, %v2281_v62  ;;  %v9523_v11 = vadd.f32 %v9394_v26, %v2282_v7  ;;  %v2284_v0 = vmul.f32 %v9389_v63, %v9373_v52 }
 0x43e   : > { %7257 = vmatprep.mubr.bf16.mxu0 %v2330_v24  ;;  %7334 = vmatpush3.bf16.msra.mxu0 %v9495_v30  ;;  %v2319_v53 = vadd.f32 %v9394_v26, %v2283_v33  ;;  %v2285_v10 = vmul.f32 %v9389_v63, %v9377_v40  ;;  %v2286_v58 = vmul.f32 %v9389_v63, %v9381_v29 }
 0x43f   : > { %7335 = vmatprep.subr.bf16.mxu0 %v9533_v28  ;;  %v2337_v43 = vpack.c.bf16 %v9520_v9, %v9513_v59  ;;  %v2320_v52 = vadd.f32 %v9394_v26, %v2284_v0  ;;  %v2287_v24 = vmul.f32 %v9389_v63, %v9385_v16  ;;  %v2288_v13 = vmul.f32 %v9389_v63, %v9398_v15  ;;  %v9588_v59 = vld [vmem:[#allocation9 + $0x38] sm:$0xff]  }
 0x440   : > { %v2338_v40 = vpack.c.bf16 %v2319_v53, %v9523_v11  ;;  %v2321_v50 = vadd.f32 %v9394_v26, %v2285_v10  ;;  %v2322_v29 = vadd.f32 %v9394_v26, %v2286_v58  ;;  %v2289_v60 = vmul.f32 %v9389_v63, %v9402_v22 }
 0x441   : > { %v2323_v37 = vadd.f32 %v9394_v26, %v2287_v24  ;;  %v9550_v5 = vadd.f32 %v9394_v26, %v2288_v13  ;;  %v3715_v16 = vmul.f32 %v9042_v25, %v9042_v25  ;;  %v3744_v15 = vadd.f32 %v9387_v57, %v9406_v32  ;;  %v16199_v13 = vld [vmem:[#allocation42_spill] sm:$0xff] }
 0x442   : > { %7336 = vmatpush3.bf16.msra.mxu0 %v9533_v28  ;;  %v2339_v45 = vpack.c.bf16 %v2321_v50, %v2320_v52  ;;  %v9558_v27 = vadd.f32 %v9394_v26, %v2289_v60  ;;  %v3716_v22 = vmul.f32 %v9047_v21, %v9047_v21  ;;  %v3717_v57 = vmul.f32 %v9052_v44, %v9052_v44  ;;  %v16197_v52 = vld [vmem:[#allocation40_spill] sm:$0xff]  ;;  %v16200_v50 = vld [vmem:[#allocation43_spill] sm:$0xff] }
 0x443   : > { %7337 = vmatprep.subr.bf16.mxu0 %v9560_v48  ;;  %v2340_v63 = vpack.c.bf16 %v2323_v37, %v2322_v29  ;;  %v3745_v6 = vadd.f32 %v3744_v15, %v9410_v39  ;;  %v3718_v18 = vmul.f32 %v9057_v17, %v9057_v17  ;;  %v3719_v39 = vmul.f32 %v9062_v23, %v9062_v23  ;;  %v16201_v29 = vld [vmem:[#allocation44_spill] sm:$0xff] }
 0x444   : > { %v2341_v56 = vpack.c.bf16 %v9558_v27, %v9550_v5  ;;  %v3763_v10 = vmul.f32 %v9287_v20, %v9077_v34  ;;  %v3764_v58 = vmul.f32 %v9287_v20, %v9082_v12  ;;  %v3765_v24 = vmul.f32 %v9287_v20, %v16197_v52  ;;  %v16202_v34 = vld [vmem:[#allocation45_spill] sm:$0xff]  ;;  %v16203_v12 = vld [vmem:[#allocation46_spill] sm:$0xff] }
 0x445   : > { %7258 = vmatmul.mubr.bf16.gmra.mrb[8].mxu0 %v2331_v19  ;;  %v3746_v32 = vadd.f32 %v3745_v6, %v3715_v16  ;;  %v9579_v19 = vld [vmem:[#allocation9 + $0x30] sm:$0xff]   ;;  %v3769_v60 = vmul.f32 %v9287_v20, %v16201_v29  ;;  %v3770_v37 = vmul.f32 %v9287_v20, %v16202_v34  ;;  %v3771_v16 = vmul.f32 %v9287_v20, %v16203_v12 }
 0x446   : > { %7261 = vmatprep.mubr.bf16.mxu0 %v2332_v4  ;;  %7338 = vmatpush3.bf16.msra.mxu0 %v9560_v48  ;;  %v3720_v4 = vmul.f32 %v9065_v54, %v9065_v54  ;;  %v3772_v15 = vmul.f32 %v9287_v20, %v9192_v61  ;;  %v3774_v6 = vmul.f32 %v9287_v20, %v9215_v14 }
 0x447   : > { %7339 = vmatprep.subr.bf16.mxu0 %v9571_v8  ;;  %v3747_v55 = vadd.f32 %v3746_v32, %v3716_v22  ;;  %v3779_v61 = vmul.f32 %v9287_v20, %v9252_v3  ;;  %v9663_v52 = vmul.f32 %v9287_v20, %v9047_v21  ;;  %v9677_v29 = vmul.f32 %v9287_v20, %v9062_v23 }
 0x449   : > { %v3748_v31 = vadd.f32 %v3747_v55, %v3717_v57  ;;  %v16205_v57 = vld [vmem:[#allocation30_spill] sm:$0xff] }
 0x44a   : > { %7340 = vmatpush3.bf16.msra.mxu0 %v9571_v8  ;;  %v3775_v32 = vmul.f32 %v9287_v20, %v16205_v57 }
 0x44b   : > { %7341 = vmatprep.subr.bf16.mxu0 %v9579_v19  ;;  %v3749_v62 = vadd.f32 %v3748_v31, %v3718_v18  ;;  %v16206_v18 = vld [vmem:[#allocation19_spill] sm:$0xff]  ;;  %v16208_v31 = vld [vmem:[#allocation21_spill] sm:$0xff] }
 0x44c   : > { %v3776_v55 = vmul.f32 %v9287_v20, %v16206_v18 }
 0x44d   : > { %7262 = vmatmul.mubr.bf16.gmra.mrb[12].mxu0 %v2333_v46  ;;  %v3750_v7 = vadd.f32 %v3749_v62, %v3719_v39  ;;  %v16207_v39 = vld [vmem:[#allocation20_spill] sm:$0xff]  ;;  %v3780_v62 = vmul.f32 %v9287_v20, %v9259_v35 }
 0x44e   : > { %7265 = vmatprep.mubr.bf16.mxu0 %v2334_v49  ;;  %7342 = vmatpush3.bf16.msra.mxu0 %v9579_v19 }
 0x44f   : > { %7343 = vmatprep.subr.bf16.mxu0 %v9588_v59  ;;  %v3751_v33 = vadd.f32 %v3750_v7, %v3720_v4  ;;  %v3778_v4 = vmul.f32 %v9287_v20, %v16208_v31  ;;  %v16209_v7 = vld [vmem:[#allocation22_spill] sm:$0xff] }
 0x450   : > { %v3781_v14 = vmul.f32 %v9287_v20, %v16209_v7 }
 0x451   : > { %v3752_v9 = vrot.slane %v3751_v33, 4 }
 0x452   : > { %7344 = vmatpush3.bf16.msra.mxu0 %v9588_v59 }
 0x453   : > { %v3753_v11 = vadd.f32 %v3752_v9, %v3751_v33  ;;  %7425 = vmatprep.subr.bf16.mxu0 %v9444_v38  ;;  %v3782_v33 = vmul.f32 %v9287_v20, %v9273_v1  ;;  %v9635_v9 = vmul.f32 %v9287_v20, %v9280_v2  ;;  %v16214_v1 = vld [vmem:[#allocation39_spill] sm:$0xff] }
 0x454   : > { %v9655_v2 = vmul.f32 %v9287_v20, %v16214_v1 }
 0x455   : > { %7266 = vmatmul.mubr.bf16.gmra.mrb[16].mxu0 %v2335_v42  ;;  %v3754_v0 = vrot.slane %v3753_v11, 2  ;;  %v16198_v42 = vld [vmem:[#allocation41_spill] sm:$0xff] }
 0x456   : > { %7269 = vmatprep.mubr.bf16.mxu0 %v2336_v47  ;;  %v3766_v47 = vmul.f32 %v9287_v20, %v16198_v42 }
 0x457   : > { %v3755_v51 = vadd.f32 %v3754_v0, %v3753_v11  ;;  %v16210_v11 = vld [vmem:[#allocation35_spill] sm:$0xff] }
 0x458   : > { %v9639_v0 = vmul.f32 %v9287_v20, %v16210_v11 }
 0x459   : > { %v3756_v36 = vrot.slane %v3755_v51, 1 }
 0x45b   : > { %v3757_v46 = vadd.f32 %v3756_v36, %v3755_v51  ;;  %v16211_v51 = vld [vmem:[#allocation36_spill] sm:$0xff]  ;;  %v16212_v36 = vld [vmem:[#allocation37_spill] sm:$0xff] }
 0x45c   : > { %v9643_v3 = vmul.f32 %v9287_v20, %v16211_v51  ;;  %v9647_v35 = vmul.f32 %v9287_v20, %v16212_v36 }
 0x45d   : > { %7270 = vmatmul.mubr.bf16.gmra.mrb[20].mxu0 %v2337_v43  ;;  %v3758_v49 = vmul.f32 0.00390625, %v3757_v46  ;;  %v3767_v43 = vmul.f32 %v9287_v20, %v16199_v13  ;;  %v16213_v46 = vld [vmem:[#allocation38_spill] sm:$0xff]  ;;  %v9669_v13 = vmul.f32 %v9287_v20, %v9052_v44 }
 0x45e   : > { %7273 = vmatprep.mubr.bf16.mxu0 %v2338_v40  ;;  %v3768_v40 = vmul.f32 %v9287_v20, %v16200_v50  ;;  %v9673_v50 = vmul.f32 %v9287_v20, %v9057_v17 }
 0x45f   : > { %v3795_v53 = vadd.f32 1e-05, %v3758_v49  ;;  %v9651_v49 = vmul.f32 %v9287_v20, %v16213_v46 }
 0x461   : > { %7702 = vrsqrt.f32 %v3795_v53  ;;  %v9659_v53 = vmul.f32 %v9287_v20, %v9042_v25  ;;  %v9681_v25 = vmul.f32 %v9287_v20, %v9065_v54 }
 0x465   : > { %7274 = vmatmul.mubr.bf16.gmra.mrb[24].mxu0 %v2339_v45  ;;  %v16204_v45 = vld [vmem:[#allocation18_spill] sm:$0xff] }
 0x466   : > { %7277 = vmatprep.mubr.bf16.mxu0 %v2340_v63  ;;  %v3773_v22 = vmul.f32 %v9287_v20, %v16204_v45  ;;  %v3777_v63 = vmul.f32 %v9287_v20, %v16207_v39 }
 0x46b   : > { %v9665_v42 = vpop.eup %7702 }
 0x46c   : > { %v3797_v21 = vmul.f32 %v9665_v42, %v3763_v10  ;;  %v3798_v34 = vmul.f32 %v9665_v42, %v3764_v58  ;;  %v3799_v12 = vmul.f32 %v9665_v42, %v3765_v24  ;;  %v3800_v44 = vmul.f32 %v9665_v42, %v3766_v47 }
 0x46d   : > { %7278 = vmatmul.mubr.bf16.gmra.mrb[28].mxu0 %v2341_v56  ;;  %v3801_v17 = vmul.f32 %v9665_v42, %v3767_v43  ;;  %v3802_v23 = vmul.f32 %v9665_v42, %v3768_v40  ;;  %v3803_v45 = vmul.f32 %v9665_v42, %v3769_v60  ;;  %v3804_v54 = vmul.f32 %v9665_v42, %v3770_v37 }
 0x46e   : > { %v3833_v20 = vadd.f32 %v9394_v26, %v3797_v21  ;;  %v3834_v10 = vadd.f32 %v9394_v26, %v3798_v34  ;;  %v3835_v58 = vadd.f32 %v9394_v26, %v3799_v12  ;;  %v3836_v24 = vadd.f32 %v9394_v26, %v3800_v44 }
 0x46f   : > { %v3837_v47 = vadd.f32 %v9394_v26, %v3801_v17  ;;  %v3838_v5 = vadd.f32 %v9394_v26, %v3802_v23  ;;  %v3839_v27 = vadd.f32 %v9394_v26, %v3803_v45  ;;  %v3840_v56 = vadd.f32 %v9394_v26, %v3804_v54 }
 0x470   : > { %v3865_v43 = vpack.c.bf16 %v3834_v10, %v3833_v20  ;;  %v3866_v40 = vpack.c.bf16 %v3836_v24, %v3835_v58  ;;  %v3805_v60 = vmul.f32 %v9665_v42, %v3771_v16  ;;  %v3806_v37 = vmul.f32 %v9665_v42, %v3772_v15 }
 0x471   : > { %v3867_v57 = vpack.c.bf16 %v3838_v5, %v3837_v47  ;;  %v3868_v18 = vpack.c.bf16 %v3840_v56, %v3839_v27  ;;  %v3807_v39 = vmul.f32 %v9665_v42, %v3773_v22  ;;  %v3808_v31 = vmul.f32 %v9665_v42, %v3774_v6 }
 0x472   : > { %7345 = vmatprep.mubr.bf16.mxu0 %v3865_v43  ;;  %v3841_v7 = vadd.f32 %v9394_v26, %v3805_v60  ;;  %v3842_v11 = vadd.f32 %v9394_v26, %v3806_v37  ;;  %v3809_v51 = vmul.f32 %v9665_v42, %v3775_v32  ;;  %v3810_v36 = vmul.f32 %v9665_v42, %v3776_v55 }
 0x473   : > { %v9711_v46 = vadd.f32 %v9394_v26, %v3807_v39  ;;  %v9714_v16 = vadd.f32 %v9394_v26, %v3808_v31  ;;  %v3811_v15 = vmul.f32 %v9665_v42, %v3777_v63  ;;  %v3812_v22 = vmul.f32 %v9665_v42, %v3778_v4 }
 0x474   : > { %v3869_v6 = vpack.c.bf16 %v3842_v11, %v3841_v7  ;;  %v3845_v1 = vadd.f32 %v9394_v26, %v3809_v51  ;;  %v3846_v21 = vadd.f32 %v9394_v26, %v3810_v36  ;;  %v3813_v34 = vmul.f32 %v9665_v42, %v3779_v61  ;;  %v4963_v11 = vld [vmem:[#allocation2 + $0x70] sm:$0xff] }
 0x475   : > { %7346 = vmatmul.mubr.bf16.vlgmr.msra.gmra.mrb[32].mxu0 %v3866_v40  ;;  %v3870_v32 = vpack.c.bf16 %v9714_v16, %v9711_v46  ;;  %v3847_v55 = vadd.f32 %v9394_v26, %v3811_v15  ;;  %v3848_v12 = vadd.f32 %v9394_v26, %v3812_v22  ;;  %v3814_v44 = vmul.f32 %v9665_v42, %v3780_v62  ;;  %v4964_v16 = vld [vmem:[#allocation2 + $0x90] sm:$0xff] }
 0x476   : > { %7349 = vmatprep.mubr.bf16.mxu0 %v3867_v57  ;;  %v3871_v63 = vpack.c.bf16 %v3846_v21, %v3845_v1  ;;  %v3849_v4 = vadd.f32 %v9394_v26, %v3813_v34  ;;  %v3815_v17 = vmul.f32 %v9665_v42, %v3781_v14  ;;  %v3816_v23 = vmul.f32 %v9665_v42, %v3782_v33  ;;  %v4965_v1 = vld [vmem:[#allocation2 + $0xb0] sm:$0xff] }
 0x477   : > { %v3872_v45 = vpack.c.bf16 %v3848_v12, %v3847_v55  ;;  %v3850_v61 = vadd.f32 %v9394_v26, %v3814_v44  ;;  %v3817_v54 = vmul.f32 %v9665_v42, %v9635_v9  ;;  %v3818_v20 = vmul.f32 %v9665_v42, %v9639_v0  ;;  %7426 = vmatpush3.bf16.msra.mxu0 %v9444_v38  ;;  %v4966_v55 = vld [vmem:[#allocation2 + $0xd0] sm:$0xff] }
 0x478   : > { %v3851_v62 = vadd.f32 %v9394_v26, %v3815_v17  ;;  %v3852_v10 = vadd.f32 %v9394_v26, %v3816_v23  ;;  %v3819_v14 = vmul.f32 %v9665_v42, %v9643_v3  ;;  %v3820_v33 = vmul.f32 %v9665_v42, %v9647_v35  ;;  %7427 = vmatprep.subr.bf16.mxu0 %v9453_v41 }
 0x479   : > { %v3873_v58 = vpack.c.bf16 %v3850_v61, %v3849_v4  ;;  %v3853_v9 = vadd.f32 %v9394_v26, %v3817_v54  ;;  %v3854_v24 = vadd.f32 %v9394_v26, %v3818_v20  ;;  %v3821_v38 = vmul.f32 %v9665_v42, %v9651_v49  ;;  %v4967_v4 = vld [vmem:[#allocation2 + $0xf0] sm:$0xff] }
 0x47a   : > { %v3874_v0 = vpack.c.bf16 %v3852_v10, %v3851_v62  ;;  %v3855_v47 = vadd.f32 %v9394_v26, %v3819_v14  ;;  %v3856_v5 = vadd.f32 %v9394_v26, %v3820_v33  ;;  %v3822_v3 = vmul.f32 %v9665_v42, %v9655_v2  ;;  %v4968_v61 = vld [vmem:[#allocation2 + $0x110] sm:$0xff] }
 0x47b   : > { %v3875_v27 = vpack.c.bf16 %v3854_v24, %v3853_v9  ;;  %v3857_v35 = vadd.f32 %v9394_v26, %v3821_v38  ;;  %v3823_v56 = vmul.f32 %v9665_v42, %v9659_v53  ;;  %v3824_v43 = vmul.f32 %v9665_v42, %v9663_v52  ;;  %7428 = vmatpush3.bf16.msra.mxu0 %v9453_v41  ;;  %v4969_v10 = vld [vmem:[#allocation2 + $0x130] sm:$0xff] }
 0x47c   : > { %v3876_v49 = vpack.c.bf16 %v3856_v5, %v3855_v47  ;;  %v3858_v40 = vadd.f32 %v9394_v26, %v3822_v3  ;;  %v3825_v60 = vmul.f32 %v9665_v42, %v9669_v13  ;;  %v3826_v2 = vmul.f32 %v9665_v42, %v9673_v50  ;;  %7429 = vmatprep.subr.bf16.mxu0 %v9495_v30  ;;  %v4970_v9 = vld [vmem:[#allocation2 + $0x150] sm:$0xff] }
 0x47d   : > { %7350 = vmatmul.mubr.bf16.gmra.mrb[36].mxu0 %v3868_v18  ;;  %v3859_v37 = vadd.f32 %v9394_v26, %v3823_v56  ;;  %v3860_v53 = vadd.f32 %v9394_v26, %v3824_v43  ;;  %v3827_v52 = vmul.f32 %v9665_v42, %v9677_v29  ;;  %v3828_v41 = vmul.f32 %v9665_v42, %v9681_v25  ;;  %v4971_v47 = vld [vmem:[#allocation2 + $0x170] sm:$0xff] }
 0x47e   : > { %7353 = vmatprep.mubr.bf16.mxu0 %v3869_v6  ;;  %v3877_v57 = vpack.c.bf16 %v3858_v40, %v3857_v35  ;;  %v3861_v13 = vadd.f32 %v9394_v26, %v3825_v60  ;;  %v3862_v39 = vadd.f32 %v9394_v26, %v3826_v2  ;;  %v4972_v35 = vld [vmem:[#allocation2 + $0x190] sm:$0xff] }
 0x47f   : > { %v3878_v50 = vpack.c.bf16 %v3860_v53, %v3859_v37  ;;  %v3863_v31 = vadd.f32 %v9394_v26, %v3827_v52  ;;  %v3864_v18 = vadd.f32 %v9394_v26, %v3828_v41  ;;  %7430 = vmatpush3.bf16.msra.mxu0 %v9495_v30  ;;  %v9786_v26 = vld [vmem:[%s15582_s3 + $0x1] ss:$0 sm:$0xff]  ;;  %v4960_v30 = vld [vmem:[#allocation2 + $0x10] sm:$0xff] }
 0x480   : > { %v3879_v7 = vpack.c.bf16 %v3862_v39, %v3861_v13  ;;  %7431 = vmatprep.subr.bf16.mxu0 %v9533_v28  ;;  %v9800_v51 = vadd.f32 %v9786_v26, %v4963_v11  ;;  %v9808_v15 = vadd.f32 %v9786_v26, %v4964_v16  ;;  %v9814_v21 = vadd.f32 %v9786_v26, %v4965_v1  ;;  %v4973_v40 = vld [vmem:[#allocation2 + $0x1b0] sm:$0xff] }
 0x481   : > { %v3880_v29 = vpack.c.bf16 %v3864_v18, %v3863_v31  ;;  %v9820_v12 = vadd.f32 %v9786_v26, %v4966_v55  ;;  %v9826_v17 = vadd.f32 %v9786_v26, %v4967_v4  ;;  %v9832_v54 = vadd.f32 %v9786_v26, %v4968_v61  ;;  %v4974_v53 = vld [vmem:[#allocation2 + $0x1d0] sm:$0xff] }
 0x482   : > { %v5031_v22 = vmax.f32 %v9800_v51, 0.0  ;;  %v5032_v34 = vmax.f32 %v9808_v15, 0.0  ;;  %v5033_v44 = vmax.f32 %v9814_v21, 0.0  ;;  %v9838_v14 = vadd.f32 %v9786_v26, %v4969_v10  ;;  %v4975_v13 = vld [vmem:[#allocation2 + $0x1f0] sm:$0xff] }
 0x483   : > { %7432 = vmatpush3.bf16.msra.mxu0 %v9533_v28  ;;  %v4961_v28 = vld [vmem:[#allocation2 + $0x30] sm:$0xff]  ;;  %v5034_v23 = vmax.f32 %v9820_v12, 0.0  ;;  %v5035_v20 = vmax.f32 %v9826_v17, 0.0  ;;  %v5036_v33 = vmax.f32 %v9832_v54, 0.0  ;;  %v9844_v24 = vadd.f32 %v9786_v26, %v4970_v9 }
 0x484   : > { %7433 = vmatprep.subr.bf16.mxu0 %v9560_v48  ;;  %v5037_v38 = vmax.f32 %v9838_v14, 0.0  ;;  %v9850_v5 = vadd.f32 %v9786_v26, %v4971_v47  ;;  %v9856_v56 = vadd.f32 %v9786_v26, %v4972_v35  ;;  %v9862_v60 = vadd.f32 %v9786_v26, %v4973_v40  ;;  %v4976_v18 = vld [vmem:[#allocation2 + $0x210] sm:$0xff]  ;;  %v10060_v14 = vld [vmem:[%s15584_s5] ss:$0 sm:$0xff] }
 0x485   : > { %7354 = vmatmul.mubr.bf16.gmra.mrb[40].mxu0 %v3870_v32  ;;  %v5038_v3 = vmax.f32 %v9844_v24, 0.0  ;;  %v9868_v52 = vadd.f32 %v9786_v26, %v4974_v53  ;;  %v9874_v39 = vadd.f32 %v9786_v26, %v4975_v13  ;;  %v4978_v16 = vld [vmem:[#allocation2 + $0x250] sm:$0xff] }
 0x486   : > { %7357 = vmatprep.mubr.bf16.mxu0 %v3871_v63  ;;  %v5039_v43 = vmax.f32 %v9850_v5, 0.0  ;;  %v5040_v2 = vmax.f32 %v9856_v56, 0.0  ;;  %v5041_v41 = vmax.f32 %v9862_v60, 0.0  ;;  %v4979_v55 = vld [vmem:[#allocation2 + $0x270] sm:$0xff] }
 0x487   : > { %7434 = vmatpush3.bf16.msra.mxu0 %v9560_v48  ;;  %v9789_v48 = vadd.f32 %v9786_v26, %v4960_v30  ;;  %v4980_v61 = vld [vmem:[#allocation2 + $0x290] sm:$0xff] }
 0x488   : > { %7435 = vmatprep.subr.bf16.mxu0 %v9571_v8  ;;  %v4981_v9 = vld [vmem:[#allocation2 + $0x2b0] sm:$0xff] }
 0x489   : > { %v5028_v42 = vmax.f32 %v9789_v48, 0.0  ;;  %v4982_v35 = vld [vmem:[#allocation2 + $0x2d0] sm:$0xff] }
 0x48a   : > { %v4983_v53 = vld [vmem:[#allocation2 + $0x2f0] sm:$0xff] }
 0x48b   : > { %7436 = vmatpush3.bf16.msra.mxu0 %v9571_v8  ;;  %v9792_v8 = vadd.f32 %v9786_v26, %v4961_v28  ;;  %v4977_v28 = vld [vmem:[#allocation2 + $0x230] sm:$0xff] }
 0x48c   : > { %7437 = vmatprep.subr.bf16.mxu0 %v9579_v19 }
 0x48d   : > { %7358 = vmatmul.mubr.bf16.gmra.mrb[44].mxu0 %v3872_v45  ;;  %v5029_v25 = vmax.f32 %v9792_v8, 0.0 }
 0x48e   : > { %7361 = vmatprep.mubr.bf16.mxu0 %v3873_v58 }
 0x48f   : > { %7438 = vmatpush3.bf16.msra.mxu0 %v9579_v19  ;;  %v4962_v19 = vld [vmem:[#allocation2 + $0x50] sm:$0xff]  ;;  %v5062_v46 = vadd.f32 %v5029_v25, %v5028_v42 }
 0x490   : > { %7439 = vmatprep.subr.bf16.mxu0 %v9588_v59 }
 0x493   : > { %7440 = vmatpush3.bf16.msra.mxu0 %v9588_v59  ;;  %v9795_v59 = vadd.f32 %v9786_v26, %v4962_v19  ;;  %v9886_v19 = vadd.f32 %v9786_v26, %v4977_v28 }
 0x495   : > { %7362 = vmatmul.mubr.bf16.gmra.mrb[48].mxu0 %v3874_v0  ;;  %v5030_v36 = vmax.f32 %v9795_v59, 0.0  ;;  %v5045_v1 = vmax.f32 %v9886_v19, 0.0 }
 0x496   : > { %7365 = vmatprep.mubr.bf16.mxu0 %v3875_v27 }
 0x497   : > { %v5063_v6 = vadd.f32 %v5062_v46, %v5030_v36 }
 0x499   : > { %v5064_v32 = vadd.f32 %v5063_v6, %v5031_v22  ;;  %v9892_v6 = vadd.f32 %v9786_v26, %v4978_v16  ;;  %v4985_v16 = vld [vmem:[#allocation2 + $0x330] sm:$0xff] }
 0x49b   : > { %v5065_v63 = vadd.f32 %v5064_v32, %v5032_v34  ;;  %v15689_v4 = vmax.f32 %v9892_v6, 0.0 }
 0x49d   : > { %7366 = vmatmul.mubr.bf16.gmra.mrb[52].mxu0 %v3876_v49  ;;  %v5066_v45 = vadd.f32 %v5065_v63, %v5033_v44  ;;  %v9898_v63 = vadd.f32 %v9786_v26, %v4979_v55 }
 0x49e   : > { %7369 = vmatprep.mubr.bf16.mxu0 %v3877_v57 }
 0x49f   : > { %v5067_v62 = vadd.f32 %v5066_v45, %v5034_v23  ;;  %v15687_v10 = vmax.f32 %v9898_v63, 0.0 }
 0x4a1   : > { %v5068_v58 = vadd.f32 %v5067_v62, %v5035_v20  ;;  %v9904_v62 = vadd.f32 %v9786_v26, %v4980_v61  ;;  %v4986_v61 = vld [vmem:[#allocation2 + $0x350] sm:$0xff] }
 0x4a3   : > { %v5069_v0 = vadd.f32 %v5068_v58, %v5036_v33  ;;  %v15686_v47 = vmax.f32 %v9904_v62, 0.0 }
 0x4a5   : > { %7370 = vmatmul.mubr.bf16.gmra.mrb[56].mxu0 %v3878_v50  ;;  %v5070_v27 = vadd.f32 %v5069_v0, %v5037_v38  ;;  %v5042_v50 = vmax.f32 %v9868_v52, 0.0  ;;  %v9910_v0 = vadd.f32 %v9786_v26, %v4981_v9 }
 0x4a6   : > { %7373 = vmatprep.mubr.bf16.mxu0 %v3879_v7  ;;  %v9880_v7 = vadd.f32 %v9786_v26, %v4976_v18  ;;  %v4984_v18 = vld [vmem:[#allocation2 + $0x310] sm:$0xff] }
 0x4a7   : > { %v5071_v49 = vadd.f32 %v5070_v27, %v5038_v3  ;;  %v15683_v40 = vmax.f32 %v9910_v0, 0.0 }
 0x4a8   : > { %v5044_v11 = vmax.f32 %v9880_v7, 0.0 }
 0x4a9   : > { %v5072_v37 = vadd.f32 %v5071_v49, %v5039_v43  ;;  %v9916_v49 = vadd.f32 %v9786_v26, %v4982_v35  ;;  %v4987_v35 = vld [vmem:[#allocation2 + $0x370] sm:$0xff] }
 0x4ab   : > { %v5073_v57 = vadd.f32 %v5072_v37, %v5040_v2  ;;  %v15681_v13 = vmax.f32 %v9916_v49, 0.0 }
 0x4ad   : > { %7374 = vmatmul.mubr.bf16.gmra.mrb[60].mxu0 %v3880_v29  ;;  %v5074_v31 = vadd.f32 %v5073_v57, %v5041_v41  ;;  %v5043_v29 = vmax.f32 %v9874_v39, 0.0  ;;  %v9922_v57 = vadd.f32 %v9786_v26, %v4983_v53 }
 0x4af   : > { %v5075_v30 = vadd.f32 %v5074_v31, %v5042_v50  ;;  %v15679_v28 = vmax.f32 %v9922_v57, 0.0 }
 0x4b1   : > { %v5076_v46 = vadd.f32 %v5075_v30, %v5043_v29  ;;  %v9928_v30 = vadd.f32 %v9786_v26, %v4984_v18  ;;  %v4988_v18 = vld [vmem:[#allocation2 + $0x390] sm:$0xff] }
 0x4b3   : > { %v5077_v32 = vadd.f32 %v5076_v46, %v5044_v11  ;;  %v15680_v55 = vmax.f32 %v9928_v30, 0.0 }
 0x4b5   : > { %v5078_v45 = vadd.f32 %v5077_v32, %v5045_v1  ;;  %v9934_v32 = vadd.f32 %v9786_v26, %v4985_v16 }
 0x4b7   : > { %v5079_v58 = vadd.f32 %v5078_v45, %v15689_v4  ;;  %v15682_v9 = vmax.f32 %v9934_v32, 0.0 }
 0x4b9   : > { %v5080_v27 = vadd.f32 %v5079_v58, %v15687_v10  ;;  %v9940_v58 = vadd.f32 %v9786_v26, %v4986_v61 }
 0x4bb   : > { %v5081_v37 = vadd.f32 %v5080_v27, %v15686_v47  ;;  %v15684_v53 = vmax.f32 %v9940_v58, 0.0 }
 0x4bd   : > { %v5082_v31 = vadd.f32 %v5081_v37, %v15683_v40  ;;  %v9946_v37 = vadd.f32 %v9786_v26, %v4987_v35  ;;  %v4991_v40 = vld [vmem:[#allocation2 + $0x3f0] sm:$0xff] }
 0x4bf   : > { %v5083_v46 = vadd.f32 %v5082_v31, %v15681_v13  ;;  %v15685_v16 = vmax.f32 %v9946_v37, 0.0  ;;  %v4990_v13 = vld [vmem:[#allocation2 + $0x3d0] sm:$0xff] }
 0x4c1   : > { %v5084_v45 = vadd.f32 %v5083_v46, %v15679_v28  ;;  %v9952_v46 = vadd.f32 %v9786_v26, %v4988_v18  ;;  %v4989_v28 = vld [vmem:[#allocation2 + $0x3b0] sm:$0xff] }
 0x4c3   : > { %v5085_v27 = vadd.f32 %v5084_v45, %v15680_v55  ;;  %v9958_v45 = vadd.f32 %v9786_v26, %v4989_v28  ;;  %v15688_v35 = vmax.f32 %v9952_v46, 0.0 }
 0x4c5   : > { %v5086_v31 = vadd.f32 %v5085_v27, %v15682_v9  ;;  %v9964_v27 = vadd.f32 %v9786_v26, %v4990_v13  ;;  %v15692_v18 = vmax.f32 %v9958_v45, 0.0 }
 0x4c7   : > { %v5087_v61 = vadd.f32 %v5086_v31, %v15684_v53  ;;  %v9970_v31 = vadd.f32 %v9786_v26, %v4991_v40  ;;  %v15691_v28 = vmax.f32 %v9964_v27, 0.0 }
 0x4c9   : > { %v5088_v55 = vadd.f32 %v5087_v61, %v15685_v16  ;;  %v15690_v61 = vmax.f32 %v9970_v31, 0.0 }
 0x4cb   : > { %v5089_v9 = vadd.f32 %v5088_v55, %v15688_v35 }
 0x4cd   : > { %v5090_v53 = vadd.f32 %v5089_v9, %v15692_v18 }
 0x4cf   : > { %v5091_v13 = vadd.f32 %v5090_v53, %v15691_v28 }
 0x4d1   : > { %v5092_v16 = vadd.f32 %v5091_v13, %v15690_v61 }
 0x4d3   : > { %v5093_v47 = vrot.slane %v5092_v16, 4 }
 0x4d5   : > { %v5094_v10 = vadd.f32 %v5093_v47, %v5092_v16 }
 0x4d7   : > { %v5095_v55 = vrot.slane %v5094_v10, 2 }
 0x4d9   : > { %v5096_v35 = vadd.f32 %v5095_v55, %v5094_v10 }
 0x4db   : > { %v5097_v4 = vrot.slane %v5096_v35, 1 }
 0x4dd   : > { %v5098_v26 = vadd.f32 %v5097_v4, %v5096_v35 }
 0x4df   : > { %v9980_v40 = vmul.f32 0.00390625, %v5098_v26 }
 0x4e1   : > { %v9985_v9 = vsub.f32 %v5028_v42, %v9980_v40  ;;  %v9990_v53 = vsub.f32 %v5029_v25, %v9980_v40  ;;  %v9995_v47 = vsub.f32 %v5030_v36, %v9980_v40  ;;  %v10004_v48 = vsub.f32 %v5031_v22, %v9980_v40 }
 0x4e2   : > { %v10011_v59 = vsub.f32 %v5032_v34, %v9980_v40  ;;  %v10018_v16 = vsub.f32 %v5033_v44, %v9980_v40  ;;  %v10025_v35 = vsub.f32 %v5034_v23, %v9980_v40  ;;  %v10032_v13 = vsub.f32 %v5035_v20, %v9980_v40 }
 0x4e3   : > { %v5132_v4 = vmul.f32 %v9985_v9, %v9985_v9  ;;  %v5133_v10 = vmul.f32 %v9990_v53, %v9990_v53  ;;  %v5134_v8 = vmul.f32 %v9995_v47, %v9995_v47  ;;  %v5135_v25 = vmul.f32 %v10004_v48, %v10004_v48 }
 0x4e4   : > { %v5136_v51 = vmul.f32 %v10011_v59, %v10011_v59  ;;  %v5137_v15 = vmul.f32 %v10018_v16, %v10018_v16  ;;  %v5138_v21 = vmul.f32 %v10025_v35, %v10025_v35  ;;  %v10039_v55 = vsub.f32 %v5036_v33, %v9980_v40 }
 0x4e5   : > { %v5164_v42 = vadd.f32 %v5133_v10, %v5132_v4  ;;  %v5139_v12 = vmul.f32 %v10032_v13, %v10032_v13  ;;  %v10046_v26 = vsub.f32 %v5037_v38, %v9980_v40  ;;  %v10053_v4 = vsub.f32 %v5038_v3, %v9980_v40 }
 0x4e6   : > { %v5140_v17 = vmul.f32 %v10039_v55, %v10039_v55 }
 0x4e7   : > { %v5165_v36 = vadd.f32 %v5164_v42, %v5134_v8  ;;  %16215 = vst [vmem:[#allocation23_spill] sm:$0xff] %v10046_v26  ;;  %16216 = vst [vmem:[#allocation24_spill] sm:$0xff] %v10053_v4  ;;  %v5141_v54 = vmul.f32 %v10046_v26, %v10046_v26  ;;  %v10065_v8 = vsub.f32 %v5039_v43, %v9980_v40 }
 0x4e8   : > { %v5142_v24 = vmul.f32 %v10053_v4, %v10053_v4  ;;  %v10085_v43 = vsub.f32 %v5041_v41, %v9980_v40 }
 0x4e9   : > { %v5166_v22 = vadd.f32 %v5165_v36, %v5135_v25  ;;  %16217 = vst [vmem:[#allocation25_spill] sm:$0xff] %v10065_v8  ;;  %v10072_v36 = vsub.f32 %v5040_v2, %v9980_v40 }
 0x4ea   : > { %16219 = vst [vmem:[#allocation27_spill] sm:$0xff] %v10085_v43  ;;  %v5145_v60 = vmul.f32 %v10085_v43, %v10085_v43 }
 0x4eb   : > { %v5167_v34 = vadd.f32 %v5166_v22, %v5136_v51  ;;  %16218 = vst [vmem:[#allocation26_spill] sm:$0xff] %v10072_v36  ;;  %v5143_v51 = vmul.f32 %v10065_v8, %v10065_v8  ;;  %v5144_v56 = vmul.f32 %v10072_v36, %v10072_v36 }
 0x4ed   : > { %v5168_v44 = vadd.f32 %v5167_v34, %v5137_v15 }
 0x4ef   : > { %v5169_v23 = vadd.f32 %v5168_v44, %v5138_v21  ;;  %v10097_v44 = vsub.f32 %v5042_v50, %v9980_v40 }
 0x4f1   : > { %v5170_v20 = vadd.f32 %v5169_v23, %v5139_v12  ;;  %16220 = vst [vmem:[#allocation28_spill] sm:$0xff] %v10097_v44  ;;  %v5146_v52 = vmul.f32 %v10097_v44, %v10097_v44 }
 0x4f3   : > { %v5171_v33 = vadd.f32 %v5170_v20, %v5140_v17 }
 0x4f5   : > { %v5172_v3 = vadd.f32 %v5171_v33, %v5141_v54  ;;  %v10108_v54 = vsub.f32 %v5043_v29, %v9980_v40 }
 0x4f7   : > { %v5173_v22 = vadd.f32 %v5172_v3, %v5142_v24  ;;  %16221 = vst [vmem:[#allocation29_spill] sm:$0xff] %v10108_v54  ;;  %v10119_v3 = vsub.f32 %v5044_v11, %v9980_v40  ;;  %v5147_v39 = vmul.f32 %v10108_v54, %v10108_v54 }
 0x4f9   : > { %v5174_v2 = vadd.f32 %v5173_v22, %v5143_v51  ;;  %16222 = vst [vmem:[#allocation31_spill] sm:$0xff] %v10119_v3  ;;  %v10130_v51 = vsub.f32 %v5045_v1, %v9980_v40  ;;  %v5148_v22 = vmul.f32 %v10119_v3, %v10119_v3 }
 0x4fb   : > { %v5175_v41 = vadd.f32 %v5174_v2, %v5144_v56  ;;  %16223 = vst [vmem:[#allocation32_spill] sm:$0xff] %v10130_v51  ;;  %v16224_v2 = vmax.f32 %v9892_v6, 0.0 }
 0x4fd   : > { %v5176_v50 = vadd.f32 %v5175_v41, %v5145_v60  ;;  %v5149_v60 = vmul.f32 %v10130_v51, %v10130_v51 }
 0x4ff   : > { %v5177_v29 = vadd.f32 %v5176_v50, %v5146_v52 }
 0x501   : > { %v5178_v7 = vadd.f32 %v5177_v29, %v5147_v39  ;;  %v16228_v29 = vmax.f32 %v9904_v62, 0.0 }
 0x503   : > { %v5179_v19 = vadd.f32 %v5178_v7, %v5148_v22 }
 0x505   : > { %v5180_v50 = vadd.f32 %v5179_v19, %v5149_v60 }
 0x508   : > { %v7251_v10 = vpop.f32.mrb[0].mxu0 }
 0x509   : > { %v2429_v38 = vpop.f32.mrb[1].mxu0  ;;  %v10090_v34 = vadd.f32 %v7251_v10, %v10060_v14 }
 0x50a   : > { %v7252_v42 = vpop.f32.mrb[2].mxu0  ;;  %v10077_v15 = vadd.f32 %v10060_v14, %v2429_v38 }
 0x50b   : > { %v2432_v25 = vpop.f32.mrb[3].mxu0  ;;  %v10102_v12 = vadd.f32 %v7252_v42, %v10060_v14 }
 0x50c   : > { %v10080_v5 = vadd.f32 %v10060_v14, %v2432_v25 }
 0x50e   : > { %v2558_v21 = vadd.f32 %v10080_v5, %v10077_v15 }
 0x510   : > { %v2559_v23 = vadd.f32 %v2558_v21, %v10090_v34  ;;  %v7255_v17 = vpop.f32.mrb[4].mxu0  ;;  %v10141_v21 = vsub.f32 %v16224_v2, %v9980_v40  ;;  %v16230_v2 = vmax.f32 %v9910_v0, 0.0 }
 0x511   : > { %v2445_v20 = vpop.f32.mrb[5].mxu0  ;;  %v10135_v11 = vadd.f32 %v7255_v17, %v10060_v14  ;;  %v16226_v17 = vmax.f32 %v9898_v63, 0.0 }
 0x512   : > { %v10113_v33 = vadd.f32 %v10060_v14, %v2445_v20  ;;  %v2560_v10 = vadd.f32 %v2559_v23, %v10102_v12  ;;  %v7256_v38 = vpop.f32.mrb[6].mxu0  ;;  %16225 = vst [vmem:[#allocation33_spill] sm:$0xff] %v10141_v21  ;;  %v5150_v6 = vmul.f32 %v10141_v21, %v10141_v21  ;;  %v10174_v60 = vsub.f32 %v16230_v2, %v9980_v40 }
 0x513   : > { %v2448_v24 = vpop.f32.mrb[7].mxu0  ;;  %v10146_v1 = vadd.f32 %v7256_v38, %v10060_v14  ;;  %v10152_v52 = vsub.f32 %v16226_v17, %v9980_v40  ;;  %v16232_v17 = vmax.f32 %v9916_v49, 0.0 }
 0x514   : > { %v2561_v42 = vadd.f32 %v2560_v10, %v10113_v33  ;;  %v10125_v25 = vadd.f32 %v10060_v14, %v2448_v24  ;;  %v5181_v22 = vadd.f32 %v5180_v50, %v5150_v6  ;;  %16231 = vst [vmem:[#allocation41_spill] sm:$0xff] %v10174_v60  ;;  %v5153_v50 = vmul.f32 %v10174_v60, %v10174_v60 }
 0x515   : > { %16227 = vst [vmem:[#allocation34_spill] sm:$0xff] %v10152_v52  ;;  %v5151_v63 = vmul.f32 %v10152_v52, %v10152_v52  ;;  %v10185_v6 = vsub.f32 %v16232_v17, %v9980_v40 }
 0x516   : > { %v2562_v56 = vadd.f32 %v2561_v42, %v10125_v25  ;;  %v10163_v42 = vsub.f32 %v16228_v29, %v9980_v40 }
 0x517   : > { %v5182_v62 = vadd.f32 %v5181_v22, %v5151_v63  ;;  %16233 = vst [vmem:[#allocation42_spill] sm:$0xff] %v10185_v6  ;;  %v5154_v49 = vmul.f32 %v10185_v6, %v10185_v6 }
 0x518   : > { %v2563_v41 = vadd.f32 %v2562_v56, %v10135_v11  ;;  %v7259_v23 = vpop.f32.mrb[8].mxu0  ;;  %16229 = vst [vmem:[#allocation40_spill] sm:$0xff] %v10163_v42  ;;  %v5152_v19 = vmul.f32 %v10163_v42, %v10163_v42 }
 0x519   : > { %v2461_v20 = vpop.f32.mrb[9].mxu0 }
 0x51a   : > { %v10157_v10 = vadd.f32 %v10060_v14, %v2461_v20  ;;  %v2564_v24 = vadd.f32 %v2563_v41, %v10146_v1  ;;  %v7260_v38 = vpop.f32.mrb[10].mxu0  ;;  %v10179_v41 = vadd.f32 %v7259_v23, %v10060_v14  ;;  %v5183_v0 = vadd.f32 %v5182_v62, %v5152_v19 }
 0x51b   : > { %v2464_v39 = vpop.f32.mrb[11].mxu0  ;;  %v16234_v23 = vmax.f32 %v9922_v57, 0.0 }
 0x51c   : > { %v2565_v7 = vadd.f32 %v2564_v24, %v10157_v10  ;;  %v10169_v56 = vadd.f32 %v10060_v14, %v2464_v39  ;;  %v10190_v24 = vadd.f32 %v7260_v38, %v10060_v14 }
 0x51d   : > { %v10196_v22 = vsub.f32 %v16234_v23, %v9980_v40 }
 0x51e   : > { %v2566_v20 = vadd.f32 %v2565_v7, %v10169_v56  ;;  %v5184_v7 = vadd.f32 %v5183_v0, %v5153_v50  ;;  %v16238_v0 = vmax.f32 %v9934_v32, 0.0 }
 0x51f   : > { %16235 = vst [vmem:[#allocation43_spill] sm:$0xff] %v10196_v22  ;;  %v5155_v57 = vmul.f32 %v10196_v22, %v10196_v22 }
 0x520   : > { %v2567_v39 = vadd.f32 %v2566_v20, %v10179_v41  ;;  %v7263_v29 = vpop.f32.mrb[12].mxu0  ;;  %v16236_v20 = vmax.f32 %v9928_v30, 0.0  ;;  %v5185_v23 = vadd.f32 %v5184_v7, %v5154_v49  ;;  %v16240_v49 = vmax.f32 %v9940_v58, 0.0 }
 0x521   : > { %v2477_v63 = vpop.f32.mrb[13].mxu0 }
 0x522   : > { %v10201_v2 = vadd.f32 %v10060_v14, %v2477_v63  ;;  %v2568_v19 = vadd.f32 %v2567_v39, %v10190_v24  ;;  %v7264_v38 = vpop.f32.mrb[14].mxu0  ;;  %v10207_v17 = vsub.f32 %v16236_v20, %v9980_v40  ;;  %v10218_v39 = vsub.f32 %v16238_v0, %v9980_v40 }
 0x523   : > { %v2480_v62 = vpop.f32.mrb[15].mxu0  ;;  %v5186_v30 = vadd.f32 %v5185_v23, %v5155_v57  ;;  %v10223_v20 = vadd.f32 %v7263_v29, %v10060_v14  ;;  %v10229_v7 = vsub.f32 %v16240_v49, %v9980_v40  ;;  %v16242_v29 = vmax.f32 %v9946_v37, 0.0 }
 0x524   : > { %16237 = vst [vmem:[#allocation44_spill] sm:$0xff] %v10207_v17  ;;  %v2569_v61 = vadd.f32 %v2568_v19, %v10201_v2  ;;  %v10213_v50 = vadd.f32 %v10060_v14, %v2480_v62  ;;  %16239 = vst [vmem:[#allocation45_spill] sm:$0xff] %v10218_v39  ;;  %v5156_v63 = vmul.f32 %v10207_v17, %v10207_v17 }
 0x525   : > { %16241 = vst [vmem:[#allocation46_spill] sm:$0xff] %v10229_v7  ;;  %v5157_v19 = vmul.f32 %v10218_v39, %v10218_v39  ;;  %v10234_v62 = vadd.f32 %v7264_v38, %v10060_v14  ;;  %v5158_v58 = vmul.f32 %v10229_v7, %v10229_v7 }
 0x526   : > { %v2570_v28 = vadd.f32 %v2569_v61, %v10213_v50  ;;  %v5187_v32 = vadd.f32 %v5186_v30, %v5156_v63  ;;  %v10240_v61 = vsub.f32 %v16242_v29, %v9980_v40 }
 0x528   : > { %v2571_v0 = vadd.f32 %v2570_v28, %v10223_v20  ;;  %v7267_v57 = vpop.f32.mrb[16].mxu0  ;;  %16243 = vst [vmem:[#allocation18_spill] sm:$0xff] %v10240_v61  ;;  %v5188_v49 = vadd.f32 %v5187_v32, %v5157_v19  ;;  %v16244_v28 = vmax.f32 %v9952_v46, 0.0  ;;  %v5159_v37 = vmul.f32 %v10240_v61, %v10240_v61 }
 0x529   : > { %v2493_v23 = vpop.f32.mrb[17].mxu0  ;;  %v16246_v32 = vmax.f32 %v9958_v45, 0.0 }
 0x52a   : > { %v10245_v18 = vadd.f32 %v10060_v14, %v2493_v23  ;;  %v2572_v63 = vadd.f32 %v2571_v0, %v10234_v62  ;;  %v7268_v38 = vpop.f32.mrb[18].mxu0  ;;  %v10251_v39 = vsub.f32 %v16244_v28, %v9980_v40  ;;  %v5189_v29 = vadd.f32 %v5188_v49, %v5158_v58 }
 0x52b   : > { %v2496_v30 = vpop.f32.mrb[19].mxu0  ;;  %v10262_v0 = vsub.f32 %v16246_v32, %v9980_v40  ;;  %v10267_v28 = vadd.f32 %v7267_v57, %v10060_v14  ;;  %v16248_v58 = vmax.f32 %v9964_v27, 0.0  ;;  %v16250_v57 = vmax.f32 %v9970_v31, 0.0 }
 0x52c   : > { %16245 = vst [vmem:[#allocation30_spill] sm:$0xff] %v10251_v39  ;;  %v2573_v17 = vadd.f32 %v2572_v63, %v10245_v18  ;;  %v10257_v19 = vadd.f32 %v10060_v14, %v2496_v30  ;;  %v5160_v23 = vmul.f32 %v10251_v39, %v10251_v39  ;;  %v5190_v46 = vadd.f32 %v5189_v29, %v5159_v37 }
 0x52d   : > { %16247 = vst [vmem:[#allocation19_spill] sm:$0xff] %v10262_v0  ;;  %v10273_v49 = vsub.f32 %v16248_v58, %v9980_v40  ;;  %v5161_v63 = vmul.f32 %v10262_v0, %v10262_v0  ;;  %v10278_v30 = vadd.f32 %v7268_v38, %v10060_v14 }
 0x52e   : > { %v2574_v61 = vadd.f32 %v2573_v17, %v10257_v19  ;;  %v5191_v45 = vadd.f32 %v5190_v46, %v5160_v23  ;;  %v10284_v17 = vsub.f32 %v16250_v57, %v9980_v40 }
 0x52f   : > { %16249 = vst [vmem:[#allocation20_spill] sm:$0xff] %v10273_v49  ;;  %v5162_v27 = vmul.f32 %v10273_v49, %v10273_v49 }
 0x530   : > { %v2575_v32 = vadd.f32 %v2574_v61, %v10267_v28  ;;  %v7271_v37 = vpop.f32.mrb[20].mxu0  ;;  %16251 = vst [vmem:[#allocation21_spill] sm:$0xff] %v10284_v17  ;;  %v5192_v58 = vadd.f32 %v5191_v45, %v5161_v63  ;;  %v5163_v61 = vmul.f32 %v10284_v17, %v10284_v17 }
 0x531   : > { %v2509_v29 = vpop.f32.mrb[21].mxu0  ;;  %v10299_v57 = vadd.f32 %v7271_v37, %v10060_v14 }
 0x532   : > { %v10289_v39 = vadd.f32 %v10060_v14, %v2509_v29  ;;  %v2576_v23 = vadd.f32 %v2575_v32, %v10278_v30  ;;  %v7272_v38 = vpop.f32.mrb[22].mxu0  ;;  %v5193_v0 = vadd.f32 %v5192_v58, %v5162_v27 }
 0x533   : > { %v2512_v46 = vpop.f32.mrb[23].mxu0  ;;  %v10303_v32 = vadd.f32 %v7272_v38, %v10060_v14 }
 0x534   : > { %v2577_v7 = vadd.f32 %v2576_v23, %v10289_v39  ;;  %v10296_v31 = vadd.f32 %v10060_v14, %v2512_v46  ;;  %v5194_v40 = vadd.f32 %v5193_v0, %v5163_v61 }
 0x536   : > { %v2578_v63 = vadd.f32 %v2577_v7, %v10296_v31  ;;  %v5195_v45 = vrot.slane %v5194_v40, 4 }
 0x538   : > { %v2579_v29 = vadd.f32 %v2578_v63, %v10299_v57  ;;  %v7275_v49 = vpop.f32.mrb[24].mxu0  ;;  %v5196_v27 = vadd.f32 %v5195_v45, %v5194_v40 }
 0x539   : > { %v2525_v17 = vpop.f32.mrb[25].mxu0  ;;  %v10315_v22 = vadd.f32 %v7275_v49, %v10060_v14 }
 0x53a   : > { %v10307_v58 = vadd.f32 %v10060_v14, %v2525_v17  ;;  %v2580_v23 = vadd.f32 %v2579_v29, %v10303_v32  ;;  %v7276_v0 = vpop.f32.mrb[26].mxu0  ;;  %v5197_v37 = vrot.slane %v5196_v27, 2 }
 0x53b   : > { %v2528_v46 = vpop.f32.mrb[27].mxu0  ;;  %v10319_v17 = vadd.f32 %v7276_v0, %v10060_v14 }
 0x53c   : > { %v2581_v61 = vadd.f32 %v2580_v23, %v10307_v58  ;;  %v10312_v7 = vadd.f32 %v10060_v14, %v2528_v46  ;;  %v5198_v38 = vadd.f32 %v5197_v37, %v5196_v27 }
 0x53e   : > { %v2582_v63 = vadd.f32 %v2581_v61, %v10312_v7  ;;  %v5199_v40 = vrot.slane %v5198_v38, 1 }
 0x540   : > { %v2583_v45 = vadd.f32 %v2582_v63, %v10315_v22  ;;  %v7279_v29 = vpop.f32.mrb[28].mxu0  ;;  %v5200_v60 = vadd.f32 %v5199_v40, %v5198_v38 }
 0x541   : > { %v2541_v6 = vpop.f32.mrb[29].mxu0  ;;  %v10331_v52 = vadd.f32 %v7279_v29, %v10060_v14 }
 0x542   : > { %v10323_v23 = vadd.f32 %v10060_v14, %v2541_v6  ;;  %v2584_v46 = vadd.f32 %v2583_v45, %v10319_v17  ;;  %v7280_v27 = vpop.f32.mrb[30].mxu0  ;;  %v5201_v49 = vmul.f32 0.00390625, %v5200_v60 }
 0x543   : > { %v2544_v37 = vpop.f32.mrb[31].mxu0  ;;  %v10335_v6 = vadd.f32 %v7280_v27, %v10060_v14 }
 0x544   : > { %v2585_v42 = vadd.f32 %v2584_v46, %v10323_v23  ;;  %v10328_v61 = vadd.f32 %v10060_v14, %v2544_v37  ;;  %v5238_v0 = vadd.f32 1e-05, %v5201_v49 }
 0x546   : > { %v2586_v63 = vadd.f32 %v2585_v42, %v10328_v61  ;;  %7704 = vrsqrt.f32 %v5238_v0  ;;  %v10345_v42 = vld [vmem:[%s15582_s3 + $0x2] ss:$0 sm:$0xff] }
 0x547   : > { %v5206_v0 = vmul.f32 %v10345_v42, %v9985_v9  ;;  %v5209_v3 = vmul.f32 %v10345_v42, %v10004_v48 }
 0x548   : > { %v2587_v38 = vadd.f32 %v2586_v63, %v10331_v52  ;;  %v7347_v40 = vpop.f32.mrb[32].mxu0  ;;  %v5207_v63 = vmul.f32 %v10345_v42, %v9990_v53 }
 0x549   : > { %v3920_v45 = vpop.f32.mrb[33].mxu0 }
 0x54a   : > { %v2588_v60 = vadd.f32 %v2587_v38, %v10335_v6  ;;  %v7348_v46 = vpop.f32.mrb[34].mxu0 }
 0x54b   : > { %v3923_v21 = vpop.f32.mrb[35].mxu0 }
 0x54c   : > { %v2589_v37 = vrot.slane %v2588_v60, 4  ;;  %v10340_v49 = vadd.f32 %v10060_v14, %v3923_v21 }
 0x54e   : > { %v2590_v51 = vadd.f32 %v2589_v37, %v2588_v60  ;;  %16252 = vst [vmem:[#allocation22_spill] sm:$0xff] %v10340_v49  ;;  %v10356_v60 = vadd.f32 %v10060_v14, %v3920_v45  ;;  %v5208_v37 = vmul.f32 %v10345_v42, %v9995_v47  ;;  %v10372_v45 = vld [vmem:[%s15582_s3 + $0x3] ss:$0 sm:$0xff] }
 0x550   : > { %v2591_v29 = vrot.slane %v2590_v51, 2  ;;  %v10347_v27 = vpop.f32.mrb[36].mxu0  ;;  %v10353_v38 = vpop.eup %7704  ;;  %16253 = vst [vmem:[#allocation35_spill] sm:$0xff] %v10356_v60  ;;  %v4049_v53 = vadd.f32 %v10340_v49, %v10356_v60 }
 0x551   : > { %v3936_v21 = vpop.f32.mrb[37].mxu0  ;;  %v5240_v9 = vmul.f32 %v10353_v38, %v5206_v0  ;;  %v5241_v47 = vmul.f32 %v10353_v38, %v5207_v63  ;;  %v5242_v36 = vmul.f32 %v10353_v38, %v5208_v37  ;;  %v5243_v48 = vmul.f32 %v10353_v38, %v5209_v3 }
 0x552   : > { %v2592_v54 = vadd.f32 %v2591_v29, %v2590_v51  ;;  %v10362_v44 = vpop.f32.mrb[38].mxu0  ;;  %v10379_v0 = vadd.f32 %v7347_v40, %v10060_v14  ;;  %v10390_v40 = vadd.f32 %v7348_v46, %v10060_v14 }
 0x553   : > { %v10367_v43 = vpop.f32.mrb[39].mxu0  ;;  %v5276_v29 = vadd.f32 %v10372_v45, %v5240_v9  ;;  %v5277_v49 = vadd.f32 %v10372_v45, %v5241_v47  ;;  %v5278_v60 = vadd.f32 %v10372_v45, %v5242_v36  ;;  %v5279_v8 = vadd.f32 %v10372_v45, %v5243_v48  ;;  %v10502_v48 = vld [vmem:[#allocation11] sm:$0xff]  }
 0x554   : > { %v2593_v51 = vrot.slane %v2592_v54, 1  ;;  %16254 = vst [vmem:[#allocation36_spill] sm:$0xff] %v10379_v0  ;;  %v4050_v63 = vadd.f32 %v4049_v53, %v10379_v0  ;;  %16255 = vst [vmem:[#allocation37_spill] sm:$0xff] %v10390_v40  ;;  %7281 = vmatprep.subr.bf16.mxu1 %v10502_v48 }
 0x555   : > { %5839 = vst [vmem:[#allocation12] sm:$0xff] %v5276_v29  ;;  %v5308_v26 = vpack.c.bf16 %v5277_v49, %v5276_v29  ;;  %5840 = vst [vmem:[#allocation12 + $0x30] sm:$0xff] %v5277_v49  ;;  %v5309_v37 = vpack.c.bf16 %v5279_v8, %v5278_v60  ;;  %7282 = vmatpush3.bf16.msra.mxu1 %v10502_v48  ;;  %v10521_v29 = vadd.f32 %v10060_v14, %v10367_v43 }
 0x556   : > { %v2594_v4 = vadd.f32 %v2593_v51, %v2592_v54  ;;  %5841 = vst [vmem:[#allocation12 + $0x60] sm:$0xff] %v5278_v60  ;;  %5842 = vst [vmem:[#allocation12 + $0x90] sm:$0xff] %v5279_v8  ;;  %v10397_v54 = vadd.f32 %v10060_v14, %v3936_v21  ;;  %v4051_v49 = vadd.f32 %v4050_v63, %v10390_v40 }
 0x557   : > { %7441 = vmatprep.mubr.bf16.mxu0 %v5308_v26  ;;  %16278 = vst [vmem:[#allocation67_spill] sm:$0xff] %v10521_v29 }
 0x558   : > { %v10385_v3 = vmul.f32 0.00390625, %v2594_v4  ;;  %v10387_v9 = vpop.f32.mrb[40].mxu0  ;;  %7442 = vmatmul.mubr.bf16.vlgmr.msra.gmra.mrb[64].mxu0 %v5309_v37  ;;  %16256 = vst [vmem:[#allocation38_spill] sm:$0xff] %v10397_v54 }
 0x559   : > { %v10392_v47 = vpop.f32.mrb[41].mxu0 }
 0x55a   : > { %v10394_v36 = vpop.f32.mrb[42].mxu0  ;;  %v10404_v4 = vsub.f32 %v10157_v10, %v10385_v3  ;;  %v10408_v8 = vsub.f32 %v10169_v56, %v10385_v3  ;;  %v10412_v26 = vsub.f32 %v10179_v41, %v10385_v3  ;;  %v10416_v46 = vsub.f32 %v10190_v24, %v10385_v3 }
 0x55b   : > { %v10400_v60 = vpop.f32.mrb[43].mxu0  ;;  %v10420_v21 = vsub.f32 %v10201_v2, %v10385_v3  ;;  %v10424_v10 = vsub.f32 %v10213_v50, %v10385_v3  ;;  %v10428_v56 = vsub.f32 %v10223_v20, %v10385_v3  ;;  %v10432_v41 = vsub.f32 %v10234_v62, %v10385_v3 }
 0x55c   : > { %16257 = vst [vmem:[#allocation39_spill] sm:$0xff] %v10404_v4  ;;  %16258 = vst [vmem:[#allocation47_spill] sm:$0xff] %v10408_v8  ;;  %v10436_v24 = vsub.f32 %v10245_v18, %v10385_v3  ;;  %v10440_v2 = vsub.f32 %v10257_v19, %v10385_v3  ;;  %v10444_v50 = vsub.f32 %v10267_v28, %v10385_v3 }
 0x55d   : > { %16259 = vst [vmem:[#allocation48_spill] sm:$0xff] %v10412_v26  ;;  %16260 = vst [vmem:[#allocation49_spill] sm:$0xff] %v10416_v46  ;;  %v10448_v20 = vsub.f32 %v10278_v30, %v10385_v3  ;;  %v10452_v62 = vsub.f32 %v10289_v39, %v10385_v3  ;;  %v10456_v18 = vsub.f32 %v10296_v31, %v10385_v3 }
 0x55e   : > { %16261 = vst [vmem:[#allocation50_spill] sm:$0xff] %v10420_v21  ;;  %16262 = vst [vmem:[#allocation51_spill] sm:$0xff] %v10424_v10  ;;  %v10460_v19 = vsub.f32 %v10299_v57, %v10385_v3  ;;  %v10464_v28 = vsub.f32 %v10303_v32, %v10385_v3  ;;  %v10468_v30 = vsub.f32 %v10307_v58, %v10385_v3 }
 0x55f   : > { %16263 = vst [vmem:[#allocation52_spill] sm:$0xff] %v10428_v56  ;;  %16264 = vst [vmem:[#allocation53_spill] sm:$0xff] %v10432_v41  ;;  %v10472_v39 = vsub.f32 %v10312_v7, %v10385_v3  ;;  %v10476_v31 = vsub.f32 %v10315_v22, %v10385_v3  ;;  %v10480_v57 = vsub.f32 %v10319_v17, %v10385_v3 }
 0x560   : > { %16265 = vst [vmem:[#allocation54_spill] sm:$0xff] %v10436_v24  ;;  %16266 = vst [vmem:[#allocation55_spill] sm:$0xff] %v10440_v2  ;;  %v10482_v53 = vpop.f32.mrb[44].mxu0  ;;  %v10486_v32 = vsub.f32 %v10323_v23, %v10385_v3  ;;  %v10490_v58 = vsub.f32 %v10328_v61, %v10385_v3  ;;  %v10494_v7 = vsub.f32 %v10331_v52, %v10385_v3 }
 0x561   : > { %16267 = vst [vmem:[#allocation56_spill] sm:$0xff] %v10444_v50  ;;  %16268 = vst [vmem:[#allocation57_spill] sm:$0xff] %v10448_v20  ;;  %v10498_v22 = vsub.f32 %v10335_v6, %v10385_v3  ;;  %v10500_v17 = vpop.f32.mrb[45].mxu0  ;;  %v10506_v23 = vsub.f32 %v10077_v15, %v10385_v3  ;;  %v10510_v61 = vsub.f32 %v10080_v5, %v10385_v3  ;;  %v7693_v15 = vld [vmem:[#allocation11 + $0x8] sm:$0xff]  }
 0x562   : > { %16269 = vst [vmem:[#allocation58_spill] sm:$0xff] %v10452_v62  ;;  %16270 = vst [vmem:[#allocation59_spill] sm:$0xff] %v10456_v18  ;;  %v10512_v51 = vpop.f32.mrb[46].mxu0  ;;  %v4052_v6 = vadd.f32 %v4051_v49, %v10397_v54  ;;  %v10525_v63 = vsub.f32 %v10090_v34, %v10385_v3  ;;  %7283 = vmatprep.subr.bf16.mxu1 %v7693_v15  ;;  %v10533_v40 = vsub.f32 %v10102_v12, %v10385_v3  ;;  %v7694_v34 = vld [vmem:[#allocation11 + $0x10] sm:$0xff]  }
 0x563   : > { %16271 = vst [vmem:[#allocation60_spill] sm:$0xff] %v10460_v19  ;;  %16272 = vst [vmem:[#allocation61_spill] sm:$0xff] %v10464_v28  ;;  %v10514_v52 = vpop.f32.mrb[47].mxu0  ;;  %v2628_v5 = vmul.f32 %v10506_v23, %v10506_v23  ;;  %v2629_v37 = vmul.f32 %v10510_v61, %v10510_v61  ;;  %7284 = vmatpush3.bf16.msra.mxu1 %v7693_v15  ;;  %v10542_v0 = vsub.f32 %v10113_v33, %v10385_v3 }
 0x564   : > { %16273 = vst [vmem:[#allocation62_spill] sm:$0xff] %v10468_v30  ;;  %16274 = vst [vmem:[#allocation63_spill] sm:$0xff] %v10494_v7  ;;  %v4053_v43 = vadd.f32 %v4052_v6, %v10521_v29  ;;  %v10550_v12 = vsub.f32 %v10125_v25, %v10385_v3  ;;  %v10554_v6 = vsub.f32 %v10135_v11, %v10385_v3  ;;  %7285 = vmatprep.subr.bf16.mxu1 %v7694_v34 }
 0x565   : > { %16275 = vst [vmem:[#allocation64_spill] sm:$0xff] %v10498_v22  ;;  %16276 = vst [vmem:[#allocation65_spill] sm:$0xff] %v10506_v23  ;;  %v2660_v23 = vadd.f32 %v2629_v37, %v2628_v5  ;;  %v10558_v15 = vadd.f32 %v10347_v27, %v10060_v14  ;;  %v10564_v5 = vsub.f32 %v10146_v1, %v10385_v3 }
 0x566   : > { %16277 = vst [vmem:[#allocation66_spill] sm:$0xff] %v10510_v61  ;;  %16279 = vst [vmem:[#allocation68_spill] sm:$0xff] %v10525_v63  ;;  %v2630_v61 = vmul.f32 %v10525_v63, %v10525_v63  ;;  %v2631_v37 = vmul.f32 %v10533_v40, %v10533_v40  ;;  %v10570_v11 = vadd.f32 %v10362_v44, %v10060_v14  ;;  %v7695_v63 = vld [vmem:[#allocation11 + $0x18] sm:$0xff]  }
 0x567   : > { %16280 = vst [vmem:[#allocation69_spill] sm:$0xff] %v10554_v6  ;;  %16281 = vst [vmem:[#allocation70_spill] sm:$0xff] %v10558_v15  ;;  %7286 = vmatpush3.bf16.msra.mxu1 %v7694_v34  ;;  %v4054_v29 = vadd.f32 %v4053_v43, %v10558_v15  ;;  %v5210_v27 = vmul.f32 %v10345_v42, %v10011_v59  ;;  %v2632_v7 = vmul.f32 %v10542_v0, %v10542_v0 }
 0x568   : > { %v10535_v49 = vpop.f32.mrb[48].mxu0  ;;  %16282 = vst [vmem:[#allocation71_spill] sm:$0xff] %v10564_v5  ;;  %v2661_v25 = vadd.f32 %v2660_v23, %v2630_v61  ;;  %16283 = vst [vmem:[#allocation72_spill] sm:$0xff] %v10570_v11  ;;  %v10579_v3 = vadd.f32 %v10387_v9, %v10060_v14  ;;  %v5211_v23 = vmul.f32 %v10345_v42, %v10018_v16  ;;  %7287 = vmatprep.subr.bf16.mxu1 %v7695_v63 }
 0x569   : > { %v10538_v54 = vpop.f32.mrb[49].mxu0  ;;  %v2633_v44 = vmul.f32 %v10550_v12, %v10550_v12  ;;  %v2634_v61 = vmul.f32 %v10554_v6, %v10554_v6  ;;  %v5212_v59 = vmul.f32 %v10345_v42, %v10025_v35  ;;  %v5213_v43 = vmul.f32 %v10345_v42, %v10032_v13 }
 0x56a   : > { %v10546_v22 = vpop.f32.mrb[50].mxu0  ;;  %v2662_v1 = vadd.f32 %v2661_v25, %v2631_v37  ;;  %v2635_v9 = vmul.f32 %v10564_v5, %v10564_v5  ;;  %v2636_v34 = vmul.f32 %v10404_v4, %v10404_v4  ;;  %v2637_v16 = vmul.f32 %v10408_v8, %v10408_v8 }
 0x56b   : > { %v10560_v33 = vpop.f32.mrb[51].mxu0  ;;  %7288 = vmatpush3.bf16.msra.mxu1 %v7695_v63  ;;  %v2638_v15 = vmul.f32 %v10412_v26, %v10412_v26  ;;  %v10601_v35 = vmul.f32 %v10416_v46, %v10416_v46  ;;  %v10605_v13 = vmul.f32 %v10420_v21, %v10420_v21  ;;  %v10609_v4 = vmul.f32 %v10424_v10, %v10424_v10 }
 0x56c   : > { %v2663_v37 = vadd.f32 %v2662_v1, %v2632_v7  ;;  %v7696_v7 = vld [vmem:[#allocation11 + $0x20] sm:$0xff]   ;;  %v10615_v63 = vmul.f32 %v10428_v56, %v10428_v56  ;;  %v10619_v1 = vmul.f32 %v10432_v41, %v10432_v41  ;;  %v10623_v46 = vmul.f32 %v10436_v24, %v10436_v24 }
 0x56d   : > { %v10629_v10 = vmul.f32 %v10440_v2, %v10440_v2  ;;  %v10633_v8 = vmul.f32 %v10444_v50, %v10444_v50  ;;  %v10637_v56 = vadd.f32 %v10060_v14, %v10392_v47  ;;  %v4055_v41 = vadd.f32 %v4054_v29, %v10570_v11  ;;  %7289 = vmatprep.subr.bf16.mxu1 %v7696_v7 }
 0x56e   : > { %v2664_v21 = vadd.f32 %v2663_v37, %v2633_v44  ;;  %v10644_v44 = vmul.f32 %v10448_v20, %v10448_v20  ;;  %v10648_v37 = vmul.f32 %v10452_v62, %v10452_v62  ;;  %v10652_v50 = vadd.f32 %v10060_v14, %v10400_v60 }
 0x56f   : > { %7290 = vmatpush3.bf16.msra.mxu1 %v7696_v7  ;;  %v10656_v47 = vmul.f32 %v10456_v18, %v10456_v18  ;;  %v10660_v29 = vmul.f32 %v10460_v19, %v10460_v19  ;;  %v10664_v11 = vmul.f32 %v10464_v28, %v10464_v28  ;;  %v4056_v62 = vadd.f32 %v4055_v41, %v10637_v56 }
 0x570   : > { %v7367_v25 = vpop.f32.mrb[52].mxu0  ;;  %v2665_v2 = vadd.f32 %v2664_v21, %v2634_v61  ;;  %v7697_v21 = vld [vmem:[#allocation11 + $0x28] sm:$0xff]   ;;  %v10669_v60 = vmul.f32 %v10468_v30, %v10468_v30  ;;  %v10673_v7 = vadd.f32 %v10394_v36, %v10060_v14  ;;  %v10677_v19 = vadd.f32 %v10482_v53, %v10060_v14 }
 0x571   : > { %v10611_v5 = vpop.f32.mrb[53].mxu0  ;;  %v4057_v18 = vadd.f32 %v4056_v62, %v10652_v50  ;;  %v10682_v28 = vadd.f32 %v10060_v14, %v10500_v17  ;;  %v10686_v41 = vadd.f32 %v10512_v51, %v10060_v14  ;;  %7291 = vmatprep.subr.bf16.mxu1 %v7697_v21  ;;  %v10694_v53 = vadd.f32 %v10535_v49, %v10060_v14 }
 0x572   : > { %v10625_v26 = vpop.f32.mrb[54].mxu0  ;;  %v2666_v61 = vadd.f32 %v2665_v2, %v2635_v9  ;;  %16284 = vst [vmem:[#allocation73_spill] sm:$0xff] %v10673_v7  ;;  %v10690_v2 = vadd.f32 %v10060_v14, %v10514_v52  ;;  %v5244_v62 = vmul.f32 %v10353_v38, %v5210_v27  ;;  %v5245_v17 = vmul.f32 %v10353_v38, %v5211_v23 }
 0x573   : > { %v10640_v6 = vpop.f32.mrb[55].mxu0  ;;  %16285 = vst [vmem:[#allocation74_spill] sm:$0xff] %v10682_v28  ;;  %7292 = vmatpush3.bf16.msra.mxu1 %v7697_v21  ;;  %v4058_v51 = vadd.f32 %v4057_v18, %v10579_v3  ;;  %v10703_v30 = vadd.f32 %v10060_v14, %v10538_v54  ;;  %v5247_v49 = vmul.f32 %v10353_v38, %v5213_v43 }
 0x574   : > { %v2667_v36 = vadd.f32 %v2666_v61, %v2636_v34  ;;  %v5246_v34 = vmul.f32 %v10353_v38, %v5212_v59  ;;  %v7698_v61 = vld [vmem:[#allocation11 + $0x30] sm:$0xff]   ;;  %v10711_v27 = vadd.f32 %v10546_v22, %v10060_v14  ;;  %v5280_v18 = vadd.f32 %v10372_v45, %v5244_v62 }
 0x575   : > { %v5281_v21 = vadd.f32 %v10372_v45, %v5245_v17  ;;  %v4059_v54 = vadd.f32 %v4058_v51, %v10673_v7  ;;  %v10720_v24 = vadd.f32 %v10060_v14, %v10560_v33  ;;  %7293 = vmatprep.subr.bf16.mxu1 %v7698_v61  ;;  %v5214_v17 = vmul.f32 %v10345_v42, %v10039_v55  ;;  %v16287_v7 = vld [vmem:[#allocation24_spill] sm:$0xff] }
 0x576   : > { %v2668_v20 = vadd.f32 %v2667_v36, %v2637_v16  ;;  %v5282_v43 = vadd.f32 %v10372_v45, %v5246_v34  ;;  %v5283_v16 = vadd.f32 %v10372_v45, %v5247_v49  ;;  %v10727_v36 = vadd.f32 %v7367_v25, %v10060_v14  ;;  %5843 = vst [vmem:[#allocation12 + $0xc0] sm:$0xff] %v5280_v18  ;;  %v16286_v34 = vld [vmem:[#allocation23_spill] sm:$0xff] }
 0x577   : > { %v5310_v62 = vpack.c.bf16 %v5281_v21, %v5280_v18  ;;  %5844 = vst [vmem:[#allocation12 + $0xf0] sm:$0xff] %v5281_v21  ;;  %7294 = vmatpush3.bf16.msra.mxu1 %v7698_v61  ;;  %v4060_v33 = vadd.f32 %v4059_v54, %v10682_v28  ;;  %v5215_v49 = vmul.f32 %v10345_v42, %v16286_v34  ;;  %v16288_v21 = vld [vmem:[#allocation25_spill] sm:$0xff]  ;;  %v16289_v61 = vld [vmem:[#allocation26_spill] sm:$0xff] }
 0x578   : > { %v10696_v9 = vpop.f32.mrb[56].mxu0  ;;  %v2669_v22 = vadd.f32 %v2668_v20, %v2638_v15  ;;  %v5311_v51 = vpack.c.bf16 %v5283_v16, %v5282_v43  ;;  %5845 = vst [vmem:[#allocation12 + $0x120] sm:$0xff] %v5282_v43  ;;  %5846 = vst [vmem:[#allocation12 + $0x150] sm:$0xff] %v5283_v16  ;;  %v5216_v20 = vmul.f32 %v10345_v42, %v16287_v7  ;;  %v7699_v15 = vld [vmem:[#allocation11 + $0x38] sm:$0xff]   ;;  %v16290_v7 = vld [vmem:[#allocation27_spill] sm:$0xff] }
 0x579   : > { %v10705_v52 = vpop.f32.mrb[57].mxu0  ;;  %7445 = vmatprep.mubr.bf16.mxu0 %v5310_v62  ;;  %v5248_v18 = vmul.f32 %v10353_v38, %v5214_v17  ;;  %v5217_v55 = vmul.f32 %v10345_v42, %v16288_v21  ;;  %v5218_v54 = vmul.f32 %v10345_v42, %v16289_v61  ;;  %v4061_v43 = vadd.f32 %v4060_v33, %v10690_v2 }
 0x57a   : > { %v10713_v23 = vpop.f32.mrb[58].mxu0  ;;  %v2670_v25 = vadd.f32 %v2669_v22, %v10601_v35  ;;  %7446 = vmatmul.mubr.bf16.gmra.mrb[68].mxu0 %v5311_v51  ;;  %v5249_v16 = vmul.f32 %v10353_v38, %v5215_v49  ;;  %v5250_v34 = vmul.f32 %v10353_v38, %v5216_v20  ;;  %v5219_v28 = vmul.f32 %v10345_v42, %v16290_v7  ;;  %v16291_v7 = vld [vmem:[#allocation28_spill] sm:$0xff] }
 0x57b   : > { %v10722_v59 = vpop.f32.mrb[59].mxu0  ;;  %v5284_v62 = vadd.f32 %v10372_v45, %v5248_v18  ;;  %v5251_v17 = vmul.f32 %v10353_v38, %v5217_v55  ;;  %v5252_v21 = vmul.f32 %v10353_v38, %v5218_v54  ;;  %7295 = vmatprep.subr.bf16.mxu1 %v7699_v15  ;;  %v4062_v33 = vadd.f32 %v4061_v43, %v10677_v19 }
 0x57c   : > { %v2671_v35 = vadd.f32 %v2670_v25, %v10605_v13  ;;  %v10756_v51 = vadd.f32 %v10060_v14, %v10611_v5  ;;  %v5285_v20 = vadd.f32 %v10372_v45, %v5249_v16  ;;  %v5286_v13 = vadd.f32 %v10372_v45, %v5250_v34  ;;  %7296 = vmatpush3.bf16.msra.mxu1 %v7699_v15 }
 0x57d   : > { %v10765_v18 = vadd.f32 %v10625_v26, %v10060_v14  ;;  %5847 = vst [vmem:[#allocation12 + $0x180] sm:$0xff] %v5284_v62  ;;  %v5287_v61 = vadd.f32 %v10372_v45, %v5251_v17  ;;  %v5253_v5 = vmul.f32 %v10353_v38, %v5219_v28  ;;  %7377 = vmatprep.subr.bf16.mxu1 %v10502_v48 }
 0x57e   : > { %v2672_v25 = vadd.f32 %v2671_v35, %v10609_v4  ;;  %v4063_v54 = vadd.f32 %v4062_v33, %v10686_v41  ;;  %v10775_v15 = vadd.f32 %v10060_v14, %v10640_v6  ;;  %v5312_v43 = vpack.c.bf16 %v5285_v20, %v5284_v62  ;;  %5848 = vst [vmem:[#allocation12 + $0x1b0] sm:$0xff] %v5285_v20  ;;  %v16292_v62 = vld [vmem:[#allocation29_spill] sm:$0xff]  ;;  %v16294_v20 = vld [vmem:[#allocation32_spill] sm:$0xff] }
 0x57f   : > { %5849 = vst [vmem:[#allocation12 + $0x1e0] sm:$0xff] %v5286_v13  ;;  %v5288_v26 = vadd.f32 %v10372_v45, %v5252_v21  ;;  %v10783_v28 = vadd.f32 %v10060_v14, %v10705_v52  ;;  %v5313_v48 = vpack.c.bf16 %v5287_v61, %v5286_v13  ;;  %5850 = vst [vmem:[#allocation12 + $0x210] sm:$0xff] %v5287_v61  ;;  %v16293_v21 = vld [vmem:[#allocation31_spill] sm:$0xff] }
 0x580   : > { %v10748_v22 = vpop.f32.mrb[60].mxu0  ;;  %v2673_v16 = vadd.f32 %v2672_v25, %v10615_v63  ;;  %v5289_v34 = vadd.f32 %v10372_v45, %v5253_v5  ;;  %v4064_v6 = vadd.f32 %v4063_v54, %v10703_v30  ;;  %7449 = vmatprep.mubr.bf16.mxu0 %v5312_v43  ;;  %v5220_v35 = vmul.f32 %v10345_v42, %v16291_v7  ;;  %v16295_v25 = vld [vmem:[#allocation33_spill] sm:$0xff] }
 0x581   : > { %v10758_v49 = vpop.f32.mrb[61].mxu0  ;;  %5851 = vst [vmem:[#allocation12 + $0x240] sm:$0xff] %v5288_v26  ;;  %v5221_v17 = vmul.f32 %v10345_v42, %v16292_v62  ;;  %v5222_v63 = vmul.f32 %v10345_v42, %v16293_v21  ;;  %v5223_v13 = vmul.f32 %v10345_v42, %v16294_v20  ;;  %v5224_v61 = vmul.f32 %v10345_v42, %v16295_v25 }
 0x582   : > { %v10767_v55 = vpop.f32.mrb[62].mxu0  ;;  %v2674_v52 = vadd.f32 %v2673_v16, %v10619_v1  ;;  %v5314_v33 = vpack.c.bf16 %v5289_v34, %v5288_v26  ;;  %5852 = vst [vmem:[#allocation12 + $0x270] sm:$0xff] %v5289_v34  ;;  %v4065_v5 = vadd.f32 %v4064_v6, %v10720_v24  ;;  %7450 = vmatmul.mubr.bf16.gmra.mrb[72].mxu0 %v5313_v48  ;;  %v16296_v26 = vld [vmem:[#allocation34_spill] sm:$0xff] }
 0x583   : > { %v10777_v4 = vpop.f32.mrb[63].mxu0  ;;  %v5254_v54 = vmul.f32 %v10353_v38, %v5220_v35  ;;  %v5255_v43 = vmul.f32 %v10353_v38, %v5221_v17  ;;  %v5256_v7 = vmul.f32 %v10353_v38, %v5222_v63  ;;  %v5257_v1 = vmul.f32 %v10353_v38, %v5223_v13  ;;  %v16297_v13 = vld [vmem:[#allocation40_spill] sm:$0xff] }
 0x584   : > { %v2675_v62 = vadd.f32 %v2674_v52, %v10623_v46  ;;  %7453 = vmatprep.mubr.bf16.mxu0 %v5314_v33  ;;  %v5225_v16 = vmul.f32 %v10345_v42, %v16296_v26  ;;  %v5258_v34 = vmul.f32 %v10353_v38, %v5224_v61  ;;  %v4066_v21 = vadd.f32 %v4065_v5, %v10694_v53  ;;  %v16298_v61 = vld [vmem:[#allocation41_spill] sm:$0xff] }
 0x585   : > { %v5290_v48 = vadd.f32 %v10372_v45, %v5254_v54  ;;  %v5291_v6 = vadd.f32 %v10372_v45, %v5255_v43  ;;  %v5292_v35 = vadd.f32 %v10372_v45, %v5256_v7  ;;  %v5293_v46 = vadd.f32 %v10372_v45, %v5257_v1  ;;  %v16299_v7 = vld [vmem:[#allocation42_spill] sm:$0xff] }
 0x586   : > { %v2676_v17 = vadd.f32 %v2675_v62, %v10629_v10  ;;  %v5259_v63 = vmul.f32 %v10353_v38, %v5225_v16  ;;  %v10815_v52 = vadd.f32 %v10372_v45, %v5258_v34  ;;  %v4067_v33 = vadd.f32 %v4066_v21, %v10711_v27  ;;  %v16300_v34 = vld [vmem:[#allocation43_spill] sm:$0xff] }
 0x587   : > { %v5315_v20 = vpack.c.bf16 %v5291_v6, %v5290_v48  ;;  %5853 = vst [vmem:[#allocation12 + $0x2a0] sm:$0xff] %v5290_v48  ;;  %5854 = vst [vmem:[#allocation12 + $0x2d0] sm:$0xff] %v5291_v6  ;;  %v5226_v25 = vmul.f32 %v10345_v42, %v16297_v13  ;;  %v5227_v5 = vmul.f32 %v10345_v42, %v16298_v61 }
 0x588   : > { %5855 = vst [vmem:[#allocation12 + $0x300] sm:$0xff] %v5292_v35  ;;  %v2677_v10 = vadd.f32 %v2676_v17, %v10633_v8  ;;  %v5316_v54 = vpack.c.bf16 %v5293_v46, %v5292_v35  ;;  %5856 = vst [vmem:[#allocation12 + $0x330] sm:$0xff] %v5293_v46  ;;  %v5295_v43 = vadd.f32 %v10372_v45, %v5259_v63  ;;  %v16301_v35 = vld [vmem:[#allocation44_spill] sm:$0xff] }
 0x589   : > { %5857 = vst [vmem:[#allocation12 + $0x360] sm:$0xff] %v10815_v52  ;;  %v5228_v62 = vmul.f32 %v10345_v42, %v16299_v7  ;;  %v4068_v1 = vadd.f32 %v4067_v33, %v10756_v51  ;;  %v5260_v26 = vmul.f32 %v10353_v38, %v5226_v25  ;;  %v5261_v16 = vmul.f32 %v10353_v38, %v5227_v5  ;;  %v16302_v25 = vld [vmem:[#allocation45_spill] sm:$0xff] }
 0x58a   : > { %v5229_v21 = vmul.f32 %v10345_v42, %v16300_v34  ;;  %v2678_v8 = vadd.f32 %v2677_v10, %v10644_v44  ;;  %v10835_v48 = vadd.f32 %v10060_v14, %v10722_v59  ;;  %5858 = vst [vmem:[#allocation12 + $0x390] sm:$0xff] %v5295_v43  ;;  %v5230_v17 = vmul.f32 %v10345_v42, %v16301_v35 }
 0x58b   : > { %v5262_v6 = vmul.f32 %v10353_v38, %v5228_v62  ;;  %v4069_v46 = vadd.f32 %v4068_v1, %v10775_v15  ;;  %7454 = vmatmul.mubr.bf16.gmra.mrb[76].mxu0 %v5315_v20  ;;  %v5296_v63 = vadd.f32 %v10372_v45, %v5260_v26  ;;  %v5297_v33 = vadd.f32 %v10372_v45, %v5261_v16  ;;  %v16303_v62 = vld [vmem:[#allocation46_spill] sm:$0xff] }
 0x58c   : > { %v5263_v13 = vmul.f32 %v10353_v38, %v5229_v21  ;;  %v2679_v44 = vadd.f32 %v2678_v8, %v10648_v37  ;;  %7457 = vmatprep.mubr.bf16.mxu0 %v5316_v54  ;;  %v5231_v61 = vmul.f32 %v10345_v42, %v16302_v25  ;;  %v5264_v5 = vmul.f32 %v10353_v38, %v5230_v17  ;;  %v16304_v16 = vld [vmem:[#allocation18_spill] sm:$0xff]  ;;  %v16307_v25 = vld [vmem:[#allocation20_spill] sm:$0xff] }
 0x58d   : > { %v10846_v59 = vadd.f32 %v10372_v45, %v5262_v6  ;;  %v4070_v10 = vadd.f32 %v4069_v46, %v10727_v36  ;;  %v5317_v20 = vpack.c.bf16 %v5295_v43, %v10815_v52  ;;  %5859 = vst [vmem:[#allocation12 + $0x3c0] sm:$0xff] %v5296_v63  ;;  %5860 = vst [vmem:[#allocation12 + $0x3f0] sm:$0xff] %v5297_v33  ;;  %v16305_v8 = vld [vmem:[#allocation30_spill] sm:$0xff]  ;;  %v16306_v46 = vld [vmem:[#allocation19_spill] sm:$0xff] }
 0x58e   : > { %v5299_v7 = vadd.f32 %v10372_v45, %v5263_v13  ;;  %v5232_v37 = vmul.f32 %v10345_v42, %v16303_v62  ;;  %v2680_v54 = vadd.f32 %v2679_v44, %v10656_v47  ;;  %v5265_v1 = vmul.f32 %v10353_v38, %v5231_v61 }
 0x58f   : > { %5861 = vst [vmem:[#allocation12 + $0x420] sm:$0xff] %v10846_v59  ;;  %v5300_v26 = vadd.f32 %v10372_v45, %v5264_v5  ;;  %v5233_v34 = vmul.f32 %v10345_v42, %v16304_v16  ;;  %v4071_v52 = vadd.f32 %v4070_v10, %v10765_v18  ;;  %v5318_v43 = vpack.c.bf16 %v5297_v33, %v5296_v63 }
 0x590   : > { %5862 = vst [vmem:[#allocation12 + $0x450] sm:$0xff] %v5299_v7  ;;  %v5266_v21 = vmul.f32 %v10353_v38, %v5232_v37  ;;  %v5234_v6 = vmul.f32 %v10345_v42, %v16305_v8  ;;  %v2681_v47 = vadd.f32 %v2680_v54, %v10660_v29  ;;  %v5301_v35 = vadd.f32 %v10372_v45, %v5265_v1  ;;  %v16308_v1 = vld [vmem:[#allocation21_spill] sm:$0xff] }
 0x591   : > { %5863 = vst [vmem:[#allocation12 + $0x480] sm:$0xff] %v5300_v26  ;;  %v5267_v17 = vmul.f32 %v10353_v38, %v5233_v34  ;;  %v5235_v13 = vmul.f32 %v10345_v42, %v16306_v46  ;;  %v4072_v44 = vadd.f32 %v4071_v52, %v10783_v28  ;;  %v5236_v61 = vmul.f32 %v10345_v42, %v16307_v25 }
 0x592   : > { %v5302_v63 = vadd.f32 %v10372_v45, %v5266_v21  ;;  %v5268_v33 = vmul.f32 %v10353_v38, %v5234_v6  ;;  %v2682_v5 = vadd.f32 %v2681_v47, %v10664_v11  ;;  %v10879_v29 = vadd.f32 %v10696_v9, %v10060_v14  ;;  %5864 = vst [vmem:[#allocation12 + $0x4b0] sm:$0xff] %v5301_v35 }
 0x593   : > { %v5303_v10 = vadd.f32 %v10372_v45, %v5267_v17  ;;  %v5269_v62 = vmul.f32 %v10353_v38, %v5235_v13  ;;  %v4073_v37 = vadd.f32 %v4072_v44, %v10835_v48  ;;  %7458 = vmatmul.mubr.bf16.gmra.mrb[80].mxu0 %v5317_v20  ;;  %v5237_v16 = vmul.f32 %v10345_v42, %v16308_v1  ;;  %v7728_v42 = vld [vmem:[%s15584_s5] ss:$0 sm:$0xff]  ;;  %v16310_v1 = vld [vmem:[#allocation64_spill] sm:$0xff] }
 0x594   : > { %5865 = vst [vmem:[#allocation12 + $0x4e0] sm:$0xff] %v5302_v63  ;;  %v5304_v54 = vadd.f32 %v10372_v45, %v5268_v33  ;;  %v5270_v11 = vmul.f32 %v10353_v38, %v5236_v61  ;;  %v2653_v9 = vmul.f32 %v10472_v39, %v10472_v39  ;;  %v2683_v34 = vadd.f32 %v2682_v5, %v10669_v60  ;;  %v16309_v61 = vld [vmem:[#allocation63_spill] sm:$0xff] }
 0x595   : > { %v10893_v52 = vadd.f32 %v10713_v23, %v10060_v14  ;;  %7461 = vmatprep.mubr.bf16.mxu0 %v5318_v43  ;;  %5866 = vst [vmem:[#allocation12 + $0x510] sm:$0xff] %v5303_v10  ;;  %v5305_v20 = vadd.f32 %v10372_v45, %v5269_v62  ;;  %v4074_v21 = vadd.f32 %v4073_v37, %v10879_v29 }
 0x596   : > { %v10901_v8 = vadd.f32 %v7728_v42, %v10758_v49  ;;  %5867 = vst [vmem:[#allocation12 + $0x540] sm:$0xff] %v5304_v54  ;;  %v5271_v60 = vmul.f32 %v10353_v38, %v5237_v16  ;;  %v5306_v6 = vadd.f32 %v10372_v45, %v5270_v11  ;;  %v2654_v14 = vmul.f32 %v10476_v31, %v10476_v31 }
 0x597   : > { %v2684_v23 = vadd.f32 %v2683_v34, %v2653_v9  ;;  %5868 = vst [vmem:[#allocation12 + $0x570] sm:$0xff] %v5305_v20  ;;  %v4075_v43 = vadd.f32 %v4074_v21, %v10893_v52  ;;  %v10909_v47 = vadd.f32 %v7728_v42, %v10777_v4  ;;  %v5319_v17 = vpack.c.bf16 %v5299_v7, %v10846_v59 }
 0x598   : > { %v5307_v49 = vadd.f32 %v10372_v45, %v5271_v60  ;;  %5869 = vst [vmem:[#allocation12 + $0x5a0] sm:$0xff] %v5306_v6  ;;  %v2655_v38 = vmul.f32 %v10480_v57, %v10480_v57  ;;  %v5320_v13 = vpack.c.bf16 %v5301_v35, %v5300_v26  ;;  %v2656_v33 = vmul.f32 %v10486_v32, %v10486_v32 }
 0x599   : > { %v2685_v46 = vadd.f32 %v2684_v23, %v2654_v14  ;;  %v4076_v44 = vadd.f32 %v4075_v43, %v10901_v8  ;;  %v10919_v4 = vadd.f32 %v7728_v42, %v10748_v22  ;;  %v2657_v45 = vmul.f32 %v10490_v58, %v10490_v58 }
 0x59a   : > { %5870 = vst [vmem:[#allocation12 + $0x5d0] sm:$0xff] %v5307_v49  ;;  %v10925_v26 = vadd.f32 %v7728_v42, %v10767_v55  ;;  %v2658_v5 = vmul.f32 %v16309_v61, %v16309_v61  ;;  %v5321_v37 = vpack.c.bf16 %v5303_v10, %v5302_v63  ;;  %v2659_v16 = vmul.f32 %v16310_v1, %v16310_v1  ;;  %v10936_v63 = vld [vmem:[%s15584_s5 + $0x1] ss:$0 sm:$0xff] }
 0x59b   : > { %v2686_v25 = vadd.f32 %v2685_v46, %v2655_v38  ;;  %v4077_v59 = vadd.f32 %v4076_v44, %v10909_v47  ;;  %7462 = vmatmul.mubr.bf16.gmra.mrb[84].mxu0 %v5319_v17  ;;  %v5322_v9 = vpack.c.bf16 %v5305_v20, %v5304_v54  ;;  %v5323_v43 = vpack.c.bf16 %v5307_v49, %v5306_v6  ;;  %v16313_v6 = vld [vmem:[#allocation66_spill] sm:$0xff] }
 0x59c   : > { %7465 = vmatprep.mubr.bf16.mxu0 %v5320_v13  ;;  %16311 = vst [vmem:[#allocation23_spill] sm:$0xff] %v10936_v63  ;;  %v10940_v20 = vmul.f32 %v10936_v63, %v10490_v58  ;;  %v16312_v13 = vld [vmem:[#allocation65_spill] sm:$0xff]  ;;  %v10948_v49 = vmul.f32 %v10936_v63, %v16313_v6  ;;  %v10963_v58 = vld [vmem:[%s15582_s3 + $0x1] ss:$0 sm:$0xff] }
 0x59d   : > { %v2687_v7 = vadd.f32 %v2686_v25, %v2656_v33  ;;  %v4078_v35 = vadd.f32 %v4077_v59, %v10919_v4  ;;  %v10944_v44 = vmul.f32 %v10936_v63, %v16312_v13  ;;  %v16314_v33 = vld [vmem:[#allocation68_spill] sm:$0xff]  ;;  %v10956_v59 = vmul.f32 %v10936_v63, %v10533_v40  ;;  %16315 = vst [vmem:[#allocation24_spill] sm:$0xff] %v10963_v58  ;;  %v16328_v6 = vld [vmem:[#allocation73_spill] sm:$0xff] }
 0x59e   : > { %v10952_v25 = vmul.f32 %v10936_v63, %v16314_v33 }
 0x59f   : > { %v2688_v62 = vadd.f32 %v2687_v7, %v2657_v45  ;;  %v4079_v22 = vadd.f32 %v4078_v35, %v10925_v26  ;;  %v5904_v7 = vld [vmem:[#allocation2 + $0x18] sm:$0xff] }
 0x5a1   : > { %v2689_v11 = vadd.f32 %v2688_v62, %v2658_v5  ;;  %v4080_v34 = vrot.slane %v4079_v22, 4  ;;  %v10967_v5 = vmul.f32 %v10936_v63, %v10542_v0  ;;  %v10971_v62 = vmul.f32 %v10936_v63, %v10550_v12 }
 0x5a3   : > { %v2690_v21 = vadd.f32 %v2689_v11, %v2659_v16  ;;  %v4081_v60 = vadd.f32 %v4080_v34, %v4079_v22  ;;  %7466 = vmatmul.mubr.bf16.gmra.mrb[88].mxu0 %v5321_v37  ;;  %v16316_v22 = vld [vmem:[#allocation69_spill] sm:$0xff]  ;;  %v16317_v16 = vld [vmem:[#allocation71_spill] sm:$0xff] }
 0x5a4   : > { %7469 = vmatprep.mubr.bf16.mxu0 %v5322_v9  ;;  %v10975_v40 = vmul.f32 %v10936_v63, %v16316_v22  ;;  %v5905_v37 = vld [vmem:[#allocation2 + $0x38] sm:$0xff]  ;;  %v10979_v11 = vmul.f32 %v10936_v63, %v16317_v16  ;;  %v16318_v9 = vld [vmem:[#allocation39_spill] sm:$0xff] }
 0x5a5   : > { %v2691_v55 = vrot.slane %v2690_v21, 4  ;;  %v4082_v42 = vrot.slane %v4081_v60, 2  ;;  %v10983_v34 = vmul.f32 %v10936_v63, %v16318_v9  ;;  %v5906_v16 = vld [vmem:[#allocation2 + $0x58] sm:$0xff]  ;;  %v16348_v9 = vld [vmem:[#allocation51_spill] sm:$0xff] }
 0x5a7   : > { %v2692_v14 = vadd.f32 %v2691_v55, %v2690_v21  ;;  %v4083_v23 = vadd.f32 %v4082_v42, %v4081_v60  ;;  %v16319_v21 = vld [vmem:[#allocation47_spill] sm:$0xff]  ;;  %v16320_v60 = vld [vmem:[#allocation48_spill] sm:$0xff]  ;;  %v16321_v42 = vld [vmem:[#allocation49_spill] sm:$0xff] }
 0x5a8   : > { %v10987_v0 = vmul.f32 %v10936_v63, %v16319_v21  ;;  %v10991_v12 = vmul.f32 %v10936_v63, %v16320_v60  ;;  %v16352_v21 = vld [vmem:[#allocation52_spill] sm:$0xff]  ;;  %v16353_v60 = vld [vmem:[#allocation53_spill] sm:$0xff] }
 0x5a9   : > { %v2693_v17 = vrot.slane %v2692_v14, 2  ;;  %v4084_v10 = vrot.slane %v4083_v23, 1 }
 0x5ab   : > { %v2694_v38 = vadd.f32 %v2693_v17, %v2692_v14  ;;  %v4085_v46 = vadd.f32 %v4084_v10, %v4083_v23  ;;  %7470 = vmatmul.mubr.bf16.gmra.mrb[92].mxu0 %v5323_v43  ;;  %v10995_v14 = vmul.f32 %v10936_v63, %v16321_v42  ;;  %v16322_v23 = vld [vmem:[#allocation50_spill] sm:$0xff]  ;;  %v11002_v17 = vadd.f32 %v10963_v58, %v5904_v7 }
 0x5ac   : > { %v10999_v43 = vmul.f32 %v10936_v63, %v16322_v23  ;;  %v16330_v7 = vld [vmem:[#allocation74_spill] sm:$0xff] }
 0x5ad   : > { %v2695_v54 = vrot.slane %v2694_v38, 1  ;;  %v10958_v45 = vmul.f32 0.00390625, %v4085_v46  ;;  %16323 = vst [vmem:[#allocation25_spill] sm:$0xff] %v11002_v17  ;;  %v16354_v42 = vld [vmem:[#allocation54_spill] sm:$0xff] }
 0x5ae   : > { %v2718_v23 = vmul.f32 %v10936_v63, %v16354_v42  ;;  %v16360_v42 = vld [vmem:[#allocation59_spill] sm:$0xff] }
 0x5af   : > { %v2696_v35 = vadd.f32 %v2695_v54, %v2694_v38  ;;  %v11006_v10 = vsub.f32 %v10637_v56, %v10958_v45  ;;  %v11010_v38 = vsub.f32 %v10652_v50, %v10958_v45  ;;  %v11014_v46 = vsub.f32 %v10579_v3, %v10958_v45 }
 0x5b0   : > { %v11017_v54 = vadd.f32 %v10963_v58, %v5905_v37  ;;  %v11021_v33 = vsub.f32 %v16328_v6, %v10958_v45  ;;  %v11025_v56 = vsub.f32 %v16330_v7, %v10958_v45  ;;  %v11029_v50 = vsub.f32 %v10690_v2, %v10958_v45  ;;  %v16356_v6 = vld [vmem:[#allocation56_spill] sm:$0xff] }
 0x5b1   : > { %v2697_v55 = vmul.f32 0.00390625, %v2696_v35  ;;  %16324 = vst [vmem:[#allocation26_spill] sm:$0xff] %v11006_v10  ;;  %16325 = vst [vmem:[#allocation27_spill] sm:$0xff] %v11010_v38  ;;  %v11033_v3 = vsub.f32 %v10677_v19, %v10958_v45  ;;  %v11037_v35 = vsub.f32 %v10686_v41, %v10958_v45  ;;  %v11041_v22 = vsub.f32 %v10703_v30, %v10958_v45 }
 0x5b2   : > { %16326 = vst [vmem:[#allocation28_spill] sm:$0xff] %v11014_v46  ;;  %16327 = vst [vmem:[#allocation29_spill] sm:$0xff] %v11017_v54  ;;  %v11045_v37 = vsub.f32 %v10720_v24, %v10958_v45  ;;  %v11049_v2 = vsub.f32 %v10694_v53, %v10958_v45  ;;  %v11053_v19 = vsub.f32 %v10711_v27, %v10958_v45 }
 0x5b3   : > { %v2734_v13 = vadd.f32 1e-05, %v2697_v55  ;;  %16329 = vst [vmem:[#allocation31_spill] sm:$0xff] %v11021_v33  ;;  %16331 = vst [vmem:[#allocation32_spill] sm:$0xff] %v11025_v56  ;;  %v11057_v41 = vsub.f32 %v10756_v51, %v10958_v45  ;;  %v11061_v30 = vsub.f32 %v10775_v15, %v10958_v45  ;;  %v11065_v24 = vsub.f32 %v10727_v36, %v10958_v45 }
 0x5b4   : > { %16332 = vst [vmem:[#allocation33_spill] sm:$0xff] %v11029_v50  ;;  %16333 = vst [vmem:[#allocation34_spill] sm:$0xff] %v11033_v3  ;;  %v11069_v53 = vsub.f32 %v10765_v18, %v10958_v45  ;;  %v11073_v27 = vsub.f32 %v10783_v28, %v10958_v45  ;;  %v11077_v51 = vsub.f32 %v10835_v48, %v10958_v45 }
 0x5b5   : > { %16334 = vst [vmem:[#allocation40_spill] sm:$0xff] %v11037_v35  ;;  %16335 = vst [vmem:[#allocation41_spill] sm:$0xff] %v11041_v22  ;;  %7706 = vrsqrt.f32 %v2734_v13  ;;  %v11081_v15 = vsub.f32 %v10879_v29, %v10958_v45  ;;  %v11085_v36 = vsub.f32 %v10893_v52, %v10958_v45  ;;  %v11089_v18 = vsub.f32 %v10901_v8, %v10958_v45  ;;  %v16355_v13 = vld [vmem:[#allocation55_spill] sm:$0xff] }
 0x5b6   : > { %16336 = vst [vmem:[#allocation42_spill] sm:$0xff] %v11045_v37  ;;  %16337 = vst [vmem:[#allocation43_spill] sm:$0xff] %v11049_v2  ;;  %v2715_v28 = vmul.f32 %v10936_v63, %v16348_v9  ;;  %v11095_v48 = vsub.f32 %v10909_v47, %v10958_v45  ;;  %v11099_v29 = vsub.f32 %v10919_v4, %v10958_v45 }
 0x5b7   : > { %16338 = vst [vmem:[#allocation44_spill] sm:$0xff] %v11053_v19  ;;  %16339 = vst [vmem:[#allocation45_spill] sm:$0xff] %v11057_v41  ;;  %v11103_v52 = vsub.f32 %v10925_v26, %v10958_v45  ;;  %v2716_v8 = vmul.f32 %v10936_v63, %v16352_v21  ;;  %v2717_v55 = vmul.f32 %v10936_v63, %v16353_v60  ;;  %v16358_v21 = vld [vmem:[#allocation57_spill] sm:$0xff]  ;;  %v16359_v60 = vld [vmem:[#allocation58_spill] sm:$0xff] }
 0x5b8   : > { %16340 = vst [vmem:[#allocation46_spill] sm:$0xff] %v11061_v30  ;;  %16341 = vst [vmem:[#allocation18_spill] sm:$0xff] %v11065_v24  ;;  %v2719_v47 = vmul.f32 %v10936_v63, %v16355_v13  ;;  %v2720_v4 = vmul.f32 %v10936_v63, %v16356_v6  ;;  %v11116_v7 = vadd.f32 %v10963_v58, %v5906_v16  ;;  %v16361_v13 = vld [vmem:[#allocation60_spill] sm:$0xff]  ;;  %v5907_v6 = vld [vmem:[#allocation2 + $0x78] sm:$0xff] }
 0x5b9   : > { %16342 = vst [vmem:[#allocation30_spill] sm:$0xff] %v11069_v53  ;;  %16343 = vst [vmem:[#allocation19_spill] sm:$0xff] %v11073_v27  ;;  %v16362_v16 = vld [vmem:[#allocation61_spill] sm:$0xff]  ;;  %v16363_v26 = vld [vmem:[#allocation62_spill] sm:$0xff]  ;;  %v16366_v27 = vmax.f32 %v11002_v17, 0.0 }
 0x5ba   : > { %16344 = vst [vmem:[#allocation20_spill] sm:$0xff] %v11077_v51  ;;  %16345 = vst [vmem:[#allocation21_spill] sm:$0xff] %v11081_v15  ;;  %v2725_v15 = vmul.f32 %v10936_v63, %v16362_v16  ;;  %v2726_v9 = vmul.f32 %v10936_v63, %v16363_v26  ;;  %v2732_v51 = vmul.f32 %v10936_v63, %v16309_v61  ;;  %v16368_v24 = vld [vmem:[#allocation35_spill] sm:$0xff] }
 0x5bb   : > { %16346 = vst [vmem:[#allocation63_spill] sm:$0xff] %v11085_v36  ;;  %16347 = vst [vmem:[#allocation64_spill] sm:$0xff] %v11089_v18  ;;  %v2724_v18 = vmul.f32 %v10936_v63, %v16361_v13  ;;  %v5908_v36 = vld [vmem:[#allocation2 + $0x98] sm:$0xff]  ;;  %v2730_v13 = vmul.f32 %v10936_v63, %v10486_v32  ;;  %v2733_v16 = vmul.f32 %v10936_v63, %v16310_v1  ;;  %v16370_v1 = vld [vmem:[#allocation22_spill] sm:$0xff] }
 0x5bc   : > { %16349 = vst [vmem:[#allocation65_spill] sm:$0xff] %v11095_v48  ;;  %16350 = vst [vmem:[#allocation66_spill] sm:$0xff] %v11099_v29  ;;  %v2722_v29 = vmul.f32 %v10936_v63, %v16359_v60  ;;  %v2723_v48 = vmul.f32 %v10936_v63, %v16360_v42  ;;  %v2728_v60 = vmul.f32 %v10936_v63, %v10476_v31  ;;  %v16374_v31 = vld [vmem:[#allocation37_spill] sm:$0xff] }
 0x5bd   : > { %16351 = vst [vmem:[#allocation68_spill] sm:$0xff] %v11103_v52  ;;  %16357 = vst [vmem:[#allocation69_spill] sm:$0xff] %v11116_v7  ;;  %v2721_v52 = vmul.f32 %v10936_v63, %v16358_v21  ;;  %v2727_v21 = vmul.f32 %v10936_v63, %v10472_v39  ;;  %v2729_v42 = vmul.f32 %v10936_v63, %v10480_v57  ;;  %v16367_v57 = vmax.f32 %v11017_v54, 0.0 }
 0x5be   : > { %v11145_v26 = vadd.f32 %v10963_v58, %v5907_v6  ;;  %v11148_v39 = vadd.f32 %v10963_v58, %v5908_v36  ;;  %v11157_v61 = vsub.f32 %v16368_v24, %v10958_v45  ;;  %v11161_v63 = vsub.f32 %v16370_v1, %v10958_v45  ;;  %v16372_v6 = vld [vmem:[#allocation36_spill] sm:$0xff] }
 0x5bf   : > { %v6006_v53 = vadd.f32 %v16367_v57, %v16366_v27  ;;  %v7707_v32 = vpop.eup %7706  ;;  %v11165_v36 = vsub.f32 %v16372_v6, %v10958_v45  ;;  %v11169_v30 = vsub.f32 %v16374_v31, %v10958_v45 }
 0x5c0   : > { %16364 = vst [vmem:[#allocation71_spill] sm:$0xff] %v11145_v26  ;;  %16365 = vst [vmem:[#allocation39_spill] sm:$0xff] %v11148_v39  ;;  %v11172_v54 = vmul.f32 %v7707_v32, %v10940_v20  ;;  %v11175_v27 = vmul.f32 %v7707_v32, %v10944_v44  ;;  %v11178_v24 = vmul.f32 %v7707_v32, %v10948_v49 }
 0x5c1   : > { %16369 = vst [vmem:[#allocation47_spill] sm:$0xff] %v11157_v61  ;;  %16371 = vst [vmem:[#allocation48_spill] sm:$0xff] %v11161_v63  ;;  %v11181_v57 = vmul.f32 %v7707_v32, %v10952_v25  ;;  %v11184_v1 = vmul.f32 %v7707_v32, %v10956_v59  ;;  %v11187_v6 = vmul.f32 %v7707_v32, %v10967_v5  ;;  %v16378_v59 = vld [vmem:[#allocation38_spill] sm:$0xff] }
 0x5c2   : > { %16373 = vst [vmem:[#allocation49_spill] sm:$0xff] %v11165_v36  ;;  %16375 = vst [vmem:[#allocation50_spill] sm:$0xff] %v11169_v30  ;;  %v11190_v31 = vmul.f32 %v7707_v32, %v10971_v62  ;;  %v11193_v20 = vmul.f32 %v7707_v32, %v10975_v40  ;;  %v11196_v44 = vmul.f32 %v7707_v32, %v10979_v11 }
 0x5c3   : > { %16376 = vst [vmem:[#allocation73_spill] sm:$0xff] %v11175_v27  ;;  %16377 = vst [vmem:[#allocation74_spill] sm:$0xff] %v11178_v24  ;;  %v11199_v49 = vmul.f32 %v7707_v32, %v10983_v34  ;;  %v11202_v25 = vmul.f32 %v7707_v32, %v10987_v0  ;;  %v11206_v17 = vsub.f32 %v16378_v59, %v10958_v45 }
 0x5c4   : > { %v11209_v5 = vmul.f32 %v7707_v32, %v10991_v12  ;;  %v11212_v62 = vmul.f32 %v7707_v32, %v10995_v14  ;;  %v11215_v40 = vmul.f32 %v7707_v32, %v10999_v43  ;;  %v11217_v11 = vmul.f32 %v7707_v32, %v2715_v28 }
 0x5c5   : > { %16379 = vst [vmem:[#allocation51_spill] sm:$0xff] %v11206_v17  ;;  %v11219_v34 = vmul.f32 %v7707_v32, %v2716_v8  ;;  %v11221_v24 = vmul.f32 %v7707_v32, %v2717_v55  ;;  %v11223_v0 = vmul.f32 %v7707_v32, %v2718_v23  ;;  %v11225_v27 = vmul.f32 %v7707_v32, %v2719_v47  ;;  %v5909_v23 = vld [vmem:[#allocation2 + $0xb8] sm:$0xff] }
 0x5c6   : > { %16380 = vst [vmem:[#allocation52_spill] sm:$0xff] %v11209_v5  ;;  %v11227_v59 = vmul.f32 %v7707_v32, %v2720_v4  ;;  %v11229_v12 = vmul.f32 %v7707_v32, %v2721_v52  ;;  %v11231_v5 = vmul.f32 %v7707_v32, %v2722_v29  ;;  %v11233_v14 = vmul.f32 %v7707_v32, %v2723_v48  ;;  %v5911_v48 = vld [vmem:[#allocation2 + $0xf8] sm:$0xff] }
 0x5c7   : > { %16381 = vst [vmem:[#allocation53_spill] sm:$0xff] %v11223_v0  ;;  %v11235_v43 = vmul.f32 %v7707_v32, %v2724_v18  ;;  %v11237_v28 = vmul.f32 %v7707_v32, %v2725_v15  ;;  %v11239_v8 = vmul.f32 %v7707_v32, %v2726_v9  ;;  %v11241_v55 = vmul.f32 %v7707_v32, %v2727_v21  ;;  %v5910_v0 = vld [vmem:[#allocation2 + $0xd8] sm:$0xff]  ;;  %v16384_v15 = vld [vmem:[#allocation67_spill] sm:$0xff]  ;;  %v16386_v9 = vld [vmem:[#allocation70_spill] sm:$0xff] }
 0x5c8   : > { %16382 = vst [vmem:[#allocation54_spill] sm:$0xff] %v11233_v14  ;;  %v11243_v47 = vmul.f32 %v7707_v32, %v2728_v60  ;;  %v11245_v4 = vmul.f32 %v7707_v32, %v2729_v42  ;;  %v11247_v52 = vmul.f32 %v7707_v32, %v2730_v13  ;;  %v11249_v29 = vmul.f32 %v7707_v32, %v2732_v51  ;;  %v16388_v60 = vld [vmem:[#allocation72_spill] sm:$0xff] }
 0x5c9   : > { %v11251_v14 = vmul.f32 %v7707_v32, %v2733_v16  ;;  %v11255_v18 = vsub.f32 %v16384_v15, %v10958_v45  ;;  %v11259_v21 = vsub.f32 %v16386_v9, %v10958_v45  ;;  %v11266_v42 = vadd.f32 %v10963_v58, %v5909_v23 }
 0x5ca   : > { %16383 = vst [vmem:[#allocation55_spill] sm:$0xff] %v11243_v47  ;;  %v11263_v47 = vsub.f32 %v16388_v60, %v10958_v45  ;;  %v11269_v51 = vadd.f32 %v10963_v58, %v5910_v0  ;;  %v11272_v13 = vadd.f32 %v10963_v58, %v5911_v48  ;;  %v16393_v15 = vmax.f32 %v11116_v7, 0.0  ;;  %v16404_v39 = vld [vmem:[#allocation74_spill] sm:$0xff] }
 0x5cb   : > { %16385 = vst [vmem:[#allocation56_spill] sm:$0xff] %v11255_v18  ;;  %16387 = vst [vmem:[#allocation57_spill] sm:$0xff] %v11259_v21  ;;  %v4119_v45 = vmul.f32 %v11157_v61, %v11157_v61  ;;  %v4120_v23 = vmul.f32 %v11161_v63, %v11161_v63  ;;  %v4121_v0 = vmul.f32 %v11165_v36, %v11165_v36  ;;  %v16397_v36 = vld [vmem:[#allocation18_spill] sm:$0xff] }
 0x5cc   : > { %16389 = vst [vmem:[#allocation58_spill] sm:$0xff] %v11263_v47  ;;  %16390 = vst [vmem:[#allocation59_spill] sm:$0xff] %v11266_v42  ;;  %v11278_v9 = vadd.f32 %v6006_v53, %v16393_v15  ;;  %v4122_v48 = vmul.f32 %v11169_v30, %v11169_v30  ;;  %v4123_v60 = vmul.f32 %v11206_v17, %v11206_v17  ;;  %v16396_v30 = vld [vmem:[#allocation46_spill] sm:$0xff] }
 0x5cd   : > { %16391 = vst [vmem:[#allocation60_spill] sm:$0xff] %v11269_v51  ;;  %16392 = vst [vmem:[#allocation61_spill] sm:$0xff] %v11272_v13  ;;  %v4124_v32 = vmul.f32 %v11255_v18, %v11255_v18  ;;  %v4125_v53 = vmul.f32 %v11259_v21, %v11259_v21  ;;  %v11296_v15 = vmul.f32 %v11263_v47, %v11263_v47  ;;  %v11317_v47 = vld [vmem:[%s15584_s5 + $0x2] ss:$0 sm:$0xff]  ;;  %v16403_v13 = vld [vmem:[#allocation73_spill] sm:$0xff] }
 0x5ce   : > { %16394 = vst [vmem:[#allocation62_spill] sm:$0xff] %v11278_v9  ;;  %v11300_v16 = vmul.f32 %v11006_v10, %v11006_v10  ;;  %v11304_v7 = vmul.f32 %v11010_v38, %v11010_v38  ;;  %v11308_v17 = vmul.f32 %v11014_v46, %v11014_v46  ;;  %v11312_v18 = vmul.f32 %v11021_v33, %v11021_v33 }
 0x5cf   : > { %16395 = vst [vmem:[#allocation35_spill] sm:$0xff] %v11317_v47  ;;  %v11321_v10 = vmul.f32 %v11025_v56, %v11025_v56  ;;  %v11325_v38 = vmul.f32 %v11029_v50, %v11029_v50  ;;  %v11329_v46 = vmul.f32 %v11033_v3, %v11033_v3  ;;  %v11333_v33 = vmul.f32 %v11037_v35, %v11037_v35 }
 0x5d0   : > { %v11337_v21 = vmul.f32 %v11041_v22, %v11041_v22  ;;  %v11341_v56 = vmul.f32 %v11045_v37, %v11045_v37  ;;  %v11345_v50 = vmul.f32 %v11049_v2, %v11049_v2  ;;  %v11349_v3 = vmul.f32 %v11053_v19, %v11053_v19 }
 0x5d1   : > { %v11353_v35 = vmul.f32 %v11057_v41, %v11057_v41  ;;  %v11357_v22 = vmul.f32 %v16396_v30, %v16396_v30  ;;  %v11361_v37 = vmul.f32 %v16397_v36, %v16397_v36  ;;  %v4151_v63 = vadd.f32 %v4120_v23, %v4119_v45 }
 0x5d2   : > { %v11365_v2 = vadd.f32 %v11317_v47, %v11172_v54  ;;  %v2774_v19 = vadd.f32 %v11317_v47, %v11181_v57  ;;  %v2775_v41 = vadd.f32 %v11317_v47, %v11184_v1  ;;  %v2776_v61 = vadd.f32 %v11317_v47, %v11187_v6  ;;  %v16399_v6 = vld [vmem:[#allocation52_spill] sm:$0xff] }
 0x5d3   : > { %16398 = vst [vmem:[#allocation22_spill] sm:$0xff] %v11361_v37  ;;  %v2777_v30 = vadd.f32 %v11317_v47, %v11190_v31  ;;  %v11377_v36 = vadd.f32 %v11317_v47, %v11193_v20  ;;  %v11381_v54 = vadd.f32 %v11317_v47, %v11196_v44  ;;  %v4152_v45 = vadd.f32 %v4151_v63, %v4121_v0  ;;  %v16400_v0 = vld [vmem:[#allocation53_spill] sm:$0xff] }
 0x5d4   : > { %v11385_v57 = vadd.f32 %v11317_v47, %v11199_v49  ;;  %v11389_v1 = vadd.f32 %v11317_v47, %v11202_v25  ;;  %v11393_v31 = vadd.f32 %v11317_v47, %v16399_v6  ;;  %v11397_v20 = vadd.f32 %v11317_v47, %v11212_v62 }
 0x5d5   : > { %v11401_v44 = vadd.f32 %v11317_v47, %v11215_v40  ;;  %v11405_v63 = vadd.f32 %v11317_v47, %v11217_v11  ;;  %v11409_v49 = vadd.f32 %v11317_v47, %v11219_v34  ;;  %v4153_v25 = vadd.f32 %v4152_v45, %v4122_v48  ;;  %v16401_v48 = vld [vmem:[#allocation54_spill] sm:$0xff] }
 0x5d6   : > { %v11413_v23 = vadd.f32 %v11317_v47, %v11221_v24  ;;  %v11417_v62 = vadd.f32 %v11317_v47, %v16400_v0  ;;  %v11421_v40 = vadd.f32 %v11317_v47, %v11225_v27  ;;  %v11425_v11 = vadd.f32 %v11317_v47, %v11227_v59 }
 0x5d7   : > { %v11429_v34 = vadd.f32 %v11317_v47, %v11229_v12  ;;  %v11433_v24 = vadd.f32 %v11317_v47, %v11231_v5  ;;  %v11437_v45 = vadd.f32 %v11317_v47, %v16401_v48  ;;  %v4154_v6 = vadd.f32 %v4153_v25, %v4123_v60  ;;  %v11458_v60 = vld [vmem:[%s15584_s5 + $0x3] ss:$0 sm:$0xff]  ;;  %v16402_v25 = vld [vmem:[#allocation55_spill] sm:$0xff] }
 0x5d8   : > { %v11441_v27 = vadd.f32 %v11317_v47, %v11235_v43  ;;  %v11445_v59 = vadd.f32 %v11317_v47, %v11237_v28  ;;  %v11449_v12 = vadd.f32 %v11317_v47, %v11239_v8  ;;  %v11453_v5 = vadd.f32 %v11317_v47, %v11241_v55 }
 0x5d9   : > { %v11462_v43 = vadd.f32 %v11317_v47, %v16402_v25  ;;  %v11466_v28 = vadd.f32 %v11317_v47, %v11245_v4  ;;  %v11470_v8 = vadd.f32 %v11317_v47, %v11247_v52  ;;  %v4155_v0 = vadd.f32 %v4154_v6, %v4124_v32 }
 0x5da   : > { %v11474_v55 = vadd.f32 %v11317_v47, %v11249_v29  ;;  %v11478_v48 = vadd.f32 %v11317_v47, %v11251_v14  ;;  %v2772_v25 = vadd.f32 %v11317_v47, %v16403_v13  ;;  %v2773_v4 = vadd.f32 %v11317_v47, %v16404_v39 }
 0x5db   : > { %v4156_v51 = vadd.f32 %v4155_v0, %v4125_v53  ;;  %vm2807_vm0 = vcmp.gt.f32.partialorder %v2774_v19, 0.0  ;;  %vm2808_vm1 = vcmp.gt.f32.partialorder %v2775_v41, 0.0  ;;  %v2843_v52 = vmul.f32 %v11458_v60, %v2774_v19 }
 0x5dc   : > { %vm2805_vm2 = vcmp.gt.f32.partialorder %v2772_v25, 0.0  ;;  %vm2806_vm3 = vcmp.gt.f32.partialorder %v2773_v4, 0.0  ;;  %v2841_v29 = vmul.f32 %v11458_v60, %v2772_v25  ;;  %v2842_v32 = vmul.f32 %v11458_v60, %v2773_v4 }
 0x5dd   : > { %v4157_v14 = vadd.f32 %v4156_v51, %v11296_v15  ;;  %v2844_v6 = vmul.f32 %v11458_v60, %v2775_v41  ;;  %v2875_v58 = vsel %vm2807_vm0, %v2774_v19, %v2843_v52  ;;  %vm2809_vm4 = vcmp.gt.f32.partialorder %v2776_v61, 0.0 }
 0x5de   : > { %v2873_v13 = vsel %vm2805_vm2, %v2772_v25, %v2841_v29  ;;  %v2874_v37 = vsel %vm2806_vm3, %v2773_v4, %v2842_v32  ;;  %vm2810_vm5 = vcmp.gt.f32.partialorder %v2777_v30, 0.0  ;;  %v2845_v39 = vmul.f32 %v11458_v60, %v2776_v61  ;;  %v7731_v32 = vld [vmem:[#allocation11 + $0x10] sm:$0xff]  }
 0x5df   : > { %v4158_v53 = vadd.f32 %v4157_v14, %v11300_v16  ;;  %v2905_v0 = vpack.c.bf16 %v2874_v37, %v2873_v13  ;;  %v2876_v47 = vsel %vm2808_vm1, %v2775_v41, %v2844_v6  ;;  %v2846_v9 = vmul.f32 %v11458_v60, %v2777_v30 }
 0x5e0   : > { %v2906_v26 = vpack.c.bf16 %v2876_v47, %v2875_v58  ;;  %v2877_v42 = vsel %vm2809_vm4, %v2776_v61, %v2845_v39  ;;  %vm2811_vm6 = vcmp.gt.f32.partialorder %v11377_v36, 0.0  ;;  %vm2812_vm7 = vcmp.gt.f32.partialorder %v11381_v54, 0.0 }
 0x5e1   : > { %v4159_v19 = vadd.f32 %v4158_v53, %v11304_v7  ;;  %7297 = vmatprep.mubr.bf16.mxu1 %v2905_v0  ;;  %v2878_v51 = vsel %vm2810_vm5, %v2777_v30, %v2846_v9  ;;  %v2847_v15 = vmul.f32 %v11458_v60, %v11377_v36  ;;  %v2848_v37 = vmul.f32 %v11458_v60, %v11381_v54  ;;  %v7729_v7 = vld [vmem:[#allocation11] sm:$0xff]   ;;  %v7732_v0 = vld [vmem:[#allocation11 + $0x18] sm:$0xff]  }
 0x5e2   : > { %7298 = vmatmul.mubr.bf16.vlgmr.msra.gmra.mrb[0].mxu1 %v2906_v26  ;;  %v2907_v41 = vpack.c.bf16 %v2878_v51, %v2877_v42  ;;  %vm2813_vm8 = vcmp.gt.f32.partialorder %v11385_v57, 0.0  ;;  %vm2814_vm9 = vcmp.gt.f32.partialorder %v11389_v1, 0.0  ;;  %v2849_v58 = vmul.f32 %v11458_v60, %v11385_v57  ;;  %v7730_v26 = vld [vmem:[#allocation11 + $0x8] sm:$0xff]  }
 0x5e3   : > { %v4160_v61 = vadd.f32 %v4159_v19, %v11308_v17  ;;  %7378 = vmatpush3.bf16.msra.mxu1 %v7729_v7  ;;  %v2879_v30 = vsel %vm2811_vm6, %v11377_v36, %v2847_v15  ;;  %v2880_v47 = vsel %vm2812_vm7, %v11381_v54, %v2848_v37  ;;  %v2850_v16 = vmul.f32 %v11458_v60, %v11389_v1  ;;  %v7733_v7 = vld [vmem:[#allocation11 + $0x20] sm:$0xff]  }
 0x5e4   : > { %7301 = vmatprep.mubr.bf16.mxu1 %v2907_v41  ;;  %7379 = vmatprep.subr.bf16.mxu1 %v7730_v26  ;;  %v2908_v42 = vpack.c.bf16 %v2880_v47, %v2879_v30  ;;  %v2881_v9 = vsel %vm2813_vm8, %v11385_v57, %v2849_v58  ;;  %vm2815_vm10 = vcmp.gt.f32.partialorder %v11393_v31, 0.0  ;;  %vm2816_vm11 = vcmp.gt.f32.partialorder %v11397_v20, 0.0 }
 0x5e5   : > { %v4161_v17 = vadd.f32 %v4160_v61, %v11312_v18  ;;  %v2882_v36 = vsel %vm2814_vm9, %v11389_v1, %v2850_v16  ;;  %v2851_v54 = vmul.f32 %v11458_v60, %v11393_v31  ;;  %v2852_v25 = vmul.f32 %v11458_v60, %v11397_v20 }
 0x5e6   : > { %v2909_v4 = vpack.c.bf16 %v2882_v36, %v2881_v9  ;;  %vm2817_vm12 = vcmp.gt.f32.partialorder %v11401_v44, 0.0  ;;  %vm2818_vm13 = vcmp.gt.f32.partialorder %v11405_v63, 0.0  ;;  %v2853_v57 = vmul.f32 %v11458_v60, %v11401_v44  ;;  %v7734_v9 = vld [vmem:[#allocation11 + $0x28] sm:$0xff]  }
 0x5e7   : > { %v4162_v18 = vadd.f32 %v4161_v17, %v11321_v10  ;;  %7380 = vmatpush3.bf16.msra.mxu1 %v7730_v26  ;;  %v2883_v52 = vsel %vm2815_vm10, %v11393_v31, %v2851_v54  ;;  %v2884_v1 = vsel %vm2816_vm11, %v11397_v20, %v2852_v25  ;;  %v2854_v29 = vmul.f32 %v11458_v60, %v11405_v63 }
 0x5e8   : > { %7381 = vmatprep.subr.bf16.mxu1 %v7731_v32  ;;  %v2910_v14 = vpack.c.bf16 %v2884_v1, %v2883_v52  ;;  %v2885_v6 = vsel %vm2817_vm12, %v11401_v44, %v2853_v57  ;;  %vm2819_vm14 = vcmp.gt.f32.partialorder %v11409_v49, 0.0  ;;  %vm2820_vm15 = vcmp.gt.f32.partialorder %v11413_v23, 0.0  ;;  %v7735_v52 = vld [vmem:[#allocation11 + $0x30] sm:$0xff]  }
 0x5e9   : > { %v4163_v13 = vadd.f32 %v4162_v18, %v11325_v38  ;;  %v2886_v10 = vsel %vm2818_vm13, %v11405_v63, %v2854_v29  ;;  %v2855_v31 = vmul.f32 %v11458_v60, %v11409_v49  ;;  %v2856_v20 = vmul.f32 %v11458_v60, %v11413_v23 }
 0x5ea   : > { %7302 = vmatmul.mubr.bf16.gmra.mrb[4].mxu1 %v2908_v42  ;;  %v2911_v39 = vpack.c.bf16 %v2886_v10, %v2885_v6  ;;  %vm2821_vm0 = vcmp.gt.f32.partialorder %v11417_v62, 0.0  ;;  %vm2822_vm1 = vcmp.gt.f32.partialorder %v11421_v40, 0.0  ;;  %v2857_v44 = vmul.f32 %v11458_v60, %v11417_v62  ;;  %v16406_v10 = vld [vmem:[#allocation71_spill] sm:$0xff] }
 0x5eb   : > { %v4164_v53 = vadd.f32 %v4163_v13, %v11329_v46  ;;  %7305 = vmatprep.mubr.bf16.mxu1 %v2909_v4  ;;  %7382 = vmatpush3.bf16.msra.mxu1 %v7731_v32  ;;  %v11544_v38 = vsel %vm2819_vm14, %v11409_v49, %v2855_v31  ;;  %v11547_v63 = vsel %vm2820_vm15, %v11413_v23, %v2856_v20  ;;  %vm2823_vm2 = vcmp.gt.f32.partialorder %v11425_v11, 0.0 }
 0x5ec   : > { %7383 = vmatprep.subr.bf16.mxu1 %v7732_v0  ;;  %v2912_v19 = vpack.c.bf16 %v11547_v63, %v11544_v38  ;;  %v2858_v51 = vmul.f32 %v11458_v60, %v11421_v40  ;;  %v11555_v46 = vsel %vm2821_vm0, %v11417_v62, %v2857_v44  ;;  %vm2824_vm3 = vcmp.gt.f32.partialorder %v11429_v34, 0.0  ;;  %v16410_v44 = vld [vmem:[#allocation22_spill] sm:$0xff]  ;;  %v7736_v63 = vld [vmem:[#allocation11 + $0x38] sm:$0xff]  }
 0x5ed   : > { %v4165_v49 = vadd.f32 %v4164_v53, %v11333_v33  ;;  %v2859_v23 = vmul.f32 %v11458_v60, %v11425_v11  ;;  %v2860_v15 = vmul.f32 %v11458_v60, %v11429_v34  ;;  %vm2825_vm4 = vcmp.gt.f32.partialorder %v11433_v24, 0.0 }
 0x5ee   : > { %v11567_v37 = vsel %vm2822_vm1, %v11421_v40, %v2858_v51  ;;  %vm2826_vm5 = vcmp.gt.f32.partialorder %v11437_v45, 0.0  ;;  %v2861_v62 = vmul.f32 %v11458_v60, %v11433_v24  ;;  %v2862_v33 = vmul.f32 %v11458_v60, %v11437_v45 }
 0x5ef   : > { %v4166_v41 = vadd.f32 %v4165_v49, %v11337_v21  ;;  %7384 = vmatpush3.bf16.msra.mxu1 %v7732_v0  ;;  %v2913_v58 = vpack.c.bf16 %v11567_v37, %v11555_v46  ;;  %v11580_v61 = vsel %vm2823_vm2, %v11425_v11, %v2859_v23  ;;  %v11583_v40 = vsel %vm2824_vm3, %v11429_v34, %v2860_v15  ;;  %v16413_v46 = vld [vmem:[#allocation60_spill] sm:$0xff]  ;;  %v16414_v23 = vld [vmem:[#allocation39_spill] sm:$0xff] }
 0x5f0   : > { %7385 = vmatprep.subr.bf16.mxu1 %v7733_v7  ;;  %v2914_v30 = vpack.c.bf16 %v11583_v40, %v11580_v61  ;;  %v11588_v47 = vsel %vm2825_vm4, %v11433_v24, %v2861_v62  ;;  %v11591_v21 = vsel %vm2826_vm5, %v11437_v45, %v2862_v33  ;;  %vm2827_vm6 = vcmp.gt.f32.partialorder %v11441_v27, 0.0  ;;  %v16416_v62 = vld [vmem:[#allocation19_spill] sm:$0xff] }
 0x5f1   : > { %v4167_v16 = vadd.f32 %v4166_v41, %v11341_v56  ;;  %v2915_v11 = vpack.c.bf16 %v11591_v21, %v11588_v47  ;;  %vm2828_vm7 = vcmp.gt.f32.partialorder %v11445_v59, 0.0  ;;  %v2863_v34 = vmul.f32 %v11458_v60, %v11441_v27 }
 0x5f2   : > { %7306 = vmatmul.mubr.bf16.gmra.mrb[8].mxu1 %v2910_v14  ;;  %v2864_v24 = vmul.f32 %v11458_v60, %v11445_v59  ;;  %vm2829_vm8 = vcmp.gt.f32.partialorder %v11449_v12, 0.0  ;;  %vm2830_vm9 = vcmp.gt.f32.partialorder %v11453_v5, 0.0  ;;  %v2865_v45 = vmul.f32 %v11458_v60, %v11449_v12  ;;  %v5912_v14 = vld [vmem:[#allocation2 + $0x118] sm:$0xff] }
 0x5f3   : > { %v4168_v56 = vadd.f32 %v4167_v16, %v11345_v50  ;;  %7309 = vmatprep.mubr.bf16.mxu1 %v2911_v39  ;;  %7386 = vmatpush3.bf16.msra.mxu1 %v7733_v7  ;;  %v11608_v26 = vsel %vm2827_vm6, %v11441_v27, %v2863_v34  ;;  %v2866_v42 = vmul.f32 %v11458_v60, %v11453_v5  ;;  %vm2831_vm10 = vcmp.gt.f32.partialorder %v11462_v43, 0.0  ;;  %v16409_v39 = vld [vmem:[#allocation30_spill] sm:$0xff]  ;;  %v16418_v7 = vld [vmem:[#allocation61_spill] sm:$0xff] }
 0x5f4   : > { %7387 = vmatprep.subr.bf16.mxu1 %v7734_v9  ;;  %v11614_v17 = vsel %vm2828_vm7, %v11445_v59, %v2864_v24  ;;  %v11617_v36 = vsel %vm2829_vm8, %v11449_v12, %v2865_v45  ;;  %vm2832_vm11 = vcmp.gt.f32.partialorder %v11466_v28, 0.0  ;;  %v2867_v50 = vmul.f32 %v11458_v60, %v11462_v43  ;;  %v16419_v24 = vld [vmem:[#allocation20_spill] sm:$0xff] }
 0x5f5   : > { %v4169_v27 = vadd.f32 %v4168_v56, %v11349_v3  ;;  %v2916_v54 = vpack.c.bf16 %v11614_v17, %v11608_v26  ;;  %v11628_v25 = vsel %vm2830_vm9, %v11453_v5, %v2866_v42  ;;  %v2868_v59 = vmul.f32 %v11458_v60, %v11466_v28  ;;  %v5915_v42 = vld [vmem:[#allocation2 + $0x178] sm:$0xff] }
 0x5f6   : > { %v2917_v12 = vpack.c.bf16 %v11628_v25, %v11617_v36  ;;  %v11635_v4 = vsel %vm2831_vm10, %v11462_v43, %v2867_v50  ;;  %vm2833_vm12 = vcmp.gt.f32.partialorder %v11470_v8, 0.0  ;;  %vm2834_vm13 = vcmp.gt.f32.partialorder %v11365_v2, 0.0 }
 0x5f7   : > { %v4170_v3 = vadd.f32 %v4169_v27, %v11353_v35  ;;  %7388 = vmatpush3.bf16.msra.mxu1 %v7734_v9  ;;  %v11641_v57 = vsel %vm2832_vm11, %v11466_v28, %v2868_v59  ;;  %v2869_v5 = vmul.f32 %v11458_v60, %v11470_v8  ;;  %v2870_v18 = vmul.f32 %v11458_v60, %v11365_v2  ;;  %v11700_v9 = vld [vmem:[#allocation9] sm:$0xff]  }
 0x5f8   : > { %7389 = vmatprep.subr.bf16.mxu1 %v7735_v52  ;;  %v2918_v43 = vpack.c.bf16 %v11641_v57, %v11635_v4  ;;  %vm2835_vm14 = vcmp.gt.f32.partialorder %v11474_v55, 0.0  ;;  %vm2836_vm15 = vcmp.gt.f32.partialorder %v11478_v48, 0.0  ;;  %v2871_v35 = vmul.f32 %v11458_v60, %v11474_v55 }
 0x5f9   : > { %v4171_v28 = vadd.f32 %v4170_v3, %v11357_v22  ;;  %v11655_v1 = vsel %vm2833_vm12, %v11470_v8, %v2869_v5  ;;  %v11658_v29 = vsel %vm2834_vm13, %v11365_v2, %v2870_v18  ;;  %v2872_v32 = vmul.f32 %v11458_v60, %v11478_v48  ;;  %v16405_v22 = vld [vmem:[#allocation59_spill] sm:$0xff]  ;;  %v16408_v2 = vld [vmem:[#allocation62_spill] sm:$0xff]  ;;  %v16421_v3 = vld [vmem:[#allocation21_spill] sm:$0xff] }
 0x5fa   : > { %7310 = vmatmul.mubr.bf16.gmra.mrb[12].mxu1 %v2912_v19  ;;  %v2919_v6 = vpack.c.bf16 %v11658_v29, %v11655_v1  ;;  %v11668_v13 = vsel %vm2835_vm14, %v11474_v55, %v2871_v35  ;;  %v15815_v8 = vmax.f32 %v16405_v22, 0.0  ;;  %v16407_v31 = vmax.f32 %v16406_v10, 0.0  ;;  %v5913_v55 = vld [vmem:[#allocation2 + $0x138] sm:$0xff]  ;;  %v16411_v19 = vld [vmem:[#allocation24_spill] sm:$0xff] }
 0x5fb   : > { %v4142_v60 = vmul.f32 %v16409_v39, %v16409_v39  ;;  %v4172_v53 = vadd.f32 %v4171_v28, %v16410_v44  ;;  %7313 = vmatprep.mubr.bf16.mxu1 %v2913_v58  ;;  %7390 = vmatpush3.bf16.msra.mxu1 %v7735_v52  ;;  %v11680_v38 = vsel %vm2836_vm15, %v11478_v48, %v2872_v32  ;;  %v15814_v49 = vmax.f32 %v16413_v46, 0.0  ;;  %v5914_v48 = vld [vmem:[#allocation2 + $0x158] sm:$0xff] }
 0x5fc   : > { %v6008_v20 = vadd.f32 %v16408_v2, %v16407_v31  ;;  %7391 = vmatprep.subr.bf16.mxu1 %v7736_v63  ;;  %v2920_v0 = vpack.c.bf16 %v11680_v38, %v11668_v13  ;;  %v11685_v51 = vadd.f32 %v16411_v19, %v5912_v14  ;;  %v16415_v15 = vmax.f32 %v16414_v23, 0.0  ;;  %v5916_v52 = vld [vmem:[#allocation2 + $0x198] sm:$0xff]  ;;  %v16423_v14 = vld [vmem:[#allocation63_spill] sm:$0xff] }
 0x5fd   : > { %v4143_v33 = vmul.f32 %v16416_v62, %v16416_v62  ;;  %v4173_v41 = vadd.f32 %v4172_v53, %v4142_v60  ;;  %v11693_v58 = vadd.f32 %v16411_v19, %v5913_v55  ;;  %v15813_v16 = vmax.f32 %v16418_v7, 0.0  ;;  %v16425_v60 = vld [vmem:[#allocation64_spill] sm:$0xff]  ;;  %v5918_v55 = vld [vmem:[#allocation2 + $0x1d8] sm:$0xff] }
 0x5fe   : > { %16412 = vst [vmem:[#allocation36_spill] sm:$0xff] %v11685_v51  ;;  %v6009_v37 = vadd.f32 %v6008_v20, %v16415_v15  ;;  %v4144_v45 = vmul.f32 %v16419_v24, %v16419_v24  ;;  %v11704_v50 = vadd.f32 %v16411_v19, %v5914_v48  ;;  %v15811_v27 = vmax.f32 %v11685_v51, 0.0  ;;  %v5917_v20 = vld [vmem:[#allocation2 + $0x1b8] sm:$0xff] }
 0x5ff   : > { %16417 = vst [vmem:[#allocation37_spill] sm:$0xff] %v11693_v58  ;;  %v4174_v56 = vadd.f32 %v4173_v41, %v4143_v33  ;;  %7392 = vmatpush3.bf16.msra.mxu1 %v7736_v63  ;;  %v4145_v5 = vmul.f32 %v16421_v3, %v16421_v3  ;;  %v11715_v35 = vadd.f32 %v16411_v19, %v5915_v42  ;;  %v15810_v28 = vmax.f32 %v11693_v58, 0.0  ;;  %v5919_v33 = vld [vmem:[#allocation2 + $0x1f8] sm:$0xff] }
 0x600   : > { %v6010_v34 = vadd.f32 %v6009_v37, %v15815_v8  ;;  %7473 = vmatprep.subr.bf16.mxu1 %v11700_v9  ;;  %16420 = vst [vmem:[#allocation38_spill] sm:$0xff] %v11704_v50  ;;  %v4146_v31 = vmul.f32 %v16423_v14, %v16423_v14  ;;  %v11726_v61 = vadd.f32 %v16411_v19, %v5916_v52  ;;  %v15809_v40 = vmax.f32 %v11704_v50, 0.0  ;;  %v5935_v38 = vld [vmem:[#allocation2 + $0x3f8] sm:$0xff]  ;;  %v16453_v8 = vld [vmem:[#allocation27_spill] sm:$0xff] }
 0x601   : > { %v4175_v18 = vadd.f32 %v4174_v56, %v4144_v45  ;;  %16422 = vst [vmem:[#allocation67_spill] sm:$0xff] %v11715_v35  ;;  %v4147_v44 = vmul.f32 %v16425_v60, %v16425_v60  ;;  %v11734_v63 = vadd.f32 %v16411_v19, %v5917_v20  ;;  %v15808_v47 = vmax.f32 %v11715_v35, 0.0  ;;  %v16429_v45 = vld [vmem:[#allocation66_spill] sm:$0xff]  ;;  %v5921_v20 = vld [vmem:[#allocation2 + $0x238] sm:$0xff]  ;;  %v16469_v35 = vld [vmem:[#allocation35_spill] sm:$0xff] }
 0x602   : > { %v6011_v59 = vadd.f32 %v6010_v34, %v15814_v49  ;;  %7314 = vmatmul.mubr.bf16.gmra.mrb[16].mxu1 %v2914_v30  ;;  %16424 = vst [vmem:[#allocation70_spill] sm:$0xff] %v11726_v61  ;;  %v11742_v41 = vadd.f32 %v16411_v19, %v5918_v55  ;;  %v15807_v48 = vmax.f32 %v11726_v61, 0.0  ;;  %v4149_v56 = vmul.f32 %v16429_v45, %v16429_v45  ;;  %v16452_v49 = vld [vmem:[#allocation26_spill] sm:$0xff] }
 0x603   : > { %v4176_v2 = vadd.f32 %v4175_v18, %v4145_v5  ;;  %7317 = vmatprep.mubr.bf16.mxu1 %v2915_v11  ;;  %16426 = vst [vmem:[#allocation72_spill] sm:$0xff] %v11734_v63  ;;  %v16427_v11 = vld [vmem:[#allocation65_spill] sm:$0xff]  ;;  %v11753_v5 = vadd.f32 %v16411_v19, %v5919_v33  ;;  %v15806_v18 = vmax.f32 %v11734_v63, 0.0 }
 0x604   : > { %v6012_v32 = vadd.f32 %v6011_v59, %v15813_v16  ;;  %v4148_v15 = vmul.f32 %v16427_v11, %v16427_v11  ;;  %16428 = vst [vmem:[#allocation52_spill] sm:$0xff] %v11742_v41  ;;  %v5920_v59 = vld [vmem:[#allocation2 + $0x218] sm:$0xff]  ;;  %v15805_v17 = vmax.f32 %v11742_v41, 0.0  ;;  %v16451_v16 = vld [vmem:[#allocation58_spill] sm:$0xff] }
 0x605   : > { %v4177_v53 = vadd.f32 %v4176_v2, %v4146_v31  ;;  %16430 = vst [vmem:[#allocation53_spill] sm:$0xff] %v11753_v5  ;;  %v11764_v26 = vadd.f32 %v16411_v19, %v5920_v59  ;;  %v15800_v55 = vmax.f32 %v11753_v5, 0.0 }
 0x606   : > { %v6013_v30 = vadd.f32 %v6012_v32, %v15811_v27  ;;  %v16431_v32 = vld [vmem:[#allocation68_spill] sm:$0xff] }
 0x607   : > { %v4178_v37 = vadd.f32 %v4177_v53, %v4147_v44  ;;  %v4150_v31 = vmul.f32 %v16431_v32, %v16431_v32  ;;  %16432 = vst [vmem:[#allocation54_spill] sm:$0xff] %v11764_v26  ;;  %v5922_v44 = vld [vmem:[#allocation2 + $0x258] sm:$0xff]  ;;  %v11770_v53 = vadd.f32 %v16411_v19, %v5921_v20  ;;  %v16449_v27 = vld [vmem:[#allocation56_spill] sm:$0xff] }
 0x608   : > { %v6014_v21 = vadd.f32 %v6013_v30, %v15810_v28  ;;  %v5926_v20 = vld [vmem:[#allocation2 + $0x2d8] sm:$0xff] }
 0x609   : > { %v4179_v42 = vadd.f32 %v4178_v37, %v4148_v15  ;;  %16433 = vst [vmem:[#allocation55_spill] sm:$0xff] %v11770_v53  ;;  %v15799_v15 = vmax.f32 %v11764_v26, 0.0 }
 0x60a   : > { %v6015_v34 = vadd.f32 %v6014_v21, %v15809_v40  ;;  %7318 = vmatmul.mubr.bf16.gmra.mrb[20].mxu1 %v2916_v54  ;;  %v11776_v21 = vadd.f32 %v16411_v19, %v5922_v44  ;;  %v5928_v44 = vld [vmem:[#allocation2 + $0x318] sm:$0xff]  ;;  %v16448_v40 = vld [vmem:[#allocation51_spill] sm:$0xff] }
 0x60b   : > { %v4180_v2 = vadd.f32 %v4179_v42, %v4149_v56  ;;  %7321 = vmatprep.mubr.bf16.mxu1 %v2917_v12  ;;  %v5923_v12 = vld [vmem:[#allocation2 + $0x278] sm:$0xff]  ;;  %v15798_v42 = vmax.f32 %v11770_v53, 0.0  ;;  %v16467_v53 = vld [vmem:[#allocation18_spill] sm:$0xff] }
 0x60c   : > { %v6016_v52 = vadd.f32 %v6015_v34, %v15808_v47  ;;  %16434 = vst [vmem:[#allocation73_spill] sm:$0xff] %v11776_v21  ;;  %v5924_v34 = vld [vmem:[#allocation2 + $0x298] sm:$0xff]  ;;  %v11785_v56 = vadd.f32 %v16411_v19, %v5923_v12  ;;  %v15803_v4 = vmax.f32 %v11776_v21, 0.0  ;;  %v11806_v12 = vadd.f32 %v16411_v19, %v5926_v20  ;;  %v16466_v21 = vld [vmem:[#allocation46_spill] sm:$0xff] }
 0x60d   : > { %v4181_v30 = vadd.f32 %v4180_v2, %v4150_v31  ;;  %v5925_v31 = vld [vmem:[#allocation2 + $0x2b8] sm:$0xff]  ;;  %v11794_v2 = vadd.f32 %v16411_v19, %v5924_v34 }
 0x60e   : > { %v6017_v54 = vadd.f32 %v6016_v52, %v15807_v48  ;;  %16435 = vst [vmem:[#allocation74_spill] sm:$0xff] %v11785_v56  ;;  %16438 = vst [vmem:[#allocation62_spill] sm:$0xff] %v11806_v12  ;;  %v16447_v48 = vld [vmem:[#allocation50_spill] sm:$0xff] }
 0x60f   : > { %v4182_v25 = vrot.slane %v4181_v30, 4  ;;  %16436 = vst [vmem:[#allocation59_spill] sm:$0xff] %v11794_v2 }
 0x610   : > { %v6018_v36 = vadd.f32 %v6017_v54, %v15806_v18  ;;  %v11800_v54 = vadd.f32 %v16411_v19, %v5925_v31 }
 0x611   : > { %v4183_v33 = vadd.f32 %v4182_v25, %v4181_v30  ;;  %v15801_v30 = vmax.f32 %v11785_v56, 0.0  ;;  %v5930_v25 = vld [vmem:[#allocation2 + $0x358] sm:$0xff] }
 0x612   : > { %v6019_v37 = vadd.f32 %v6018_v36, %v15805_v17  ;;  %7322 = vmatmul.mubr.bf16.gmra.mrb[24].mxu1 %v2918_v43  ;;  %16437 = vst [vmem:[#allocation71_spill] sm:$0xff] %v11800_v54  ;;  %v5929_v36 = vld [vmem:[#allocation2 + $0x338] sm:$0xff]  ;;  %v11827_v13 = vadd.f32 %v16411_v19, %v5930_v25 }
 0x613   : > { %v4184_v52 = vrot.slane %v4183_v33, 2  ;;  %7325 = vmatprep.mubr.bf16.mxu1 %v2919_v6  ;;  %v5927_v6 = vld [vmem:[#allocation2 + $0x2f8] sm:$0xff] }
 0x614   : > { %v6020_v59 = vadd.f32 %v6019_v37, %v15800_v55  ;;  %v15802_v37 = vmax.f32 %v11794_v2, 0.0  ;;  %v11815_v31 = vadd.f32 %v16411_v19, %v5927_v6  ;;  %v5934_v55 = vld [vmem:[#allocation2 + $0x3d8] sm:$0xff]  ;;  %16442 = vst [vmem:[#allocation39_spill] sm:$0xff] %v11827_v13  ;;  %v15812_v6 = vmax.f32 %v11806_v12, 0.0  ;;  %v16462_v2 = vld [vmem:[#allocation43_spill] sm:$0xff] }
 0x615   : > { %v4185_v43 = vadd.f32 %v4184_v52, %v4183_v33  ;;  %v5932_v52 = vld [vmem:[#allocation2 + $0x398] sm:$0xff] }
 0x616   : > { %v6021_v57 = vadd.f32 %v6020_v59, %v15799_v15  ;;  %v5931_v59 = vld [vmem:[#allocation2 + $0x378] sm:$0xff]  ;;  %16439 = vst [vmem:[#allocation30_spill] sm:$0xff] %v11815_v31  ;;  %v15816_v25 = vmax.f32 %v11815_v31, 0.0  ;;  %v16459_v31 = vld [vmem:[#allocation40_spill] sm:$0xff] }
 0x617   : > { %v4186_v29 = vrot.slane %v4185_v43, 1  ;;  %v5933_v15 = vld [vmem:[#allocation2 + $0x3b8] sm:$0xff] }
 0x618   : > { %v6022_v1 = vadd.f32 %v6021_v57, %v15798_v42  ;;  %v15804_v57 = vmax.f32 %v11800_v54, 0.0  ;;  %v16446_v17 = vld [vmem:[#allocation49_spill] sm:$0xff]  ;;  %v16461_v54 = vld [vmem:[#allocation42_spill] sm:$0xff] }
 0x619   : > { %v4187_v34 = vadd.f32 %v4186_v29, %v4185_v43  ;;  %v11824_v43 = vadd.f32 %v16411_v19, %v5929_v36  ;;  %v11833_v29 = vadd.f32 %v16411_v19, %v5932_v52  ;;  %v11842_v36 = vadd.f32 %v16411_v19, %v5934_v55  ;;  %v16454_v55 = vld [vmem:[#allocation28_spill] sm:$0xff]  ;;  %v16460_v12 = vld [vmem:[#allocation41_spill] sm:$0xff] }
 0x61a   : > { %v6023_v33 = vadd.f32 %v6022_v1, %v15803_v4  ;;  %7326 = vmatmul.mubr.bf16.gmra.mrb[28].mxu1 %v2920_v0  ;;  %v11821_v1 = vadd.f32 %v16411_v19, %v5928_v44  ;;  %v11830_v0 = vadd.f32 %v16411_v19, %v5931_v59  ;;  %v11848_v52 = vadd.f32 %v16411_v19, %v5935_v38  ;;  %v16443_v4 = vld [vmem:[#allocation23_spill] sm:$0xff]  ;;  %v16445_v38 = vld [vmem:[#allocation48_spill] sm:$0xff]  ;;  %v16465_v56 = vld [vmem:[#allocation45_spill] sm:$0xff] }
 0x61b   : > { %v4188_v42 = vmul.f32 0.00390625, %v4187_v34  ;;  %16441 = vst [vmem:[#allocation24_spill] sm:$0xff] %v11824_v43  ;;  %v11839_v34 = vadd.f32 %v16411_v19, %v5933_v15  ;;  %v4195_v18 = vmul.f32 %v16443_v4, %v16446_v17  ;;  %v4196_v47 = vmul.f32 %v16443_v4, %v16447_v48  ;;  %v16455_v15 = vld [vmem:[#allocation31_spill] sm:$0xff] }
 0x61c   : > { %v6024_v20 = vadd.f32 %v6023_v33, %v15801_v30  ;;  %16440 = vst [vmem:[#allocation22_spill] sm:$0xff] %v11821_v1  ;;  %v15822_v30 = vmax.f32 %v11821_v1, 0.0  ;;  %v4197_v28 = vmul.f32 %v16443_v4, %v16448_v40  ;;  %v4201_v17 = vmul.f32 %v16443_v4, %v16452_v49  ;;  %v16463_v1 = vld [vmem:[#allocation44_spill] sm:$0xff] }
 0x61d   : > { %v4225_v44 = vadd.f32 1e-05, %v4188_v42  ;;  %v4202_v48 = vmul.f32 %v16443_v4, %v16453_v8  ;;  %v4203_v40 = vmul.f32 %v16443_v4, %v16454_v55  ;;  %v16456_v42 = vld [vmem:[#allocation32_spill] sm:$0xff]  ;;  %v4208_v8 = vmul.f32 %v16443_v4, %v16459_v31 }
 0x61e   : > { %v6025_v33 = vadd.f32 %v6024_v20, %v15802_v37  ;;  %v16458_v20 = vld [vmem:[#allocation34_spill] sm:$0xff]  ;;  %v4209_v55 = vmul.f32 %v16443_v4, %v16460_v12  ;;  %v4214_v31 = vmul.f32 %v16443_v4, %v16466_v21  ;;  %v4215_v12 = vmul.f32 %v16443_v4, %v16467_v53 }
 0x61f   : > { %7708 = vrsqrt.f32 %v4225_v44  ;;  %v16444_v44 = vld [vmem:[#allocation47_spill] sm:$0xff]  ;;  %v4207_v49 = vmul.f32 %v16443_v4, %v16458_v20  ;;  %v4213_v20 = vmul.f32 %v16443_v4, %v16465_v56  ;;  %v4220_v56 = vmul.f32 %v16443_v4, %v16423_v14 }
 0x620   : > { %v6026_v59 = vadd.f32 %v6025_v33, %v15804_v57  ;;  %v4222_v33 = vmul.f32 %v16443_v4, %v16427_v11  ;;  %v4193_v19 = vmul.f32 %v16443_v4, %v16444_v44  ;;  %v4194_v57 = vmul.f32 %v16443_v4, %v16445_v38 }
 0x621   : > { %v4200_v38 = vmul.f32 %v16443_v4, %v16451_v16  ;;  %v4221_v21 = vmul.f32 %v16443_v4, %v16425_v60  ;;  %v4223_v53 = vmul.f32 %v16443_v4, %v16429_v45 }
 0x622   : > { %v6027_v37 = vadd.f32 %v6026_v59, %v15812_v6  ;;  %v4198_v59 = vmul.f32 %v16443_v4, %v16449_v27  ;;  %v16450_v6 = vld [vmem:[#allocation57_spill] sm:$0xff]  ;;  %v4204_v27 = vmul.f32 %v16443_v4, %v16455_v15  ;;  %v4210_v15 = vmul.f32 %v16443_v4, %v16461_v54 }
 0x623   : > { %v4199_v44 = vmul.f32 %v16443_v4, %v16450_v6  ;;  %v4216_v54 = vmul.f32 %v16443_v4, %v16409_v39  ;;  %v4224_v39 = vmul.f32 %v16443_v4, %v16431_v32 }
 0x624   : > { %v6028_v11 = vadd.f32 %v6027_v37, %v15816_v25  ;;  %v4205_v37 = vmul.f32 %v16443_v4, %v16456_v42  ;;  %v16457_v25 = vld [vmem:[#allocation33_spill] sm:$0xff]  ;;  %v4211_v42 = vmul.f32 %v16443_v4, %v16462_v2  ;;  %v4217_v2 = vmul.f32 %v16443_v4, %v16416_v62 }
 0x625   : > { %v4206_v16 = vmul.f32 %v16443_v4, %v16457_v25  ;;  %v16464_v25 = vmax.f32 %v11824_v43, 0.0  ;;  %v16468_v62 = vmax.f32 %v11827_v13, 0.0 }
 0x626   : > { %v6029_v6 = vadd.f32 %v6028_v11, %v15822_v30  ;;  %v4212_v11 = vmul.f32 %v16443_v4, %v16463_v1  ;;  %v4218_v1 = vmul.f32 %v16443_v4, %v16419_v24 }
 0x628   : > { %v6030_v30 = vadd.f32 %v6029_v6, %v16464_v25  ;;  %v4219_v6 = vmul.f32 %v16443_v4, %v16421_v3 }
 0x629   : > { %v7709_v25 = vpop.eup %7708 }
 0x62a   : > { %v11929_v43 = vadd.f32 %v6030_v30, %v16468_v62  ;;  %v4256_v24 = vmul.f32 %v7709_v25, %v4222_v33  ;;  %v4227_v26 = vmul.f32 %v7709_v25, %v4193_v19  ;;  %v4228_v3 = vmul.f32 %v7709_v25, %v4194_v57 }
 0x62b   : > { %v4229_v5 = vmul.f32 %v7709_v25, %v4195_v18  ;;  %v4230_v41 = vmul.f32 %v7709_v25, %v4196_v47  ;;  %v4231_v14 = vmul.f32 %v7709_v25, %v4197_v28  ;;  %v4232_v63 = vmul.f32 %v7709_v25, %v4198_v59 }
 0x62c   : > { %v4233_v61 = vmul.f32 %v7709_v25, %v4199_v44  ;;  %v11932_v60 = vadd.f32 %v16469_v35, %v4256_v24  ;;  %v4234_v50 = vmul.f32 %v7709_v25, %v4200_v38  ;;  %v4235_v45 = vmul.f32 %v7709_v25, %v4201_v17 }
 0x62d   : > { %v4236_v58 = vmul.f32 %v7709_v25, %v4202_v48  ;;  %v4237_v51 = vmul.f32 %v7709_v25, %v4203_v40  ;;  %v4238_v32 = vmul.f32 %v7709_v25, %v4204_v27  ;;  %v4239_v4 = vmul.f32 %v7709_v25, %v4205_v37 }
 0x62e   : > { %v4240_v13 = vmul.f32 %v7709_v25, %v4206_v16  ;;  %v4241_v30 = vmul.f32 %v7709_v25, %v4207_v49  ;;  %v4242_v62 = vmul.f32 %v7709_v25, %v4208_v8  ;;  %v4243_v33 = vmul.f32 %v7709_v25, %v4209_v55 }
 0x62f   : > { %v4244_v19 = vmul.f32 %v7709_v25, %v4210_v15  ;;  %v4245_v57 = vmul.f32 %v7709_v25, %v4211_v42  ;;  %v4246_v18 = vmul.f32 %v7709_v25, %v4212_v11  ;;  %v4247_v47 = vmul.f32 %v7709_v25, %v4213_v20 }
 0x630   : > { %v4248_v28 = vmul.f32 %v7709_v25, %v4214_v31  ;;  %v4249_v59 = vmul.f32 %v7709_v25, %v4215_v12  ;;  %v4250_v44 = vmul.f32 %v7709_v25, %v4216_v54  ;;  %v4251_v7 = vmul.f32 %v7709_v25, %v4217_v2 }
 0x631   : > { %v4252_v24 = vmul.f32 %v7709_v25, %v4218_v1  ;;  %v4253_v46 = vmul.f32 %v7709_v25, %v4219_v6  ;;  %v4254_v38 = vmul.f32 %v7709_v25, %v4220_v56  ;;  %v4255_v17 = vmul.f32 %v7709_v25, %v4221_v21 }
 0x632   : > { %v4257_v48 = vmul.f32 %v7709_v25, %v4223_v53  ;;  %v4258_v40 = vmul.f32 %v7709_v25, %v4224_v39  ;;  %v4263_v27 = vadd.f32 %v16469_v35, %v4227_v26  ;;  %v4264_v37 = vadd.f32 %v16469_v35, %v4228_v3 }
 0x633   : > { %v4265_v16 = vadd.f32 %v16469_v35, %v4229_v5  ;;  %v4266_v49 = vadd.f32 %v16469_v35, %v4230_v41  ;;  %v4267_v8 = vadd.f32 %v16469_v35, %v4231_v14  ;;  %v4268_v55 = vadd.f32 %v16469_v35, %v4232_v63 }
 0x634   : > { %v4269_v15 = vadd.f32 %v16469_v35, %v4233_v61  ;;  %v4270_v42 = vadd.f32 %v16469_v35, %v4234_v50  ;;  %v4271_v11 = vadd.f32 %v16469_v35, %v4235_v45  ;;  %v4272_v20 = vadd.f32 %v16469_v35, %v4236_v58 }
 0x635   : > { %v11945_v26 = vadd.f32 %v16469_v35, %v4237_v51  ;;  %v11948_v31 = vadd.f32 %v16469_v35, %v4238_v32  ;;  %v11951_v41 = vadd.f32 %v16469_v35, %v4239_v4  ;;  %v11954_v5 = vadd.f32 %v16469_v35, %v4240_v13  ;;  %v11974_v13 = vld [vmem:[%s15584_s5 + $0x3] ss:$0 sm:$0xff] }
 0x636   : > { %v11957_v61 = vadd.f32 %v16469_v35, %v4241_v30  ;;  %v11960_v50 = vadd.f32 %v16469_v35, %v4242_v62  ;;  %v11963_v58 = vadd.f32 %v16469_v35, %v4243_v33  ;;  %v11966_v51 = vadd.f32 %v16469_v35, %v4244_v19 }
 0x637   : > { %v11969_v63 = vadd.f32 %v16469_v35, %v4245_v57  ;;  %v11977_v12 = vadd.f32 %v16469_v35, %v4246_v18  ;;  %v11980_v54 = vadd.f32 %v16469_v35, %v4247_v47  ;;  %v11983_v2 = vadd.f32 %v16469_v35, %v4248_v28 }
 0x638   : > { %v11986_v1 = vadd.f32 %v16469_v35, %v4249_v59  ;;  %v11989_v6 = vadd.f32 %v16469_v35, %v4250_v44  ;;  %v11992_v56 = vadd.f32 %v16469_v35, %v4251_v7  ;;  %v11995_v25 = vadd.f32 %v16469_v35, %v4252_v24 }
 0x639   : > { %v11998_v21 = vadd.f32 %v16469_v35, %v4253_v46  ;;  %v12001_v53 = vadd.f32 %v16469_v35, %v4254_v38  ;;  %v12004_v39 = vadd.f32 %v16469_v35, %v4255_v17  ;;  %v12007_v3 = vadd.f32 %v16469_v35, %v4257_v48 }
 0x63a   : > { %v12010_v14 = vadd.f32 %v16469_v35, %v4258_v40  ;;  %vm4298_vm0 = vcmp.gt.f32.partialorder %v4265_v16, 0.0  ;;  %vm4299_vm1 = vcmp.gt.f32.partialorder %v4266_v49, 0.0  ;;  %v4334_v7 = vmul.f32 %v11974_v13, %v4265_v16 }
 0x63b   : > { %v4335_v45 = vmul.f32 %v11974_v13, %v4266_v49  ;;  %vm4296_vm2 = vcmp.gt.f32.partialorder %v4263_v27, 0.0  ;;  %vm4297_vm3 = vcmp.gt.f32.partialorder %v4264_v37, 0.0  ;;  %v4332_v46 = vmul.f32 %v11974_v13, %v4263_v27 }
 0x63c   : > { %v4333_v32 = vmul.f32 %v11974_v13, %v4264_v37  ;;  %v4366_v4 = vsel %vm4298_vm0, %v4265_v16, %v4334_v7  ;;  %vm4300_vm4 = vcmp.gt.f32.partialorder %v4267_v8, 0.0  ;;  %vm4301_vm5 = vcmp.gt.f32.partialorder %v4268_v55, 0.0 }
 0x63d   : > { %v4367_v30 = vsel %vm4299_vm1, %v4266_v49, %v4335_v45  ;;  %v4364_v62 = vsel %vm4296_vm2, %v4263_v27, %v4332_v46  ;;  %v4336_v19 = vmul.f32 %v11974_v13, %v4267_v8  ;;  %v4337_v18 = vmul.f32 %v11974_v13, %v4268_v55  ;;  %v7738_v49 = vld [vmem:[#allocation9 + $0x8] sm:$0xff]  }
 0x63e   : > { %v4365_v33 = vsel %vm4297_vm3, %v4264_v37, %v4333_v32  ;;  %v4397_v35 = vpack.c.bf16 %v4367_v30, %v4366_v4  ;;  %vm4302_vm6 = vcmp.gt.f32.partialorder %v4269_v15, 0.0  ;;  %vm4303_vm7 = vcmp.gt.f32.partialorder %v4270_v42, 0.0  ;;  %v7739_v30 = vld [vmem:[#allocation9 + $0x10] sm:$0xff]  }
 0x63f   : > { %v4396_v57 = vpack.c.bf16 %v4365_v33, %v4364_v62  ;;  %v4368_v47 = vsel %vm4300_vm4, %v4267_v8, %v4336_v19  ;;  %v4338_v28 = vmul.f32 %v11974_v13, %v4269_v15  ;;  %v4339_v59 = vmul.f32 %v11974_v13, %v4270_v42 }
 0x640   : > { %vm4304_vm8 = vcmp.gt.f32.partialorder %v4271_v11, 0.0  ;;  %v4369_v44 = vsel %vm4301_vm5, %v4268_v55, %v4337_v18  ;;  %vm4305_vm9 = vcmp.gt.f32.partialorder %v4272_v20, 0.0  ;;  %v4340_v24 = vmul.f32 %v11974_v13, %v4271_v11 }
 0x641   : > { %7393 = vmatprep.mubr.bf16.mxu1 %v4396_v57  ;;  %v4341_v38 = vmul.f32 %v11974_v13, %v4272_v20  ;;  %v4398_v17 = vpack.c.bf16 %v4369_v44, %v4368_v47  ;;  %v4370_v48 = vsel %vm4302_vm6, %v4269_v15, %v4338_v28  ;;  %v4371_v40 = vsel %vm4303_vm7, %v4270_v42, %v4339_v59  ;;  %v7740_v57 = vld [vmem:[#allocation9 + $0x18] sm:$0xff]  }
 0x642   : > { %7394 = vmatmul.mubr.bf16.vlgmr.msra.gmra.mrb[32].mxu1 %v4397_v35  ;;  %vm4306_vm10 = vcmp.gt.f32.partialorder %v11945_v26, 0.0  ;;  %v4399_v27 = vpack.c.bf16 %v4371_v40, %v4370_v48  ;;  %v4372_v37 = vsel %vm4304_vm8, %v4271_v11, %v4340_v24  ;;  %vm4307_vm11 = vcmp.gt.f32.partialorder %v11948_v31, 0.0 }
 0x643   : > { %7474 = vmatpush3.bf16.msra.mxu1 %v11700_v9  ;;  %v4373_v16 = vsel %vm4305_vm9, %v4272_v20, %v4341_v38  ;;  %7397 = vmatprep.mubr.bf16.mxu1 %v4398_v17  ;;  %v4342_v55 = vmul.f32 %v11974_v13, %v11945_v26  ;;  %v4343_v15 = vmul.f32 %v11974_v13, %v11948_v31  ;;  %vm4308_vm12 = vcmp.gt.f32.partialorder %v11951_v41, 0.0  ;;  %v7741_v17 = vld [vmem:[#allocation9 + $0x20] sm:$0xff]  }
 0x644   : > { %7475 = vmatprep.subr.bf16.mxu1 %v7738_v49  ;;  %v4400_v8 = vpack.c.bf16 %v4373_v16, %v4372_v37  ;;  %vm4309_vm13 = vcmp.gt.f32.partialorder %v11954_v5, 0.0  ;;  %v4344_v9 = vmul.f32 %v11974_v13, %v11951_v41  ;;  %v4345_v42 = vmul.f32 %v11974_v13, %v11954_v5 }
 0x645   : > { %vm4310_vm14 = vcmp.gt.f32.partialorder %v11957_v61, 0.0  ;;  %v4374_v11 = vsel %vm4306_vm10, %v11945_v26, %v4342_v55  ;;  %v4375_v20 = vsel %vm4307_vm11, %v11948_v31, %v4343_v15  ;;  %vm4311_vm15 = vcmp.gt.f32.partialorder %v11960_v50, 0.0 }
 0x646   : > { %v4346_v7 = vmul.f32 %v11974_v13, %v11957_v61  ;;  %v4401_v45 = vpack.c.bf16 %v4375_v20, %v4374_v11  ;;  %v4376_v46 = vsel %vm4308_vm12, %v11951_v41, %v4344_v9  ;;  %v4377_v32 = vsel %vm4309_vm13, %v11954_v5, %v4345_v42 }
 0x647   : > { %7476 = vmatpush3.bf16.msra.mxu1 %v7738_v49  ;;  %v4347_v4 = vmul.f32 %v11974_v13, %v11960_v50  ;;  %v4402_v62 = vpack.c.bf16 %v4377_v32, %v4376_v46  ;;  %vm4312_vm0 = vcmp.gt.f32.partialorder %v11963_v58, 0.0  ;;  %vm4313_vm1 = vcmp.gt.f32.partialorder %v11966_v51, 0.0 }
 0x648   : > { %7477 = vmatprep.subr.bf16.mxu1 %v7739_v30  ;;  %v12048_v26 = vsel %vm4310_vm14, %v11957_v61, %v4346_v7  ;;  %v4348_v41 = vmul.f32 %v11974_v13, %v11963_v58  ;;  %v4349_v5 = vmul.f32 %v11974_v13, %v11966_v51  ;;  %vm4314_vm2 = vcmp.gt.f32.partialorder %v11969_v63, 0.0 }
 0x649   : > { %v12053_v31 = vsel %vm4311_vm15, %v11960_v50, %v4347_v4  ;;  %vm4315_vm3 = vcmp.gt.f32.partialorder %v11977_v12, 0.0  ;;  %v4350_v33 = vmul.f32 %v11974_v13, %v11969_v63  ;;  %v4351_v50 = vmul.f32 %v11974_v13, %v11977_v12 }
 0x64a   : > { %7398 = vmatmul.mubr.bf16.gmra.mrb[36].mxu1 %v4399_v27  ;;  %v4403_v61 = vpack.c.bf16 %v12053_v31, %v12048_v26  ;;  %v12068_v35 = vsel %vm4312_vm0, %v11963_v58, %v4348_v41  ;;  %v12071_v19 = vsel %vm4313_vm1, %v11966_v51, %v4349_v5  ;;  %vm4316_vm4 = vcmp.gt.f32.partialorder %v11980_v54, 0.0 }
 0x64b   : > { %7401 = vmatprep.mubr.bf16.mxu1 %v4400_v8  ;;  %7478 = vmatpush3.bf16.msra.mxu1 %v7739_v30  ;;  %vm4317_vm5 = vcmp.gt.f32.partialorder %v11983_v2, 0.0  ;;  %v4404_v18 = vpack.c.bf16 %v12071_v19, %v12068_v35  ;;  %v12078_v47 = vsel %vm4314_vm2, %v11969_v63, %v4350_v33  ;;  %v12081_v28 = vsel %vm4315_vm3, %v11977_v12, %v4351_v50  ;;  %v7743_v30 = vld [vmem:[#allocation9 + $0x30] sm:$0xff]  }
 0x64c   : > { %7479 = vmatprep.subr.bf16.mxu1 %v7740_v57  ;;  %v4352_v58 = vmul.f32 %v11974_v13, %v11980_v54  ;;  %v4405_v51 = vpack.c.bf16 %v12081_v28, %v12078_v47  ;;  %v4353_v59 = vmul.f32 %v11974_v13, %v11983_v2  ;;  %vm4318_vm6 = vcmp.gt.f32.partialorder %v11986_v1, 0.0  ;;  %v16474_v47 = vld [vmem:[#allocation29_spill] sm:$0xff] }
 0x64d   : > { %vm4319_vm7 = vcmp.gt.f32.partialorder %v11989_v6, 0.0  ;;  %v4354_v63 = vmul.f32 %v11974_v13, %v11986_v1  ;;  %v4355_v12 = vmul.f32 %v11974_v13, %v11989_v6  ;;  %vm4320_vm8 = vcmp.gt.f32.partialorder %v11992_v56, 0.0 }
 0x64e   : > { %v12092_v44 = vsel %vm4316_vm4, %v11980_v54, %v4352_v58  ;;  %v4385_v24 = vsel %vm4317_vm5, %v11983_v2, %v4353_v59  ;;  %vm4321_vm9 = vcmp.gt.f32.partialorder %v11995_v25, 0.0  ;;  %v4356_v38 = vmul.f32 %v11974_v13, %v11992_v56  ;;  %v16476_v59 = vld [vmem:[#allocation69_spill] sm:$0xff] }
 0x64f   : > { %7480 = vmatpush3.bf16.msra.mxu1 %v7740_v57  ;;  %v4357_v54 = vmul.f32 %v11974_v13, %v11995_v25  ;;  %v4406_v48 = vpack.c.bf16 %v4385_v24, %v12092_v44  ;;  %v4386_v40 = vsel %vm4318_vm6, %v11986_v1, %v4354_v63  ;;  %v4387_v27 = vsel %vm4319_vm7, %v11989_v6, %v4355_v12  ;;  %v16472_v57 = vld [vmem:[#allocation25_spill] sm:$0xff] }
 0x650   : > { %7481 = vmatprep.subr.bf16.mxu1 %v7741_v17  ;;  %vm4322_vm10 = vcmp.gt.f32.partialorder %v11998_v21, 0.0  ;;  %v4407_v37 = vpack.c.bf16 %v4387_v27, %v4386_v40  ;;  %v4388_v2 = vsel %vm4320_vm8, %v11992_v56, %v4356_v38  ;;  %vm4323_vm11 = vcmp.gt.f32.partialorder %v12001_v53, 0.0  ;;  %v7742_v56 = vld [vmem:[#allocation9 + $0x28] sm:$0xff]  }
 0x651   : > { %v4389_v16 = vsel %vm4321_vm9, %v11995_v25, %v4357_v54  ;;  %v4358_v8 = vmul.f32 %v11974_v13, %v11998_v21  ;;  %v4359_v55 = vmul.f32 %v11974_v13, %v12001_v53  ;;  %vm4324_vm12 = vcmp.gt.f32.partialorder %v12004_v39, 0.0 }
 0x652   : > { %7402 = vmatmul.mubr.bf16.gmra.mrb[40].mxu1 %v4401_v45  ;;  %v4408_v49 = vpack.c.bf16 %v4389_v16, %v4388_v2  ;;  %vm4325_vm13 = vcmp.gt.f32.partialorder %v11932_v60, 0.0  ;;  %v4360_v1 = vmul.f32 %v11974_v13, %v12004_v39  ;;  %v4361_v6 = vmul.f32 %v11974_v13, %v11932_v60  ;;  %v16481_v16 = vld [vmem:[#allocation60_spill] sm:$0xff] }
 0x653   : > { %7405 = vmatprep.mubr.bf16.mxu1 %v4402_v62  ;;  %7482 = vmatpush3.bf16.msra.mxu1 %v7741_v17  ;;  %vm4326_vm14 = vcmp.gt.f32.partialorder %v12007_v3, 0.0  ;;  %v4390_v25 = vsel %vm4322_vm10, %v11998_v21, %v4358_v8  ;;  %v4391_v15 = vsel %vm4323_vm11, %v12001_v53, %v4359_v55  ;;  %vm4327_vm15 = vcmp.gt.f32.partialorder %v12010_v14, 0.0 }
 0x654   : > { %7483 = vmatprep.subr.bf16.mxu1 %v7742_v56  ;;  %v4362_v9 = vmul.f32 %v11974_v13, %v12007_v3  ;;  %v4409_v42 = vpack.c.bf16 %v4391_v15, %v4390_v25  ;;  %v4392_v11 = vsel %vm4324_vm12, %v12004_v39, %v4360_v1  ;;  %v4393_v20 = vsel %vm4325_vm13, %v11932_v60, %v4361_v6  ;;  %v16483_v1 = vld [vmem:[#allocation61_spill] sm:$0xff]  ;;  %v16485_v15 = vld [vmem:[#allocation36_spill] sm:$0xff] }
 0x655   : > { %v4363_v7 = vmul.f32 %v11974_v13, %v12010_v14  ;;  %v4410_v45 = vpack.c.bf16 %v4393_v20, %v4392_v11  ;;  %v15841_v21 = vmax.f32 %v11839_v34, 0.0  ;;  %v16470_v53 = vmax.f32 %v11830_v0, 0.0 }
 0x656   : > { %v4394_v46 = vsel %vm4326_vm14, %v12007_v3, %v4362_v9  ;;  %v15840_v60 = vmax.f32 %v11842_v36, 0.0  ;;  %v16471_v62 = vmax.f32 %v11833_v29, 0.0  ;;  %v15839_v3 = vmax.f32 %v11848_v52, 0.0 }
 0x657   : > { %v6032_v32 = vadd.f32 %v11929_v43, %v16470_v53  ;;  %7484 = vmatpush3.bf16.msra.mxu1 %v7742_v56  ;;  %v4395_v4 = vsel %vm4327_vm15, %v12010_v14, %v4363_v7  ;;  %v7744_v14 = vld [vmem:[#allocation9 + $0x38] sm:$0xff]   ;;  %v16475_v28 = vmax.f32 %v16474_v47, 0.0  ;;  %v16477_v44 = vmax.f32 %v16476_v59, 0.0 }
 0x658   : > { %7485 = vmatprep.subr.bf16.mxu1 %v7743_v30  ;;  %v4411_v39 = vpack.c.bf16 %v4395_v4, %v4394_v46  ;;  %v16478_v12 = vmax.f32 %v16406_v10, 0.0  ;;  %v16479_v17 = vmax.f32 %v16414_v23, 0.0  ;;  %v16480_v27 = vmax.f32 %v16405_v22, 0.0  ;;  %v16487_v7 = vld [vmem:[#allocation37_spill] sm:$0xff]  ;;  %v7443_v4 = vpop.f32.mrb[64].mxu0 }
 0x659   : > { %v6033_v13 = vadd.f32 %v6032_v32, %v16471_v62  ;;  %v16484_v6 = vmax.f32 %v16483_v1, 0.0  ;;  %v16486_v9 = vmax.f32 %v16485_v15, 0.0  ;;  %v16489_v62 = vld [vmem:[#allocation38_spill] sm:$0xff] }
 0x65a   : > { %7406 = vmatmul.mubr.bf16.gmra.mrb[44].mxu1 %v4403_v61 }
 0x65b   : > { %v6034_v43 = vadd.f32 %v6033_v13, %v15841_v21  ;;  %7409 = vmatprep.mubr.bf16.mxu1 %v4404_v18  ;;  %7486 = vmatpush3.bf16.msra.mxu1 %v7743_v30  ;;  %v16473_v18 = vmax.f32 %v16472_v57, 0.0  ;;  %v12229_v30 = vld [vmem:[%s15584_s5] ss:$0 sm:$0xff]  ;;  %v16490_v13 = vmax.f32 %v16489_v62, 0.0 }
 0x65c   : > { %7487 = vmatprep.subr.bf16.mxu1 %v7744_v14 }
 0x65d   : > { %v6035_v41 = vadd.f32 %v6034_v43, %v15840_v60 }
 0x65f   : > { %v6036_v5 = vadd.f32 %v6035_v41, %v15839_v3  ;;  %7488 = vmatpush3.bf16.msra.mxu1 %v7744_v14 }
 0x661   : > { %v6037_v33 = vrot.slane %v6036_v5, 4 }
 0x662   : > { %7410 = vmatmul.mubr.bf16.gmra.mrb[48].mxu1 %v4405_v51 }
 0x663   : > { %v6038_v26 = vadd.f32 %v6037_v33, %v6036_v5  ;;  %7413 = vmatprep.mubr.bf16.mxu1 %v4406_v48 }
 0x665   : > { %v6039_v31 = vrot.slane %v6038_v26, 2 }
 0x667   : > { %v6040_v61 = vadd.f32 %v6039_v31, %v6038_v26  ;;  %v16492_v26 = vld [vmem:[#allocation67_spill] sm:$0xff] }
 0x668   : > { %v16493_v31 = vmax.f32 %v16492_v26, 0.0 }
 0x669   : > { %v6041_v50 = vrot.slane %v6040_v61, 1 }
 0x66a   : > { %7414 = vmatmul.mubr.bf16.gmra.mrb[52].mxu1 %v4407_v37 }
 0x66b   : > { %7417 = vmatprep.mubr.bf16.mxu1 %v4408_v49  ;;  %v6042_v35 = vadd.f32 %v6041_v50, %v6040_v61  ;;  %v16482_v49 = vmax.f32 %v16481_v16, 0.0 }
 0x66d   : > { %v12158_v19 = vmul.f32 0.00390625, %v6042_v35 }
 0x66f   : > { %v12163_v58 = vsub.f32 %v16473_v18, %v12158_v19  ;;  %v12168_v51 = vsub.f32 %v16475_v28, %v12158_v19  ;;  %v12173_v63 = vsub.f32 %v16477_v44, %v12158_v19  ;;  %v12178_v24 = vsub.f32 %v16478_v12, %v12158_v19  ;;  %v16496_v28 = vld [vmem:[#allocation70_spill] sm:$0xff] }
 0x670   : > { %v12187_v48 = vsub.f32 %v16479_v17, %v12158_v19  ;;  %v12194_v10 = vsub.f32 %v16480_v27, %v12158_v19  ;;  %v12201_v8 = vsub.f32 %v16482_v49, %v12158_v19  ;;  %v12208_v56 = vsub.f32 %v16484_v6, %v12158_v19 }
 0x671   : > { %v6076_v38 = vmul.f32 %v12163_v58, %v12163_v58  ;;  %v6077_v54 = vmul.f32 %v12168_v51, %v12168_v51  ;;  %v6078_v40 = vmul.f32 %v12173_v63, %v12173_v63  ;;  %v6079_v37 = vmul.f32 %v12178_v24, %v12178_v24 }
 0x672   : > { %7418 = vmatmul.mubr.bf16.gmra.mrb[56].mxu1 %v4409_v42  ;;  %v6080_v23 = vmul.f32 %v12187_v48, %v12187_v48  ;;  %v6081_v22 = vmul.f32 %v12194_v10, %v12194_v10  ;;  %v12215_v42 = vsub.f32 %v16486_v9, %v12158_v19  ;;  %v6082_v11 = vmul.f32 %v12201_v8, %v12201_v8 }
 0x673   : > { %7421 = vmatprep.mubr.bf16.mxu1 %v4410_v45  ;;  %v6108_v2 = vadd.f32 %v6077_v54, %v6076_v38  ;;  %v16488_v45 = vmax.f32 %v16487_v7, 0.0  ;;  %v6083_v53 = vmul.f32 %v12208_v56, %v12208_v56  ;;  %v12234_v43 = vsub.f32 %v16490_v13, %v12158_v19  ;;  %v16504_v7 = vld [vmem:[#allocation53_spill] sm:$0xff] }
 0x674   : > { %v6084_v14 = vmul.f32 %v12215_v42, %v12215_v42  ;;  %v12244_v61 = vsub.f32 %v16493_v31, %v12158_v19  ;;  %v12249_v18 = vadd.f32 %v7443_v4, %v12229_v30  ;;  %v16497_v59 = vmax.f32 %v16496_v28, 0.0  ;;  %v16511_v28 = vld [vmem:[#allocation55_spill] sm:$0xff] }
 0x675   : > { %v6109_v55 = vadd.f32 %v6108_v2, %v6078_v40  ;;  %v12222_v46 = vsub.f32 %v16488_v45, %v12158_v19  ;;  %v6086_v12 = vmul.f32 %v12234_v43, %v12234_v43  ;;  %v16499_v40 = vld [vmem:[#allocation72_spill] sm:$0xff]  ;;  %v16505_v45 = vmax.f32 %v16504_v7, 0.0 }
 0x676   : > { %16494 = vst [vmem:[#allocation20_spill] sm:$0xff] %v12249_v18  ;;  %v12257_v44 = vsub.f32 %v16497_v59, %v12158_v19  ;;  %v16500_v27 = vmax.f32 %v16499_v40, 0.0  ;;  %v6087_v2 = vmul.f32 %v12244_v61, %v12244_v61  ;;  %v16512_v59 = vmax.f32 %v16511_v28, 0.0 }
 0x677   : > { %v6110_v25 = vadd.f32 %v6109_v55, %v6079_v37  ;;  %v6085_v35 = vmul.f32 %v12222_v46, %v12222_v46  ;;  %v16501_v55 = vld [vmem:[#allocation52_spill] sm:$0xff] }
 0x678   : > { %v12269_v37 = vsub.f32 %v16500_v27, %v12158_v19  ;;  %v16502_v1 = vmax.f32 %v16501_v55, 0.0 }
 0x679   : > { %v6111_v20 = vadd.f32 %v6110_v25, %v6080_v23  ;;  %v6088_v25 = vmul.f32 %v12257_v44, %v12257_v44 }
 0x67a   : > { %7422 = vmatmul.mubr.bf16.gmra.mrb[60].mxu1 %v4411_v39  ;;  %v5363_v39 = vpop.f32.mrb[65].mxu0  ;;  %v12277_v6 = vsub.f32 %v16502_v1, %v12158_v19 }
 0x67b   : > { %v6112_v32 = vadd.f32 %v6111_v20, %v6081_v22  ;;  %v12239_v5 = vadd.f32 %v12229_v30, %v5363_v39  ;;  %v7444_v33 = vpop.f32.mrb[66].mxu0 }
 0x67c   : > { %v5366_v50 = vpop.f32.mrb[67].mxu0  ;;  %v12262_v54 = vadd.f32 %v7444_v33, %v12229_v30  ;;  %v6090_v31 = vmul.f32 %v12277_v6, %v12277_v6 }
 0x67d   : > { %v6113_v41 = vadd.f32 %v6112_v32, %v6082_v11  ;;  %16491 = vst [vmem:[#allocation19_spill] sm:$0xff] %v12239_v5  ;;  %v12252_v47 = vadd.f32 %v12229_v30, %v5366_v50  ;;  %v7447_v23 = vpop.f32.mrb[68].mxu0  ;;  %v6089_v32 = vmul.f32 %v12269_v37, %v12269_v37 }
 0x67e   : > { %16498 = vst [vmem:[#allocation63_spill] sm:$0xff] %v12262_v54  ;;  %v5379_v22 = vpop.f32.mrb[69].mxu0  ;;  %v12293_v62 = vadd.f32 %v7447_v23, %v12229_v30 }
 0x67f   : > { %v6114_v57 = vadd.f32 %v6113_v41, %v6083_v53  ;;  %16495 = vst [vmem:[#allocation21_spill] sm:$0xff] %v12252_v47  ;;  %v5492_v17 = vadd.f32 %v12252_v47, %v12239_v5  ;;  %v12282_v9 = vadd.f32 %v12229_v30, %v5379_v22  ;;  %v7448_v20 = vpop.f32.mrb[70].mxu0  ;;  %v12288_v53 = vsub.f32 %v16505_v45, %v12158_v19  ;;  %v16508_v41 = vld [vmem:[#allocation54_spill] sm:$0xff] }
 0x680   : > { %v5382_v4 = vpop.f32.mrb[71].mxu0  ;;  %16506 = vst [vmem:[#allocation65_spill] sm:$0xff] %v12293_v62  ;;  %v16509_v33 = vmax.f32 %v16508_v41, 0.0 }
 0x681   : > { %v6115_v38 = vadd.f32 %v6114_v57, %v6084_v14  ;;  %v5493_v49 = vadd.f32 %v5492_v17, %v12249_v18  ;;  %16503 = vst [vmem:[#allocation64_spill] sm:$0xff] %v12282_v9  ;;  %v12297_v14 = vadd.f32 %v12229_v30, %v5382_v4  ;;  %v7451_v27 = vpop.f32.mrb[72].mxu0 }
 0x682   : > { %v12302_v26 = vsub.f32 %v16509_v33, %v12158_v19  ;;  %v5395_v23 = vpop.f32.mrb[73].mxu0 }
 0x683   : > { %v6116_v16 = vadd.f32 %v6115_v38, %v6085_v35  ;;  %v5494_v11 = vadd.f32 %v5493_v49, %v12262_v54  ;;  %16507 = vst [vmem:[#allocation66_spill] sm:$0xff] %v12297_v14  ;;  %v12307_v35 = vadd.f32 %v7448_v20, %v12229_v30  ;;  %v6091_v38 = vmul.f32 %v12288_v53, %v12288_v53 }
 0x684   : > { %v6092_v55 = vmul.f32 %v12302_v26, %v12302_v26  ;;  %v12326_v22 = vadd.f32 %v12229_v30, %v5395_v23 }
 0x685   : > { %v6117_v15 = vadd.f32 %v6116_v16, %v6086_v12  ;;  %v5495_v13 = vadd.f32 %v5494_v11, %v12282_v9  ;;  %16510 = vst [vmem:[#allocation68_spill] sm:$0xff] %v12307_v35  ;;  %v12313_v12 = vsub.f32 %v16512_v59, %v12158_v19  ;;  %v16516_v11 = vld [vmem:[#allocation74_spill] sm:$0xff] }
 0x686   : > { %16515 = vst [vmem:[#allocation23_spill] sm:$0xff] %v12326_v22  ;;  %v16517_v20 = vmax.f32 %v16516_v11, 0.0 }
 0x687   : > { %v6118_v39 = vadd.f32 %v6117_v15, %v6087_v2  ;;  %v5496_v57 = vadd.f32 %v5495_v13, %v12297_v14  ;;  %v16513_v2 = vld [vmem:[#allocation73_spill] sm:$0xff]  ;;  %v7452_v15 = vpop.f32.mrb[74].mxu0  ;;  %v6093_v45 = vmul.f32 %v12313_v12, %v12313_v12 }
 0x688   : > { %v16514_v16 = vmax.f32 %v16513_v2, 0.0  ;;  %v12332_v7 = vsub.f32 %v16517_v20, %v12158_v19  ;;  %v16523_v2 = vld [vmem:[#allocation71_spill] sm:$0xff] }
 0x689   : > { %v6119_v50 = vadd.f32 %v6118_v39, %v6088_v25  ;;  %v5497_v40 = vadd.f32 %v5496_v57, %v12293_v62  ;;  %v12337_v39 = vadd.f32 %v7451_v27, %v12229_v30 }
 0x68a   : > { %v12321_v49 = vsub.f32 %v16514_v16, %v12158_v19  ;;  %v16524_v16 = vmax.f32 %v16523_v2, 0.0 }
 0x68b   : > { %v6120_v17 = vadd.f32 %v6119_v50, %v6089_v32  ;;  %v5498_v25 = vadd.f32 %v5497_v40, %v12307_v35  ;;  %v5398_v32 = vpop.f32.mrb[75].mxu0  ;;  %16518 = vst [vmem:[#allocation47_spill] sm:$0xff] %v12337_v39 }
 0x68c   : > { %v12341_v41 = vadd.f32 %v12229_v30, %v5398_v32  ;;  %v7455_v33 = vpop.f32.mrb[76].mxu0  ;;  %v6094_v59 = vmul.f32 %v12321_v49, %v12321_v49  ;;  %v12357_v23 = vsub.f32 %v16524_v16, %v12158_v19  ;;  %v16526_v32 = vld [vmem:[#allocation62_spill] sm:$0xff] }
 0x68d   : > { %v6121_v1 = vadd.f32 %v6120_v17, %v6090_v31  ;;  %v5499_v13 = vadd.f32 %v5498_v25, %v12326_v22  ;;  %v16520_v31 = vld [vmem:[#allocation59_spill] sm:$0xff]  ;;  %v5411_v28 = vpop.f32.mrb[77].mxu0  ;;  %v6095_v25 = vmul.f32 %v12332_v7, %v12332_v7  ;;  %v12384_v21 = vadd.f32 %v7455_v33, %v12229_v30 }
 0x68e   : > { %16519 = vst [vmem:[#allocation48_spill] sm:$0xff] %v12341_v41  ;;  %v16521_v50 = vmax.f32 %v16520_v31, 0.0  ;;  %v7456_v27 = vpop.f32.mrb[78].mxu0 }
 0x68f   : > { %v6122_v4 = vadd.f32 %v6121_v1, %v6091_v38  ;;  %v12351_v38 = vadd.f32 %v7452_v15, %v12229_v30  ;;  %v5500_v40 = vadd.f32 %v5499_v13, %v12341_v41  ;;  %v5414_v1 = vpop.f32.mrb[79].mxu0  ;;  %16531 = vst [vmem:[#allocation56_spill] sm:$0xff] %v12384_v21  ;;  %v12395_v41 = vadd.f32 %v7456_v27, %v12229_v30 }
 0x690   : > { %v12346_v57 = vsub.f32 %v16521_v50, %v12158_v19  ;;  %v7459_v15 = vpop.f32.mrb[80].mxu0 }
 0x691   : > { %v6123_v17 = vadd.f32 %v6122_v4, %v6092_v55  ;;  %16522 = vst [vmem:[#allocation49_spill] sm:$0xff] %v12351_v38  ;;  %v5501_v20 = vadd.f32 %v5500_v40, %v12337_v39  ;;  %v12363_v55 = vadd.f32 %v12229_v30, %v5411_v28  ;;  %v16527_v4 = vmax.f32 %v16526_v32, 0.0  ;;  %v5427_v31 = vpop.f32.mrb[81].mxu0  ;;  %v16529_v28 = vld [vmem:[#allocation30_spill] sm:$0xff]  ;;  %16534 = vst [vmem:[#allocation57_spill] sm:$0xff] %v12395_v41 }
 0x692   : > { %v6096_v50 = vmul.f32 %v12346_v57, %v12346_v57  ;;  %v16530_v40 = vmax.f32 %v16529_v28, 0.0  ;;  %v6097_v32 = vmul.f32 %v12357_v23, %v12357_v23  ;;  %v12428_v9 = vadd.f32 %v7459_v15, %v12229_v30 }
 0x693   : > { %v6124_v11 = vadd.f32 %v6123_v17, %v6093_v45  ;;  %16525 = vst [vmem:[#allocation50_spill] sm:$0xff] %v12363_v55  ;;  %v12368_v13 = vsub.f32 %v16527_v4, %v12158_v19  ;;  %v5502_v16 = vadd.f32 %v5501_v20, %v12351_v38  ;;  %v12374_v45 = vadd.f32 %v12229_v30, %v5414_v1  ;;  %v7460_v17 = vpop.f32.mrb[82].mxu0  ;;  %v16532_v1 = vld [vmem:[#allocation22_spill] sm:$0xff] }
 0x694   : > { %v12379_v3 = vsub.f32 %v16530_v40, %v12158_v19  ;;  %v5430_v60 = vpop.f32.mrb[83].mxu0  ;;  %v16533_v20 = vmax.f32 %v16532_v1, 0.0  ;;  %16542 = vst [vmem:[#allocation27_spill] sm:$0xff] %v12428_v9  ;;  %v12439_v54 = vadd.f32 %v7460_v17, %v12229_v30  ;;  %v16545_v17 = vmax.f32 %v11842_v36, 0.0 }
 0x695   : > { %v6125_v2 = vadd.f32 %v6124_v11, %v6094_v59  ;;  %16528 = vst [vmem:[#allocation51_spill] sm:$0xff] %v12374_v45  ;;  %v5503_v59 = vadd.f32 %v5502_v16, %v12363_v55  ;;  %v7463_v11 = vpop.f32.mrb[84].mxu0  ;;  %v6098_v28 = vmul.f32 %v12368_v13, %v12368_v13 }
 0x696   : > { %v12390_v38 = vsub.f32 %v16533_v20, %v12158_v19  ;;  %v5443_v39 = vpop.f32.mrb[85].mxu0  ;;  %v6099_v1 = vmul.f32 %v12379_v3, %v12379_v3 }
 0x697   : > { %v6126_v4 = vadd.f32 %v6125_v2, %v6095_v25  ;;  %v5504_v25 = vadd.f32 %v5503_v59, %v12374_v45  ;;  %v7464_v33 = vpop.f32.mrb[86].mxu0  ;;  %v16535_v2 = vld [vmem:[#allocation24_spill] sm:$0xff] }
 0x698   : > { %v16536_v16 = vmax.f32 %v16535_v2, 0.0  ;;  %v5446_v22 = vpop.f32.mrb[87].mxu0  ;;  %v6100_v2 = vmul.f32 %v12390_v38, %v12390_v38 }
 0x699   : > { %v6127_v40 = vadd.f32 %v6126_v4, %v6096_v50  ;;  %v5505_v35 = vadd.f32 %v5504_v25, %v12384_v21  ;;  %v12407_v50 = vadd.f32 %v12229_v30, %v5427_v31  ;;  %v7467_v27 = vpop.f32.mrb[88].mxu0  ;;  %v16538_v4 = vld [vmem:[#allocation39_spill] sm:$0xff]  ;;  %v16541_v31 = vmax.f32 %v11830_v0, 0.0 }
 0x69a   : > { %v12401_v55 = vsub.f32 %v16536_v16, %v12158_v19  ;;  %v16539_v59 = vmax.f32 %v16538_v4, 0.0  ;;  %v5459_v62 = vpop.f32.mrb[89].mxu0 }
 0x69b   : > { %v6128_v20 = vadd.f32 %v6127_v40, %v6097_v32  ;;  %16537 = vst [vmem:[#allocation58_spill] sm:$0xff] %v12407_v50  ;;  %v5506_v14 = vadd.f32 %v5505_v35, %v12395_v41  ;;  %v12418_v32 = vadd.f32 %v12229_v30, %v5430_v60  ;;  %v7468_v40 = vpop.f32.mrb[90].mxu0  ;;  %v12423_v25 = vsub.f32 %v16541_v31, %v12158_v19 }
 0x69c   : > { %v12412_v45 = vsub.f32 %v16539_v59, %v12158_v19  ;;  %v5462_v21 = vpop.f32.mrb[91].mxu0  ;;  %v6101_v4 = vmul.f32 %v12401_v55, %v12401_v55  ;;  %v16543_v60 = vmax.f32 %v11833_v29, 0.0 }
 0x69d   : > { %v6129_v16 = vadd.f32 %v6128_v20, %v6098_v28  ;;  %16540 = vst [vmem:[#allocation26_spill] sm:$0xff] %v12418_v32  ;;  %v5507_v28 = vadd.f32 %v5506_v14, %v12407_v50  ;;  %v7471_v35 = vpop.f32.mrb[92].mxu0  ;;  %v16544_v14 = vmax.f32 %v11839_v34, 0.0  ;;  %v6103_v29 = vmul.f32 %v12423_v25, %v12423_v25 }
 0x69e   : > { %v12434_v20 = vsub.f32 %v16543_v60, %v12158_v19  ;;  %v5475_v41 = vpop.f32.mrb[93].mxu0  ;;  %v6102_v0 = vmul.f32 %v12412_v45, %v12412_v45 }
 0x69f   : > { %v6130_v59 = vadd.f32 %v6129_v16, %v6099_v1  ;;  %v5508_v1 = vadd.f32 %v5507_v28, %v12418_v32  ;;  %v7472_v15 = vpop.f32.mrb[94].mxu0  ;;  %v12445_v16 = vsub.f32 %v16544_v14, %v12158_v19  ;;  %v12462_v32 = vadd.f32 %v12229_v30, %v5446_v22 }
 0x6a0   : > { %v5478_v50 = vpop.f32.mrb[95].mxu0  ;;  %v6104_v34 = vmul.f32 %v12434_v20, %v12434_v20  ;;  %v12478_v22 = vadd.f32 %v7464_v33, %v12229_v30  ;;  %v12489_v33 = vadd.f32 %v12229_v30, %v5462_v21  ;;  %v12507_v21 = vadd.f32 %v7468_v40, %v12229_v30 }
 0x6a1   : > { %v6131_v31 = vadd.f32 %v6130_v59, %v6100_v2  ;;  %v5509_v18 = vadd.f32 %v5508_v1, %v12428_v9  ;;  %v12451_v2 = vadd.f32 %v12229_v30, %v5443_v39  ;;  %v12456_v59 = vsub.f32 %v16545_v17, %v12158_v19 }
 0x6a2   : > { %v6105_v39 = vmul.f32 %v12445_v16, %v12445_v16  ;;  %v12472_v1 = vadd.f32 %v7463_v11, %v12229_v30  ;;  %v12485_v11 = vadd.f32 %v12229_v30, %v5459_v62  ;;  %v12500_v62 = vadd.f32 %v7467_v27, %v12229_v30  ;;  %16551 = vst [vmem:[#allocation34_spill] sm:$0xff] %v12507_v21 }
 0x6a3   : > { %v6132_v60 = vadd.f32 %v6131_v31, %v6101_v4  ;;  %v5510_v14 = vadd.f32 %v5509_v18, %v12439_v54  ;;  %v16546_v4 = vmax.f32 %v11848_v52, 0.0  ;;  %v6106_v18 = vmul.f32 %v12456_v59, %v12456_v59 }
 0x6a4   : > { %16547 = vst [vmem:[#allocation28_spill] sm:$0xff] %v12485_v11  ;;  %16549 = vst [vmem:[#allocation32_spill] sm:$0xff] %v12500_v62  ;;  %v12514_v27 = vadd.f32 %v12229_v30, %v5475_v41 }
 0x6a5   : > { %v6133_v28 = vadd.f32 %v6132_v60, %v6102_v0  ;;  %v12467_v31 = vsub.f32 %v16546_v4, %v12158_v19  ;;  %v5511_v17 = vadd.f32 %v5510_v14, %v12451_v2 }
 0x6a7   : > { %v6134_v36 = vadd.f32 %v6133_v28, %v6103_v29  ;;  %v5512_v52 = vadd.f32 %v5511_v17, %v12462_v32  ;;  %v6107_v19 = vmul.f32 %v12467_v31, %v12467_v31 }
 0x6a9   : > { %v6135_v0 = vadd.f32 %v6134_v36, %v6104_v34  ;;  %v5513_v29 = vadd.f32 %v5512_v52, %v12472_v1  ;;  %v12494_v36 = vld [vmem:[%s15586_s7] ss:$0 sm:$0xff] }
 0x6ab   : > { %v6136_v60 = vadd.f32 %v6135_v0, %v6105_v39  ;;  %v5514_v34 = vadd.f32 %v5513_v29, %v12478_v22 }
 0x6ad   : > { %v6137_v14 = vadd.f32 %v6136_v60, %v6106_v18  ;;  %v5515_v18 = vadd.f32 %v5514_v34, %v12485_v11 }
 0x6af   : > { %v6138_v17 = vadd.f32 %v6137_v14, %v6107_v19  ;;  %v5516_v29 = vadd.f32 %v5515_v18, %v12489_v33 }
 0x6b1   : > { %v6139_v52 = vrot.slane %v6138_v17, 4 }
 0x6b3   : > { %v6140_v47 = vadd.f32 %v6139_v52, %v6138_v17  ;;  %v12523_v17 = vadd.f32 %v12229_v30, %v5478_v50 }
 0x6b5   : > { %v7299_v4 = vpop.f32.mrb[0].mxu1  ;;  %v6141_v5 = vrot.slane %v6140_v47, 2 }
 0x6b6   : > { %v3008_v28 = vpop.f32.mrb[1].mxu1 }
 0x6b7   : > { %v7300_v9 = vpop.f32.mrb[2].mxu1  ;;  %v12504_v60 = vadd.f32 %v12494_v36, %v3008_v28  ;;  %v12517_v28 = vadd.f32 %v7299_v4, %v12494_v36  ;;  %v6142_v52 = vadd.f32 %v6141_v5, %v6140_v47 }
 0x6b8   : > { %v3011_v39 = vpop.f32.mrb[3].mxu1  ;;  %v12531_v4 = vadd.f32 %v7300_v9, %v12494_v36 }
 0x6b9   : > { %v12497_v0 = vadd.f32 %v12494_v36, %v3011_v39  ;;  %16550 = vst [vmem:[#allocation33_spill] sm:$0xff] %v12504_v60  ;;  %v5517_v39 = vadd.f32 %v5516_v29, %v12500_v62  ;;  %16552 = vst [vmem:[#allocation40_spill] sm:$0xff] %v12517_v28  ;;  %v12527_v29 = vadd.f32 %v7471_v35, %v12229_v30 }
 0x6ba   : > { %16554 = vst [vmem:[#allocation42_spill] sm:$0xff] %v12531_v4  ;;  %v12534_v62 = vadd.f32 %v7472_v15, %v12229_v30  ;;  %v7078_v30 = vld [vmem:[%s15582_s3 + $0x2] ss:$0 sm:$0xff] }
 0x6bb   : > { %16548 = vst [vmem:[#allocation31_spill] sm:$0xff] %v12497_v0  ;;  %v3137_v19 = vadd.f32 %v12497_v0, %v12504_v60  ;;  %v5518_v40 = vadd.f32 %v5517_v39, %v12507_v21  ;;  %16553 = vst [vmem:[#allocation41_spill] sm:$0xff] %v12527_v29  ;;  %v6143_v60 = vrot.slane %v6142_v52, 1 }
 0x6bc   : > { %16555 = vst [vmem:[#allocation43_spill] sm:$0xff] %v12534_v62 }
 0x6bd   : > { %v7303_v14 = vpop.f32.mrb[4].mxu1  ;;  %v3138_v0 = vadd.f32 %v3137_v19, %v12517_v28  ;;  %v5519_v41 = vadd.f32 %v5518_v40, %v12514_v27  ;;  %v6144_v50 = vadd.f32 %v6143_v60, %v6142_v52 }
 0x6be   : > { %v3024_v34 = vpop.f32.mrb[5].mxu1 }
 0x6bf   : > { %v12519_v11 = vpop.f32.mrb[6].mxu1  ;;  %v5520_v39 = vadd.f32 %v5519_v41, %v12523_v17  ;;  %v12538_v21 = vadd.f32 %v12494_v36, %v3024_v34  ;;  %v3139_v5 = vadd.f32 %v3138_v0, %v12531_v4  ;;  %v6145_v40 = vmul.f32 0.00390625, %v6144_v50 }
 0x6c0   : > { %v3027_v18 = vpop.f32.mrb[7].mxu1  ;;  %v6150_v41 = vmul.f32 %v7078_v30, %v12163_v58  ;;  %v6151_v50 = vmul.f32 %v7078_v30, %v12168_v51  ;;  %v6153_v4 = vmul.f32 %v7078_v30, %v12178_v24  ;;  %v6157_v58 = vmul.f32 %v7078_v30, %v12208_v56 }
 0x6c1   : > { %16556 = vst [vmem:[#allocation44_spill] sm:$0xff] %v12538_v21  ;;  %v5521_v35 = vadd.f32 %v5520_v39, %v12527_v29  ;;  %v6182_v60 = vadd.f32 1e-05, %v6145_v40  ;;  %v3140_v34 = vadd.f32 %v3139_v5, %v12538_v21  ;;  %v12554_v0 = vadd.f32 %v12494_v36, %v3027_v18 }
 0x6c2   : > { %v6155_v40 = vmul.f32 %v7078_v30, %v12194_v10  ;;  %v6156_v5 = vmul.f32 %v7078_v30, %v12201_v8  ;;  %v6159_v51 = vmul.f32 %v7078_v30, %v12222_v46  ;;  %v12578_v10 = vmul.f32 %v7078_v30, %v12257_v44 }
 0x6c3   : > { %v5522_v9 = vadd.f32 %v5521_v35, %v12534_v62  ;;  %16557 = vst [vmem:[#allocation45_spill] sm:$0xff] %v12554_v0  ;;  %7710 = vrsqrt.f32 %v6182_v60  ;;  %v6152_v35 = vmul.f32 %v7078_v30, %v12173_v63  ;;  %v6154_v62 = vmul.f32 %v7078_v30, %v12187_v48 }
 0x6c4   : > { %v3141_v18 = vadd.f32 %v3140_v34, %v12554_v0  ;;  %v12570_v63 = vmul.f32 %v7078_v30, %v12234_v43  ;;  %v12575_v48 = vmul.f32 %v7078_v30, %v12244_v61  ;;  %v12581_v8 = vmul.f32 %v7078_v30, %v12269_v37 }
 0x6c5   : > { %v12541_v47 = vpop.f32.mrb[8].mxu1  ;;  %v5523_v52 = vrot.slane %v5522_v9, 4  ;;  %v12584_v56 = vadd.f32 %v7303_v14, %v12494_v36  ;;  %v12589_v46 = vmul.f32 %v7078_v30, %v12277_v6  ;;  %v12592_v43 = vmul.f32 %v7078_v30, %v12288_v53 }
 0x6c6   : > { %v3040_v19 = vpop.f32.mrb[9].mxu1  ;;  %v12595_v61 = vmul.f32 %v7078_v30, %v12302_v26  ;;  %v12598_v44 = vmul.f32 %v7078_v30, %v12313_v12  ;;  %v12603_v37 = vmul.f32 %v7078_v30, %v12321_v49  ;;  %v12606_v14 = vmul.f32 %v7078_v30, %v12332_v7 }
 0x6c7   : > { %v12545_v28 = vpop.f32.mrb[10].mxu1  ;;  %v5524_v39 = vadd.f32 %v5523_v52, %v5522_v9  ;;  %v6158_v9 = vmul.f32 %v7078_v30, %v12215_v42  ;;  %16558 = vst [vmem:[#allocation46_spill] sm:$0xff] %v12584_v56  ;;  %v3142_v6 = vadd.f32 %v3141_v18, %v12584_v56  ;;  %v12612_v53 = vmul.f32 %v7078_v30, %v12346_v57 }
 0x6c8   : > { %v12550_v15 = vpop.f32.mrb[11].mxu1  ;;  %v12615_v26 = vmul.f32 %v7078_v30, %v12357_v23  ;;  %v12618_v12 = vmul.f32 %v7078_v30, %v12368_v13  ;;  %v12621_v52 = vmul.f32 %v7078_v30, %v12379_v3  ;;  %v12624_v49 = vmul.f32 %v7078_v30, %v12390_v38 }
 0x6c9   : > { %v5525_v21 = vrot.slane %v5524_v39, 2  ;;  %v12627_v7 = vmul.f32 %v7078_v30, %v12401_v55  ;;  %v12634_v57 = vadd.f32 %v12519_v11, %v12494_v36  ;;  %v12637_v23 = vmul.f32 %v7078_v30, %v12423_v25 }
 0x6ca   : > { %v12640_v13 = vmul.f32 %v7078_v30, %v12434_v20  ;;  %v12643_v3 = vmul.f32 %v7078_v30, %v12445_v16  ;;  %v12646_v38 = vmul.f32 %v7078_v30, %v12456_v59  ;;  %v12656_v11 = vmul.f32 %v7078_v30, %v12467_v31 }
 0x6cb   : > { %v12609_v34 = vadd.f32 %v5525_v21, %v5524_v39  ;;  %v12630_v21 = vmul.f32 %v7078_v30, %v12412_v45  ;;  %16559 = vst [vmem:[#allocation18_spill] sm:$0xff] %v12634_v57  ;;  %v12653_v45 = vld [vmem:[%s15582_s3 + $0x3] ss:$0 sm:$0xff]  ;;  %v12659_v25 = vadd.f32 %v12494_v36, %v3040_v19  ;;  %v12662_v20 = vadd.f32 %v3142_v6, %v12634_v57 }
 0x6cd   : > { %v12564_v29 = vpop.f32.mrb[12].mxu1  ;;  %v12648_v55 = vpop.eup %7710  ;;  %16560 = vst [vmem:[#allocation35_spill] sm:$0xff] %v12659_v25 }
 0x6ce   : > { %v12572_v24 = vpop.f32.mrb[13].mxu1  ;;  %v6184_v39 = vmul.f32 %v12648_v55, %v6150_v41  ;;  %v6185_v18 = vmul.f32 %v12648_v55, %v6151_v50  ;;  %v6186_v56 = vmul.f32 %v12648_v55, %v6152_v35  ;;  %v6187_v0 = vmul.f32 %v12648_v55, %v6153_v4 }
 0x6cf   : > { %v12586_v42 = vpop.f32.mrb[14].mxu1  ;;  %v6188_v19 = vmul.f32 %v12648_v55, %v6154_v62  ;;  %v6189_v30 = vmul.f32 %v12648_v55, %v6155_v40  ;;  %v6190_v6 = vmul.f32 %v12648_v55, %v6156_v5  ;;  %v6191_v16 = vmul.f32 %v12648_v55, %v6157_v58 }
 0x6d0   : > { %v12600_v60 = vpop.f32.mrb[15].mxu1  ;;  %v6220_v41 = vadd.f32 %v12653_v45, %v6184_v39  ;;  %v6221_v50 = vadd.f32 %v12653_v45, %v6185_v18  ;;  %v6222_v35 = vadd.f32 %v12653_v45, %v6186_v56  ;;  %v6223_v4 = vadd.f32 %v12653_v45, %v6187_v0 }
 0x6d1   : > { %v6224_v62 = vadd.f32 %v12653_v45, %v6188_v19  ;;  %v6225_v40 = vadd.f32 %v12653_v45, %v6189_v30  ;;  %v12688_v5 = vadd.f32 %v12653_v45, %v6190_v6  ;;  %v12691_v58 = vadd.f32 %v12653_v45, %v6191_v16 }
 0x6d2   : > { %6783 = vst [vmem:[#allocation12 + $0x8] sm:$0xff] %v6220_v41  ;;  %6784 = vst [vmem:[#allocation12 + $0x38] sm:$0xff] %v6221_v50  ;;  %v6253_v39 = vpack.c.bf16 %v6223_v4, %v6222_v35  ;;  %v6192_v0 = vmul.f32 %v12648_v55, %v6158_v9  ;;  %v6193_v56 = vmul.f32 %v12648_v55, %v6159_v51 }
 0x6d3   : > { %6785 = vst [vmem:[#allocation12 + $0x68] sm:$0xff] %v6222_v35  ;;  %6786 = vst [vmem:[#allocation12 + $0x98] sm:$0xff] %v6223_v4  ;;  %v6254_v18 = vpack.c.bf16 %v6225_v40, %v6224_v62  ;;  %v6255_v19 = vpack.c.bf16 %v12691_v58, %v12688_v5  ;;  %v6194_v16 = vmul.f32 %v12648_v55, %v12570_v63 }
 0x6d4   : > { %6787 = vst [vmem:[#allocation12 + $0xc8] sm:$0xff] %v6224_v62  ;;  %6788 = vst [vmem:[#allocation12 + $0xf8] sm:$0xff] %v6225_v40  ;;  %v6195_v30 = vmul.f32 %v12648_v55, %v12575_v48  ;;  %v6228_v9 = vadd.f32 %v12653_v45, %v6192_v0  ;;  %v6229_v51 = vadd.f32 %v12653_v45, %v6193_v56 }
 0x6d5   : > { %v12665_v59 = vpop.f32.mrb[16].mxu1  ;;  %6789 = vst [vmem:[#allocation12 + $0x128] sm:$0xff] %v12688_v5  ;;  %6790 = vst [vmem:[#allocation12 + $0x158] sm:$0xff] %v12691_v58  ;;  %v6196_v6 = vmul.f32 %v12648_v55, %v12578_v10  ;;  %v6198_v48 = vmul.f32 %v12648_v55, %v12589_v46  ;;  %v6200_v62 = vmul.f32 %v12648_v55, %v12595_v61 }
 0x6d6   : > { %16561 = vst [vmem:[#allocation25_spill] sm:$0xff] %v12665_v59  ;;  %v12671_v31 = vpop.f32.mrb[17].mxu1  ;;  %v12713_v63 = vadd.f32 %v12653_v45, %v6195_v30  ;;  %v6256_v10 = vpack.c.bf16 %v6229_v51, %v6228_v9  ;;  %6791 = vst [vmem:[#allocation12 + $0x188] sm:$0xff] %v6228_v9  ;;  %v6201_v58 = vmul.f32 %v12648_v55, %v12598_v44 }
 0x6d7   : > { %v12677_v57 = vpop.f32.mrb[18].mxu1  ;;  %6792 = vst [vmem:[#allocation12 + $0x1b8] sm:$0xff] %v6229_v51  ;;  %v12750_v0 = vadd.f32 %v12653_v45, %v6200_v62  ;;  %v6202_v56 = vmul.f32 %v12648_v55, %v12603_v37  ;;  %v6204_v9 = vmul.f32 %v12648_v55, %v12612_v53  ;;  %v6205_v37 = vmul.f32 %v12648_v55, %v12615_v26  ;;  %v16580_v53 = vld [vmem:[#allocation21_spill] sm:$0xff] }
 0x6d8   : > { %16562 = vst [vmem:[#allocation29_spill] sm:$0xff] %v12677_v57  ;;  %v12683_v59 = vpop.f32.mrb[19].mxu1  ;;  %v6252_v57 = vpack.c.bf16 %v6221_v50, %v6220_v41  ;;  %v6197_v41 = vmul.f32 %v12648_v55, %v12581_v8  ;;  %v12710_v50 = vadd.f32 %v12653_v45, %v6194_v16  ;;  %v12722_v8 = vadd.f32 %v12653_v45, %v6196_v6 }
 0x6d9   : > { %6794 = vst [vmem:[#allocation12 + $0x218] sm:$0xff] %v12713_v63  ;;  %v12763_v30 = vadd.f32 %v12653_v45, %v6201_v58  ;;  %6799 = vst [vmem:[#allocation12 + $0x308] sm:$0xff] %v12750_v0  ;;  %v6206_v6 = vmul.f32 %v12648_v55, %v12618_v12  ;;  %v12784_v26 = vadd.f32 %v12653_v45, %v6204_v9 }
 0x6da   : > { %7489 = vmatprep.mubr.bf16.mxu1 %v6252_v57  ;;  %v6199_v57 = vmul.f32 %v12648_v55, %v12592_v43  ;;  %v12725_v4 = vadd.f32 %v12653_v45, %v6197_v41  ;;  %v6257_v46 = vpack.c.bf16 %v12713_v63, %v12710_v50  ;;  %6793 = vst [vmem:[#allocation12 + $0x1e8] sm:$0xff] %v12710_v50  ;;  %6795 = vst [vmem:[#allocation12 + $0x248] sm:$0xff] %v12722_v8 }
 0x6db   : > { %7490 = vmatmul.mubr.bf16.vlgmr.msra.gmra.mrb[64].mxu1 %v6253_v39  ;;  %v12736_v43 = vadd.f32 %v12653_v45, %v6198_v48  ;;  %v6207_v41 = vmul.f32 %v12648_v55, %v12621_v52  ;;  %6800 = vst [vmem:[#allocation12 + $0x338] sm:$0xff] %v12763_v30  ;;  %v12787_v48 = vadd.f32 %v12653_v45, %v6205_v37  ;;  %6803 = vst [vmem:[#allocation12 + $0x3c8] sm:$0xff] %v12784_v26 }
 0x6dc   : > { %7493 = vmatprep.mubr.bf16.mxu1 %v6254_v18  ;;  %v12739_v5 = vadd.f32 %v12653_v45, %v6199_v57  ;;  %v6258_v61 = vpack.c.bf16 %v12725_v4, %v12722_v8  ;;  %6796 = vst [vmem:[#allocation12 + $0x278] sm:$0xff] %v12725_v4  ;;  %v6203_v18 = vmul.f32 %v12648_v55, %v12606_v14  ;;  %v16572_v4 = vld [vmem:[#allocation28_spill] sm:$0xff] }
 0x6dd   : > { %v12719_v35 = vpop.f32.mrb[20].mxu1  ;;  %6797 = vst [vmem:[#allocation12 + $0x2a8] sm:$0xff] %v12736_v43  ;;  %v12771_v14 = vadd.f32 %v12653_v45, %v6202_v56  ;;  %v6208_v57 = vmul.f32 %v12648_v55, %v12624_v49  ;;  %v12796_v52 = vadd.f32 %v12653_v45, %v6206_v6  ;;  %v12799_v62 = vadd.f32 %v12653_v45, %v6207_v41 }
 0x6de   : > { %v12729_v40 = vpop.f32.mrb[21].mxu1  ;;  %6798 = vst [vmem:[#allocation12 + $0x2d8] sm:$0xff] %v12739_v5  ;;  %v12774_v51 = vadd.f32 %v12653_v45, %v6203_v18  ;;  %v6209_v58 = vmul.f32 %v12648_v55, %v12627_v7  ;;  %6804 = vst [vmem:[#allocation12 + $0x3f8] sm:$0xff] %v12787_v48  ;;  %v6210_v56 = vmul.f32 %v12648_v55, %v12630_v21 }
 0x6df   : > { %v12743_v39 = vpop.f32.mrb[22].mxu1  ;;  %6801 = vst [vmem:[#allocation12 + $0x368] sm:$0xff] %v12771_v14  ;;  %v12806_v49 = vadd.f32 %v12653_v45, %v6208_v57  ;;  %v6211_v18 = vmul.f32 %v12648_v55, %v12637_v23  ;;  %v3144_v9 = vadd.f32 %v12662_v20, %v12659_v25  ;;  %6805 = vst [vmem:[#allocation12 + $0x428] sm:$0xff] %v12796_v52 }
 0x6e0   : > { %v12756_v16 = vpop.f32.mrb[23].mxu1  ;;  %6802 = vst [vmem:[#allocation12 + $0x398] sm:$0xff] %v12774_v51  ;;  %6806 = vst [vmem:[#allocation12 + $0x458] sm:$0xff] %v12799_v62  ;;  %v12819_v7 = vadd.f32 %v12653_v45, %v6209_v58  ;;  %v6213_v21 = vmul.f32 %v12648_v55, %v12643_v3  ;;  %v12827_v23 = vadd.f32 %v12494_v36, %v12550_v15  ;;  %v16564_v58 = vrot.slane %v12609_v34, 1 }
 0x6e1   : > { %6807 = vst [vmem:[#allocation12 + $0x488] sm:$0xff] %v12806_v49  ;;  %v12836_v6 = vadd.f32 %v12653_v45, %v6211_v18  ;;  %v6215_v3 = vmul.f32 %v12648_v55, %v12656_v11 }
 0x6e2   : > { %16563 = vst [vmem:[#allocation69_spill] sm:$0xff] %v12827_v23  ;;  %6808 = vst [vmem:[#allocation12 + $0x4b8] sm:$0xff] %v12819_v7  ;;  %v12849_v57 = vadd.f32 %v12653_v45, %v6213_v21 }
 0x6e3   : > { %7494 = vmatmul.mubr.bf16.gmra.mrb[68].mxu1 %v6255_v19  ;;  %v6212_v19 = vmul.f32 %v12648_v55, %v12640_v13  ;;  %v6214_v13 = vmul.f32 %v12648_v55, %v12646_v38  ;;  %6810 = vst [vmem:[#allocation12 + $0x518] sm:$0xff] %v12836_v6  ;;  %v12864_v11 = vadd.f32 %v12653_v45, %v6215_v3 }
 0x6e4   : > { %7497 = vmatprep.mubr.bf16.mxu1 %v6256_v10  ;;  %v12833_v10 = vadd.f32 %v12653_v45, %v6210_v56  ;;  %v5528_v56 = vadd.f32 %v16564_v58, %v12609_v34  ;;  %6812 = vst [vmem:[#allocation12 + $0x578] sm:$0xff] %v12849_v57  ;;  %v3145_v34 = vadd.f32 %v3144_v9, %v12827_v23 }
 0x6e5   : > { %v12814_v37 = vpop.f32.mrb[24].mxu1  ;;  %v12846_v15 = vadd.f32 %v12653_v45, %v6212_v19  ;;  %v12861_v55 = vadd.f32 %v12653_v45, %v6214_v13  ;;  %6814 = vst [vmem:[#allocation12 + $0x5d8] sm:$0xff] %v12864_v11  ;;  %v12877_v45 = vadd.f32 %v12541_v47, %v12494_v36  ;;  %v12895_v47 = vadd.f32 %v12545_v28, %v12494_v36 }
 0x6e6   : > { %v12829_v20 = vpop.f32.mrb[25].mxu1  ;;  %6809 = vst [vmem:[#allocation12 + $0x4e8] sm:$0xff] %v12833_v10  ;;  %v12879_v13 = vmul.f32 0.00390625, %v5528_v56 }
 0x6e7   : > { %v12842_v41 = vpop.f32.mrb[26].mxu1  ;;  %6811 = vst [vmem:[#allocation12 + $0x548] sm:$0xff] %v12846_v15  ;;  %6813 = vst [vmem:[#allocation12 + $0x5a8] sm:$0xff] %v12861_v55  ;;  %v3146_v58 = vadd.f32 %v3145_v34, %v12877_v45 }
 0x6e8   : > { %v12854_v18 = vpop.f32.mrb[27].mxu1  ;;  %16565 = vst [vmem:[#allocation60_spill] sm:$0xff] %v12877_v45  ;;  %v12891_v9 = vsub.f32 %v12439_v54, %v12879_v13  ;;  %16567 = vst [vmem:[#allocation36_spill] sm:$0xff] %v12895_v47  ;;  %v12902_v50 = vsub.f32 %v12451_v2, %v12879_v13  ;;  %v12906_v63 = vsub.f32 %v12462_v32, %v12879_v13  ;;  %v16575_v32 = vld [vmem:[#allocation32_spill] sm:$0xff] }
 0x6e9   : > { %v12910_v54 = vsub.f32 %v12472_v1, %v12879_v13  ;;  %v12914_v28 = vsub.f32 %v12478_v22, %v12879_v13  ;;  %v12924_v2 = vsub.f32 %v12489_v33, %v12879_v13  ;;  %v16576_v1 = vld [vmem:[#allocation34_spill] sm:$0xff]  ;;  %v12938_v21 = vsub.f32 %v12514_v27, %v12879_v13  ;;  %v16577_v33 = vld [vmem:[#allocation41_spill] sm:$0xff] }
 0x6ea   : > { %16566 = vst [vmem:[#allocation61_spill] sm:$0xff] %v12891_v9  ;;  %16568 = vst [vmem:[#allocation37_spill] sm:$0xff] %v12902_v50  ;;  %v12932_v34 = vsub.f32 %v16576_v1, %v12879_v13  ;;  %v12946_v19 = vsub.f32 %v16577_v33, %v12879_v13  ;;  %v16579_v1 = vld [vmem:[#allocation19_spill] sm:$0xff]  ;;  %v12958_v27 = vsub.f32 %v16580_v53, %v12879_v13  ;;  %v16582_v33 = vld [vmem:[#allocation20_spill] sm:$0xff] }
 0x6eb   : > { %7498 = vmatmul.mubr.bf16.gmra.mrb[72].mxu1 %v6257_v46  ;;  %16569 = vst [vmem:[#allocation38_spill] sm:$0xff] %v12906_v63  ;;  %16570 = vst [vmem:[#allocation67_spill] sm:$0xff] %v12910_v54  ;;  %v12920_v46 = vsub.f32 %v16572_v4, %v12879_v13  ;;  %v12942_v4 = vsub.f32 %v12523_v17, %v12879_v13  ;;  %v12954_v12 = vsub.f32 %v16579_v1, %v12879_v13  ;;  %v16586_v53 = vld [vmem:[#allocation63_spill] sm:$0xff] }
 0x6ec   : > { %7501 = vmatprep.mubr.bf16.mxu1 %v6258_v61  ;;  %16571 = vst [vmem:[#allocation70_spill] sm:$0xff] %v12914_v28  ;;  %16574 = vst [vmem:[#allocation52_spill] sm:$0xff] %v12924_v2  ;;  %v12928_v61 = vsub.f32 %v16575_v32, %v12879_v13  ;;  %v16578_v32 = vld [vmem:[#allocation43_spill] sm:$0xff]  ;;  %v12962_v17 = vadd.f32 %v12494_v36, %v12572_v24  ;;  %v3147_v44 = vadd.f32 %v3146_v58, %v12895_v47  ;;  %v16590_v47 = vld [vmem:[#allocation65_spill] sm:$0xff] }
 0x6ed   : > { %v12884_v3 = vpop.f32.mrb[28].mxu1  ;;  %16573 = vst [vmem:[#allocation72_spill] sm:$0xff] %v12920_v46  ;;  %v12950_v38 = vsub.f32 %v16578_v32, %v12879_v13  ;;  %v12967_v45 = vsub.f32 %v16582_v33, %v12879_v13  ;;  %v16584_v32 = vpack.c.bf16 %v12739_v5, %v12736_v43  ;;  %v16585_v1 = vpack.c.bf16 %v12763_v30, %v12750_v0  ;;  %v16588_v5 = vld [vmem:[#allocation64_spill] sm:$0xff] }
 0x6ee   : > { %v12898_v56 = vpop.f32.mrb[29].mxu1  ;;  %16581 = vst [vmem:[#allocation53_spill] sm:$0xff] %v12962_v17  ;;  %v12977_v23 = vsub.f32 %v16586_v53, %v12879_v13  ;;  %v5562_v24 = vmul.f32 %v12954_v12, %v12954_v12  ;;  %v5563_v58 = vmul.f32 %v12958_v27, %v12958_v27  ;;  %v3148_v33 = vadd.f32 %v3147_v44, %v12962_v17 }
 0x6ef   : > { %v12916_v8 = vpop.f32.mrb[30].mxu1  ;;  %16583 = vst [vmem:[#allocation54_spill] sm:$0xff] %v12967_v45  ;;  %v12986_v43 = vadd.f32 %v12494_v36, %v12600_v60  ;;  %v12990_v0 = vsub.f32 %v16588_v5, %v12879_v13  ;;  %v5564_v30 = vmul.f32 %v12967_v45, %v12967_v45  ;;  %v13005_v5 = vsub.f32 %v16590_v47, %v12879_v13 }
 0x6f0   : > { %v12934_v22 = vpop.f32.mrb[31].mxu1  ;;  %v5565_v44 = vmul.f32 %v12977_v23, %v12977_v23  ;;  %v5594_v17 = vadd.f32 %v5563_v58, %v5562_v24  ;;  %v16593_v24 = vld [vmem:[#allocation68_spill] sm:$0xff] }
 0x6f1   : > { %16587 = vst [vmem:[#allocation55_spill] sm:$0xff] %v12986_v43  ;;  %v3149_v60 = vadd.f32 %v3148_v33, %v12986_v43  ;;  %v5566_v25 = vmul.f32 %v12990_v0, %v12990_v0  ;;  %v13018_v58 = vsub.f32 %v16593_v24, %v12879_v13 }
 0x6f2   : > { %v5595_v45 = vadd.f32 %v5594_v17, %v5564_v30  ;;  %v16594_v17 = vld [vmem:[#allocation23_spill] sm:$0xff] }
 0x6f3   : > { %7502 = vmatmul.mubr.bf16.gmra.mrb[76].mxu1 %v16584_v32  ;;  %v6262_v32 = vpack.c.bf16 %v12787_v48, %v12784_v26  ;;  %v16591_v26 = vpack.c.bf16 %v12774_v51, %v12771_v14  ;;  %v13014_v48 = vadd.f32 %v12564_v29, %v12494_v36  ;;  %v13025_v30 = vsub.f32 %v16594_v17, %v12879_v13 }
 0x6f4   : > { %7505 = vmatprep.mubr.bf16.mxu1 %v16585_v1  ;;  %v16589_v1 = vld [vmem:[#allocation66_spill] sm:$0xff]  ;;  %v5596_v33 = vadd.f32 %v5595_v45, %v5565_v44  ;;  %v5568_v14 = vmul.f32 %v13005_v5, %v13005_v5  ;;  %v6263_v51 = vpack.c.bf16 %v12799_v62, %v12796_v52  ;;  %v6264_v45 = vpack.c.bf16 %v12819_v7, %v12806_v49  ;;  %v16595_v44 = vld [vmem:[#allocation48_spill] sm:$0xff] }
 0x6f5   : > { %v12998_v53 = vsub.f32 %v16589_v1, %v12879_v13  ;;  %16592 = vst [vmem:[#allocation73_spill] sm:$0xff] %v13014_v48  ;;  %v3150_v1 = vadd.f32 %v3149_v60, %v13014_v48  ;;  %v13039_v60 = vsub.f32 %v16595_v44, %v12879_v13  ;;  %v5570_v49 = vmul.f32 %v13025_v30, %v13025_v30  ;;  %v16599_v44 = vld [vmem:[#allocation25_spill] sm:$0xff] }
 0x6f6   : > { %v5597_v29 = vadd.f32 %v5596_v33, %v5566_v25  ;;  %v13045_v25 = vadd.f32 %v12494_v36, %v12671_v31  ;;  %v13056_v33 = vadd.f32 %v12494_v36, %v12683_v59  ;;  %v16597_v31 = vld [vmem:[#allocation49_spill] sm:$0xff]  ;;  %v16600_v59 = vld [vmem:[#allocation50_spill] sm:$0xff] }
 0x6f7   : > { %v5567_v47 = vmul.f32 %v12998_v53, %v12998_v53  ;;  %v13061_v17 = vsub.f32 %v16597_v31, %v12879_v13 }
 0x6f9   : > { %v5598_v24 = vadd.f32 %v5597_v29, %v5567_v47  ;;  %16598 = vst [vmem:[#allocation74_spill] sm:$0xff] %v13061_v17 }
 0x6fb   : > { %7506 = vmatmul.mubr.bf16.gmra.mrb[80].mxu1 %v16591_v26  ;;  %v5569_v26 = vmul.f32 %v13018_v58, %v13018_v58  ;;  %v5599_v7 = vadd.f32 %v5598_v24, %v5568_v14 }
 0x6fc   : > { %7509 = vmatprep.mubr.bf16.mxu1 %v6262_v32  ;;  %v13033_v32 = vadd.f32 %v12586_v42, %v12494_v36  ;;  %v16596_v42 = vld [vmem:[#allocation47_spill] sm:$0xff] }
 0x6fd   : > { %v13050_v62 = vsub.f32 %v16596_v42, %v12879_v13  ;;  %v5600_v29 = vadd.f32 %v5599_v7, %v5569_v26  ;;  %v13067_v42 = vadd.f32 %v16599_v44, %v12494_v36  ;;  %v13083_v7 = vadd.f32 %v12494_v36, %v12729_v40 }
 0x6fe   : > { %v3151_v52 = vadd.f32 %v3150_v1, %v13033_v32  ;;  %v5571_v1 = vmul.f32 %v13039_v60, %v13039_v60 }
 0x6ff   : > { %v5601_v24 = vadd.f32 %v5600_v29, %v5570_v49  ;;  %v13094_v29 = vadd.f32 %v12494_v36, %v12756_v16  ;;  %v16606_v16 = vld [vmem:[#allocation57_spill] sm:$0xff] }
 0x700   : > { %v3152_v47 = vadd.f32 %v3151_v52, %v13045_v25  ;;  %v16601_v52 = vld [vmem:[#allocation29_spill] sm:$0xff] }
 0x701   : > { %v13078_v31 = vadd.f32 %v16601_v52, %v12494_v36  ;;  %v5602_v48 = vadd.f32 %v5601_v24, %v5571_v1  ;;  %v16605_v24 = vpack.c.bf16 %v12849_v57, %v12846_v15 }
 0x702   : > { %v3153_v14 = vadd.f32 %v3152_v47, %v13056_v33  ;;  %v16602_v47 = vld [vmem:[#allocation51_spill] sm:$0xff] }
 0x703   : > { %7510 = vmatmul.mubr.bf16.gmra.mrb[84].mxu1 %v6263_v51  ;;  %v13072_v51 = vsub.f32 %v16600_v59, %v12879_v13  ;;  %v13087_v44 = vsub.f32 %v16602_v47, %v12879_v13  ;;  %v5573_v59 = vmul.f32 %v13061_v17, %v13061_v17  ;;  %v16604_v47 = vpack.c.bf16 %v12836_v6, %v12833_v10  ;;  %v16608_v6 = vld [vmem:[#allocation58_spill] sm:$0xff] }
 0x704   : > { %7513 = vmatprep.mubr.bf16.mxu1 %v6264_v45  ;;  %v5572_v45 = vmul.f32 %v13050_v62, %v13050_v62  ;;  %v3154_v26 = vadd.f32 %v3153_v14, %v13067_v42  ;;  %v16603_v14 = vld [vmem:[#allocation56_spill] sm:$0xff] }
 0x705   : > { %v13098_v52 = vsub.f32 %v16603_v14, %v12879_v13  ;;  %v5574_v40 = vmul.f32 %v13072_v51, %v13072_v51  ;;  %v5575_v14 = vmul.f32 %v13087_v44, %v13087_v44 }
 0x706   : > { %v3155_v49 = vadd.f32 %v3154_v26, %v13078_v31  ;;  %v5603_v43 = vadd.f32 %v5602_v48, %v5572_v45  ;;  %v13111_v26 = vsub.f32 %v16606_v16, %v12879_v13  ;;  %v13117_v48 = vadd.f32 %v12719_v35, %v12494_v36 }
 0x707   : > { %v13122_v45 = vsub.f32 %v16608_v6, %v12879_v13  ;;  %v5576_v15 = vmul.f32 %v13098_v52, %v13098_v52  ;;  %v13133_v35 = vadd.f32 %v12494_v36, %v12829_v20 }
 0x708   : > { %v3156_v1 = vadd.f32 %v3155_v49, %v13083_v7  ;;  %16607 = vst [vmem:[#allocation59_spill] sm:$0xff] %v13111_v26  ;;  %v5604_v17 = vadd.f32 %v5603_v43, %v5573_v59  ;;  %v13128_v49 = vadd.f32 %v12743_v39, %v12494_v36  ;;  %v16609_v59 = vld [vmem:[#allocation26_spill] sm:$0xff]  ;;  %v13144_v39 = vadd.f32 %v12494_v36, %v12854_v18 }
 0x709   : > { %v5578_v20 = vmul.f32 %v13122_v45, %v13122_v45 }
 0x70a   : > { %v3157_v10 = vadd.f32 %v3156_v1, %v13094_v29  ;;  %v5605_v57 = vadd.f32 %v5604_v17, %v5574_v40  ;;  %v5577_v1 = vmul.f32 %v13111_v26, %v13111_v26  ;;  %v16611_v40 = vld [vmem:[#allocation27_spill] sm:$0xff] }
 0x70b   : > { %7514 = vmatmul.mubr.bf16.gmra.mrb[88].mxu1 %v16604_v47  ;;  %v13137_v47 = vsub.f32 %v16609_v59, %v12879_v13  ;;  %v13148_v16 = vsub.f32 %v16611_v40, %v12879_v13  ;;  %v16613_v59 = vpack.c.bf16 %v12864_v11, %v12861_v55  ;;  %v13160_v13 = vadd.f32 %v12814_v37, %v12494_v36 }
 0x70c   : > { %7517 = vmatprep.mubr.bf16.mxu1 %v16605_v24  ;;  %v3158_v43 = vadd.f32 %v3157_v10, %v13117_v48  ;;  %v5606_v24 = vadd.f32 %v5605_v57, %v5575_v14  ;;  %v13167_v11 = vadd.f32 %v12842_v41, %v12494_v36  ;;  %v5581_v37 = vmul.f32 %v12891_v9, %v12891_v9 }
 0x70d   : > { %16610 = vst [vmem:[#allocation71_spill] sm:$0xff] %v13137_v47  ;;  %16612 = vst [vmem:[#allocation62_spill] sm:$0xff] %v13148_v16  ;;  %v5579_v18 = vmul.f32 %v13137_v47, %v13137_v47  ;;  %v13184_v41 = vadd.f32 %v12494_v36, %v12934_v22 }
 0x70e   : > { %v3159_v17 = vadd.f32 %v3158_v43, %v13128_v49  ;;  %v5607_v10 = vadd.f32 %v5606_v24, %v5576_v15  ;;  %v5580_v24 = vmul.f32 %v13148_v16, %v13148_v16 }
 0x710   : > { %v3160_v14 = vadd.f32 %v3159_v17, %v13133_v35  ;;  %v5608_v43 = vadd.f32 %v5607_v10, %v5577_v1  ;;  %v13172_v1 = vadd.f32 %v12494_v36, %v12898_v56  ;;  %v5582_v56 = vmul.f32 %v12902_v50, %v12902_v50 }
 0x711   : > { %v13208_v50 = vadd.f32 %v12916_v8, %v12494_v36 }
 0x712   : > { %v3161_v40 = vadd.f32 %v3160_v14, %v13144_v39  ;;  %v5609_v55 = vadd.f32 %v5608_v43, %v5578_v20 }
 0x713   : > { %7518 = vmatmul.mubr.bf16.gmra.mrb[92].mxu1 %v16613_v59  ;;  %v13179_v59 = vld [vmem:[%s15586_s7] ss:$0 sm:$0xff] }
 0x714   : > { %v3162_v17 = vadd.f32 %v3161_v40, %v13160_v13  ;;  %v5610_v10 = vadd.f32 %v5609_v55, %v5579_v18  ;;  %16614 = vst [vmem:[#allocation30_spill] sm:$0xff] %v13179_v59 }
 0x715   : > { %v7395_v6 = vpop.f32.mrb[32].mxu1 }
 0x716   : > { %v4451_v57 = vpop.f32.mrb[33].mxu1  ;;  %v3163_v20 = vadd.f32 %v3162_v17, %v13167_v11  ;;  %v5611_v43 = vadd.f32 %v5610_v10, %v5580_v24  ;;  %v5583_v17 = vmul.f32 %v12906_v63, %v12906_v63 }
 0x717   : > { %v7396_v26 = vpop.f32.mrb[34].mxu1  ;;  %v13193_v55 = vadd.f32 %v13179_v59, %v4451_v57  ;;  %v5584_v57 = vmul.f32 %v12910_v54, %v12910_v54 }
 0x718   : > { %v4454_v15 = vpop.f32.mrb[35].mxu1  ;;  %v3164_v18 = vadd.f32 %v3163_v20, %v13172_v1  ;;  %v5612_v16 = vadd.f32 %v5611_v43, %v5581_v37  ;;  %v13212_v43 = vadd.f32 %v7395_v6, %v13179_v59  ;;  %v13223_v8 = vadd.f32 %v7396_v26, %v13179_v59 }
 0x719   : > { %v13187_v14 = vadd.f32 %v13179_v59, %v4454_v15  ;;  %16616 = vst [vmem:[#allocation24_spill] sm:$0xff] %v13193_v55  ;;  %v13199_v15 = vadd.f32 %v12884_v3, %v12494_v36  ;;  %v5585_v3 = vmul.f32 %v12914_v28, %v12914_v28  ;;  %v5587_v6 = vmul.f32 %v12924_v2, %v12924_v2 }
 0x71a   : > { %v3165_v47 = vadd.f32 %v3164_v18, %v13184_v41  ;;  %v5613_v20 = vadd.f32 %v5612_v16, %v5582_v56  ;;  %16617 = vst [vmem:[#allocation39_spill] sm:$0xff] %v13212_v43  ;;  %v5586_v16 = vmul.f32 %v12920_v46, %v12920_v46  ;;  %16618 = vst [vmem:[#allocation28_spill] sm:$0xff] %v13223_v8 }
 0x71b   : > { %16615 = vst [vmem:[#allocation22_spill] sm:$0xff] %v13187_v14  ;;  %v4580_v24 = vadd.f32 %v13187_v14, %v13193_v55  ;;  %v5589_v46 = vmul.f32 %v12932_v34, %v12932_v34 }
 0x71c   : > { %v3166_v37 = vadd.f32 %v3165_v47, %v13199_v15  ;;  %v5614_v18 = vadd.f32 %v5613_v20, %v5583_v17 }
 0x71d   : > { %v7399_v40 = vpop.f32.mrb[36].mxu1  ;;  %v4581_v55 = vadd.f32 %v4580_v24, %v13212_v43 }
 0x71e   : > { %v4467_v9 = vpop.f32.mrb[37].mxu1  ;;  %v3167_v14 = vadd.f32 %v3166_v37, %v13208_v50  ;;  %v5615_v56 = vadd.f32 %v5614_v18, %v5584_v57  ;;  %v5588_v18 = vmul.f32 %v12928_v61, %v12928_v61 }
 0x71f   : > { %v7400_v22 = vpop.f32.mrb[38].mxu1  ;;  %v13230_v24 = vadd.f32 %v13179_v59, %v4467_v9  ;;  %v4582_v37 = vadd.f32 %v4581_v55, %v13223_v8  ;;  %v5590_v9 = vmul.f32 %v12938_v21, %v12938_v21 }
 0x720   : > { %v4470_v10 = vpop.f32.mrb[39].mxu1  ;;  %v3168_v36 = vrot.slane %v3167_v14, 4  ;;  %v5616_v28 = vadd.f32 %v5615_v56, %v5585_v3 }
 0x721   : > { %16619 = vst [vmem:[#allocation32_spill] sm:$0xff] %v13230_v24  ;;  %v4583_v3 = vadd.f32 %v4582_v37, %v13230_v24  ;;  %v5592_v37 = vmul.f32 %v12946_v19, %v12946_v19 }
 0x722   : > { %v3169_v20 = vadd.f32 %v3168_v36, %v3167_v14  ;;  %v5617_v43 = vadd.f32 %v5616_v28, %v5586_v16  ;;  %v13239_v14 = vadd.f32 %v13179_v59, %v4470_v10  ;;  %v5591_v28 = vmul.f32 %v12942_v4, %v12942_v4 }
 0x724   : > { %v3170_v26 = vrot.slane %v3169_v20, 2  ;;  %v5618_v63 = vadd.f32 %v5617_v43, %v5587_v6  ;;  %16620 = vst [vmem:[#allocation34_spill] sm:$0xff] %v13239_v14 }
 0x725   : > { %v13220_v54 = vpop.f32.mrb[40].mxu1 }
 0x726   : > { %v4483_v47 = vpop.f32.mrb[41].mxu1  ;;  %v3171_v2 = vadd.f32 %v3170_v26, %v3169_v20  ;;  %v5619_v55 = vadd.f32 %v5618_v63, %v5588_v18  ;;  %v4584_v20 = vadd.f32 %v4583_v3, %v13239_v14  ;;  %v13257_v18 = vadd.f32 %v7399_v40, %v13179_v59 }
 0x727   : > { %v13227_v17 = vpop.f32.mrb[42].mxu1  ;;  %v5593_v26 = vmul.f32 %v12950_v38, %v12950_v38  ;;  %v13267_v3 = vadd.f32 %v7400_v22, %v13179_v59  ;;  %v13272_v40 = vadd.f32 %v13179_v59, %v4483_v47 }
 0x728   : > { %v4486_v57 = vpop.f32.mrb[43].mxu1  ;;  %v3172_v36 = vrot.slane %v3171_v2, 1  ;;  %v5620_v16 = vadd.f32 %v5619_v55, %v5589_v46  ;;  %16622 = vst [vmem:[#allocation43_spill] sm:$0xff] %v13257_v18  ;;  %v4585_v46 = vadd.f32 %v4584_v20, %v13257_v18 }
 0x729   : > { %16625 = vst [vmem:[#allocation20_spill] sm:$0xff] %v13267_v3  ;;  %16626 = vst [vmem:[#allocation63_spill] sm:$0xff] %v13272_v40 }
 0x72a   : > { %v3173_v6 = vadd.f32 %v3172_v36, %v3171_v2  ;;  %v5621_v63 = vadd.f32 %v5620_v16, %v5590_v9 }
 0x72c   : > { %v5622_v24 = vadd.f32 %v5621_v63, %v5591_v28 }
 0x72d   : > { %v13243_v56 = vpop.f32.mrb[44].mxu1 }
 0x72e   : > { %16621 = vst [vmem:[#allocation41_spill] sm:$0xff] %v13243_v56  ;;  %v13245_v8 = vpop.f32.mrb[45].mxu1  ;;  %v13261_v56 = vmul.f32 0.00390625, %v3173_v6  ;;  %v5623_v2 = vadd.f32 %v5622_v24, %v5592_v37  ;;  %v4586_v6 = vadd.f32 %v4585_v46, %v13267_v3 }
 0x72f   : > { %v13249_v43 = vpop.f32.mrb[46].mxu1 }
 0x730   : > { %v13252_v10 = vpop.f32.mrb[47].mxu1  ;;  %16623 = vst [vmem:[#allocation19_spill] sm:$0xff] %v13261_v56  ;;  %v5624_v9 = vadd.f32 %v5623_v2, %v5593_v26  ;;  %v13278_v28 = vsub.f32 %v13033_v32, %v13261_v56  ;;  %v13282_v24 = vsub.f32 %v13045_v25, %v13261_v56  ;;  %v13286_v22 = vsub.f32 %v13056_v33, %v13261_v56 }
 0x731   : > { %v13293_v37 = vsub.f32 %v13067_v42, %v13261_v56  ;;  %v13297_v32 = vsub.f32 %v13078_v31, %v13261_v56  ;;  %v13301_v25 = vsub.f32 %v13083_v7, %v13261_v56  ;;  %v13305_v33 = vsub.f32 %v13094_v29, %v13261_v56 }
 0x732   : > { %16628 = vst [vmem:[#allocation66_spill] sm:$0xff] %v13278_v28  ;;  %16629 = vst [vmem:[#allocation65_spill] sm:$0xff] %v13282_v24  ;;  %v5625_v47 = vrot.slane %v5624_v9, 4  ;;  %v13309_v63 = vsub.f32 %v13117_v48, %v13261_v56  ;;  %v13313_v42 = vsub.f32 %v13128_v49, %v13261_v56  ;;  %v13317_v31 = vsub.f32 %v13133_v35, %v13261_v56 }
 0x733   : > { %16630 = vst [vmem:[#allocation68_spill] sm:$0xff] %v13286_v22  ;;  %16631 = vst [vmem:[#allocation23_spill] sm:$0xff] %v13293_v37  ;;  %v13321_v7 = vsub.f32 %v13144_v39, %v13261_v56  ;;  %v13325_v29 = vsub.f32 %v13160_v13, %v13261_v56  ;;  %v13329_v48 = vsub.f32 %v13167_v11, %v13261_v56  ;;  %v16646_v11 = vld [vmem:[#allocation33_spill] sm:$0xff] }
 0x734   : > { %16632 = vst [vmem:[#allocation48_spill] sm:$0xff] %v13297_v32  ;;  %16633 = vst [vmem:[#allocation47_spill] sm:$0xff] %v13301_v25  ;;  %v5626_v26 = vadd.f32 %v5625_v47, %v5624_v9  ;;  %v13333_v49 = vsub.f32 %v13172_v1, %v13261_v56  ;;  %v13337_v35 = vsub.f32 %v13184_v41, %v13261_v56  ;;  %v16648_v1 = vld [vmem:[#allocation31_spill] sm:$0xff]  ;;  %v16681_v25 = vld [vmem:[#allocation46_spill] sm:$0xff] }
 0x735   : > { %v13264_v55 = vpop.f32.mrb[48].mxu1  ;;  %16634 = vst [vmem:[#allocation49_spill] sm:$0xff] %v13305_v33  ;;  %16635 = vst [vmem:[#allocation25_spill] sm:$0xff] %v13309_v63  ;;  %v13341_v39 = vsub.f32 %v13199_v15, %v13261_v56  ;;  %v13345_v13 = vsub.f32 %v13208_v50, %v13261_v56  ;;  %v13351_v9 = vsub.f32 %v16646_v11, %v13261_v56  ;;  %v13370_v11 = vld [vmem:[%s15584_s5 + $0x1] ss:$0 sm:$0xff] }
 0x736   : > { %16624 = vst [vmem:[#allocation21_spill] sm:$0xff] %v13264_v55  ;;  %v13269_v36 = vpop.f32.mrb[49].mxu1  ;;  %16636 = vst [vmem:[#allocation50_spill] sm:$0xff] %v13313_v42  ;;  %v5627_v46 = vrot.slane %v5626_v26, 2  ;;  %v13355_v47 = vsub.f32 %v16648_v1, %v13261_v56  ;;  %v4587_v41 = vadd.f32 %v4586_v6, %v13272_v40  ;;  %v13359_v15 = vadd.f32 %v13179_v59, %v4486_v57  ;;  %v16654_v1 = vld [vmem:[#allocation40_spill] sm:$0xff]  ;;  %v16676_v42 = vld [vmem:[#allocation37_spill] sm:$0xff] }
 0x737   : > { %v13274_v16 = vpop.f32.mrb[50].mxu1  ;;  %16637 = vst [vmem:[#allocation29_spill] sm:$0xff] %v13317_v31  ;;  %16638 = vst [vmem:[#allocation51_spill] sm:$0xff] %v13321_v7  ;;  %v3207_v57 = vmul.f32 %v13351_v9, %v13351_v9  ;;  %v13383_v40 = vadd.f32 %v13220_v54, %v13179_v59 }
 0x738   : > { %16627 = vst [vmem:[#allocation64_spill] sm:$0xff] %v13274_v16  ;;  %v13289_v20 = vpop.f32.mrb[51].mxu1  ;;  %16639 = vst [vmem:[#allocation56_spill] sm:$0xff] %v13325_v29  ;;  %v5628_v50 = vadd.f32 %v5627_v46, %v5626_v26  ;;  %v3208_v6 = vmul.f32 %v13355_v47, %v13355_v47  ;;  %v4588_v26 = vadd.f32 %v4587_v41, %v13359_v15 }
 0x739   : > { %16640 = vst [vmem:[#allocation57_spill] sm:$0xff] %v13329_v48  ;;  %16641 = vst [vmem:[#allocation58_spill] sm:$0xff] %v13333_v49  ;;  %v13387_v49 = vmul.f32 %v13370_v11, %v12954_v12  ;;  %v16661_v12 = vld [vmem:[#allocation54_spill] sm:$0xff] }
 0x73a   : > { %16642 = vst [vmem:[#allocation26_spill] sm:$0xff] %v13337_v35  ;;  %16643 = vst [vmem:[#allocation27_spill] sm:$0xff] %v13341_v39  ;;  %v13374_v39 = vsub.f32 %v16654_v1, %v13261_v56  ;;  %v16657_v1 = vld [vmem:[#allocation42_spill] sm:$0xff]  ;;  %v3239_v54 = vadd.f32 %v3208_v6, %v3207_v57  ;;  %v4589_v41 = vadd.f32 %v4588_v26, %v13383_v40 }
 0x73b   : > { %16644 = vst [vmem:[#allocation75_spill] sm:$0xff] %v13345_v13  ;;  %16647 = vst [vmem:[#allocation33_spill] sm:$0xff] %v13351_v9  ;;  %v5629_v13 = vrot.slane %v5628_v50, 1  ;;  %v13391_v48 = vsub.f32 %v16657_v1, %v13261_v56  ;;  %v5639_v1 = vmul.f32 %v13370_v11, %v12977_v23  ;;  %v5642_v57 = vmul.f32 %v13370_v11, %v13005_v5 }
 0x73c   : > { %16649 = vst [vmem:[#allocation31_spill] sm:$0xff] %v13355_v47  ;;  %16650 = vst [vmem:[#allocation77_spill] sm:$0xff] %v13359_v15  ;;  %v13397_v47 = vmul.f32 %v13370_v11, %v12958_v27  ;;  %v5640_v15 = vmul.f32 %v13370_v11, %v12990_v0  ;;  %v13418_v26 = vadd.f32 %v13227_v17, %v13179_v59  ;;  %v16665_v0 = vld [vmem:[#allocation44_spill] sm:$0xff] }
 0x73d   : > { %v13347_v2 = vpop.f32.mrb[52].mxu1  ;;  %16655 = vst [vmem:[#allocation40_spill] sm:$0xff] %v13374_v39  ;;  %v5630_v46 = vadd.f32 %v5629_v13, %v5628_v50  ;;  %16656 = vst [vmem:[#allocation81_spill] sm:$0xff] %v13383_v40  ;;  %v3209_v13 = vmul.f32 %v13374_v39, %v13374_v39  ;;  %v5641_v39 = vmul.f32 %v13370_v11, %v12998_v53 }
 0x73e   : > { %16645 = vst [vmem:[#allocation76_spill] sm:$0xff] %v13347_v2  ;;  %v13361_v3 = vpop.f32.mrb[53].mxu1  ;;  %16658 = vst [vmem:[#allocation42_spill] sm:$0xff] %v13391_v48  ;;  %v5643_v23 = vmul.f32 %v13370_v11, %v13018_v58  ;;  %v3210_v53 = vmul.f32 %v13391_v48, %v13391_v48  ;;  %v5644_v5 = vmul.f32 %v13370_v11, %v13025_v30 }
 0x73f   : > { %16651 = vst [vmem:[#allocation78_spill] sm:$0xff] %v13361_v3  ;;  %v13363_v18 = vpop.f32.mrb[54].mxu1  ;;  %v5631_v35 = vmul.f32 0.00390625, %v5630_v46  ;;  %v5638_v46 = vmul.f32 %v13370_v11, %v16661_v12  ;;  %v3240_v6 = vadd.f32 %v3239_v54, %v3209_v13  ;;  %16663 = vst [vmem:[#allocation84_spill] sm:$0xff] %v13418_v26  ;;  %v5645_v17 = vmul.f32 %v13370_v11, %v13039_v60  ;;  %v16668_v54 = vld [vmem:[#allocation74_spill] sm:$0xff] }
 0x740   : > { %16652 = vst [vmem:[#allocation79_spill] sm:$0xff] %v13363_v18  ;;  %v13365_v14 = vpop.f32.mrb[55].mxu1  ;;  %v13436_v13 = vadd.f32 %v13179_v59, %v13245_v8  ;;  %v4590_v58 = vadd.f32 %v4589_v41, %v13418_v26  ;;  %v5648_v40 = vmul.f32 %v13370_v11, %v13072_v51  ;;  %v5649_v30 = vmul.f32 %v13370_v11, %v13087_v44  ;;  %v16669_v8 = vld [vmem:[#allocation59_spill] sm:$0xff]  ;;  %v16672_v51 = vld [vmem:[#allocation45_spill] sm:$0xff] }
 0x741   : > { %16653 = vst [vmem:[#allocation80_spill] sm:$0xff] %v13365_v14  ;;  %v5668_v29 = vadd.f32 1e-05, %v5631_v35  ;;  %v13426_v35 = vsub.f32 %v16665_v0, %v13261_v56  ;;  %v5647_v0 = vmul.f32 %v13370_v11, %v16668_v54  ;;  %v3241_v48 = vadd.f32 %v3240_v6, %v3210_v53  ;;  %v16671_v54 = vld [vmem:[#allocation62_spill] sm:$0xff]  ;;  %v16675_v53 = vld [vmem:[#allocation61_spill] sm:$0xff] }
 0x742   : > { %16667 = vst [vmem:[#allocation86_spill] sm:$0xff] %v13436_v13  ;;  %v5650_v60 = vmul.f32 %v13370_v11, %v13098_v52  ;;  %v5651_v7 = vmul.f32 %v13370_v11, %v16669_v8  ;;  %v5652_v41 = vmul.f32 %v13370_v11, %v13122_v45  ;;  %v5654_v31 = vmul.f32 %v13370_v11, %v16671_v54 }
 0x743   : > { %7712 = vrsqrt.f32 %v5668_v29  ;;  %16666 = vst [vmem:[#allocation44_spill] sm:$0xff] %v13426_v35  ;;  %v5646_v29 = vmul.f32 %v13370_v11, %v13050_v62  ;;  %v16670_v62 = vld [vmem:[#allocation71_spill] sm:$0xff]  ;;  %v13459_v6 = vsub.f32 %v16672_v51, %v13261_v56  ;;  %v3211_v44 = vmul.f32 %v13426_v35, %v13426_v35  ;;  %v16679_v51 = vld [vmem:[#allocation38_spill] sm:$0xff] }
 0x744   : > { %v5653_v26 = vmul.f32 %v13370_v11, %v16670_v62  ;;  %v5655_v8 = vmul.f32 %v13370_v11, %v16675_v53  ;;  %v5656_v45 = vmul.f32 %v13370_v11, %v16676_v42  ;;  %v4591_v62 = vadd.f32 %v4590_v58, %v13436_v13  ;;  %v16680_v35 = vld [vmem:[#allocation67_spill] sm:$0xff]  ;;  %v16684_v58 = vld [vmem:[#allocation70_spill] sm:$0xff] }
 0x745   : > { %v13393_v9 = vpop.f32.mrb[56].mxu1  ;;  %16673 = vst [vmem:[#allocation74_spill] sm:$0xff] %v13459_v6  ;;  %v13472_v54 = vadd.f32 %v13179_v59, %v13252_v10  ;;  %v5657_v33 = vmul.f32 %v13370_v11, %v16679_v51  ;;  %v13482_v53 = vsub.f32 %v16681_v25, %v13261_v56  ;;  %v5659_v13 = vmul.f32 %v13370_v11, %v16684_v58  ;;  %v16685_v10 = vld [vmem:[#allocation72_spill] sm:$0xff] }
 0x746   : > { %16659 = vst [vmem:[#allocation82_spill] sm:$0xff] %v13393_v9  ;;  %v13402_v50 = vpop.f32.mrb[57].mxu1  ;;  %v5660_v32 = vmul.f32 %v13370_v11, %v16685_v10  ;;  %v5662_v51 = vmul.f32 %v13370_v11, %v12928_v61  ;;  %v5663_v25 = vmul.f32 %v13370_v11, %v12932_v34  ;;  %v3212_v58 = vmul.f32 %v13459_v6, %v13459_v6  ;;  %v16688_v10 = vld [vmem:[#allocation41_spill] sm:$0xff] }
 0x747   : > { %16660 = vst [vmem:[#allocation83_spill] sm:$0xff] %v13402_v50  ;;  %v13410_v27 = vpop.f32.mrb[58].mxu1  ;;  %16677 = vst [vmem:[#allocation71_spill] sm:$0xff] %v13472_v54  ;;  %v5667_v61 = vmul.f32 %v13370_v11, %v12950_v38  ;;  %v4592_v34 = vadd.f32 %v4591_v62, %v13472_v54 }
 0x748   : > { %16662 = vst [vmem:[#allocation54_spill] sm:$0xff] %v13410_v27  ;;  %v13420_v12 = vpop.f32.mrb[59].mxu1  ;;  %16682 = vst [vmem:[#allocation45_spill] sm:$0xff] %v13482_v53  ;;  %v3242_v27 = vadd.f32 %v3241_v48, %v3211_v44  ;;  %v5664_v48 = vmul.f32 %v13370_v11, %v12938_v21  ;;  %v5665_v44 = vmul.f32 %v13370_v11, %v12942_v4  ;;  %v16690_v21 = vld [vmem:[#allocation18_spill] sm:$0xff]  ;;  %v16692_v4 = vld [vmem:[#allocation35_spill] sm:$0xff] }
 0x749   : > { %16664 = vst [vmem:[#allocation85_spill] sm:$0xff] %v13420_v12  ;;  %v13515_v37 = vsub.f32 %v16690_v21, %v13261_v56  ;;  %v13519_v6 = vsub.f32 %v16692_v4, %v13261_v56 }
 0x74a   : > { %v3243_v22 = vadd.f32 %v3242_v27, %v3212_v58 }
 0x74b   : > { %16691 = vst [vmem:[#allocation67_spill] sm:$0xff] %v13515_v37  ;;  %16693 = vst [vmem:[#allocation46_spill] sm:$0xff] %v13519_v6 }
 0x74d   : > { %v13463_v52 = vpop.f32.mrb[60].mxu1 }
 0x74e   : > { %16674 = vst [vmem:[#allocation59_spill] sm:$0xff] %v13463_v52  ;;  %v13474_v63 = vpop.f32.mrb[61].mxu1  ;;  %v5658_v52 = vmul.f32 %v13370_v11, %v16680_v35 }
 0x74f   : > { %16678 = vst [vmem:[#allocation62_spill] sm:$0xff] %v13474_v63  ;;  %v13484_v42 = vpop.f32.mrb[62].mxu1  ;;  %v16686_v63 = vld [vmem:[#allocation52_spill] sm:$0xff] }
 0x750   : > { %16683 = vst [vmem:[#allocation61_spill] sm:$0xff] %v13484_v42  ;;  %v5661_v9 = vmul.f32 %v13370_v11, %v16686_v63  ;;  %v13494_v35 = vpop.f32.mrb[63].mxu1  ;;  %v5666_v63 = vmul.f32 %v13370_v11, %v12946_v19  ;;  %v13510_v42 = vadd.f32 %v16688_v10, %v13179_v59  ;;  %v3213_v19 = vmul.f32 %v13482_v53, %v13482_v53 }
 0x751   : > { %16687 = vst [vmem:[#allocation37_spill] sm:$0xff] %v13494_v35  ;;  %v7713_v35 = vpop.eup %7712 }
 0x752   : > { %16689 = vst [vmem:[#allocation38_spill] sm:$0xff] %v13510_v42  ;;  %v5670_v38 = vmul.f32 %v7713_v35, %v13387_v49  ;;  %v5671_v11 = vmul.f32 %v7713_v35, %v13397_v47  ;;  %v5672_v10 = vmul.f32 %v7713_v35, %v5638_v46  ;;  %v5673_v12 = vmul.f32 %v7713_v35, %v5639_v1 }
 0x753   : > { %v5674_v62 = vmul.f32 %v7713_v35, %v5640_v15  ;;  %v5675_v54 = vmul.f32 %v7713_v35, %v5641_v39  ;;  %v5676_v24 = vmul.f32 %v7713_v35, %v5642_v57  ;;  %v5677_v50 = vmul.f32 %v7713_v35, %v5643_v23 }
 0x754   : > { %v5678_v21 = vmul.f32 %v7713_v35, %v5644_v5  ;;  %v5679_v18 = vmul.f32 %v7713_v35, %v5645_v17  ;;  %v5680_v28 = vmul.f32 %v7713_v35, %v5646_v29  ;;  %v5681_v2 = vmul.f32 %v7713_v35, %v5647_v0 }
 0x755   : > { %v5682_v4 = vmul.f32 %v7713_v35, %v5648_v40  ;;  %v5683_v14 = vmul.f32 %v7713_v35, %v5649_v30  ;;  %v5684_v3 = vmul.f32 %v7713_v35, %v5650_v60  ;;  %v5685_v16 = vmul.f32 %v7713_v35, %v5651_v7  ;;  %v16695_v7 = vld [vmem:[#allocation69_spill] sm:$0xff] }
 0x756   : > { %v5686_v53 = vmul.f32 %v7713_v35, %v5652_v41  ;;  %v5687_v27 = vmul.f32 %v7713_v35, %v5653_v26  ;;  %v5688_v58 = vmul.f32 %v7713_v35, %v5654_v31  ;;  %v5689_v49 = vmul.f32 %v7713_v35, %v5655_v8  ;;  %v7075_v31 = vld [vmem:[%s15584_s5 + $0x2] ss:$0 sm:$0xff]  ;;  %v16697_v26 = vld [vmem:[#allocation60_spill] sm:$0xff] }
 0x757   : > { %v5690_v55 = vmul.f32 %v7713_v35, %v5656_v45  ;;  %v5691_v47 = vmul.f32 %v7713_v35, %v5657_v33  ;;  %v5692_v46 = vmul.f32 %v7713_v35, %v5658_v52  ;;  %v5693_v1 = vmul.f32 %v7713_v35, %v5659_v13  ;;  %v16699_v13 = vld [vmem:[#allocation36_spill] sm:$0xff] }
 0x758   : > { %v5694_v15 = vmul.f32 %v7713_v35, %v5660_v32  ;;  %v5695_v39 = vmul.f32 %v7713_v35, %v5661_v9  ;;  %v5696_v57 = vmul.f32 %v7713_v35, %v5662_v51  ;;  %v5697_v23 = vmul.f32 %v7713_v35, %v5663_v25 }
 0x759   : > { %v5698_v5 = vmul.f32 %v7713_v35, %v5664_v48  ;;  %v5699_v17 = vmul.f32 %v7713_v35, %v5665_v44  ;;  %v5700_v29 = vmul.f32 %v7713_v35, %v5666_v63  ;;  %v5701_v0 = vmul.f32 %v7713_v35, %v5667_v61 }
 0x75a   : > { %v3244_v40 = vadd.f32 %v3243_v22, %v3213_v19  ;;  %v4593_v30 = vadd.f32 %v4592_v34, %v13510_v42  ;;  %v3214_v33 = vmul.f32 %v13515_v37, %v13515_v37  ;;  %v13533_v32 = vadd.f32 %v13249_v43, %v13179_v59 }
 0x75b   : > { %v13537_v9 = vsub.f32 %v16695_v7, %v13261_v56  ;;  %v13541_v22 = vsub.f32 %v16697_v26, %v13261_v56  ;;  %v13545_v60 = vsub.f32 %v16699_v13, %v13261_v56  ;;  %v13549_v41 = vmul.f32 %v13519_v6, %v13519_v6 }
 0x75c   : > { %16694 = vst [vmem:[#allocation70_spill] sm:$0xff] %v13533_v32  ;;  %v13551_v52 = vadd.f32 %v3244_v40, %v3214_v33  ;;  %v13555_v43 = vadd.f32 %v13179_v59, %v13269_v36  ;;  %v13558_v8 = vadd.f32 %v4593_v30, %v13533_v32  ;;  %v13562_v45 = vadd.f32 %v13179_v59, %v13289_v20 }
 0x75d   : > { %16696 = vst [vmem:[#allocation72_spill] sm:$0xff] %v13537_v9  ;;  %16698 = vst [vmem:[#allocation52_spill] sm:$0xff] %v13541_v22  ;;  %v13564_v51 = vadd.f32 %v7075_v31, %v5670_v38  ;;  %v13566_v35 = vadd.f32 %v7075_v31, %v5671_v11  ;;  %v13568_v25 = vadd.f32 %v7075_v31, %v5672_v10 }
 0x75e   : > { %16700 = vst [vmem:[#allocation41_spill] sm:$0xff] %v13545_v60  ;;  %16701 = vst [vmem:[#allocation18_spill] sm:$0xff] %v13549_v41  ;;  %v13570_v48 = vadd.f32 %v7075_v31, %v5673_v12  ;;  %v13572_v44 = vadd.f32 %v7075_v31, %v5674_v62  ;;  %v13574_v63 = vadd.f32 %v7075_v31, %v5675_v54 }
 0x75f   : > { %16702 = vst [vmem:[#allocation35_spill] sm:$0xff] %v13551_v52  ;;  %16703 = vst [vmem:[#allocation69_spill] sm:$0xff] %v13555_v43  ;;  %v13576_v36 = vadd.f32 %v7075_v31, %v5676_v24  ;;  %v13578_v61 = vadd.f32 %v7075_v31, %v5677_v50  ;;  %v13580_v34 = vadd.f32 %v7075_v31, %v5678_v21  ;;  %vm5739_vm0 = vcmp.gt.f32.partialorder %v13564_v51, 0.0 }
 0x760   : > { %16704 = vst [vmem:[#allocation60_spill] sm:$0xff] %v13558_v8  ;;  %16705 = vst [vmem:[#allocation36_spill] sm:$0xff] %v13562_v45  ;;  %v13582_v20 = vadd.f32 %v7075_v31, %v5679_v18  ;;  %v13584_v19 = vadd.f32 %v7075_v31, %v5680_v28  ;;  %v13586_v38 = vadd.f32 %v7075_v31, %v5681_v2  ;;  %vm5740_vm1 = vcmp.gt.f32.partialorder %v13566_v35, 0.0 }
 0x761   : > { %v13588_v11 = vadd.f32 %v7075_v31, %v5682_v4  ;;  %v13590_v12 = vadd.f32 %v7075_v31, %v5683_v14  ;;  %v13592_v10 = vadd.f32 %v7075_v31, %v5684_v3  ;;  %v13594_v54 = vadd.f32 %v7075_v31, %v5685_v16 }
 0x762   : > { %v13596_v24 = vadd.f32 %v7075_v31, %v5686_v53  ;;  %v13598_v50 = vadd.f32 %v7075_v31, %v5687_v27  ;;  %v13600_v62 = vadd.f32 %v7075_v31, %v5688_v58  ;;  %v13602_v18 = vadd.f32 %v7075_v31, %v5689_v49 }
 0x763   : > { %v13604_v28 = vadd.f32 %v7075_v31, %v5690_v55  ;;  %v13606_v2 = vadd.f32 %v7075_v31, %v5691_v47  ;;  %v13608_v21 = vadd.f32 %v7075_v31, %v5692_v46  ;;  %v13610_v14 = vadd.f32 %v7075_v31, %v5693_v1  ;;  %v13631_v47 = vld [vmem:[%s15584_s5 + $0x3] ss:$0 sm:$0xff] }
 0x764   : > { %v13612_v3 = vadd.f32 %v7075_v31, %v5694_v15  ;;  %v13614_v16 = vadd.f32 %v7075_v31, %v5695_v39  ;;  %v13616_v53 = vadd.f32 %v7075_v31, %v5696_v57  ;;  %v13618_v4 = vadd.f32 %v7075_v31, %v5697_v23 }
 0x765   : > { %v13620_v27 = vadd.f32 %v7075_v31, %v5698_v5  ;;  %v13622_v58 = vadd.f32 %v7075_v31, %v5699_v17  ;;  %v13624_v55 = vadd.f32 %v7075_v31, %v5700_v29  ;;  %v13626_v49 = vadd.f32 %v7075_v31, %v5701_v0 }
 0x766   : > { %16706 = vst [vmem:[#allocation87_spill] sm:$0xff] %v13612_v3  ;;  %16707 = vst [vmem:[#allocation88_spill] sm:$0xff] %v13614_v16  ;;  %vm5741_vm2 = vcmp.gt.f32.partialorder %v13568_v25, 0.0  ;;  %vm5742_vm3 = vcmp.gt.f32.partialorder %v13570_v48, 0.0  ;;  %vm5743_vm4 = vcmp.gt.f32.partialorder %v13572_v44, 0.0  ;;  %vm5744_vm5 = vcmp.gt.f32.partialorder %v13574_v63, 0.0 }
 0x767   : > { %16708 = vst [vmem:[#allocation89_spill] sm:$0xff] %v13618_v4  ;;  %16709 = vst [vmem:[#allocation90_spill] sm:$0xff] %v13620_v27  ;;  %vm5745_vm6 = vcmp.gt.f32.partialorder %v13576_v36, 0.0  ;;  %vm5746_vm7 = vcmp.gt.f32.partialorder %v13578_v61, 0.0  ;;  %vm5747_vm8 = vcmp.gt.f32.partialorder %v13580_v34, 0.0  ;;  %vm5748_vm9 = vcmp.gt.f32.partialorder %v13582_v20, 0.0 }
 0x768   : > { %16710 = vst [vmem:[#allocation91_spill] sm:$0xff] %v13622_v58  ;;  %vm5749_vm10 = vcmp.gt.f32.partialorder %v13584_v19, 0.0  ;;  %vm5750_vm11 = vcmp.gt.f32.partialorder %v13586_v38, 0.0  ;;  %v5775_v46 = vmul.f32 %v13631_v47, %v13564_v51  ;;  %v5776_v1 = vmul.f32 %v13631_v47, %v13566_v35 }
 0x769   : > { %v5777_v15 = vmul.f32 %v13631_v47, %v13568_v25  ;;  %v5778_v39 = vmul.f32 %v13631_v47, %v13570_v48  ;;  %v5779_v57 = vmul.f32 %v13631_v47, %v13572_v44  ;;  %v5780_v23 = vmul.f32 %v13631_v47, %v13574_v63 }
 0x76a   : > { %v5781_v5 = vmul.f32 %v13631_v47, %v13576_v36  ;;  %v5782_v17 = vmul.f32 %v13631_v47, %v13578_v61  ;;  %v5783_v29 = vmul.f32 %v13631_v47, %v13580_v34  ;;  %v5784_v0 = vmul.f32 %v13631_v47, %v13582_v20 }
 0x76b   : > { %v5785_v40 = vmul.f32 %v13631_v47, %v13584_v19  ;;  %v5786_v30 = vmul.f32 %v13631_v47, %v13586_v38  ;;  %v5787_v31 = vmul.f32 %v13631_v47, %v13588_v11  ;;  %v5788_v33 = vmul.f32 %v13631_v47, %v13590_v12 }
 0x76c   : > { %v5789_v7 = vmul.f32 %v13631_v47, %v13592_v10  ;;  %v5790_v26 = vmul.f32 %v13631_v47, %v13594_v54  ;;  %vm5767_vm12 = vcmp.gt.f32.partialorder %v13620_v27, 0.0  ;;  %vm5768_vm13 = vcmp.gt.f32.partialorder %v13622_v58, 0.0 }
 0x76d   : > { %vm5769_vm14 = vcmp.gt.f32.partialorder %v13624_v55, 0.0  ;;  %vm5770_vm15 = vcmp.gt.f32.partialorder %v13626_v49, 0.0  ;;  %v5791_v13 = vmul.f32 %v13631_v47, %v13596_v24  ;;  %v5792_v32 = vmul.f32 %v13631_v47, %v13598_v50 }
 0x76e   : > { %v5793_v42 = vmul.f32 %v13631_v47, %v13600_v62  ;;  %v5794_v6 = vmul.f32 %v13631_v47, %v13602_v18  ;;  %v5795_v37 = vmul.f32 %v13631_v47, %v13604_v28  ;;  %v5796_v60 = vmul.f32 %v13631_v47, %v13606_v2 }
 0x76f   : > { %v5797_v45 = vmul.f32 %v13631_v47, %v13608_v21  ;;  %v5798_v59 = vmul.f32 %v13631_v47, %v13610_v14  ;;  %v5799_v22 = vmul.f32 %v13631_v47, %v13612_v3  ;;  %v5800_v56 = vmul.f32 %v13631_v47, %v13614_v16 }
 0x770   : > { %v5801_v8 = vmul.f32 %v13631_v47, %v13616_v53  ;;  %v5802_v43 = vmul.f32 %v13631_v47, %v13618_v4  ;;  %v5803_v52 = vmul.f32 %v13631_v47, %v13620_v27  ;;  %v5804_v41 = vmul.f32 %v13631_v47, %v13622_v58 }
 0x771   : > { %v5805_v9 = vmul.f32 %v13631_v47, %v13624_v55  ;;  %v5806_v3 = vmul.f32 %v13631_v47, %v13626_v49  ;;  %v5807_v16 = vsel %vm5739_vm0, %v13564_v51, %v5775_v46  ;;  %v5808_v4 = vsel %vm5740_vm1, %v13566_v35, %v5776_v1  ;;  %v16740_v46 = vld [vmem:[#allocation30_spill] sm:$0xff]  ;;  %v16741_v1 = vld [vmem:[#allocation21_spill] sm:$0xff] }
 0x772   : > { %v5809_v27 = vsel %vm5741_vm2, %v13568_v25, %v5777_v15  ;;  %v5810_v58 = vsel %vm5742_vm3, %v13570_v48, %v5778_v39  ;;  %v5811_v47 = vsel %vm5743_vm4, %v13572_v44, %v5779_v57  ;;  %v5812_v51 = vsel %vm5744_vm5, %v13574_v63, %v5780_v23  ;;  %5871 = vst [vmem:[#allocation12 + $0x10] sm:$0xff] %v5807_v16  ;;  %v16735_v16 = vld [vmem:[#allocation69_spill] sm:$0xff]  ;;  %v16742_v39 = vld [vmem:[#allocation36_spill] sm:$0xff]  ;;  %v16743_v23 = vld [vmem:[#allocation55_spill] sm:$0xff] }
 0x773   : > { %v5813_v35 = vsel %vm5745_vm6, %v13576_v36, %v5781_v5  ;;  %v5814_v25 = vsel %vm5746_vm7, %v13578_v61, %v5782_v17  ;;  %5872 = vst [vmem:[#allocation12 + $0x40] sm:$0xff] %v5808_v4  ;;  %5873 = vst [vmem:[#allocation12 + $0x70] sm:$0xff] %v5809_v27  ;;  %v5815_v48 = vsel %vm5747_vm8, %v13580_v34, %v5783_v29  ;;  %vm16711_vm0 = vcmp.gt.f32.partialorder %v13588_v11, 0.0  ;;  %v16737_v4 = vld [vmem:[#allocation19_spill] sm:$0xff]  ;;  %v16738_v27 = vld [vmem:[#allocation53_spill] sm:$0xff] }
 0x774   : > { %5874 = vst [vmem:[#allocation12 + $0xa0] sm:$0xff] %v5810_v58  ;;  %v5816_v44 = vsel %vm5748_vm9, %v13582_v20, %v5784_v0  ;;  %v5817_v63 = vsel %vm5749_vm10, %v13584_v19, %v5785_v40  ;;  %v5818_v36 = vsel %vm5750_vm11, %v13586_v38, %v5786_v30  ;;  %5875 = vst [vmem:[#allocation12 + $0xd0] sm:$0xff] %v5811_v47  ;;  %vm16712_vm1 = vcmp.gt.f32.partialorder %v13590_v12, 0.0  ;;  %v16739_v58 = vld [vmem:[#allocation52_spill] sm:$0xff]  ;;  %v16744_v17 = vld [vmem:[#allocation41_spill] sm:$0xff] }
 0x775   : > { %5876 = vst [vmem:[#allocation12 + $0x100] sm:$0xff] %v5812_v51  ;;  %5877 = vst [vmem:[#allocation12 + $0x130] sm:$0xff] %v5813_v35  ;;  %v5819_v61 = vsel %vm16711_vm0, %v13588_v11, %v5787_v31  ;;  %v5820_v34 = vsel %vm16712_vm1, %v13590_v12, %v5788_v33  ;;  %vm16713_vm2 = vcmp.gt.f32.partialorder %v13592_v10, 0.0  ;;  %vm16714_vm3 = vcmp.gt.f32.partialorder %v13594_v54, 0.0  ;;  %v16745_v40 = vld [vmem:[#allocation64_spill] sm:$0xff]  ;;  %v16746_v33 = vld [vmem:[#allocation78_spill] sm:$0xff] }
 0x776   : > { %5878 = vst [vmem:[#allocation12 + $0x160] sm:$0xff] %v5814_v25  ;;  %v5821_v20 = vsel %vm16713_vm2, %v13592_v10, %v5789_v7  ;;  %v5822_v19 = vsel %vm16714_vm3, %v13594_v54, %v5790_v26  ;;  %5879 = vst [vmem:[#allocation12 + $0x190] sm:$0xff] %v5815_v48  ;;  %vm16715_vm4 = vcmp.gt.f32.partialorder %v13596_v24, 0.0  ;;  %vm16716_vm5 = vcmp.gt.f32.partialorder %v13598_v50, 0.0  ;;  %v16747_v26 = vld [vmem:[#allocation73_spill] sm:$0xff]  ;;  %v16748_v25 = vld [vmem:[#allocation80_spill] sm:$0xff] }
 0x777   : > { %5880 = vst [vmem:[#allocation12 + $0x1c0] sm:$0xff] %v5816_v44  ;;  %5881 = vst [vmem:[#allocation12 + $0x1f0] sm:$0xff] %v5817_v63  ;;  %v5823_v38 = vsel %vm16715_vm4, %v13596_v24, %v5791_v13  ;;  %v5824_v11 = vsel %vm16716_vm5, %v13598_v50, %v5792_v32  ;;  %vm16717_vm6 = vcmp.gt.f32.partialorder %v13600_v62, 0.0  ;;  %vm16718_vm7 = vcmp.gt.f32.partialorder %v13602_v18, 0.0  ;;  %v16723_v24 = vld [vmem:[#allocation87_spill] sm:$0xff]  ;;  %v16725_v50 = vld [vmem:[#allocation88_spill] sm:$0xff] }
 0x778   : > { %5882 = vst [vmem:[#allocation12 + $0x220] sm:$0xff] %v5818_v36  ;;  %v5825_v12 = vsel %vm16717_vm6, %v13600_v62, %v5793_v42  ;;  %v5826_v10 = vsel %vm16718_vm7, %v13602_v18, %v5794_v6  ;;  %5883 = vst [vmem:[#allocation12 + $0x250] sm:$0xff] %v5819_v61  ;;  %vm16719_vm8 = vcmp.gt.f32.partialorder %v13604_v28, 0.0  ;;  %vm16720_vm9 = vcmp.gt.f32.partialorder %v13606_v2, 0.0  ;;  %v16728_v62 = vld [vmem:[#allocation89_spill] sm:$0xff]  ;;  %v16730_v18 = vld [vmem:[#allocation90_spill] sm:$0xff] }
 0x779   : > { %5884 = vst [vmem:[#allocation12 + $0x280] sm:$0xff] %v5820_v34  ;;  %5885 = vst [vmem:[#allocation12 + $0x2b0] sm:$0xff] %v5821_v20  ;;  %v5827_v54 = vsel %vm16719_vm8, %v13604_v28, %v5795_v37  ;;  %v5828_v32 = vsel %vm16720_vm9, %v13606_v2, %v5796_v60  ;;  %vm16721_vm10 = vcmp.gt.f32.partialorder %v13608_v21, 0.0  ;;  %vm16722_vm11 = vcmp.gt.f32.partialorder %v13610_v14, 0.0  ;;  %v16731_v28 = vld [vmem:[#allocation91_spill] sm:$0xff]  ;;  %v16749_v20 = vld [vmem:[#allocation76_spill] sm:$0xff] }
 0x77a   : > { %5886 = vst [vmem:[#allocation12 + $0x2e0] sm:$0xff] %v5822_v19  ;;  %v5829_v42 = vsel %vm16721_vm10, %v13608_v21, %v5797_v45  ;;  %v5830_v6 = vsel %vm16722_vm11, %v13610_v14, %v5798_v59  ;;  %5887 = vst [vmem:[#allocation12 + $0x310] sm:$0xff] %v5823_v38  ;;  %vm16724_vm0 = vcmp.gt.f32.partialorder %v16723_v24, 0.0  ;;  %vm16726_vm1 = vcmp.gt.f32.partialorder %v16725_v50, 0.0  ;;  %v16734_v21 = vld [vmem:[#allocation35_spill] sm:$0xff] }
 0x77b   : > { %5888 = vst [vmem:[#allocation12 + $0x340] sm:$0xff] %v5824_v11  ;;  %5889 = vst [vmem:[#allocation12 + $0x370] sm:$0xff] %v5825_v12  ;;  %v5831_v37 = vsel %vm16724_vm0, %v16723_v24, %v5799_v22  ;;  %v5832_v60 = vsel %vm16726_vm1, %v16725_v50, %v5800_v56  ;;  %vm16727_vm2 = vcmp.gt.f32.partialorder %v13616_v53, 0.0  ;;  %vm16729_vm3 = vcmp.gt.f32.partialorder %v16728_v62, 0.0  ;;  %v16750_v11 = vld [vmem:[#allocation66_spill] sm:$0xff] }
 0x77c   : > { %5890 = vst [vmem:[#allocation12 + $0x3a0] sm:$0xff] %v5826_v10  ;;  %v5833_v45 = vsel %vm16727_vm2, %v13616_v53, %v5801_v8  ;;  %v5834_v59 = vsel %vm16729_vm3, %v16728_v62, %v5802_v43  ;;  %5891 = vst [vmem:[#allocation12 + $0x3d0] sm:$0xff] %v5827_v54  ;;  %v5835_v22 = vsel %vm5767_vm12, %v16730_v18, %v5803_v52  ;;  %v16732_v52 = vld [vmem:[#allocation72_spill] sm:$0xff]  ;;  %v16751_v54 = vld [vmem:[#allocation79_spill] sm:$0xff] }
 0x77d   : > { %5892 = vst [vmem:[#allocation12 + $0x400] sm:$0xff] %v5828_v32  ;;  %5893 = vst [vmem:[#allocation12 + $0x430] sm:$0xff] %v5829_v42  ;;  %v5836_v56 = vsel %vm5768_vm13, %v16731_v28, %v5804_v41  ;;  %v5837_v8 = vsel %vm5769_vm14, %v13624_v55, %v5805_v9  ;;  %v5838_v43 = vsel %vm5770_vm15, %v13626_v49, %v5806_v3  ;;  %v16733_v41 = vld [vmem:[#allocation18_spill] sm:$0xff]  ;;  %v16736_v9 = vld [vmem:[#allocation60_spill] sm:$0xff] }
 0x77e   : > { %5894 = vst [vmem:[#allocation12 + $0x460] sm:$0xff] %v5830_v6  ;;  %5895 = vst [vmem:[#allocation12 + $0x490] sm:$0xff] %v5831_v37  ;;  %v3216_v2 = vmul.f32 %v16732_v52, %v16732_v52  ;;  %v3246_v14 = vadd.f32 %v16734_v21, %v16733_v41  ;;  %v4595_v53 = vadd.f32 %v16736_v9, %v16735_v16  ;;  %v16752_v6 = vld [vmem:[#allocation83_spill] sm:$0xff]  ;;  %v16753_v37 = vld [vmem:[#allocation65_spill] sm:$0xff] }
 0x77f   : > { %5896 = vst [vmem:[#allocation12 + $0x4c0] sm:$0xff] %v5832_v60  ;;  %5897 = vst [vmem:[#allocation12 + $0x4f0] sm:$0xff] %v5833_v45  ;;  %v13833_v3 = vsub.f32 %v16738_v27, %v16737_v4  ;;  %v3217_v55 = vmul.f32 %v16739_v58, %v16739_v58  ;;  %v13839_v15 = vadd.f32 %v16741_v1, %v16740_v46  ;;  %v16754_v62 = vld [vmem:[#allocation85_spill] sm:$0xff]  ;;  %v16755_v18 = vld [vmem:[#allocation68_spill] sm:$0xff] }
 0x780   : > { %5898 = vst [vmem:[#allocation12 + $0x520] sm:$0xff] %v5834_v59  ;;  %5899 = vst [vmem:[#allocation12 + $0x550] sm:$0xff] %v5835_v22  ;;  %v3247_v49 = vadd.f32 %v3246_v14, %v3216_v2  ;;  %v4596_v57 = vadd.f32 %v4595_v53, %v16742_v39  ;;  %v13844_v5 = vsub.f32 %v16743_v23, %v16737_v4  ;;  %v16757_v41 = vld [vmem:[#allocation82_spill] sm:$0xff]  ;;  %v16758_v9 = vld [vmem:[#allocation48_spill] sm:$0xff] }
 0x781   : > { %5900 = vst [vmem:[#allocation12 + $0x580] sm:$0xff] %v5836_v56  ;;  %5901 = vst [vmem:[#allocation12 + $0x5b0] sm:$0xff] %v5837_v8  ;;  %v3218_v29 = vmul.f32 %v16744_v17, %v16744_v17  ;;  %v13850_v30 = vadd.f32 %v16745_v40, %v16740_v46  ;;  %v13855_v7 = vadd.f32 %v16740_v46, %v16746_v33  ;;  %v16756_v8 = vld [vmem:[#allocation23_spill] sm:$0xff]  ;;  %v16759_v27 = vld [vmem:[#allocation54_spill] sm:$0xff] }
 0x782   : > { %5902 = vst [vmem:[#allocation12 + $0x5e0] sm:$0xff] %v5838_v43  ;;  %v3248_v0 = vadd.f32 %v3247_v49, %v3217_v55  ;;  %v4597_v31 = vadd.f32 %v4596_v57, %v13839_v15  ;;  %v13859_v13 = vsub.f32 %v16747_v26, %v16737_v4  ;;  %v3219_v47 = vmul.f32 %v13833_v3, %v13833_v3  ;;  %v16760_v1 = vld [vmem:[#allocation62_spill] sm:$0xff]  ;;  %v16761_v23 = vld [vmem:[#allocation47_spill] sm:$0xff]  ;;  %v16763_v26 = vld [vmem:[#allocation49_spill] sm:$0xff] }
 0x783   : > { %v13866_v48 = vadd.f32 %v16740_v46, %v16748_v25  ;;  %v3220_v44 = vmul.f32 %v13844_v5, %v13844_v5  ;;  %v13875_v19 = vadd.f32 %v16749_v20, %v16740_v46  ;;  %v3222_v12 = vmul.f32 %v16750_v11, %v16750_v11  ;;  %v16764_v25 = vld [vmem:[#allocation25_spill] sm:$0xff]  ;;  %v16766_v20 = vld [vmem:[#allocation50_spill] sm:$0xff] }
 0x784   : > { %v3249_v51 = vadd.f32 %v3248_v0, %v3218_v29  ;;  %v4598_v35 = vadd.f32 %v4597_v31, %v13850_v30  ;;  %v3221_v61 = vmul.f32 %v13859_v13, %v13859_v13  ;;  %v13882_v32 = vadd.f32 %v16751_v54, %v16740_v46  ;;  %v16762_v31 = vld [vmem:[#allocation37_spill] sm:$0xff] }
 0x785   : > { %v13887_v24 = vadd.f32 %v16740_v46, %v16752_v6  ;;  %v3223_v50 = vmul.f32 %v16753_v37, %v16753_v37  ;;  %v13894_v59 = vadd.f32 %v16740_v46, %v16754_v62  ;;  %v3224_v22 = vmul.f32 %v16755_v18, %v16755_v18  ;;  %v16768_v6 = vld [vmem:[#allocation29_spill] sm:$0xff]  ;;  %v16769_v62 = vld [vmem:[#allocation51_spill] sm:$0xff] }
 0x786   : > { %v3250_v63 = vadd.f32 %v3249_v51, %v3219_v47  ;;  %v4599_v36 = vadd.f32 %v4598_v35, %v13855_v7  ;;  %v3225_v43 = vmul.f32 %v16756_v8, %v16756_v8  ;;  %v4556_v21 = vadd.f32 %v16757_v41, %v16740_v46 }
 0x787   : > { %v3226_v53 = vmul.f32 %v16758_v9, %v16758_v9  ;;  %v4559_v55 = vadd.f32 %v16759_v27, %v16740_v46  ;;  %v4564_v57 = vadd.f32 %v16740_v46, %v16760_v1  ;;  %v3227_v29 = vmul.f32 %v16761_v23, %v16761_v23 }
 0x788   : > { %v3251_v34 = vadd.f32 %v3250_v63, %v3220_v44  ;;  %v4600_v38 = vadd.f32 %v4599_v36, %v13866_v48  ;;  %v4567_v33 = vadd.f32 %v16740_v46, %v16762_v31  ;;  %v3228_v47 = vmul.f32 %v16763_v26, %v16763_v26  ;;  %v16765_v36 = vld [vmem:[#allocation59_spill] sm:$0xff] }
 0x789   : > { %v3229_v44 = vmul.f32 %v16764_v25, %v16764_v25 }
 0x78a   : > { %v3252_v10 = vadd.f32 %v3251_v34, %v3221_v61  ;;  %v4601_v42 = vadd.f32 %v4600_v38, %v13875_v19  ;;  %v4572_v61 = vadd.f32 %v16765_v36, %v16740_v46  ;;  %v3230_v38 = vmul.f32 %v16766_v20, %v16766_v20 }
 0x78c   : > { %v3253_v60 = vadd.f32 %v3252_v10, %v3222_v12  ;;  %v4602_v45 = vadd.f32 %v4601_v42, %v13882_v32  ;;  %v16767_v10 = vld [vmem:[#allocation61_spill] sm:$0xff] }
 0x78d   : > { %v4575_v54 = vadd.f32 %v16767_v10, %v16740_v46 }
 0x78e   : > { %v3254_v28 = vadd.f32 %v3253_v60, %v3223_v50  ;;  %v4603_v56 = vadd.f32 %v4602_v45, %v13887_v24  ;;  %v3231_v50 = vmul.f32 %v16768_v6, %v16768_v6 }
 0x790   : > { %v3255_v2 = vadd.f32 %v3254_v28, %v3224_v22  ;;  %v4604_v14 = vadd.f32 %v4603_v56, %v13894_v59  ;;  %v3232_v22 = vmul.f32 %v16769_v62, %v16769_v62 }
 0x792   : > { %v3256_v4 = vadd.f32 %v3255_v2, %v3225_v43  ;;  %v4605_v49 = vadd.f32 %v4604_v14, %v4556_v21  ;;  %v16770_v43 = vld [vmem:[#allocation56_spill] sm:$0xff] }
 0x793   : > { %v3233_v2 = vmul.f32 %v16770_v43, %v16770_v43 }
 0x794   : > { %v3257_v0 = vadd.f32 %v3256_v4, %v3226_v53  ;;  %v4606_v40 = vadd.f32 %v4605_v49, %v4559_v55  ;;  %v16771_v53 = vld [vmem:[#allocation57_spill] sm:$0xff]  ;;  %v16772_v49 = vld [vmem:[#allocation58_spill] sm:$0xff] }
 0x795   : > { %v3234_v4 = vmul.f32 %v16771_v53, %v16771_v53  ;;  %v3235_v1 = vmul.f32 %v16772_v49, %v16772_v49 }
 0x796   : > { %v3258_v51 = vadd.f32 %v3257_v0, %v3227_v29  ;;  %v4607_v35 = vadd.f32 %v4606_v40, %v4564_v57  ;;  %v16773_v40 = vld [vmem:[#allocation26_spill] sm:$0xff] }
 0x797   : > { %v3236_v31 = vmul.f32 %v16773_v40, %v16773_v40 }
 0x798   : > { %v3259_v63 = vadd.f32 %v3258_v51, %v3228_v47  ;;  %v4608_v34 = vadd.f32 %v4607_v35, %v4567_v33  ;;  %v16774_v35 = vld [vmem:[#allocation27_spill] sm:$0xff] }
 0x79a   : > { %v3260_v12 = vadd.f32 %v3259_v63, %v3229_v44  ;;  %v4609_v42 = vadd.f32 %v4608_v34, %v4572_v61  ;;  %v3237_v44 = vmul.f32 %v16774_v35, %v16774_v35  ;;  %v16775_v34 = vld [vmem:[#allocation75_spill] sm:$0xff] }
 0x79c   : > { %v3261_v60 = vadd.f32 %v3260_v12, %v3230_v38  ;;  %v4610_v45 = vadd.f32 %v4609_v42, %v4575_v54  ;;  %v3238_v38 = vmul.f32 %v16775_v34, %v16775_v34 }
 0x79e   : > { %v3262_v28 = vadd.f32 %v3261_v60, %v3231_v50  ;;  %v4611_v56 = vrot.slane %v4610_v45, 4 }
 0x7a0   : > { %v3263_v41 = vadd.f32 %v3262_v28, %v3232_v22  ;;  %v4612_v14 = vadd.f32 %v4611_v56, %v4610_v45 }
 0x7a2   : > { %v3264_v46 = vadd.f32 %v3263_v41, %v3233_v2  ;;  %v4613_v27 = vrot.slane %v4612_v14, 2 }
 0x7a4   : > { %v3265_v29 = vadd.f32 %v3264_v46, %v3234_v4  ;;  %v4614_v0 = vadd.f32 %v4613_v27, %v4612_v14 }
 0x7a6   : > { %v3266_v47 = vadd.f32 %v3265_v29, %v3235_v1  ;;  %v4615_v51 = vrot.slane %v4614_v0, 1  ;;  %v16795_v1 = vld [vmem:[#allocation24_spill] sm:$0xff] }
 0x7a8   : > { %v3267_v63 = vadd.f32 %v3266_v47, %v3236_v31  ;;  %v4616_v36 = vadd.f32 %v4615_v51, %v4614_v0  ;;  %v14019_v31 = vld [vmem:[%s15586_s7 + $0x1] ss:$0 sm:$0xff]  ;;  %v16800_v47 = vld [vmem:[#allocation39_spill] sm:$0xff] }
 0x7a9   : > { %16799 = vst [vmem:[#allocation80_spill] sm:$0xff] %v14019_v31 }
 0x7aa   : > { %v3268_v12 = vadd.f32 %v3267_v63, %v3237_v44  ;;  %v13940_v42 = vmul.f32 0.00390625, %v4616_v36 }
 0x7ac   : > { %v3269_v10 = vadd.f32 %v3268_v12, %v3238_v38  ;;  %16776 = vst [vmem:[#allocation87_spill] sm:$0xff] %v13940_v42  ;;  %v13944_v45 = vsub.f32 %v16735_v16, %v13940_v42  ;;  %v13948_v22 = vsub.f32 %v16742_v39, %v13940_v42  ;;  %v13952_v28 = vsub.f32 %v13839_v15, %v13940_v42 }
 0x7ad   : > { %v13956_v56 = vsub.f32 %v13850_v30, %v13940_v42  ;;  %v13960_v2 = vsub.f32 %v13855_v7, %v13940_v42  ;;  %v13964_v16 = vsub.f32 %v13866_v48, %v13940_v42  ;;  %v13968_v39 = vsub.f32 %v13875_v19, %v13940_v42 }
 0x7ae   : > { %v3270_v50 = vrot.slane %v3269_v10, 4  ;;  %16777 = vst [vmem:[#allocation88_spill] sm:$0xff] %v13944_v45  ;;  %16778 = vst [vmem:[#allocation89_spill] sm:$0xff] %v13948_v22  ;;  %v13972_v15 = vsub.f32 %v13882_v32, %v13940_v42  ;;  %v13976_v30 = vsub.f32 %v13887_v24, %v13940_v42  ;;  %v13980_v7 = vsub.f32 %v13894_v59, %v13940_v42  ;;  %v13988_v19 = vpop.f32.mrb[64].mxu1 }
 0x7af   : > { %16779 = vst [vmem:[#allocation90_spill] sm:$0xff] %v13952_v28  ;;  %16780 = vst [vmem:[#allocation91_spill] sm:$0xff] %v13956_v56  ;;  %v13983_v14 = vsub.f32 %v4556_v21, %v13940_v42  ;;  %v13986_v48 = vsub.f32 %v4559_v55, %v13940_v42  ;;  %v13991_v32 = vsub.f32 %v4564_v57, %v13940_v42  ;;  %v13999_v59 = vpop.f32.mrb[65].mxu1  ;;  %v16797_v57 = vld [vmem:[#allocation22_spill] sm:$0xff] }
 0x7b0   : > { %v3271_v60 = vadd.f32 %v3270_v50, %v3269_v10  ;;  %16781 = vst [vmem:[#allocation72_spill] sm:$0xff] %v13960_v2  ;;  %16782 = vst [vmem:[#allocation18_spill] sm:$0xff] %v13964_v16  ;;  %v13994_v46 = vsub.f32 %v4567_v33, %v13940_v42  ;;  %v13997_v24 = vsub.f32 %v4572_v61, %v13940_v42  ;;  %v14004_v27 = vpop.f32.mrb[66].mxu1  ;;  %v16804_v10 = vld [vmem:[#allocation33_spill] sm:$0xff] }
 0x7b1   : > { %16783 = vst [vmem:[#allocation35_spill] sm:$0xff] %v13968_v39  ;;  %16784 = vst [vmem:[#allocation69_spill] sm:$0xff] %v13972_v15  ;;  %v14002_v21 = vsub.f32 %v4575_v54, %v13940_v42  ;;  %v14008_v29 = vsub.f32 %v16795_v1, %v13940_v42  ;;  %v14012_v0 = vsub.f32 %v16797_v57, %v13940_v42  ;;  %v14014_v33 = vpop.f32.mrb[67].mxu1 }
 0x7b2   : > { %v3272_v41 = vrot.slane %v3271_v60, 2  ;;  %16785 = vst [vmem:[#allocation60_spill] sm:$0xff] %v13976_v30  ;;  %16786 = vst [vmem:[#allocation19_spill] sm:$0xff] %v13980_v7  ;;  %v14023_v51 = vsub.f32 %v16800_v47, %v13940_v42  ;;  %v3281_v50 = vmul.f32 %v14019_v31, %v16804_v10  ;;  %v16810_v47 = vld [vmem:[#allocation40_spill] sm:$0xff]  ;;  %v16811_v10 = vld [vmem:[#allocation42_spill] sm:$0xff]  ;;  %v3303_v7 = vmul.f32 %v14019_v31, %v16764_v25 }
 0x7b3   : > { %16787 = vst [vmem:[#allocation53_spill] sm:$0xff] %v13983_v14  ;;  %16788 = vst [vmem:[#allocation52_spill] sm:$0xff] %v13986_v48  ;;  %v4650_v44 = vmul.f32 %v14008_v29, %v14008_v29  ;;  %v4651_v63 = vmul.f32 %v14012_v0, %v14012_v0  ;;  %v3308_v25 = vmul.f32 %v14019_v31, %v16771_v53 }
 0x7b4   : > { %16789 = vst [vmem:[#allocation30_spill] sm:$0xff] %v13988_v19  ;;  %v3273_v4 = vadd.f32 %v3272_v41, %v3271_v60  ;;  %16790 = vst [vmem:[#allocation21_spill] sm:$0xff] %v13991_v32  ;;  %v16806_v41 = vld [vmem:[#allocation28_spill] sm:$0xff] }
 0x7b5   : > { %16791 = vst [vmem:[#allocation36_spill] sm:$0xff] %v13994_v46  ;;  %16792 = vst [vmem:[#allocation55_spill] sm:$0xff] %v13997_v24  ;;  %v4682_v1 = vadd.f32 %v4651_v63, %v4650_v44  ;;  %v16814_v46 = vld [vmem:[#allocation45_spill] sm:$0xff]  ;;  %v16815_v63 = vld [vmem:[#allocation67_spill] sm:$0xff] }
 0x7b6   : > { %16793 = vst [vmem:[#allocation41_spill] sm:$0xff] %v14002_v21  ;;  %16794 = vst [vmem:[#allocation64_spill] sm:$0xff] %v14004_v27  ;;  %v3274_v55 = vrot.slane %v3273_v4, 1  ;;  %v14029_v36 = vpop.f32.mrb[68].mxu1  ;;  %v3287_v44 = vmul.f32 %v14019_v31, %v16814_v46  ;;  %v3294_v46 = vmul.f32 %v14019_v31, %v13844_v5 }
 0x7b7   : > { %16796 = vst [vmem:[#allocation78_spill] sm:$0xff] %v14008_v29  ;;  %16798 = vst [vmem:[#allocation73_spill] sm:$0xff] %v14012_v0  ;;  %v14031_v12 = vpop.f32.mrb[69].mxu1  ;;  %v3283_v0 = vmul.f32 %v14019_v31, %v16810_v47  ;;  %v3284_v29 = vmul.f32 %v14019_v31, %v16811_v10  ;;  %v3290_v47 = vmul.f32 %v14019_v31, %v16732_v52 }
 0x7b8   : > { %v3275_v61 = vadd.f32 %v3274_v55, %v3273_v4  ;;  %16801 = vst [vmem:[#allocation76_spill] sm:$0xff] %v14023_v51  ;;  %16802 = vst [vmem:[#allocation66_spill] sm:$0xff] %v14029_v36  ;;  %v14035_v60 = vpop.f32.mrb[70].mxu1  ;;  %v14039_v4 = vsub.f32 %v16806_v41, %v13940_v42  ;;  %v4652_v55 = vmul.f32 %v14023_v51, %v14023_v51  ;;  %v16813_v41 = vld [vmem:[#allocation74_spill] sm:$0xff] }
 0x7b9   : > { %16803 = vst [vmem:[#allocation79_spill] sm:$0xff] %v14031_v12  ;;  %16805 = vst [vmem:[#allocation83_spill] sm:$0xff] %v14035_v60  ;;  %v14043_v57 = vpop.f32.mrb[71].mxu1  ;;  %v3286_v24 = vmul.f32 %v14019_v31, %v16813_v41  ;;  %v3288_v51 = vmul.f32 %v14019_v31, %v16815_v63  ;;  %v3291_v10 = vmul.f32 %v14019_v31, %v16739_v58 }
 0x7ba   : > { %v3276_v54 = vmul.f32 0.00390625, %v3275_v61  ;;  %16807 = vst [vmem:[#allocation65_spill] sm:$0xff] %v14039_v4  ;;  %16808 = vst [vmem:[#allocation85_spill] sm:$0xff] %v14043_v57  ;;  %v16809_v61 = vld [vmem:[#allocation31_spill] sm:$0xff]  ;;  %v4683_v32 = vadd.f32 %v4682_v1, %v4652_v55  ;;  %v3293_v41 = vmul.f32 %v14019_v31, %v13833_v3  ;;  %v16817_v55 = vld [vmem:[#allocation32_spill] sm:$0xff]  ;;  %v4653_v63 = vmul.f32 %v14039_v4, %v14039_v4 }
 0x7bb   : > { %v14073_v1 = vsub.f32 %v16817_v55, %v13940_v42  ;;  %v3295_v52 = vmul.f32 %v14019_v31, %v13859_v13  ;;  %v3296_v58 = vmul.f32 %v14019_v31, %v16750_v11  ;;  %v3298_v3 = vmul.f32 %v14019_v31, %v16755_v18  ;;  %v16820_v4 = vld [vmem:[#allocation34_spill] sm:$0xff] }
 0x7bc   : > { %v3313_v38 = vadd.f32 1e-05, %v3276_v54  ;;  %v3282_v54 = vmul.f32 %v14019_v31, %v16809_v61  ;;  %v16816_v61 = vld [vmem:[#allocation46_spill] sm:$0xff]  ;;  %v3300_v55 = vmul.f32 %v14019_v31, %v16758_v9  ;;  %v14093_v13 = vsub.f32 %v16820_v4, %v13940_v42 }
 0x7bd   : > { %v3289_v48 = vmul.f32 %v14019_v31, %v16816_v61  ;;  %16818 = vst [vmem:[#allocation68_spill] sm:$0xff] %v14073_v1  ;;  %v3299_v61 = vmul.f32 %v14019_v31, %v16756_v8  ;;  %v4684_v14 = vadd.f32 %v4683_v32, %v4653_v63  ;;  %v3302_v18 = vmul.f32 %v14019_v31, %v16763_v26 }
 0x7be   : > { %7714 = vrsqrt.f32 %v3313_v38  ;;  %v16812_v38 = vld [vmem:[#allocation44_spill] sm:$0xff]  ;;  %v14085_v5 = vpop.f32.mrb[72].mxu1  ;;  %16821 = vst [vmem:[#allocation82_spill] sm:$0xff] %v14093_v13  ;;  %v3304_v8 = vmul.f32 %v14019_v31, %v16766_v20  ;;  %v3305_v4 = vmul.f32 %v14019_v31, %v16768_v6  ;;  %v3306_v32 = vmul.f32 %v14019_v31, %v16769_v62 }
 0x7bf   : > { %v3285_v21 = vmul.f32 %v14019_v31, %v16812_v38  ;;  %v3292_v38 = vmul.f32 %v14019_v31, %v16744_v17  ;;  %v3297_v17 = vmul.f32 %v14019_v31, %v16753_v37  ;;  %16819 = vst [vmem:[#allocation23_spill] sm:$0xff] %v14085_v5  ;;  %v14095_v11 = vpop.f32.mrb[73].mxu1  ;;  %v3301_v37 = vmul.f32 %v14019_v31, %v16761_v23 }
 0x7c0   : > { %16822 = vst [vmem:[#allocation48_spill] sm:$0xff] %v14095_v11  ;;  %v14105_v9 = vpop.f32.mrb[74].mxu1  ;;  %v3307_v23 = vmul.f32 %v14019_v31, %v16770_v43  ;;  %v4654_v26 = vmul.f32 %v14073_v1, %v14073_v1  ;;  %v3309_v20 = vmul.f32 %v14019_v31, %v16772_v49  ;;  %v3310_v6 = vmul.f32 %v14019_v31, %v16773_v40  ;;  %v16825_v1 = vld [vmem:[#allocation43_spill] sm:$0xff] }
 0x7c1   : > { %16823 = vst [vmem:[#allocation54_spill] sm:$0xff] %v14105_v9  ;;  %v14115_v63 = vpop.f32.mrb[75].mxu1  ;;  %v3311_v62 = vmul.f32 %v14019_v31, %v16774_v35  ;;  %v3312_v43 = vmul.f32 %v14019_v31, %v16775_v34  ;;  %v14129_v15 = vsub.f32 %v16825_v1, %v13940_v42  ;;  %v4655_v53 = vmul.f32 %v14093_v13, %v14093_v13 }
 0x7c2   : > { %16824 = vst [vmem:[#allocation62_spill] sm:$0xff] %v14115_v63  ;;  %v4685_v39 = vadd.f32 %v4684_v14, %v4654_v26 }
 0x7c3   : > { %16826 = vst [vmem:[#allocation47_spill] sm:$0xff] %v14129_v15 }
 0x7c6   : > { %v14133_v31 = vpop.f32.mrb[76].mxu1 }
 0x7c7   : > { %16827 = vst [vmem:[#allocation37_spill] sm:$0xff] %v14133_v31  ;;  %v14135_v13 = vpop.f32.mrb[77].mxu1 }
 0x7c8   : > { %v7715_v30 = vpop.eup %7714  ;;  %16828 = vst [vmem:[#allocation49_spill] sm:$0xff] %v14135_v13 }
 0x7c9   : > { %v3315_v16 = vmul.f32 %v7715_v30, %v3281_v50  ;;  %v3316_v49 = vmul.f32 %v7715_v30, %v3282_v54  ;;  %v3317_v2 = vmul.f32 %v7715_v30, %v3283_v0  ;;  %v3318_v56 = vmul.f32 %v7715_v30, %v3284_v29 }
 0x7ca   : > { %v3319_v40 = vmul.f32 %v7715_v30, %v3285_v21  ;;  %v3320_v28 = vmul.f32 %v7715_v30, %v3286_v24  ;;  %v3321_v9 = vmul.f32 %v7715_v30, %v3287_v44  ;;  %v3322_v35 = vmul.f32 %v7715_v30, %v3288_v51  ;;  %v14137_v21 = vpop.f32.mrb[78].mxu1 }
 0x7cb   : > { %v3323_v22 = vmul.f32 %v7715_v30, %v3289_v48  ;;  %v3324_v5 = vmul.f32 %v7715_v30, %v3290_v47  ;;  %v3325_v45 = vmul.f32 %v7715_v30, %v3291_v10  ;;  %v3326_v34 = vmul.f32 %v7715_v30, %v3292_v38  ;;  %16829 = vst [vmem:[#allocation25_spill] sm:$0xff] %v14137_v21  ;;  %v14139_v44 = vpop.f32.mrb[79].mxu1 }
 0x7cc   : > { %v3327_v1 = vmul.f32 %v7715_v30, %v3293_v41  ;;  %v3328_v63 = vmul.f32 %v7715_v30, %v3294_v46  ;;  %v3329_v11 = vmul.f32 %v7715_v30, %v3295_v52  ;;  %v3330_v60 = vmul.f32 %v7715_v30, %v3296_v58  ;;  %16830 = vst [vmem:[#allocation59_spill] sm:$0xff] %v14139_v44 }
 0x7cd   : > { %v3331_v14 = vmul.f32 %v7715_v30, %v3297_v17  ;;  %v3332_v50 = vmul.f32 %v7715_v30, %v3298_v3  ;;  %v3333_v0 = vmul.f32 %v7715_v30, %v3299_v61  ;;  %v3334_v29 = vmul.f32 %v7715_v30, %v3300_v55  ;;  %v16831_v17 = vld [vmem:[#allocation20_spill] sm:$0xff]  ;;  %v14153_v55 = vld [vmem:[%s15586_s7 + $0x2] ss:$0 sm:$0xff] }
 0x7ce   : > { %v3335_v24 = vmul.f32 %v7715_v30, %v3301_v37  ;;  %v3336_v51 = vmul.f32 %v7715_v30, %v3302_v18  ;;  %v3337_v48 = vmul.f32 %v7715_v30, %v3303_v7  ;;  %v3338_v54 = vmul.f32 %v7715_v30, %v3304_v8  ;;  %v14148_v7 = vld [vmem:[%s15584_s5] ss:$0 sm:$0xff]  ;;  %16834 = vst [vmem:[#allocation29_spill] sm:$0xff] %v14153_v55  ;;  %v14157_v18 = vpop.f32.mrb[80].mxu1 }
 0x7cf   : > { %v3339_v47 = vmul.f32 %v7715_v30, %v3305_v4  ;;  %v3340_v10 = vmul.f32 %v7715_v30, %v3306_v32  ;;  %v3341_v38 = vmul.f32 %v7715_v30, %v3307_v23  ;;  %v3342_v41 = vmul.f32 %v7715_v30, %v3308_v25  ;;  %16833 = vst [vmem:[#allocation61_spill] sm:$0xff] %v14148_v7  ;;  %v16840_v32 = vld [vmem:[#allocation81_spill] sm:$0xff]  ;;  %v14171_v25 = vpop.f32.mrb[81].mxu1 }
 0x7d0   : > { %v3343_v46 = vmul.f32 %v7715_v30, %v3309_v20  ;;  %v3344_v52 = vmul.f32 %v7715_v30, %v3310_v6  ;;  %v3345_v58 = vmul.f32 %v7715_v30, %v3311_v62  ;;  %v3346_v26 = vmul.f32 %v7715_v30, %v3312_v43  ;;  %16835 = vst [vmem:[#allocation51_spill] sm:$0xff] %v14157_v18  ;;  %v16836_v30 = vld [vmem:[#allocation63_spill] sm:$0xff] }
 0x7d1   : > { %v14143_v3 = vsub.f32 %v16831_v17, %v13940_v42  ;;  %v4686_v61 = vadd.f32 %v4685_v39, %v4655_v53  ;;  %v4656_v37 = vmul.f32 %v14129_v15, %v14129_v15  ;;  %v14161_v8 = vsub.f32 %v16836_v30, %v13940_v42  ;;  %v16838_v39 = vld [vmem:[#allocation77_spill] sm:$0xff]  ;;  %16842 = vst [vmem:[#allocation26_spill] sm:$0xff] %v14171_v25  ;;  %v14187_v53 = vpop.f32.mrb[82].mxu1 }
 0x7d2   : > { %v14165_v4 = vsub.f32 %v16838_v39, %v13940_v42  ;;  %v14169_v23 = vsub.f32 %v16840_v32, %v13940_v42  ;;  %v14181_v62 = vadd.f32 %v14148_v7, %v13999_v59  ;;  %v14185_v43 = vadd.f32 %v14148_v7, %v14014_v33  ;;  %16847 = vst [vmem:[#allocation39_spill] sm:$0xff] %v14187_v53  ;;  %v14201_v59 = vpop.f32.mrb[83].mxu1 }
 0x7d3   : > { %16832 = vst [vmem:[#allocation50_spill] sm:$0xff] %v14143_v3  ;;  %16837 = vst [vmem:[#allocation56_spill] sm:$0xff] %v14161_v8  ;;  %v14175_v20 = vmul.f32 %v14143_v3, %v14143_v3  ;;  %v14177_v6 = vadd.f32 %v4686_v61, %v4656_v37  ;;  %v14190_v17 = vadd.f32 %v14153_v55, %v3315_v16 }
 0x7d4   : > { %16839 = vst [vmem:[#allocation57_spill] sm:$0xff] %v14165_v4  ;;  %16841 = vst [vmem:[#allocation58_spill] sm:$0xff] %v14169_v23  ;;  %v14193_v30 = vadd.f32 %v14153_v55, %v3316_v49  ;;  %v14196_v39 = vadd.f32 %v14153_v55, %v3317_v2  ;;  %v14199_v61 = vadd.f32 %v14153_v55, %v3318_v56 }
 0x7d5   : > { %16843 = vst [vmem:[#allocation27_spill] sm:$0xff] %v14175_v20  ;;  %16844 = vst [vmem:[#allocation75_spill] sm:$0xff] %v14177_v6  ;;  %v14204_v37 = vadd.f32 %v14153_v55, %v3319_v40  ;;  %v14207_v33 = vadd.f32 %v14153_v55, %v3320_v28  ;;  %v14210_v16 = vadd.f32 %v14153_v55, %v3321_v9  ;;  %vm3384_vm12 = vcmp.gt.f32.partialorder %v14190_v17, 0.0 }
 0x7d6   : > { %16845 = vst [vmem:[#allocation24_spill] sm:$0xff] %v14181_v62  ;;  %16846 = vst [vmem:[#allocation22_spill] sm:$0xff] %v14185_v43  ;;  %v14213_v49 = vadd.f32 %v14153_v55, %v3322_v35  ;;  %v14216_v2 = vadd.f32 %v14153_v55, %v3323_v22  ;;  %v14219_v56 = vadd.f32 %v14153_v55, %v3324_v5  ;;  %vm3385_vm13 = vcmp.gt.f32.partialorder %v14193_v30, 0.0 }
 0x7d7   : > { %16848 = vst [vmem:[#allocation33_spill] sm:$0xff] %v14201_v59  ;;  %v14222_v32 = vadd.f32 %v14153_v55, %v3325_v45  ;;  %v14225_v40 = vadd.f32 %v14153_v55, %v3326_v34  ;;  %v14228_v28 = vadd.f32 %v14153_v55, %v3327_v1  ;;  %v14231_v9 = vadd.f32 %v14153_v55, %v3328_v63 }
 0x7d8   : > { %v14234_v35 = vadd.f32 %v14153_v55, %v3329_v11  ;;  %v14237_v22 = vadd.f32 %v14153_v55, %v3330_v60  ;;  %v14240_v5 = vadd.f32 %v14153_v55, %v3331_v14  ;;  %v14243_v45 = vadd.f32 %v14153_v55, %v3332_v50  ;;  %v14263_v50 = vpop.f32.mrb[84].mxu1 }
 0x7d9   : > { %v14246_v34 = vadd.f32 %v14153_v55, %v3333_v0  ;;  %v14249_v1 = vadd.f32 %v14153_v55, %v3334_v29  ;;  %v14252_v63 = vadd.f32 %v14153_v55, %v3335_v24  ;;  %v14255_v11 = vadd.f32 %v14153_v55, %v3336_v51  ;;  %16849 = vst [vmem:[#allocation28_spill] sm:$0xff] %v14263_v50  ;;  %v14277_v3 = vpop.f32.mrb[85].mxu1 }
 0x7da   : > { %v14258_v60 = vadd.f32 %v14153_v55, %v3337_v48  ;;  %v14261_v14 = vadd.f32 %v14153_v55, %v3338_v54  ;;  %v14266_v0 = vadd.f32 %v14153_v55, %v3339_v47  ;;  %v14269_v29 = vadd.f32 %v14153_v55, %v3340_v10  ;;  %16853 = vst [vmem:[#allocation44_spill] sm:$0xff] %v14277_v3 }
 0x7db   : > { %v14272_v24 = vadd.f32 %v14153_v55, %v3341_v38  ;;  %v14275_v51 = vadd.f32 %v14153_v55, %v3342_v41  ;;  %v14280_v48 = vadd.f32 %v14153_v55, %v3343_v46  ;;  %v14283_v54 = vadd.f32 %v14153_v55, %v3344_v52  ;;  %v14294_v38 = vld [vmem:[%s15586_s7 + $0x3] ss:$0 sm:$0xff]  ;;  %v14296_v41 = vpop.f32.mrb[86].mxu1 }
 0x7dc   : > { %16850 = vst [vmem:[#allocation31_spill] sm:$0xff] %v14266_v0  ;;  %16851 = vst [vmem:[#allocation40_spill] sm:$0xff] %v14269_v29  ;;  %v14286_v47 = vadd.f32 %v14153_v55, %v3345_v58  ;;  %v14289_v10 = vadd.f32 %v14153_v55, %v3346_v26  ;;  %vm3386_vm14 = vcmp.gt.f32.partialorder %v14196_v39, 0.0  ;;  %vm3387_vm15 = vcmp.gt.f32.partialorder %v14199_v61, 0.0  ;;  %v14302_v46 = vpop.f32.mrb[87].mxu1 }
 0x7dd   : > { %16852 = vst [vmem:[#allocation42_spill] sm:$0xff] %v14275_v51  ;;  %16854 = vst [vmem:[#allocation74_spill] sm:$0xff] %v14280_v48  ;;  %vm3388_vm4 = vcmp.gt.f32.partialorder %v14204_v37, 0.0  ;;  %vm3389_vm5 = vcmp.gt.f32.partialorder %v14207_v33, 0.0  ;;  %vm3390_vm6 = vcmp.gt.f32.partialorder %v14210_v16, 0.0  ;;  %vm3391_vm7 = vcmp.gt.f32.partialorder %v14213_v49, 0.0 }
 0x7de   : > { %16855 = vst [vmem:[#allocation45_spill] sm:$0xff] %v14283_v54  ;;  %16856 = vst [vmem:[#allocation67_spill] sm:$0xff] %v14294_v38  ;;  %vm3392_vm8 = vcmp.gt.f32.partialorder %v14216_v2, 0.0  ;;  %vm3393_vm9 = vcmp.gt.f32.partialorder %v14219_v56, 0.0  ;;  %vm3394_vm10 = vcmp.gt.f32.partialorder %v14222_v32, 0.0  ;;  %vm3395_vm11 = vcmp.gt.f32.partialorder %v14225_v40, 0.0 }
 0x7df   : > { %16857 = vst [vmem:[#allocation46_spill] sm:$0xff] %v14296_v41  ;;  %16858 = vst [vmem:[#allocation32_spill] sm:$0xff] %v14302_v46  ;;  %v3420_v52 = vmul.f32 %v14294_v38, %v14190_v17  ;;  %v3421_v58 = vmul.f32 %v14294_v38, %v14193_v30  ;;  %v3422_v26 = vmul.f32 %v14294_v38, %v14196_v39  ;;  %v14348_v25 = vpop.f32.mrb[88].mxu1  ;;  %vm3412_vm2 = vcmp.gt.f32.partialorder %v14280_v48, 0.0 }
 0x7e0   : > { %v3423_v55 = vmul.f32 %v14294_v38, %v14199_v61  ;;  %v3424_v15 = vmul.f32 %v14294_v38, %v14204_v37  ;;  %v3425_v41 = vmul.f32 %v14294_v38, %v14207_v33  ;;  %v3426_v50 = vmul.f32 %v14294_v38, %v14210_v16  ;;  %16859 = vst [vmem:[#allocation34_spill] sm:$0xff] %v14348_v25  ;;  %v14362_v13 = vpop.f32.mrb[89].mxu1 }
 0x7e1   : > { %v3427_v46 = vmul.f32 %v14294_v38, %v14213_v49  ;;  %v3428_v3 = vmul.f32 %v14294_v38, %v14216_v2  ;;  %v3429_v53 = vmul.f32 %v14294_v38, %v14219_v56  ;;  %v3430_v18 = vmul.f32 %v14294_v38, %v14222_v32  ;;  %16860 = vst [vmem:[#allocation43_spill] sm:$0xff] %v14362_v13  ;;  %v14376_v12 = vpop.f32.mrb[90].mxu1 }
 0x7e2   : > { %v3431_v59 = vmul.f32 %v14294_v38, %v14225_v40  ;;  %v3432_v21 = vmul.f32 %v14294_v38, %v14228_v28  ;;  %v3433_v31 = vmul.f32 %v14294_v38, %v14231_v9  ;;  %v3434_v44 = vmul.f32 %v14294_v38, %v14234_v35  ;;  %16861 = vst [vmem:[#allocation20_spill] sm:$0xff] %v14376_v12  ;;  %v14386_v62 = vpop.f32.mrb[91].mxu1 }
 0x7e3   : > { %v3435_v25 = vmul.f32 %v14294_v38, %v14237_v22  ;;  %vm3413_vm3 = vcmp.gt.f32.partialorder %v14283_v54, 0.0  ;;  %vm3414_vm0 = vcmp.gt.f32.partialorder %v14286_v47, 0.0  ;;  %vm3415_vm1 = vcmp.gt.f32.partialorder %v14289_v10, 0.0  ;;  %16862 = vst [vmem:[#allocation63_spill] sm:$0xff] %v14386_v62 }
 0x7e4   : > { %v3436_v36 = vmul.f32 %v14294_v38, %v14240_v5  ;;  %v3437_v57 = vmul.f32 %v14294_v38, %v14243_v45  ;;  %v3438_v23 = vmul.f32 %v14294_v38, %v14246_v34  ;;  %v3439_v13 = vmul.f32 %v14294_v38, %v14249_v1 }
 0x7e5   : > { %v3440_v27 = vmul.f32 %v14294_v38, %v14252_v63  ;;  %v3441_v4 = vmul.f32 %v14294_v38, %v14255_v11  ;;  %v3442_v42 = vmul.f32 %v14294_v38, %v14258_v60  ;;  %v3443_v43 = vmul.f32 %v14294_v38, %v14261_v14 }
 0x7e6   : > { %v3444_v19 = vmul.f32 %v14294_v38, %v14266_v0  ;;  %v3445_v12 = vmul.f32 %v14294_v38, %v14269_v29  ;;  %v3446_v7 = vmul.f32 %v14294_v38, %v14272_v24  ;;  %v3447_v6 = vmul.f32 %v14294_v38, %v14275_v51 }
 0x7e7   : > { %v3448_v20 = vmul.f32 %v14294_v38, %v14280_v48  ;;  %v3449_v8 = vmul.f32 %v14294_v38, %v14283_v54  ;;  %v3450_v62 = vmul.f32 %v14294_v38, %v14286_v47  ;;  %v3451_v0 = vmul.f32 %v14294_v38, %v14289_v10 }
 0x7e8   : > { %v3452_v29 = vsel %vm3384_vm12, %v14190_v17, %v3420_v52  ;;  %v3453_v51 = vsel %vm3385_vm13, %v14193_v30, %v3421_v58  ;;  %v3454_v48 = vsel %vm3386_vm14, %v14196_v39, %v3422_v26  ;;  %v3455_v54 = vsel %vm3387_vm15, %v14199_v61, %v3423_v55 }
 0x7e9   : > { %v3456_v38 = vsel %vm3388_vm4, %v14204_v37, %v3424_v15  ;;  %v3457_v17 = vsel %vm3389_vm5, %v14207_v33, %v3425_v41  ;;  %v3458_v30 = vsel %vm3390_vm6, %v14210_v16, %v3426_v50  ;;  %v3459_v39 = vsel %vm3391_vm7, %v14213_v49, %v3427_v46  ;;  %3484 = vst [vmem:[#allocation12 + $0x20] sm:$0xff] %v3452_v29  ;;  %v14440_v33 = vpop.f32.mrb[92].mxu1  ;;  %v16900_v46 = vld [vmem:[#allocation58_spill] sm:$0xff] }
 0x7ea   : > { %3485 = vst [vmem:[#allocation12 + $0x50] sm:$0xff] %v3453_v51  ;;  %3486 = vst [vmem:[#allocation12 + $0x80] sm:$0xff] %v3454_v48  ;;  %v3460_v15 = vsel %vm3392_vm8, %v14216_v2, %v3428_v3  ;;  %v3461_v55 = vsel %vm3393_vm9, %v14219_v56, %v3429_v53  ;;  %v3462_v61 = vsel %vm3394_vm10, %v14222_v32, %v3430_v18  ;;  %vm16863_vm12 = vcmp.gt.f32.partialorder %v14228_v28, 0.0  ;;  %v14454_v16 = vpop.f32.mrb[93].mxu1  ;;  %v16875_v56 = vld [vmem:[#allocation31_spill] sm:$0xff]  ;;  %v16877_v32 = vld [vmem:[#allocation40_spill] sm:$0xff] }
 0x7eb   : > { %3487 = vst [vmem:[#allocation12 + $0xb0] sm:$0xff] %v3455_v54  ;;  %v3463_v37 = vsel %vm3395_vm11, %v14225_v40, %v3431_v59  ;;  %3488 = vst [vmem:[#allocation12 + $0xe0] sm:$0xff] %v3456_v38  ;;  %v3464_v3 = vsel %vm16863_vm12, %v14228_v28, %v3432_v21  ;;  %vm16864_vm13 = vcmp.gt.f32.partialorder %v14231_v9, 0.0  ;;  %vm16865_vm14 = vcmp.gt.f32.partialorder %v14234_v35, 0.0  ;;  %v14468_v49 = vpop.f32.mrb[94].mxu1  ;;  %v16880_v40 = vld [vmem:[#allocation42_spill] sm:$0xff] }
 0x7ec   : > { %3489 = vst [vmem:[#allocation12 + $0x110] sm:$0xff] %v3457_v17  ;;  %3490 = vst [vmem:[#allocation12 + $0x140] sm:$0xff] %v3458_v30  ;;  %v3465_v53 = vsel %vm16864_vm13, %v14231_v9, %v3433_v31  ;;  %v3466_v18 = vsel %vm16865_vm14, %v14234_v35, %v3434_v44  ;;  %vm16866_vm15 = vcmp.gt.f32.partialorder %v14237_v22, 0.0  ;;  %vm16867_vm4 = vcmp.gt.f32.partialorder %v14240_v5, 0.0  ;;  %v14482_v2 = vpop.f32.mrb[95].mxu1  ;;  %v16882_v28 = vld [vmem:[#allocation74_spill] sm:$0xff] }
 0x7ed   : > { %3491 = vst [vmem:[#allocation12 + $0x170] sm:$0xff] %v3459_v39  ;;  %v3467_v59 = vsel %vm16866_vm15, %v14237_v22, %v3435_v25  ;;  %3492 = vst [vmem:[#allocation12 + $0x1a0] sm:$0xff] %v3460_v15  ;;  %v3468_v21 = vsel %vm16867_vm4, %v14240_v5, %v3436_v36  ;;  %vm16868_vm5 = vcmp.gt.f32.partialorder %v14243_v45, 0.0  ;;  %vm16869_vm6 = vcmp.gt.f32.partialorder %v14246_v34, 0.0  ;;  %v16883_v9 = vld [vmem:[#allocation45_spill] sm:$0xff]  ;;  %v16886_v22 = vld [vmem:[#allocation75_spill] sm:$0xff] }
 0x7ee   : > { %3493 = vst [vmem:[#allocation12 + $0x1d0] sm:$0xff] %v3461_v55  ;;  %3494 = vst [vmem:[#allocation12 + $0x200] sm:$0xff] %v3462_v61  ;;  %v3469_v31 = vsel %vm16868_vm5, %v14243_v45, %v3437_v57  ;;  %v3470_v44 = vsel %vm16869_vm6, %v14246_v34, %v3438_v23  ;;  %vm16870_vm7 = vcmp.gt.f32.partialorder %v14249_v1, 0.0  ;;  %vm16871_vm8 = vcmp.gt.f32.partialorder %v14252_v63, 0.0  ;;  %v16887_v45 = vld [vmem:[#allocation61_spill] sm:$0xff]  ;;  %v16895_v51 = vld [vmem:[#allocation64_spill] sm:$0xff] }
 0x7ef   : > { %3495 = vst [vmem:[#allocation12 + $0x230] sm:$0xff] %v3463_v37  ;;  %v3471_v25 = vsel %vm16870_vm7, %v14249_v1, %v3439_v13  ;;  %3496 = vst [vmem:[#allocation12 + $0x260] sm:$0xff] %v3464_v3  ;;  %v3472_v36 = vsel %vm16871_vm8, %v14252_v63, %v3440_v27  ;;  %vm16872_vm9 = vcmp.gt.f32.partialorder %v14255_v11, 0.0  ;;  %vm16873_vm10 = vcmp.gt.f32.partialorder %v14258_v60, 0.0  ;;  %v16890_v1 = vld [vmem:[#allocation24_spill] sm:$0xff]  ;;  %v16891_v63 = vld [vmem:[#allocation22_spill] sm:$0xff] }
 0x7f0   : > { %3497 = vst [vmem:[#allocation12 + $0x290] sm:$0xff] %v3465_v53  ;;  %3498 = vst [vmem:[#allocation12 + $0x2c0] sm:$0xff] %v3466_v18  ;;  %v3473_v57 = vsel %vm16872_vm9, %v14255_v11, %v3441_v4  ;;  %v3474_v23 = vsel %vm16873_vm10, %v14258_v60, %v3442_v42  ;;  %vm16874_vm11 = vcmp.gt.f32.partialorder %v14261_v14, 0.0  ;;  %vm16876_vm12 = vcmp.gt.f32.partialorder %v16875_v56, 0.0  ;;  %v16892_v60 = vld [vmem:[#allocation87_spill] sm:$0xff]  ;;  %v16899_v38 = vld [vmem:[#allocation86_spill] sm:$0xff] }
 0x7f1   : > { %3499 = vst [vmem:[#allocation12 + $0x2f0] sm:$0xff] %v3467_v59  ;;  %v3475_v13 = vsel %vm16874_vm11, %v14261_v14, %v3443_v43  ;;  %3500 = vst [vmem:[#allocation12 + $0x320] sm:$0xff] %v3468_v21  ;;  %v3476_v27 = vsel %vm16876_vm12, %v16875_v56, %v3444_v19  ;;  %vm16878_vm13 = vcmp.gt.f32.partialorder %v16877_v32, 0.0  ;;  %vm16879_vm14 = vcmp.gt.f32.partialorder %v14272_v24, 0.0  ;;  %v16893_v14 = vld [vmem:[#allocation84_spill] sm:$0xff]  ;;  %v16901_v17 = vld [vmem:[#allocation85_spill] sm:$0xff] }
 0x7f2   : > { %3501 = vst [vmem:[#allocation12 + $0x350] sm:$0xff] %v3469_v31  ;;  %3502 = vst [vmem:[#allocation12 + $0x380] sm:$0xff] %v3470_v44  ;;  %v3477_v4 = vsel %vm16878_vm13, %v16877_v32, %v3445_v12  ;;  %v3478_v42 = vsel %vm16879_vm14, %v14272_v24, %v3446_v7  ;;  %vm16881_vm15 = vcmp.gt.f32.partialorder %v16880_v40, 0.0  ;;  %v3480_v19 = vsel %vm3412_vm2, %v16882_v28, %v3448_v20  ;;  %v16884_v20 = vld [vmem:[#allocation56_spill] sm:$0xff]  ;;  %v16903_v39 = vld [vmem:[#allocation71_spill] sm:$0xff] }
 0x7f3   : > { %3503 = vst [vmem:[#allocation12 + $0x3b0] sm:$0xff] %v3471_v25  ;;  %v3479_v43 = vsel %vm16881_vm15, %v16880_v40, %v3447_v6  ;;  %3504 = vst [vmem:[#allocation12 + $0x3e0] sm:$0xff] %v3472_v36  ;;  %v3481_v12 = vsel %vm3413_vm3, %v16883_v9, %v3449_v8  ;;  %v3482_v7 = vsel %vm3414_vm0, %v14286_v47, %v3450_v62  ;;  %v16885_v8 = vld [vmem:[#allocation27_spill] sm:$0xff]  ;;  %v16888_v62 = vld [vmem:[#allocation30_spill] sm:$0xff] }
 0x7f4   : > { %3505 = vst [vmem:[#allocation12 + $0x410] sm:$0xff] %v3473_v57  ;;  %3506 = vst [vmem:[#allocation12 + $0x440] sm:$0xff] %v3474_v23  ;;  %v3483_v6 = vsel %vm3415_vm1, %v14289_v10, %v3451_v0  ;;  %v4658_v35 = vmul.f32 %v16884_v20, %v16884_v20  ;;  %v4688_v5 = vadd.f32 %v16886_v22, %v16885_v8  ;;  %v16894_v0 = vld [vmem:[#allocation57_spill] sm:$0xff]  ;;  %v16897_v47 = vld [vmem:[#allocation79_spill] sm:$0xff] }
 0x7f5   : > { %3507 = vst [vmem:[#allocation12 + $0x470] sm:$0xff] %v3475_v13  ;;  %3508 = vst [vmem:[#allocation12 + $0x4a0] sm:$0xff] %v3476_v27  ;;  %v14514_v34 = vadd.f32 %v16888_v62, %v16887_v45  ;;  %v6436_v11 = vadd.f32 %v16891_v63, %v16890_v1  ;;  %v14520_v50 = vsub.f32 %v16893_v14, %v16892_v60  ;;  %v16904_v3 = vld [vmem:[#allocation38_spill] sm:$0xff]  ;;  %v16908_v13 = vld [vmem:[#allocation83_spill] sm:$0xff] }
 0x7f6   : > { %3509 = vst [vmem:[#allocation12 + $0x4d0] sm:$0xff] %v3477_v4  ;;  %3510 = vst [vmem:[#allocation12 + $0x500] sm:$0xff] %v3478_v42  ;;  %v4659_v29 = vmul.f32 %v16894_v0, %v16894_v0  ;;  %v4689_v24 = vadd.f32 %v4688_v5, %v4658_v35  ;;  %v14526_v48 = vadd.f32 %v16895_v51, %v16887_v45  ;;  %v16905_v21 = vld [vmem:[#allocation66_spill] sm:$0xff]  ;;  %v16910_v32 = vld [vmem:[#allocation48_spill] sm:$0xff] }
 0x7f7   : > { %3511 = vst [vmem:[#allocation12 + $0x530] sm:$0xff] %v3479_v43  ;;  %3512 = vst [vmem:[#allocation12 + $0x560] sm:$0xff] %v3480_v19  ;;  %v6437_v54 = vadd.f32 %v6436_v11, %v14514_v34  ;;  %v14531_v10 = vadd.f32 %v16887_v45, %v16897_v47  ;;  %v14535_v41 = vsub.f32 %v16899_v38, %v16892_v60  ;;  %v16907_v25 = vld [vmem:[#allocation70_spill] sm:$0xff]  ;;  %v16915_v22 = vld [vmem:[#allocation23_spill] sm:$0xff] }
 0x7f8   : > { %3513 = vst [vmem:[#allocation12 + $0x590] sm:$0xff] %v3481_v12  ;;  %3514 = vst [vmem:[#allocation12 + $0x5c0] sm:$0xff] %v3482_v7  ;;  %v4660_v52 = vmul.f32 %v16900_v46, %v16900_v46  ;;  %v4690_v58 = vadd.f32 %v4689_v24, %v4659_v29  ;;  %v14542_v30 = vadd.f32 %v16887_v45, %v16901_v17  ;;  %v16912_v28 = vld [vmem:[#allocation62_spill] sm:$0xff]  ;;  %v16917_v11 = vld [vmem:[#allocation89_spill] sm:$0xff] }
 0x7f9   : > { %3515 = vst [vmem:[#allocation12 + $0x5f0] sm:$0xff] %v3483_v6  ;;  %16889 = vst [vmem:[#allocation77_spill] sm:$0xff] %v14514_v34  ;;  %v6438_v26 = vadd.f32 %v6437_v54, %v14526_v48  ;;  %v14546_v15 = vsub.f32 %v16903_v39, %v16892_v60  ;;  %v4661_v55 = vmul.f32 %v14520_v50, %v14520_v50  ;;  %v16914_v6 = vld [vmem:[#allocation88_spill] sm:$0xff]  ;;  %v16918_v29 = vld [vmem:[#allocation54_spill] sm:$0xff] }
 0x7fa   : > { %16896 = vst [vmem:[#allocation81_spill] sm:$0xff] %v14526_v48  ;;  %16898 = vst [vmem:[#allocation31_spill] sm:$0xff] %v14531_v10  ;;  %v4691_v61 = vadd.f32 %v4690_v58, %v4660_v52  ;;  %v14553_v53 = vsub.f32 %v16904_v3, %v16892_v60  ;;  %v4662_v18 = vmul.f32 %v14535_v41, %v14535_v41  ;;  %v16920_v54 = vld [vmem:[#allocation49_spill] sm:$0xff]  ;;  %v16922_v38 = vld [vmem:[#allocation90_spill] sm:$0xff] }
 0x7fb   : > { %16902 = vst [vmem:[#allocation40_spill] sm:$0xff] %v14542_v30  ;;  %v6439_v37 = vadd.f32 %v6438_v26, %v14531_v10  ;;  %v14559_v31 = vadd.f32 %v16905_v21, %v16887_v45  ;;  %v14564_v36 = vsub.f32 %v16907_v25, %v16892_v60  ;;  %v4663_v57 = vmul.f32 %v14546_v15, %v14546_v15  ;;  %v16923_v17 = vld [vmem:[#allocation59_spill] sm:$0xff] }
 0x7fc   : > { %v4692_v59 = vadd.f32 %v4691_v61, %v4661_v55  ;;  %v14570_v56 = vadd.f32 %v16908_v13, %v16887_v45  ;;  %v14575_v4 = vadd.f32 %v16887_v45, %v16910_v32  ;;  %v4664_v42 = vmul.f32 %v14553_v53, %v14553_v53  ;;  %v16925_v55 = vld [vmem:[#allocation91_spill] sm:$0xff]  ;;  %v16930_v32 = vld [vmem:[#allocation25_spill] sm:$0xff] }
 0x7fd   : > { %16906 = vst [vmem:[#allocation42_spill] sm:$0xff] %v14559_v31  ;;  %v6440_v44 = vadd.f32 %v6439_v37, %v14542_v30  ;;  %v14582_v19 = vadd.f32 %v16887_v45, %v16912_v28  ;;  %v4665_v9 = vmul.f32 %v14564_v36, %v14564_v36  ;;  %v4666_v35 = vmul.f32 %v16914_v6, %v16914_v6 }
 0x7fe   : > { %v4693_v23 = vadd.f32 %v4692_v59, %v4662_v18  ;;  %16909 = vst [vmem:[#allocation74_spill] sm:$0xff] %v14570_v56  ;;  %16911 = vst [vmem:[#allocation45_spill] sm:$0xff] %v14575_v4  ;;  %v14591_v5 = vadd.f32 %v16915_v22, %v16887_v45  ;;  %v4667_v60 = vmul.f32 %v16917_v11, %v16917_v11  ;;  %v16926_v18 = vld [vmem:[#allocation72_spill] sm:$0xff] }
 0x7ff   : > { %v6441_v27 = vadd.f32 %v6440_v44, %v14559_v31  ;;  %16913 = vst [vmem:[#allocation56_spill] sm:$0xff] %v14582_v19  ;;  %v14598_v24 = vadd.f32 %v16918_v29, %v16887_v45  ;;  %v14603_v47 = vadd.f32 %v16887_v45, %v16920_v54  ;;  %v4668_v52 = vmul.f32 %v16922_v38, %v16922_v38  ;;  %v16927_v44 = vld [vmem:[#allocation37_spill] sm:$0xff] }
 0x800   : > { %v4694_v40 = vadd.f32 %v4693_v23, %v4663_v57  ;;  %16916 = vst [vmem:[#allocation27_spill] sm:$0xff] %v14591_v5  ;;  %v14610_v39 = vadd.f32 %v16887_v45, %v16923_v17  ;;  %v4669_v61 = vmul.f32 %v16925_v55, %v16925_v55  ;;  %v4670_v59 = vmul.f32 %v16926_v18, %v16926_v18  ;;  %v16929_v23 = vld [vmem:[#allocation18_spill] sm:$0xff] }
 0x801   : > { %v6442_v43 = vadd.f32 %v6441_v27, %v14570_v56  ;;  %16919 = vst [vmem:[#allocation75_spill] sm:$0xff] %v14598_v24  ;;  %16921 = vst [vmem:[#allocation61_spill] sm:$0xff] %v14603_v47  ;;  %v14619_v25 = vadd.f32 %v16927_v44, %v16887_v45  ;;  %v4671_v13 = vmul.f32 %v16929_v23, %v16929_v23 }
 0x802   : > { %v4695_v12 = vadd.f32 %v4694_v40, %v4664_v42  ;;  %16924 = vst [vmem:[#allocation30_spill] sm:$0xff] %v14610_v39  ;;  %v14626_v42 = vadd.f32 %v16930_v32, %v16887_v45 }
 0x803   : > { %v6443_v7 = vadd.f32 %v6442_v43, %v14575_v4  ;;  %16928 = vst [vmem:[#allocation87_spill] sm:$0xff] %v14619_v25  ;;  %v16932_v43 = vld [vmem:[#allocation26_spill] sm:$0xff] }
 0x804   : > { %v4696_v8 = vadd.f32 %v4695_v12, %v4665_v9  ;;  %16931 = vst [vmem:[#allocation84_spill] sm:$0xff] %v14626_v42  ;;  %v14631_v28 = vadd.f32 %v16887_v45, %v16932_v43  ;;  %v16934_v9 = vld [vmem:[#allocation35_spill] sm:$0xff] }
 0x805   : > { %v6444_v62 = vadd.f32 %v6443_v7, %v14582_v19  ;;  %v4672_v12 = vmul.f32 %v16934_v9, %v16934_v9 }
 0x806   : > { %v4697_v14 = vadd.f32 %v4696_v8, %v4666_v35  ;;  %16933 = vst [vmem:[#allocation57_spill] sm:$0xff] %v14631_v28  ;;  %v16935_v8 = vld [vmem:[#allocation33_spill] sm:$0xff] }
 0x807   : > { %v6445_v51 = vadd.f32 %v6444_v62, %v14591_v5  ;;  %v14638_v22 = vadd.f32 %v16887_v45, %v16935_v8  ;;  %v16937_v62 = vld [vmem:[#allocation69_spill] sm:$0xff] }
 0x808   : > { %v4698_v58 = vadd.f32 %v4697_v14, %v4667_v60  ;;  %v4673_v60 = vmul.f32 %v16937_v62, %v16937_v62 }
 0x809   : > { %v6446_v26 = vadd.f32 %v6445_v51, %v14598_v24  ;;  %16936 = vst [vmem:[#allocation64_spill] sm:$0xff] %v14638_v22  ;;  %v16938_v51 = vld [vmem:[#allocation60_spill] sm:$0xff] }
 0x80a   : > { %v4699_v37 = vadd.f32 %v4698_v58, %v4668_v52  ;;  %v4674_v54 = vmul.f32 %v16938_v51, %v16938_v51  ;;  %v16939_v58 = vld [vmem:[#allocation51_spill] sm:$0xff] }
 0x80b   : > { %v6447_v3 = vadd.f32 %v6446_v26, %v14603_v47  ;;  %v14647_v26 = vadd.f32 %v16939_v58, %v16887_v45  ;;  %v16951_v58 = vld [vmem:[#allocation28_spill] sm:$0xff] }
 0x80c   : > { %v4700_v21 = vadd.f32 %v4699_v37, %v4669_v61  ;;  %v16941_v61 = vld [vmem:[#allocation19_spill] sm:$0xff] }
 0x80d   : > { %v6448_v57 = vadd.f32 %v6447_v3, %v14610_v39  ;;  %16940 = vst [vmem:[#allocation79_spill] sm:$0xff] %v14647_v26  ;;  %v4675_v37 = vmul.f32 %v16941_v61, %v16941_v61 }
 0x80e   : > { %v4701_v27 = vadd.f32 %v4700_v21, %v4670_v59  ;;  %v16942_v59 = vld [vmem:[#allocation39_spill] sm:$0xff] }
 0x80f   : > { %v6449_v40 = vadd.f32 %v6448_v57, %v14619_v25  ;;  %v14654_v21 = vadd.f32 %v16942_v59, %v16887_v45  ;;  %v16944_v57 = vld [vmem:[#allocation44_spill] sm:$0xff] }
 0x810   : > { %v4702_v7 = vadd.f32 %v4701_v27, %v4671_v13  ;;  %v14659_v13 = vadd.f32 %v16887_v45, %v16944_v57  ;;  %v16946_v27 = vld [vmem:[#allocation53_spill] sm:$0xff]  ;;  %v16954_v57 = vld [vmem:[#allocation46_spill] sm:$0xff] }
 0x811   : > { %v6450_v35 = vadd.f32 %v6449_v40, %v14626_v42  ;;  %16943 = vst [vmem:[#allocation86_spill] sm:$0xff] %v14654_v21  ;;  %v4676_v32 = vmul.f32 %v16946_v27, %v16946_v27 }
 0x812   : > { %v4703_v14 = vadd.f32 %v4702_v7, %v4672_v12  ;;  %16945 = vst [vmem:[#allocation58_spill] sm:$0xff] %v14659_v13  ;;  %v16947_v12 = vld [vmem:[#allocation32_spill] sm:$0xff] }
 0x813   : > { %v6451_v29 = vadd.f32 %v6450_v35, %v14631_v28  ;;  %v14666_v7 = vadd.f32 %v16887_v45, %v16947_v12  ;;  %v16949_v35 = vld [vmem:[#allocation52_spill] sm:$0xff]  ;;  %v14682_v12 = vadd.f32 %v16954_v57, %v16887_v45 }
 0x814   : > { %v4704_v52 = vadd.f32 %v4703_v14, %v4673_v60  ;;  %v4677_v8 = vmul.f32 %v16949_v35, %v16949_v35 }
 0x815   : > { %v6452_v17 = vadd.f32 %v6451_v29, %v14638_v22  ;;  %16948 = vst [vmem:[#allocation85_spill] sm:$0xff] %v14666_v7  ;;  %v16950_v29 = vld [vmem:[#allocation21_spill] sm:$0xff]  ;;  %16955 = vst [vmem:[#allocation38_spill] sm:$0xff] %v14682_v12 }
 0x816   : > { %v4705_v3 = vadd.f32 %v4704_v52, %v4674_v54  ;;  %v4678_v54 = vmul.f32 %v16950_v29, %v16950_v29 }
 0x817   : > { %v6453_v44 = vadd.f32 %v6452_v17, %v14647_v26  ;;  %v14675_v17 = vadd.f32 %v16951_v58, %v16887_v45 }
 0x818   : > { %v4706_v40 = vadd.f32 %v4705_v3, %v4675_v37  ;;  %v16953_v3 = vld [vmem:[#allocation36_spill] sm:$0xff] }
 0x819   : > { %v6454_v43 = vadd.f32 %v6453_v44, %v14654_v21  ;;  %16952 = vst [vmem:[#allocation71_spill] sm:$0xff] %v14675_v17  ;;  %v4679_v59 = vmul.f32 %v16953_v3, %v16953_v3 }
 0x81a   : > { %v4707_v60 = vadd.f32 %v4706_v40, %v4676_v32  ;;  %v16956_v40 = vld [vmem:[#allocation43_spill] sm:$0xff] }
 0x81b   : > { %v6455_v14 = vadd.f32 %v6454_v43, %v14659_v13  ;;  %v14687_v43 = vadd.f32 %v16887_v45, %v16956_v40  ;;  %v16962_v40 = vld [vmem:[#allocation34_spill] sm:$0xff] }
 0x81c   : > { %v4708_v52 = vadd.f32 %v4707_v60, %v4677_v8  ;;  %v16958_v8 = vld [vmem:[#allocation55_spill] sm:$0xff]  ;;  %v14701_v21 = vadd.f32 %v16962_v40, %v16887_v45  ;;  %v14721_v40 = vadd.f32 %v14440_v33, %v16887_v45 }
 0x81d   : > { %v6456_v37 = vadd.f32 %v6455_v14, %v14666_v7  ;;  %16957 = vst [vmem:[#allocation66_spill] sm:$0xff] %v14687_v43  ;;  %v4680_v60 = vmul.f32 %v16958_v8, %v16958_v8  ;;  %v16959_v7 = vld [vmem:[#allocation63_spill] sm:$0xff] }
 0x81e   : > { %v4709_v44 = vadd.f32 %v4708_v52, %v4678_v54  ;;  %v14694_v13 = vadd.f32 %v16887_v45, %v16959_v7  ;;  %v16961_v54 = vld [vmem:[#allocation41_spill] sm:$0xff]  ;;  %16963 = vst [vmem:[#allocation83_spill] sm:$0xff] %v14701_v21  ;;  %16968 = vst [vmem:[#allocation23_spill] sm:$0xff] %v14721_v40 }
 0x81f   : > { %v6457_v32 = vadd.f32 %v6456_v37, %v14675_v17  ;;  %v4681_v52 = vmul.f32 %v16961_v54, %v16961_v54 }
 0x820   : > { %v4710_v58 = vadd.f32 %v4709_v44, %v4679_v59  ;;  %16960 = vst [vmem:[#allocation70_spill] sm:$0xff] %v14694_v13  ;;  %v16964_v44 = vld [vmem:[#allocation20_spill] sm:$0xff] }
 0x821   : > { %v6458_v14 = vadd.f32 %v6457_v32, %v14682_v12  ;;  %v14706_v32 = vadd.f32 %v16964_v44, %v16887_v45  ;;  %v14711_v12 = vadd.f32 %v16887_v45, %v14454_v16  ;;  %v14726_v16 = vadd.f32 %v14468_v49, %v16887_v45 }
 0x822   : > { %v4711_v57 = vadd.f32 %v4710_v58, %v4680_v60 }
 0x823   : > { %v6459_v37 = vadd.f32 %v6458_v14, %v14687_v43  ;;  %16965 = vst [vmem:[#allocation48_spill] sm:$0xff] %v14706_v32  ;;  %16966 = vst [vmem:[#allocation62_spill] sm:$0xff] %v14711_v12  ;;  %v14716_v14 = vadd.f32 %v16887_v45, %v14482_v2  ;;  %v16974_v45 = vld [vmem:[#allocation65_spill] sm:$0xff] }
 0x824   : > { %v4712_v17 = vadd.f32 %v4711_v57, %v4681_v52  ;;  %16969 = vst [vmem:[#allocation89_spill] sm:$0xff] %v14726_v16 }
 0x825   : > { %v6460_v26 = vadd.f32 %v6459_v37, %v14694_v13  ;;  %16967 = vst [vmem:[#allocation88_spill] sm:$0xff] %v14716_v14 }
 0x826   : > { %v4713_v59 = vrot.slane %v4712_v17, 4 }
 0x827   : > { %v6461_v7 = vadd.f32 %v6460_v26, %v14701_v21  ;;  %v16973_v21 = vld [vmem:[#allocation76_spill] sm:$0xff] }
 0x828   : > { %v4714_v60 = vadd.f32 %v4713_v59, %v4712_v17 }
 0x829   : > { %v6462_v58 = vadd.f32 %v6461_v7, %v14706_v32 }
 0x82a   : > { %v4715_v52 = vrot.slane %v4714_v60, 2 }
 0x82b   : > { %v6463_v57 = vadd.f32 %v6462_v58, %v14711_v12  ;;  %v16972_v12 = vld [vmem:[#allocation73_spill] sm:$0xff] }
 0x82c   : > { %v4716_v37 = vadd.f32 %v4715_v52, %v4714_v60  ;;  %v16970_v60 = vld [vmem:[#allocation78_spill] sm:$0xff]  ;;  %v16971_v52 = vld [vmem:[#allocation80_spill] sm:$0xff] }
 0x82d   : > { %v6464_v26 = vadd.f32 %v6463_v57, %v14716_v14  ;;  %v4724_v33 = vmul.f32 %v16971_v52, %v16970_v60  ;;  %v4725_v57 = vmul.f32 %v16971_v52, %v16972_v12  ;;  %v4726_v49 = vmul.f32 %v16971_v52, %v16973_v21  ;;  %v16978_v60 = vld [vmem:[#allocation50_spill] sm:$0xff] }
 0x82e   : > { %v4717_v44 = vrot.slane %v4716_v37, 1  ;;  %v4732_v12 = vmul.f32 %v16971_v52, %v16884_v20  ;;  %v4733_v21 = vmul.f32 %v16971_v52, %v16894_v0  ;;  %v4739_v20 = vmul.f32 %v16971_v52, %v14564_v36 }
 0x82f   : > { %v6465_v17 = vadd.f32 %v6464_v26, %v14721_v40  ;;  %v4727_v26 = vmul.f32 %v16971_v52, %v16974_v45  ;;  %v4731_v40 = vmul.f32 %v16971_v52, %v16978_v60  ;;  %v4736_v45 = vmul.f32 %v16971_v52, %v14535_v41 }
 0x830   : > { %v4718_v59 = vadd.f32 %v4717_v44, %v4716_v37  ;;  %v16975_v37 = vld [vmem:[#allocation68_spill] sm:$0xff]  ;;  %v4740_v0 = vmul.f32 %v16971_v52, %v16914_v6  ;;  %v4743_v41 = vmul.f32 %v16971_v52, %v16925_v55  ;;  %v4746_v36 = vmul.f32 %v16971_v52, %v16934_v9 }
 0x831   : > { %v6466_v2 = vadd.f32 %v6465_v17, %v14726_v16  ;;  %v4728_v44 = vmul.f32 %v16971_v52, %v16975_v37  ;;  %v16976_v17 = vld [vmem:[#allocation82_spill] sm:$0xff]  ;;  %v4737_v37 = vmul.f32 %v16971_v52, %v14546_v15  ;;  %v4744_v15 = vmul.f32 %v16971_v52, %v16926_v18 }
 0x832   : > { %v4719_v7 = vmul.f32 0.00390625, %v4718_v59  ;;  %v4729_v59 = vmul.f32 %v16971_v52, %v16976_v17  ;;  %v4738_v17 = vmul.f32 %v16971_v52, %v14553_v53  ;;  %v4745_v53 = vmul.f32 %v16971_v52, %v16929_v23 }
 0x833   : > { %v6467_v58 = vrot.slane %v6466_v2, 4  ;;  %v4747_v6 = vmul.f32 %v16971_v52, %v16937_v62  ;;  %v4750_v55 = vmul.f32 %v16971_v52, %v16946_v27  ;;  %v4751_v18 = vmul.f32 %v16971_v52, %v16949_v35 }
 0x834   : > { %v4756_v32 = vadd.f32 1e-05, %v4719_v7  ;;  %v4752_v23 = vmul.f32 %v16971_v52, %v16950_v29  ;;  %v4753_v9 = vmul.f32 %v16971_v52, %v16953_v3  ;;  %v4754_v62 = vmul.f32 %v16971_v52, %v16958_v8 }
 0x835   : > { %v6468_v14 = vadd.f32 %v6467_v58, %v6466_v2  ;;  %v4734_v2 = vmul.f32 %v16971_v52, %v16900_v46  ;;  %v4735_v58 = vmul.f32 %v16971_v52, %v14520_v50  ;;  %v4741_v46 = vmul.f32 %v16971_v52, %v16917_v11 }
 0x836   : > { %7716 = vrsqrt.f32 %v4756_v32  ;;  %v16977_v32 = vld [vmem:[#allocation47_spill] sm:$0xff]  ;;  %v4742_v50 = vmul.f32 %v16971_v52, %v16922_v38  ;;  %v4748_v11 = vmul.f32 %v16971_v52, %v16938_v51  ;;  %v4749_v38 = vmul.f32 %v16971_v52, %v16941_v61 }
 0x837   : > { %v4730_v7 = vmul.f32 %v16971_v52, %v16977_v32  ;;  %v6469_v32 = vrot.slane %v6468_v14, 2  ;;  %v4755_v51 = vmul.f32 %v16971_v52, %v16961_v54 }
 0x839   : > { %v6470_v61 = vadd.f32 %v6469_v32, %v6468_v14 }
 0x840   : > { %v7717_v60 = vpop.eup %7716 }
 0x841   : > { %v4758_v13 = vmul.f32 %v7717_v60, %v4724_v33  ;;  %v4759_v43 = vmul.f32 %v7717_v60, %v4725_v57  ;;  %v4760_v27 = vmul.f32 %v7717_v60, %v4726_v49  ;;  %v4761_v22 = vmul.f32 %v7717_v60, %v4727_v26 }
 0x842   : > { %v4762_v28 = vmul.f32 %v7717_v60, %v4728_v44  ;;  %v4763_v35 = vmul.f32 %v7717_v60, %v4729_v59  ;;  %v4764_v42 = vmul.f32 %v7717_v60, %v4730_v7  ;;  %v4765_v25 = vmul.f32 %v7717_v60, %v4731_v40 }
 0x843   : > { %v4766_v29 = vmul.f32 %v7717_v60, %v4732_v12  ;;  %v4767_v39 = vmul.f32 %v7717_v60, %v4733_v21  ;;  %v4768_v47 = vmul.f32 %v7717_v60, %v4734_v2  ;;  %v4769_v24 = vmul.f32 %v7717_v60, %v4735_v58 }
 0x844   : > { %v4770_v3 = vmul.f32 %v7717_v60, %v4736_v45  ;;  %v4771_v5 = vmul.f32 %v7717_v60, %v4737_v37  ;;  %v4772_v19 = vmul.f32 %v7717_v60, %v4738_v17  ;;  %v4773_v8 = vmul.f32 %v7717_v60, %v4739_v20  ;;  %v16980_v37 = vld [vmem:[#allocation29_spill] sm:$0xff] }
 0x845   : > { %v4774_v4 = vmul.f32 %v7717_v60, %v4740_v0  ;;  %v4775_v56 = vmul.f32 %v7717_v60, %v4741_v46  ;;  %v4776_v54 = vmul.f32 %v7717_v60, %v4742_v50  ;;  %v4777_v14 = vmul.f32 %v7717_v60, %v4743_v41 }
 0x846   : > { %v4778_v52 = vmul.f32 %v7717_v60, %v4744_v15  ;;  %v4779_v33 = vmul.f32 %v7717_v60, %v4745_v53  ;;  %v4780_v57 = vmul.f32 %v7717_v60, %v4746_v36  ;;  %v4781_v49 = vmul.f32 %v7717_v60, %v4747_v6 }
 0x847   : > { %v4782_v26 = vmul.f32 %v7717_v60, %v4748_v11  ;;  %v4783_v44 = vmul.f32 %v7717_v60, %v4749_v38  ;;  %v4784_v59 = vmul.f32 %v7717_v60, %v4750_v55  ;;  %v4785_v40 = vmul.f32 %v7717_v60, %v4751_v18 }
 0x848   : > { %v4786_v7 = vmul.f32 %v7717_v60, %v4752_v23  ;;  %v4787_v12 = vmul.f32 %v7717_v60, %v4753_v9  ;;  %v4788_v21 = vmul.f32 %v7717_v60, %v4754_v62  ;;  %v4789_v2 = vmul.f32 %v7717_v60, %v4755_v51  ;;  %v16986_v51 = vld [vmem:[#allocation67_spill] sm:$0xff] }
 0x849   : > { %v6471_v58 = vrot.slane %v6470_v61, 1  ;;  %v14797_v17 = vadd.f32 %v16980_v37, %v4758_v13  ;;  %v14800_v20 = vadd.f32 %v16980_v37, %v4759_v43  ;;  %v14803_v0 = vadd.f32 %v16980_v37, %v4760_v27 }
 0x84a   : > { %v14806_v32 = vadd.f32 %v16980_v37, %v4761_v22  ;;  %v14809_v46 = vadd.f32 %v16980_v37, %v4762_v28  ;;  %v14812_v50 = vadd.f32 %v16980_v37, %v4763_v35  ;;  %v14815_v41 = vadd.f32 %v16980_v37, %v4764_v42 }
 0x84b   : > { %v14794_v45 = vadd.f32 %v6471_v58, %v6470_v61  ;;  %v14818_v13 = vadd.f32 %v16980_v37, %v4765_v25  ;;  %v14821_v43 = vadd.f32 %v16980_v37, %v4766_v29  ;;  %v14824_v15 = vadd.f32 %v16980_v37, %v4767_v39 }
 0x84c   : > { %v14827_v22 = vadd.f32 %v16980_v37, %v4768_v47  ;;  %v14830_v28 = vadd.f32 %v16980_v37, %v4769_v24  ;;  %v14833_v53 = vadd.f32 %v16980_v37, %v4770_v3  ;;  %v14836_v42 = vadd.f32 %v16980_v37, %v4771_v5 }
 0x84d   : > { %16979 = vst [vmem:[#allocation54_spill] sm:$0xff] %v14794_v45  ;;  %v14839_v25 = vadd.f32 %v16980_v37, %v4772_v19  ;;  %v14842_v36 = vadd.f32 %v16980_v37, %v4773_v8  ;;  %v14845_v39 = vadd.f32 %v16980_v37, %v4774_v4  ;;  %v14848_v47 = vadd.f32 %v16980_v37, %v4775_v56 }
 0x84e   : > { %v14851_v24 = vadd.f32 %v16980_v37, %v4776_v54  ;;  %v14854_v6 = vadd.f32 %v16980_v37, %v4777_v14  ;;  %v14857_v5 = vadd.f32 %v16980_v37, %v4778_v52  ;;  %v14860_v19 = vadd.f32 %v16980_v37, %v4779_v33 }
 0x84f   : > { %v14863_v11 = vadd.f32 %v16980_v37, %v4780_v57  ;;  %v14866_v4 = vadd.f32 %v16980_v37, %v4781_v49  ;;  %v14869_v56 = vadd.f32 %v16980_v37, %v4782_v26  ;;  %v14872_v38 = vadd.f32 %v16980_v37, %v4783_v44 }
 0x850   : > { %v14875_v55 = vadd.f32 %v16980_v37, %v4784_v59  ;;  %v14878_v18 = vadd.f32 %v16980_v37, %v4785_v40  ;;  %v14881_v23 = vadd.f32 %v16980_v37, %v4786_v7  ;;  %v14884_v60 = vadd.f32 %v16980_v37, %v4787_v12 }
 0x851   : > { %16981 = vst [vmem:[#allocation49_spill] sm:$0xff] %v14869_v56  ;;  %16982 = vst [vmem:[#allocation90_spill] sm:$0xff] %v14872_v38  ;;  %v14887_v9 = vadd.f32 %v16980_v37, %v4788_v21  ;;  %v14890_v62 = vadd.f32 %v16980_v37, %v4789_v2  ;;  %vm4827_vm0 = vcmp.gt.f32.partialorder %v14797_v17, 0.0  ;;  %vm4828_vm1 = vcmp.gt.f32.partialorder %v14800_v20, 0.0 }
 0x852   : > { %16983 = vst [vmem:[#allocation59_spill] sm:$0xff] %v14878_v18  ;;  %16984 = vst [vmem:[#allocation91_spill] sm:$0xff] %v14881_v23  ;;  %vm4829_vm2 = vcmp.gt.f32.partialorder %v14803_v0, 0.0  ;;  %vm4830_vm3 = vcmp.gt.f32.partialorder %v14806_v32, 0.0  ;;  %vm4831_vm4 = vcmp.gt.f32.partialorder %v14809_v46, 0.0  ;;  %vm4832_vm5 = vcmp.gt.f32.partialorder %v14812_v50, 0.0 }
 0x853   : > { %16985 = vst [vmem:[#allocation72_spill] sm:$0xff] %v14884_v60  ;;  %vm4833_vm6 = vcmp.gt.f32.partialorder %v14815_v41, 0.0  ;;  %vm4834_vm7 = vcmp.gt.f32.partialorder %v14818_v13, 0.0  ;;  %vm4835_vm8 = vcmp.gt.f32.partialorder %v14821_v43, 0.0  ;;  %vm4836_vm9 = vcmp.gt.f32.partialorder %v14824_v15, 0.0 }
 0x854   : > { %vm4837_vm10 = vcmp.gt.f32.partialorder %v14827_v22, 0.0  ;;  %vm4838_vm11 = vcmp.gt.f32.partialorder %v14830_v28, 0.0  ;;  %v4863_v61 = vmul.f32 %v16986_v51, %v14797_v17  ;;  %v4864_v27 = vmul.f32 %v16986_v51, %v14800_v20 }
 0x855   : > { %v4865_v35 = vmul.f32 %v16986_v51, %v14803_v0  ;;  %v4866_v29 = vmul.f32 %v16986_v51, %v14806_v32  ;;  %v4867_v3 = vmul.f32 %v16986_v51, %v14809_v46  ;;  %v4868_v8 = vmul.f32 %v16986_v51, %v14812_v50 }
 0x856   : > { %v4869_v54 = vmul.f32 %v16986_v51, %v14815_v41  ;;  %v4870_v14 = vmul.f32 %v16986_v51, %v14818_v13  ;;  %v4871_v52 = vmul.f32 %v16986_v51, %v14821_v43  ;;  %v4872_v33 = vmul.f32 %v16986_v51, %v14824_v15 }
 0x857   : > { %v4873_v57 = vmul.f32 %v16986_v51, %v14827_v22  ;;  %v4874_v49 = vmul.f32 %v16986_v51, %v14830_v28  ;;  %v4875_v26 = vmul.f32 %v16986_v51, %v14833_v53  ;;  %v4876_v44 = vmul.f32 %v16986_v51, %v14836_v42 }
 0x858   : > { %v4877_v59 = vmul.f32 %v16986_v51, %v14839_v25  ;;  %v4878_v40 = vmul.f32 %v16986_v51, %v14842_v36  ;;  %vm4855_vm12 = vcmp.gt.f32.partialorder %v14881_v23, 0.0  ;;  %vm4856_vm13 = vcmp.gt.f32.partialorder %v14884_v60, 0.0 }
 0x859   : > { %vm4857_vm14 = vcmp.gt.f32.partialorder %v14887_v9, 0.0  ;;  %vm4858_vm15 = vcmp.gt.f32.partialorder %v14890_v62, 0.0  ;;  %v4879_v7 = vmul.f32 %v16986_v51, %v14845_v39  ;;  %v4880_v12 = vmul.f32 %v16986_v51, %v14848_v47 }
 0x85a   : > { %v4881_v21 = vmul.f32 %v16986_v51, %v14851_v24  ;;  %v4882_v2 = vmul.f32 %v16986_v51, %v14854_v6  ;;  %v4883_v58 = vmul.f32 %v16986_v51, %v14857_v5  ;;  %v4884_v37 = vmul.f32 %v16986_v51, %v14860_v19 }
 0x85b   : > { %v4885_v31 = vmul.f32 %v16986_v51, %v14863_v11  ;;  %v4886_v30 = vmul.f32 %v16986_v51, %v14866_v4  ;;  %v4887_v10 = vmul.f32 %v16986_v51, %v14869_v56  ;;  %v4888_v48 = vmul.f32 %v16986_v51, %v14872_v38 }
 0x85c   : > { %v4889_v34 = vmul.f32 %v16986_v51, %v14875_v55  ;;  %v4890_v63 = vmul.f32 %v16986_v51, %v14878_v18  ;;  %v4891_v1 = vmul.f32 %v16986_v51, %v14881_v23  ;;  %v4892_v16 = vmul.f32 %v16986_v51, %v14884_v60 }
 0x85d   : > { %v4893_v45 = vmul.f32 %v16986_v51, %v14887_v9  ;;  %v4894_v56 = vmul.f32 %v16986_v51, %v14890_v62  ;;  %v4895_v38 = vsel %vm4827_vm0, %v14797_v17, %v4863_v61  ;;  %v4896_v18 = vsel %vm4828_vm1, %v14800_v20, %v4864_v27 }
 0x85e   : > { %v4897_v23 = vsel %vm4829_vm2, %v14803_v0, %v4865_v35  ;;  %v4898_v60 = vsel %vm4830_vm3, %v14806_v32, %v4866_v29  ;;  %v4899_v51 = vsel %vm4831_vm4, %v14809_v46, %v4867_v3  ;;  %v4900_v17 = vsel %vm4832_vm5, %v14812_v50, %v4868_v8  ;;  %4927 = vst [vmem:[#allocation12 + $0x28] sm:$0xff] %v4895_v38  ;;  %v17001_v38 = vld [vmem:[#allocation90_spill] sm:$0xff]  ;;  %v17013_v29 = vld [vmem:[#allocation81_spill] sm:$0xff]  ;;  %v17014_v8 = vld [vmem:[#allocation31_spill] sm:$0xff] }
 0x85f   : > { %v4901_v20 = vsel %vm4833_vm6, %v14815_v41, %v4869_v54  ;;  %v4902_v0 = vsel %vm4834_vm7, %v14818_v13, %v4870_v14  ;;  %4928 = vst [vmem:[#allocation12 + $0x58] sm:$0xff] %v4896_v18  ;;  %4929 = vst [vmem:[#allocation12 + $0x88] sm:$0xff] %v4897_v23  ;;  %v4903_v32 = vsel %vm4835_vm8, %v14821_v43, %v4871_v52  ;;  %vm16987_vm0 = vcmp.gt.f32.partialorder %v14833_v53, 0.0  ;;  %v17007_v18 = vld [vmem:[#allocation72_spill] sm:$0xff] }
 0x860   : > { %4930 = vst [vmem:[#allocation12 + $0xb8] sm:$0xff] %v4898_v60  ;;  %v4904_v46 = vsel %vm4836_vm9, %v14824_v15, %v4872_v33  ;;  %v4905_v50 = vsel %vm4837_vm10, %v14827_v22, %v4873_v57  ;;  %v4906_v41 = vsel %vm4838_vm11, %v14830_v28, %v4874_v49  ;;  %4931 = vst [vmem:[#allocation12 + $0xe8] sm:$0xff] %v4899_v51  ;;  %vm16988_vm1 = vcmp.gt.f32.partialorder %v14836_v42, 0.0  ;;  %v17015_v33 = vld [vmem:[#allocation40_spill] sm:$0xff] }
 0x861   : > { %4932 = vst [vmem:[#allocation12 + $0x118] sm:$0xff] %v4900_v17  ;;  %4933 = vst [vmem:[#allocation12 + $0x148] sm:$0xff] %v4901_v20  ;;  %v4907_v13 = vsel %vm16987_vm0, %v14833_v53, %v4875_v26  ;;  %v4908_v43 = vsel %vm16988_vm1, %v14836_v42, %v4876_v44  ;;  %vm16989_vm2 = vcmp.gt.f32.partialorder %v14839_v25, 0.0  ;;  %vm16990_vm3 = vcmp.gt.f32.partialorder %v14842_v36, 0.0  ;;  %v17016_v44 = vld [vmem:[#allocation42_spill] sm:$0xff] }
 0x862   : > { %4934 = vst [vmem:[#allocation12 + $0x178] sm:$0xff] %v4902_v0  ;;  %v4909_v15 = vsel %vm16989_vm2, %v14839_v25, %v4877_v59  ;;  %v4910_v22 = vsel %vm16990_vm3, %v14842_v36, %v4878_v40  ;;  %4935 = vst [vmem:[#allocation12 + $0x1a8] sm:$0xff] %v4903_v32  ;;  %vm16991_vm4 = vcmp.gt.f32.partialorder %v14845_v39, 0.0  ;;  %vm16992_vm5 = vcmp.gt.f32.partialorder %v14848_v47, 0.0  ;;  %v17019_v0 = vld [vmem:[#allocation56_spill] sm:$0xff] }
 0x863   : > { %4936 = vst [vmem:[#allocation12 + $0x1d8] sm:$0xff] %v4904_v46  ;;  %4937 = vst [vmem:[#allocation12 + $0x208] sm:$0xff] %v4905_v50  ;;  %v4911_v28 = vsel %vm16991_vm4, %v14845_v39, %v4879_v7  ;;  %v4912_v53 = vsel %vm16992_vm5, %v14848_v47, %v4880_v12  ;;  %vm16993_vm6 = vcmp.gt.f32.partialorder %v14851_v24, 0.0  ;;  %vm16994_vm7 = vcmp.gt.f32.partialorder %v14854_v6, 0.0  ;;  %v17017_v12 = vld [vmem:[#allocation74_spill] sm:$0xff] }
 0x864   : > { %4938 = vst [vmem:[#allocation12 + $0x238] sm:$0xff] %v4906_v41  ;;  %v4913_v42 = vsel %vm16993_vm6, %v14851_v24, %v4881_v21  ;;  %v4914_v25 = vsel %vm16994_vm7, %v14854_v6, %v4882_v2  ;;  %4939 = vst [vmem:[#allocation12 + $0x268] sm:$0xff] %v4907_v13  ;;  %vm16995_vm8 = vcmp.gt.f32.partialorder %v14857_v5, 0.0  ;;  %vm16996_vm9 = vcmp.gt.f32.partialorder %v14860_v19, 0.0  ;;  %v16999_v6 = vld [vmem:[#allocation49_spill] sm:$0xff]  ;;  %v17020_v41 = vld [vmem:[#allocation27_spill] sm:$0xff] }
 0x865   : > { %4940 = vst [vmem:[#allocation12 + $0x298] sm:$0xff] %v4908_v43  ;;  %4941 = vst [vmem:[#allocation12 + $0x2c8] sm:$0xff] %v4909_v15  ;;  %v4915_v36 = vsel %vm16995_vm8, %v14857_v5, %v4883_v58  ;;  %v4916_v39 = vsel %vm16996_vm9, %v14860_v19, %v4884_v37  ;;  %vm16997_vm10 = vcmp.gt.f32.partialorder %v14863_v11, 0.0  ;;  %vm16998_vm11 = vcmp.gt.f32.partialorder %v14866_v4, 0.0  ;;  %v17018_v37 = vld [vmem:[#allocation45_spill] sm:$0xff] }
 0x866   : > { %4942 = vst [vmem:[#allocation12 + $0x2f8] sm:$0xff] %v4910_v22  ;;  %v4917_v47 = vsel %vm16997_vm10, %v14863_v11, %v4885_v31  ;;  %v4918_v24 = vsel %vm16998_vm11, %v14866_v4, %v4886_v30  ;;  %4943 = vst [vmem:[#allocation12 + $0x328] sm:$0xff] %v4911_v28  ;;  %vm17000_vm0 = vcmp.gt.f32.partialorder %v16999_v6, 0.0  ;;  %vm17002_vm1 = vcmp.gt.f32.partialorder %v17001_v38, 0.0  ;;  %v17004_v11 = vld [vmem:[#allocation59_spill] sm:$0xff] }
 0x867   : > { %4944 = vst [vmem:[#allocation12 + $0x358] sm:$0xff] %v4912_v53  ;;  %4945 = vst [vmem:[#allocation12 + $0x388] sm:$0xff] %v4913_v42  ;;  %v4919_v5 = vsel %vm17000_vm0, %v16999_v6, %v4887_v10  ;;  %v4920_v19 = vsel %vm17002_vm1, %v17001_v38, %v4888_v48  ;;  %vm17003_vm2 = vcmp.gt.f32.partialorder %v14875_v55, 0.0  ;;  %vm17005_vm3 = vcmp.gt.f32.partialorder %v17004_v11, 0.0  ;;  %v17006_v4 = vld [vmem:[#allocation91_spill] sm:$0xff] }
 0x868   : > { %4946 = vst [vmem:[#allocation12 + $0x3b8] sm:$0xff] %v4914_v25  ;;  %v4921_v31 = vsel %vm17003_vm2, %v14875_v55, %v4889_v34  ;;  %v4922_v30 = vsel %vm17005_vm3, %v17004_v11, %v4890_v63  ;;  %4947 = vst [vmem:[#allocation12 + $0x3e8] sm:$0xff] %v4915_v36  ;;  %v4923_v10 = vsel %vm4855_vm12, %v17006_v4, %v4891_v1  ;;  %v17008_v1 = vld [vmem:[#allocation54_spill] sm:$0xff]  ;;  %v17021_v22 = vld [vmem:[#allocation75_spill] sm:$0xff] }
 0x869   : > { %4948 = vst [vmem:[#allocation12 + $0x418] sm:$0xff] %v4916_v39  ;;  %4949 = vst [vmem:[#allocation12 + $0x448] sm:$0xff] %v4917_v47  ;;  %v4924_v48 = vsel %vm4856_vm13, %v17007_v18, %v4892_v16  ;;  %v4925_v34 = vsel %vm4857_vm14, %v14887_v9, %v4893_v45  ;;  %v4926_v63 = vsel %vm4858_vm15, %v14890_v62, %v4894_v56  ;;  %v15085_v55 = vmul.f32 0.00390625, %v17008_v1  ;;  %v17009_v16 = vld [vmem:[#allocation89_spill] sm:$0xff]  ;;  %v17010_v45 = vld [vmem:[#allocation24_spill] sm:$0xff] }
 0x86a   : > { %4950 = vst [vmem:[#allocation12 + $0x478] sm:$0xff] %v4918_v24  ;;  %4951 = vst [vmem:[#allocation12 + $0x4a8] sm:$0xff] %v4919_v5  ;;  %v17011_v56 = vld [vmem:[#allocation22_spill] sm:$0xff]  ;;  %v17012_v62 = vld [vmem:[#allocation77_spill] sm:$0xff] }
 0x86b   : > { %4952 = vst [vmem:[#allocation12 + $0x4d8] sm:$0xff] %v4920_v19  ;;  %4953 = vst [vmem:[#allocation12 + $0x508] sm:$0xff] %v4921_v31  ;;  %v15089_v23 = vsub.f32 %v17009_v16, %v15085_v55  ;;  %v15093_v60 = vsub.f32 %v17010_v45, %v15085_v55  ;;  %v15097_v9 = vsub.f32 %v17011_v56, %v15085_v55  ;;  %v17022_v25 = vld [vmem:[#allocation61_spill] sm:$0xff]  ;;  %v17023_v24 = vld [vmem:[#allocation30_spill] sm:$0xff] }
 0x86c   : > { %4954 = vst [vmem:[#allocation12 + $0x538] sm:$0xff] %v4922_v30  ;;  %4955 = vst [vmem:[#allocation12 + $0x568] sm:$0xff] %v4923_v10  ;;  %v15101_v61 = vsub.f32 %v17012_v62, %v15085_v55  ;;  %v15109_v3 = vsub.f32 %v17013_v29, %v15085_v55  ;;  %v15113_v54 = vsub.f32 %v17014_v8, %v15085_v55  ;;  %v17024_v19 = vld [vmem:[#allocation87_spill] sm:$0xff]  ;;  %v17025_v4 = vld [vmem:[#allocation84_spill] sm:$0xff] }
 0x86d   : > { %4956 = vst [vmem:[#allocation12 + $0x598] sm:$0xff] %v4924_v48  ;;  %4957 = vst [vmem:[#allocation12 + $0x5c8] sm:$0xff] %v4925_v34  ;;  %v6506_v27 = vmul.f32 %v15093_v60, %v15093_v60  ;;  %v6507_v35 = vmul.f32 %v15097_v9, %v15097_v9  ;;  %v15119_v57 = vsub.f32 %v17015_v33, %v15085_v55  ;;  %v17026_v34 = vld [vmem:[#allocation57_spill] sm:$0xff]  ;;  %v17027_v45 = vld [vmem:[#allocation64_spill] sm:$0xff] }
 0x86e   : > { %4958 = vst [vmem:[#allocation12 + $0x5f8] sm:$0xff] %v4926_v63  ;;  %v6508_v14 = vmul.f32 %v15101_v61, %v15101_v61  ;;  %v6509_v49 = vmul.f32 %v15109_v3, %v15109_v3  ;;  %v15125_v59 = vsub.f32 %v17016_v44, %v15085_v55  ;;  %v6510_v40 = vmul.f32 %v15113_v54, %v15113_v54  ;;  %v17030_v44 = vld [vmem:[#allocation58_spill] sm:$0xff] }
 0x86f   : > { %v6538_v52 = vadd.f32 %v6507_v35, %v6506_v27  ;;  %v15131_v21 = vsub.f32 %v17017_v12, %v15085_v55  ;;  %v6511_v2 = vmul.f32 %v15119_v57, %v15119_v57  ;;  %v15137_v51 = vsub.f32 %v17018_v37, %v15085_v55  ;;  %v17028_v35 = vld [vmem:[#allocation79_spill] sm:$0xff] }
 0x870   : > { %v6512_v17 = vmul.f32 %v15125_v59, %v15125_v59  ;;  %v15143_v32 = vsub.f32 %v17019_v0, %v15085_v55  ;;  %v15149_v13 = vsub.f32 %v17020_v41, %v15085_v55  ;;  %v15155_v28 = vsub.f32 %v17021_v22, %v15085_v55  ;;  %v17033_v41 = vld [vmem:[#allocation38_spill] sm:$0xff] }
 0x871   : > { %v6539_v26 = vadd.f32 %v6538_v52, %v6508_v14  ;;  %v6513_v46 = vmul.f32 %v15131_v21, %v15131_v21  ;;  %v6514_v43 = vmul.f32 %v15137_v51, %v15137_v51  ;;  %v15161_v36 = vsub.f32 %v17022_v25, %v15085_v55  ;;  %v17029_v52 = vld [vmem:[#allocation86_spill] sm:$0xff] }
 0x872   : > { %v6515_v53 = vmul.f32 %v15143_v32, %v15143_v32  ;;  %v6516_v39 = vmul.f32 %v15149_v13, %v15149_v13  ;;  %v15167_v6 = vsub.f32 %v17023_v24, %v15085_v55  ;;  %v6517_v5 = vmul.f32 %v15155_v28, %v15155_v28 }
 0x873   : > { %v6540_v7 = vadd.f32 %v6539_v26, %v6509_v49  ;;  %v15173_v31 = vsub.f32 %v17024_v19, %v15085_v55  ;;  %v6518_v11 = vmul.f32 %v15161_v36, %v15161_v36  ;;  %v15179_v10 = vsub.f32 %v17025_v4, %v15085_v55  ;;  %v17036_v19 = vld [vmem:[#allocation83_spill] sm:$0xff] }
 0x874   : > { %v6519_v18 = vmul.f32 %v15167_v6, %v15167_v6  ;;  %v15185_v63 = vsub.f32 %v17026_v34, %v15085_v55  ;;  %v15191_v56 = vsub.f32 %v17027_v45, %v15085_v55  ;;  %v15197_v29 = vsub.f32 %v17028_v35, %v15085_v55  ;;  %v17039_v35 = vld [vmem:[#allocation88_spill] sm:$0xff] }
 0x875   : > { %v6541_v58 = vadd.f32 %v6540_v7, %v6510_v40  ;;  %v6520_v1 = vmul.f32 %v15173_v31, %v15173_v31  ;;  %v6521_v62 = vmul.f32 %v15179_v10, %v15179_v10  ;;  %v15203_v33 = vsub.f32 %v17029_v52, %v15085_v55 }
 0x876   : > { %v6522_v8 = vmul.f32 %v15185_v63, %v15185_v63  ;;  %v6523_v49 = vmul.f32 %v15191_v56, %v15191_v56  ;;  %v15209_v40 = vsub.f32 %v17030_v44, %v15085_v55  ;;  %v6524_v7 = vmul.f32 %v15197_v29, %v15197_v29 }
 0x877   : > { %v6542_v20 = vadd.f32 %v6541_v58, %v6511_v2  ;;  %v17031_v2 = vld [vmem:[#allocation85_spill] sm:$0xff]  ;;  %v6525_v37 = vmul.f32 %v15203_v33, %v15203_v33 }
 0x878   : > { %v15215_v58 = vsub.f32 %v17031_v2, %v15085_v55 }
 0x879   : > { %v6543_v50 = vadd.f32 %v6542_v20, %v6512_v17  ;;  %v17032_v20 = vld [vmem:[#allocation71_spill] sm:$0xff] }
 0x87a   : > { %v15221_v0 = vsub.f32 %v17032_v20, %v15085_v55  ;;  %v6537_v20 = vmul.f32 %v15089_v23, %v15089_v23 }
 0x87b   : > { %v6544_v15 = vadd.f32 %v6543_v50, %v6513_v46  ;;  %v6526_v46 = vmul.f32 %v15209_v40, %v15209_v40 }
 0x87c   : > { %v6528_v25 = vmul.f32 %v15221_v0, %v15221_v0 }
 0x87d   : > { %v6545_v42 = vadd.f32 %v6544_v15, %v6514_v43  ;;  %v15227_v43 = vsub.f32 %v17033_v41, %v15085_v55  ;;  %v6527_v15 = vmul.f32 %v15215_v58, %v15215_v58 }
 0x87f   : > { %v6546_v47 = vadd.f32 %v6545_v42, %v6515_v53  ;;  %v17034_v53 = vld [vmem:[#allocation66_spill] sm:$0xff] }
 0x880   : > { %v6498_v42 = vsub.f32 %v17034_v53, %v15085_v55 }
 0x881   : > { %v6547_v38 = vadd.f32 %v6546_v47, %v6516_v39  ;;  %v17035_v47 = vld [vmem:[#allocation70_spill] sm:$0xff] }
 0x882   : > { %v6499_v24 = vsub.f32 %v17035_v47, %v15085_v55 }
 0x883   : > { %v6548_v30 = vadd.f32 %v6547_v38, %v6517_v5  ;;  %v6529_v5 = vmul.f32 %v15227_v43, %v15227_v43 }
 0x884   : > { %v6531_v34 = vmul.f32 %v6499_v24, %v6499_v24 }
 0x885   : > { %v6549_v48 = vadd.f32 %v6548_v30, %v6518_v11  ;;  %v6500_v11 = vsub.f32 %v17036_v19, %v15085_v55  ;;  %v6530_v30 = vmul.f32 %v6498_v42, %v6498_v42 }
 0x887   : > { %v6550_v16 = vadd.f32 %v6549_v48, %v6519_v18  ;;  %v17037_v18 = vld [vmem:[#allocation48_spill] sm:$0xff] }
 0x888   : > { %v6501_v48 = vsub.f32 %v17037_v18, %v15085_v55 }
 0x889   : > { %v6551_v27 = vadd.f32 %v6550_v16, %v6520_v1  ;;  %v17038_v16 = vld [vmem:[#allocation62_spill] sm:$0xff] }
 0x88a   : > { %v6502_v45 = vsub.f32 %v17038_v16, %v15085_v55 }
 0x88b   : > { %v6552_v14 = vadd.f32 %v6551_v27, %v6521_v62  ;;  %v6532_v62 = vmul.f32 %v6500_v11, %v6500_v11 }
 0x88c   : > { %v6534_v44 = vmul.f32 %v6502_v45, %v6502_v45 }
 0x88d   : > { %v6553_v26 = vadd.f32 %v6552_v14, %v6522_v8  ;;  %v6503_v8 = vsub.f32 %v17039_v35, %v15085_v55  ;;  %v6533_v14 = vmul.f32 %v6501_v48, %v6501_v48 }
 0x88f   : > { %v6554_v12 = vadd.f32 %v6553_v26, %v6523_v49  ;;  %v17040_v49 = vld [vmem:[#allocation23_spill] sm:$0xff] }
 0x890   : > { %v6504_v26 = vsub.f32 %v17040_v49, %v15085_v55  ;;  %v7081_v55 = vld [vmem:[%s15584_s5 + $0x1] ss:$0 sm:$0xff] }
 0x891   : > { %v6555_v17 = vadd.f32 %v6554_v12, %v6524_v7  ;;  %v6535_v12 = vmul.f32 %v6503_v8, %v6503_v8  ;;  %v6581_v19 = vmul.f32 %v7081_v55, %v15097_v9  ;;  %v6584_v18 = vmul.f32 %v7081_v55, %v15113_v54 }
 0x892   : > { %v6587_v16 = vmul.f32 %v7081_v55, %v15131_v21  ;;  %v6591_v9 = vmul.f32 %v7081_v55, %v15155_v28  ;;  %v6594_v54 = vmul.f32 %v7081_v55, %v15173_v31  ;;  %v6597_v21 = vmul.f32 %v7081_v55, %v15191_v56 }
 0x893   : > { %v6556_v50 = vadd.f32 %v6555_v17, %v6525_v37  ;;  %v6536_v37 = vmul.f32 %v6504_v26, %v6504_v26  ;;  %v6601_v28 = vmul.f32 %v7081_v55, %v15215_v58  ;;  %v6604_v35 = vmul.f32 %v7081_v55, %v6498_v42 }
 0x894   : > { %v6605_v31 = vmul.f32 %v7081_v55, %v6499_v24  ;;  %v6609_v49 = vmul.f32 %v7081_v55, %v6503_v8  ;;  %v6610_v56 = vmul.f32 %v7081_v55, %v6504_v26 }
 0x895   : > { %v6557_v22 = vadd.f32 %v6556_v50, %v6526_v46 }
 0x897   : > { %v6558_v39 = vadd.f32 %v6557_v22, %v6527_v15 }
 0x899   : > { %v6559_v38 = vadd.f32 %v6558_v39, %v6528_v25 }
 0x89b   : > { %v6560_v4 = vadd.f32 %v6559_v38, %v6529_v5  ;;  %v6580_v38 = vmul.f32 %v7081_v55, %v15093_v60  ;;  %v6590_v60 = vmul.f32 %v7081_v55, %v15149_v13  ;;  %v6600_v13 = vmul.f32 %v7081_v55, %v15209_v40 }
 0x89d   : > { %v6561_v1 = vadd.f32 %v6560_v4, %v6530_v30  ;;  %v6582_v30 = vmul.f32 %v7081_v55, %v15101_v61  ;;  %v6583_v4 = vmul.f32 %v7081_v55, %v15109_v3  ;;  %v6592_v61 = vmul.f32 %v7081_v55, %v15161_v36 }
 0x89e   : > { %v6593_v3 = vmul.f32 %v7081_v55, %v15167_v6  ;;  %v6602_v36 = vmul.f32 %v7081_v55, %v15221_v0  ;;  %v6603_v6 = vmul.f32 %v7081_v55, %v15227_v43 }
 0x89f   : > { %v6562_v27 = vadd.f32 %v6561_v1, %v6531_v34  ;;  %v6585_v34 = vmul.f32 %v7081_v55, %v15119_v57  ;;  %v6586_v1 = vmul.f32 %v7081_v55, %v15125_v59  ;;  %v6595_v57 = vmul.f32 %v7081_v55, %v15179_v10 }
 0x8a0   : > { %v6596_v59 = vmul.f32 %v7081_v55, %v15185_v63  ;;  %v6607_v10 = vmul.f32 %v7081_v55, %v6501_v48  ;;  %v6608_v63 = vmul.f32 %v7081_v55, %v6502_v45 }
 0x8a1   : > { %v6563_v52 = vadd.f32 %v6562_v27, %v6532_v62  ;;  %v6588_v62 = vmul.f32 %v7081_v55, %v15137_v51  ;;  %v6589_v27 = vmul.f32 %v7081_v55, %v15143_v32  ;;  %v6598_v51 = vmul.f32 %v7081_v55, %v15197_v29 }
 0x8a2   : > { %v6599_v32 = vmul.f32 %v7081_v55, %v15203_v33  ;;  %v6611_v29 = vmul.f32 %v7081_v55, %v15089_v23 }
 0x8a3   : > { %v6564_v7 = vadd.f32 %v6563_v52, %v6533_v14  ;;  %v6606_v14 = vmul.f32 %v7081_v55, %v6500_v11 }
 0x8a5   : > { %v6565_v2 = vadd.f32 %v6564_v7, %v6534_v44 }
 0x8a7   : > { %v6566_v17 = vadd.f32 %v6565_v2, %v6535_v12 }
 0x8a9   : > { %v6567_v46 = vadd.f32 %v6566_v17, %v6536_v37 }
 0x8ab   : > { %v6568_v50 = vadd.f32 %v6567_v46, %v6537_v20 }
 0x8ad   : > { %v6569_v41 = vrot.slane %v6568_v50, 4 }
 0x8af   : > { %v6570_v15 = vadd.f32 %v6569_v41, %v6568_v50 }
 0x8b1   : > { %v6571_v22 = vrot.slane %v6570_v15, 2 }
 0x8b3   : > { %v6572_v53 = vadd.f32 %v6571_v22, %v6570_v15 }
 0x8b5   : > { %v6573_v25 = vrot.slane %v6572_v53, 1 }
 0x8b7   : > { %v6574_v39 = vadd.f32 %v6573_v25, %v6572_v53 }
 0x8b9   : > { %v6575_v47 = vmul.f32 0.00390625, %v6574_v39 }
 0x8bb   : > { %v6612_v5 = vadd.f32 1e-05, %v6575_v47 }
 0x8bd   : > { %7718 = vrsqrt.f32 %v6612_v5 }
 0x8c7   : > { %v7719_v52 = vpop.eup %7718 }
 0x8c8   : > { %v6614_v44 = vmul.f32 %v7719_v52, %v6580_v38  ;;  %v6615_v33 = vmul.f32 %v7719_v52, %v6581_v19  ;;  %v6616_v7 = vmul.f32 %v7719_v52, %v6582_v30  ;;  %v6617_v40 = vmul.f32 %v7719_v52, %v6583_v4  ;;  %v7082_v19 = vld [vmem:[%s15584_s5 + $0x2] ss:$0 sm:$0xff] }
 0x8c9   : > { %v6618_v12 = vmul.f32 %v7719_v52, %v6584_v18  ;;  %v6619_v58 = vmul.f32 %v7719_v52, %v6585_v34  ;;  %v6620_v2 = vmul.f32 %v7719_v52, %v6586_v1  ;;  %v6621_v0 = vmul.f32 %v7719_v52, %v6587_v16 }
 0x8ca   : > { %v6622_v37 = vmul.f32 %v7719_v52, %v6588_v62  ;;  %v6623_v43 = vmul.f32 %v7719_v52, %v6589_v27  ;;  %v6624_v42 = vmul.f32 %v7719_v52, %v6590_v60  ;;  %v6625_v24 = vmul.f32 %v7719_v52, %v6591_v9 }
 0x8cb   : > { %v6626_v11 = vmul.f32 %v7719_v52, %v6592_v61  ;;  %v6627_v48 = vmul.f32 %v7719_v52, %v6593_v3  ;;  %v6628_v17 = vmul.f32 %v7719_v52, %v6594_v54  ;;  %v6629_v45 = vmul.f32 %v7719_v52, %v6595_v57 }
 0x8cc   : > { %v6630_v8 = vmul.f32 %v7719_v52, %v6596_v59  ;;  %v6631_v26 = vmul.f32 %v7719_v52, %v6597_v21  ;;  %v6632_v20 = vmul.f32 %v7719_v52, %v6598_v51  ;;  %v6633_v23 = vmul.f32 %v7719_v52, %v6599_v32 }
 0x8cd   : > { %v6634_v46 = vmul.f32 %v7719_v52, %v6600_v13  ;;  %v6635_v50 = vmul.f32 %v7719_v52, %v6601_v28  ;;  %v6636_v41 = vmul.f32 %v7719_v52, %v6602_v36  ;;  %v6637_v15 = vmul.f32 %v7719_v52, %v6603_v6 }
 0x8ce   : > { %v6638_v22 = vmul.f32 %v7719_v52, %v6604_v35  ;;  %v6639_v53 = vmul.f32 %v7719_v52, %v6605_v31  ;;  %v6640_v25 = vmul.f32 %v7719_v52, %v6606_v14  ;;  %v6641_v39 = vmul.f32 %v7719_v52, %v6607_v10 }
 0x8cf   : > { %v6642_v47 = vmul.f32 %v7719_v52, %v6608_v63  ;;  %v6643_v5 = vmul.f32 %v7719_v52, %v6609_v49  ;;  %v6644_v55 = vmul.f32 %v7719_v52, %v6610_v56  ;;  %v6645_v38 = vmul.f32 %v7719_v52, %v6611_v29 }
 0x8d0   : > { %v15282_v30 = vadd.f32 %v7082_v19, %v6614_v44  ;;  %v15284_v4 = vadd.f32 %v7082_v19, %v6615_v33  ;;  %v15286_v18 = vadd.f32 %v7082_v19, %v6616_v7  ;;  %v15288_v34 = vadd.f32 %v7082_v19, %v6617_v40  ;;  %v15349_v33 = vld [vmem:[%s15584_s5 + $0x3] ss:$0 sm:$0xff] }
 0x8d1   : > { %v15290_v1 = vadd.f32 %v7082_v19, %v6618_v12  ;;  %v15292_v16 = vadd.f32 %v7082_v19, %v6619_v58  ;;  %v15294_v62 = vadd.f32 %v7082_v19, %v6620_v2  ;;  %v15296_v27 = vadd.f32 %v7082_v19, %v6621_v0 }
 0x8d2   : > { %v15298_v60 = vadd.f32 %v7082_v19, %v6622_v37  ;;  %v15300_v9 = vadd.f32 %v7082_v19, %v6623_v43  ;;  %v15302_v61 = vadd.f32 %v7082_v19, %v6624_v42  ;;  %v15304_v3 = vadd.f32 %v7082_v19, %v6625_v24 }
 0x8d3   : > { %v15306_v54 = vadd.f32 %v7082_v19, %v6626_v11  ;;  %v15308_v57 = vadd.f32 %v7082_v19, %v6627_v48  ;;  %v15310_v59 = vadd.f32 %v7082_v19, %v6628_v17  ;;  %v15312_v21 = vadd.f32 %v7082_v19, %v6629_v45 }
 0x8d4   : > { %v15314_v51 = vadd.f32 %v7082_v19, %v6630_v8  ;;  %v15316_v32 = vadd.f32 %v7082_v19, %v6631_v26  ;;  %v15318_v13 = vadd.f32 %v7082_v19, %v6632_v20  ;;  %v15320_v28 = vadd.f32 %v7082_v19, %v6633_v23 }
 0x8d5   : > { %v15322_v36 = vadd.f32 %v7082_v19, %v6634_v46  ;;  %v15324_v6 = vadd.f32 %v7082_v19, %v6635_v50  ;;  %v15326_v35 = vadd.f32 %v7082_v19, %v6636_v41  ;;  %v15328_v31 = vadd.f32 %v7082_v19, %v6637_v15 }
 0x8d6   : > { %v15330_v14 = vadd.f32 %v7082_v19, %v6638_v22  ;;  %v15332_v10 = vadd.f32 %v7082_v19, %v6639_v53  ;;  %v15334_v52 = vadd.f32 %v7082_v19, %v6640_v25  ;;  %v15336_v63 = vadd.f32 %v7082_v19, %v6641_v39 }
 0x8d7   : > { %v15338_v49 = vadd.f32 %v7082_v19, %v6642_v47  ;;  %v15340_v56 = vadd.f32 %v7082_v19, %v6643_v5  ;;  %v15342_v29 = vadd.f32 %v7082_v19, %v6644_v55  ;;  %v15344_v44 = vadd.f32 %v7082_v19, %v6645_v38 }
 0x8d8   : > { %17041 = vst [vmem:[#allocation37_spill] sm:$0xff] %v15330_v14  ;;  %17042 = vst [vmem:[#allocation18_spill] sm:$0xff] %v15332_v10  ;;  %vm6683_vm12 = vcmp.gt.f32.partialorder %v15282_v30, 0.0  ;;  %vm6684_vm13 = vcmp.gt.f32.partialorder %v15284_v4, 0.0  ;;  %vm6685_vm14 = vcmp.gt.f32.partialorder %v15286_v18, 0.0  ;;  %vm6686_vm15 = vcmp.gt.f32.partialorder %v15288_v34, 0.0 }
 0x8d9   : > { %17043 = vst [vmem:[#allocation25_spill] sm:$0xff] %v15336_v63  ;;  %17044 = vst [vmem:[#allocation26_spill] sm:$0xff] %v15338_v49  ;;  %vm6687_vm4 = vcmp.gt.f32.partialorder %v15290_v1, 0.0  ;;  %vm6688_vm5 = vcmp.gt.f32.partialorder %v15292_v16, 0.0  ;;  %vm6689_vm6 = vcmp.gt.f32.partialorder %v15294_v62, 0.0  ;;  %vm6690_vm7 = vcmp.gt.f32.partialorder %v15296_v27, 0.0 }
 0x8da   : > { %17045 = vst [vmem:[#allocation35_spill] sm:$0xff] %v15340_v56  ;;  %vm6691_vm8 = vcmp.gt.f32.partialorder %v15298_v60, 0.0  ;;  %vm6692_vm9 = vcmp.gt.f32.partialorder %v15300_v9, 0.0  ;;  %vm6693_vm10 = vcmp.gt.f32.partialorder %v15302_v61, 0.0  ;;  %vm6694_vm11 = vcmp.gt.f32.partialorder %v15304_v3, 0.0 }
 0x8db   : > { %v6719_v7 = vmul.f32 %v15349_v33, %v15282_v30  ;;  %v6720_v40 = vmul.f32 %v15349_v33, %v15284_v4  ;;  %v6721_v12 = vmul.f32 %v15349_v33, %v15286_v18  ;;  %v6722_v58 = vmul.f32 %v15349_v33, %v15288_v34 }
 0x8dc   : > { %v6723_v2 = vmul.f32 %v15349_v33, %v15290_v1  ;;  %v6724_v0 = vmul.f32 %v15349_v33, %v15292_v16  ;;  %v6725_v37 = vmul.f32 %v15349_v33, %v15294_v62  ;;  %v6726_v43 = vmul.f32 %v15349_v33, %v15296_v27 }
 0x8dd   : > { %v6727_v42 = vmul.f32 %v15349_v33, %v15298_v60  ;;  %v6728_v24 = vmul.f32 %v15349_v33, %v15300_v9  ;;  %v6729_v11 = vmul.f32 %v15349_v33, %v15302_v61  ;;  %v6730_v48 = vmul.f32 %v15349_v33, %v15304_v3 }
 0x8de   : > { %v6731_v17 = vmul.f32 %v15349_v33, %v15306_v54  ;;  %v6732_v45 = vmul.f32 %v15349_v33, %v15308_v57  ;;  %v6733_v8 = vmul.f32 %v15349_v33, %v15310_v59  ;;  %v6734_v26 = vmul.f32 %v15349_v33, %v15312_v21 }
 0x8df   : > { %vm6711_vm0 = vcmp.gt.f32.partialorder %v15338_v49, 0.0  ;;  %vm6712_vm1 = vcmp.gt.f32.partialorder %v15340_v56, 0.0  ;;  %vm6713_vm2 = vcmp.gt.f32.partialorder %v15342_v29, 0.0  ;;  %vm6714_vm3 = vcmp.gt.f32.partialorder %v15344_v44, 0.0 }
 0x8e0   : > { %v6735_v20 = vmul.f32 %v15349_v33, %v15314_v51  ;;  %v6736_v23 = vmul.f32 %v15349_v33, %v15316_v32  ;;  %v6737_v46 = vmul.f32 %v15349_v33, %v15318_v13  ;;  %v6738_v50 = vmul.f32 %v15349_v33, %v15320_v28 }
 0x8e1   : > { %v6739_v41 = vmul.f32 %v15349_v33, %v15322_v36  ;;  %v6740_v15 = vmul.f32 %v15349_v33, %v15324_v6  ;;  %v6741_v22 = vmul.f32 %v15349_v33, %v15326_v35  ;;  %v6742_v53 = vmul.f32 %v15349_v33, %v15328_v31 }
 0x8e2   : > { %v6743_v25 = vmul.f32 %v15349_v33, %v15330_v14  ;;  %v6744_v39 = vmul.f32 %v15349_v33, %v15332_v10  ;;  %v6745_v47 = vmul.f32 %v15349_v33, %v15334_v52  ;;  %v6746_v5 = vmul.f32 %v15349_v33, %v15336_v63 }
 0x8e3   : > { %v6747_v55 = vmul.f32 %v15349_v33, %v15338_v49  ;;  %v6748_v38 = vmul.f32 %v15349_v33, %v15340_v56  ;;  %v6749_v19 = vmul.f32 %v15349_v33, %v15342_v29  ;;  %v6750_v14 = vmul.f32 %v15349_v33, %v15344_v44 }
 0x8e4   : > { %v6751_v10 = vsel %vm6683_vm12, %v15282_v30, %v6719_v7  ;;  %v6752_v63 = vsel %vm6684_vm13, %v15284_v4, %v6720_v40  ;;  %v6753_v49 = vsel %vm6685_vm14, %v15286_v18, %v6721_v12  ;;  %v6754_v56 = vsel %vm6686_vm15, %v15288_v34, %v6722_v58  ;;  %v17066_v7 = vld [vmem:[#allocation35_spill] sm:$0xff] }
 0x8e5   : > { %v6755_v33 = vsel %vm6687_vm4, %v15290_v1, %v6723_v2  ;;  %v6756_v30 = vsel %vm6688_vm5, %v15292_v16, %v6724_v0  ;;  %v6757_v4 = vsel %vm6689_vm6, %v15294_v62, %v6725_v37  ;;  %v6758_v18 = vsel %vm6690_vm7, %v15296_v27, %v6726_v43  ;;  %6815 = vst [vmem:[#allocation12 + $0x18] sm:$0xff] %v6751_v10  ;;  %v17060_v10 = vld [vmem:[#allocation18_spill] sm:$0xff] }
 0x8e6   : > { %6816 = vst [vmem:[#allocation12 + $0x48] sm:$0xff] %v6752_v63  ;;  %6817 = vst [vmem:[#allocation12 + $0x78] sm:$0xff] %v6753_v49  ;;  %v6759_v34 = vsel %vm6691_vm8, %v15298_v60, %v6727_v42  ;;  %v6760_v1 = vsel %vm6692_vm9, %v15300_v9, %v6728_v24  ;;  %v6761_v16 = vsel %vm6693_vm10, %v15302_v61, %v6729_v11  ;;  %vm17046_vm12 = vcmp.gt.f32.partialorder %v15306_v54, 0.0  ;;  %v17063_v63 = vld [vmem:[#allocation25_spill] sm:$0xff]  ;;  %v17065_v49 = vld [vmem:[#allocation26_spill] sm:$0xff] }
 0x8e7   : > { %6818 = vst [vmem:[#allocation12 + $0xa8] sm:$0xff] %v6754_v56  ;;  %v6762_v62 = vsel %vm6694_vm11, %v15304_v3, %v6730_v48  ;;  %6819 = vst [vmem:[#allocation12 + $0xd8] sm:$0xff] %v6755_v33  ;;  %v6763_v27 = vsel %vm17046_vm12, %v15306_v54, %v6731_v17  ;;  %vm17047_vm13 = vcmp.gt.f32.partialorder %v15308_v57, 0.0  ;;  %vm17048_vm14 = vcmp.gt.f32.partialorder %v15310_v59, 0.0 }
 0x8e8   : > { %6820 = vst [vmem:[#allocation12 + $0x108] sm:$0xff] %v6756_v30  ;;  %6821 = vst [vmem:[#allocation12 + $0x138] sm:$0xff] %v6757_v4  ;;  %v6764_v60 = vsel %vm17047_vm13, %v15308_v57, %v6732_v45  ;;  %v6765_v9 = vsel %vm17048_vm14, %v15310_v59, %v6733_v8  ;;  %vm17049_vm15 = vcmp.gt.f32.partialorder %v15312_v21, 0.0  ;;  %vm17050_vm4 = vcmp.gt.f32.partialorder %v15314_v51, 0.0 }
 0x8e9   : > { %6822 = vst [vmem:[#allocation12 + $0x168] sm:$0xff] %v6758_v18  ;;  %v6766_v61 = vsel %vm17049_vm15, %v15312_v21, %v6734_v26  ;;  %6823 = vst [vmem:[#allocation12 + $0x198] sm:$0xff] %v6759_v34  ;;  %v6767_v3 = vsel %vm17050_vm4, %v15314_v51, %v6735_v20  ;;  %vm17051_vm5 = vcmp.gt.f32.partialorder %v15316_v32, 0.0  ;;  %vm17052_vm6 = vcmp.gt.f32.partialorder %v15318_v13, 0.0 }
 0x8ea   : > { %6824 = vst [vmem:[#allocation12 + $0x1c8] sm:$0xff] %v6760_v1  ;;  %6825 = vst [vmem:[#allocation12 + $0x1f8] sm:$0xff] %v6761_v16  ;;  %v6768_v54 = vsel %vm17051_vm5, %v15316_v32, %v6736_v23  ;;  %v6769_v57 = vsel %vm17052_vm6, %v15318_v13, %v6737_v46  ;;  %vm17053_vm7 = vcmp.gt.f32.partialorder %v15320_v28, 0.0  ;;  %vm17054_vm8 = vcmp.gt.f32.partialorder %v15322_v36, 0.0 }
 0x8eb   : > { %6826 = vst [vmem:[#allocation12 + $0x228] sm:$0xff] %v6762_v62  ;;  %v6770_v59 = vsel %vm17053_vm7, %v15320_v28, %v6738_v50  ;;  %6827 = vst [vmem:[#allocation12 + $0x258] sm:$0xff] %v6763_v27  ;;  %v6771_v21 = vsel %vm17054_vm8, %v15322_v36, %v6739_v41  ;;  %vm17055_vm9 = vcmp.gt.f32.partialorder %v15324_v6, 0.0  ;;  %vm17056_vm10 = vcmp.gt.f32.partialorder %v15326_v35, 0.0  ;;  %v17058_v28 = vld [vmem:[#allocation37_spill] sm:$0xff] }
 0x8ec   : > { %6828 = vst [vmem:[#allocation12 + $0x288] sm:$0xff] %v6764_v60  ;;  %6829 = vst [vmem:[#allocation12 + $0x2b8] sm:$0xff] %v6765_v9  ;;  %v6772_v51 = vsel %vm17055_vm9, %v15324_v6, %v6740_v15  ;;  %v6773_v32 = vsel %vm17056_vm10, %v15326_v35, %v6741_v22  ;;  %vm17057_vm11 = vcmp.gt.f32.partialorder %v15328_v31, 0.0  ;;  %vm17059_vm12 = vcmp.gt.f32.partialorder %v17058_v28, 0.0 }
 0x8ed   : > { %6830 = vst [vmem:[#allocation12 + $0x2e8] sm:$0xff] %v6766_v61  ;;  %v6774_v13 = vsel %vm17057_vm11, %v15328_v31, %v6742_v53  ;;  %6831 = vst [vmem:[#allocation12 + $0x318] sm:$0xff] %v6767_v3  ;;  %v6775_v36 = vsel %vm17059_vm12, %v17058_v28, %v6743_v25  ;;  %vm17061_vm13 = vcmp.gt.f32.partialorder %v17060_v10, 0.0  ;;  %vm17062_vm14 = vcmp.gt.f32.partialorder %v15334_v52, 0.0 }
 0x8ee   : > { %6832 = vst [vmem:[#allocation12 + $0x348] sm:$0xff] %v6768_v54  ;;  %6833 = vst [vmem:[#allocation12 + $0x378] sm:$0xff] %v6769_v57  ;;  %v6776_v6 = vsel %vm17061_vm13, %v17060_v10, %v6744_v39  ;;  %v6777_v35 = vsel %vm17062_vm14, %v15334_v52, %v6745_v47  ;;  %vm17064_vm15 = vcmp.gt.f32.partialorder %v17063_v63, 0.0  ;;  %v6779_v56 = vsel %vm6711_vm0, %v17065_v49, %v6747_v55 }
 0x8ef   : > { %6834 = vst [vmem:[#allocation12 + $0x3a8] sm:$0xff] %v6770_v59  ;;  %v6778_v31 = vsel %vm17064_vm15, %v17063_v63, %v6746_v5  ;;  %6835 = vst [vmem:[#allocation12 + $0x3d8] sm:$0xff] %v6771_v21  ;;  %v6780_v40 = vsel %vm6712_vm1, %v17066_v7, %v6748_v38  ;;  %v6781_v52 = vsel %vm6713_vm2, %v15342_v29, %v6749_v19 }
 0x8f0   : > { %6836 = vst [vmem:[#allocation12 + $0x408] sm:$0xff] %v6772_v51  ;;  %6837 = vst [vmem:[#allocation12 + $0x438] sm:$0xff] %v6773_v32  ;;  %v6782_v12 = vsel %vm6714_vm3, %v15344_v44, %v6750_v14 }
 0x8f1   : > { %6838 = vst [vmem:[#allocation12 + $0x468] sm:$0xff] %v6774_v13  ;;  %6839 = vst [vmem:[#allocation12 + $0x498] sm:$0xff] %v6775_v36 }
 0x8f2   : > { %6840 = vst [vmem:[#allocation12 + $0x4c8] sm:$0xff] %v6776_v6  ;;  %6841 = vst [vmem:[#allocation12 + $0x4f8] sm:$0xff] %v6777_v35 }
 0x8f3   : > { %6842 = vst [vmem:[#allocation12 + $0x528] sm:$0xff] %v6778_v31  ;;  %6843 = vst [vmem:[#allocation12 + $0x558] sm:$0xff] %v6779_v56 }
 0x8f4   : > { %6844 = vst [vmem:[#allocation12 + $0x588] sm:$0xff] %v6780_v40  ;;  %6845 = vst [vmem:[#allocation12 + $0x5b8] sm:$0xff] %v6781_v52 }
 0x8f5   : > { %6846 = vst [vmem:[#allocation12 + $0x5e8] sm:$0xff] %v6782_v12 }
 0x8f6 PF: > { %p7565_p0 = scmp.eq.s32.totalorder %s8046_s9, 1  ;;  %s7979_s16 = smov [#allocation12]  }
 0x8f7   : > { %s6853_s13 = sshll.u32 %s7979_s16, 4  ;;  %s6854_s13 = int_to_ptr.vmem [resolvable:$true] %s6853_s13 }
 0x8f8   : > { %s7889_s0 = scalar_lea.vmem %s6854_s13, 24576  ;;  %p7896_p10 = scmp.lt.s32.totalorder %s6854_s13, %s6854_s13 }
 0x8f9   : > { %p7890_p2 = scmp.ne.s32.totalorder %s6854_s13, %s7889_s0  ;;  %p7897_p9 = scmp.lt.s32.totalorder %s7889_s0, %s7889_s0 }
 0x8fb   : > { %p7891_p13 = pnand %p7890_p2, %p7565_p0  ;;  %p7898_p11 = por %p7897_p9, %p7896_p10 }
 0x8fd   : > { %p7892_p3 = pneg %p7891_p13 }
 0x8ff   : > { %p7899_p7 = pnand %p7898_p11, %p7892_p3 }
 0x901   : > { %7902 = shalt.err (!%p7899_p7)
}
 0x902   : > { %s7903_s11 = scalar_lea.hbm %s15587_s8, 24576 }
 0x903   : > { %p7904_p8 = scmp.ne.s32.totalorder %s15587_s8, %s7903_s11  ;;  %p7909_p5 = scmp.lt.u32.totalorder %s7903_s11, %s15587_s8 }
 0x905   : > { %p7905_p1 = pnand %p7904_p8, %p7565_p0 }
 0x907   : > { %p7906_p4 = pneg %p7905_p1 }
 0x909   : > { %p7911_p6 = pnand %p7909_p5, %p7906_p4 }
 0x90b   : > { %7914 = shalt.err (!%p7911_p6)
}
 0x90c   : > { %s7980_s22 = smov 768   ;;  %s7981_s30 = smov 48  }
 0x90d   : > { %7538 = dma.vmem_to_hbm [thread:$0]  (%p7565_p0), %s6854_s13, 24576, %s15587_s8, [#allocation5], %s7980_s22, %s7980_s22, %s7981_s30  }
 0x90e   : > { %7948 = dma.done.wait (%p7565_p0), [#allocation5], 24576  }
 0x90f   : > { %7950 = vsyncadd (%p7565_p0), [#allocation5], 4294942720 }
 0x910 PF: > { %p23_p12 = scmp.ge.s32.totalorder %s8124_s18, 4   ;;  %s17067_s27 = smov %s7957_s28 }
 0x911   : > { %s17068_s28 = smov %s7961_s29  ;;  %s17069_s29 = smov %s8155_s14 }
 0x912   : > { %s17070_s30 = smov %s8124_s18  ;;  %25 = sbr.rel (!%p23_p12) target bundleno = 11 (0xb), region = 122 }
 0x919   :  { %6869 = vsyncpa [#allocation4], 1 }
 0x91a   :  { %6871 = vsyncpa [#allocation4 + $0x1], 1 }
 0x91b   :  { %6872 = vsyncpa [#allocation7], 1 }
 0x91c   :  { %6874 = vsyncpa [#allocation7 + $0x1], 1 }
 0x91d   :  { %6875 = vsyncpa [#allocation10], 1 }
 0x91e   :  { %6876 = vsyncpa [#allocation5], 1 }
 0x91f   :  { %6878 = vsyncpa [#allocation5 + $0x1], 1 }

</bundles_post_ra>
